<compile_context>
chip_gen: v6e
topology: v6e:2x2x1
jax: 0.10.0
libtpu: 0.0.40
codegen_flags: <defaults>
</compile_context>

<pallas_src>
import functools

import jax
import jax.numpy as jnp
from jax.experimental import pallas as pl
from jax.experimental.pallas import tpu as pltpu


def _round_up(x, m):
    return ((x + m - 1) // m) * m


def _largest_divisor_leq(n, cap):
    """Largest divisor of n that is <= cap (at least 1)."""
    best = 1
    for d in range(1, n + 1):
        if n % d == 0 and d <= cap:
            best = d
    return best


def _convdown_kernel(x_ref, w0_ref, w1_ref, w2_ref,
                     sh0_ref, sh1_ref, sh2_ref, o_ref,
                     xpad_ref, a0pad_ref, a1pad_ref, slab_ref,
                     *, Hb, Wb, Nb, chunk_rows, pin, p0, p1, p2):
    """Fused downsample + double_conv for Nb images per grid step.

    x_ref:    (Nb, M, pin)        bf16, space-to-depth input, M = (H/2)*(W/2)
    w*_ref:   (taps*Pk, Pc)       bf16, packed/folded conv weights (taps along K)
    sh*_ref:  (1, Pc)             f32, per-channel additive shift (bias / folded BN)
    o_ref:    (Nb, M, p2)         bf16, lane-dense (channel-padded) output
    xpad/a0pad/a1pad: (Nb*stripe, C) bf16 scratch, per-image zero-halo stripes
    slab_ref: (Nb*Mc, Kmax)       bf16 scratch, im2col slab for one row chunk
    """
    M = Hb * Wb
    Mc = chunk_rows * Wb
    n_chunks = Hb // chunk_rows
    pad_rows = _round_up(Wb + 1, 8)          # sublane-aligned halo
    stripe = M + 2 * pad_rows
    f32 = jnp.float32
    bf16 = jnp.bfloat16
    zero = jnp.zeros((), bf16)

    taps_2x2 = [(dy, dx) for dy in (-1, 0) for dx in (-1, 0)]
    taps_3x3 = [(dy, dx) for dy in (-1, 0, 1) for dx in (-1, 0, 1)]

    # Column index j of each pixel row within a chunk, shape (Mc, 1).  Chunks
    # start at full row boundaries, so the same pattern serves every chunk.
    col = jax.lax.broadcasted_iota(jnp.int32, (chunk_rows, Wb, 1), 1).reshape(Mc, 1)

    def zero_halos(ref, C):
        z = jnp.zeros((pad_rows, C), bf16)
        for b in range(Nb):
            base = b * stripe
            ref[base:base + pad_rows, :] = z
            ref[base + pad_rows + M:base + stripe, :] = z

    # Halo rows of every stage input must read as zero (conv zero padding).
    zero_halos(xpad_ref, pin)
    zero_halos(a0pad_ref, p0)
    zero_halos(a1pad_ref, p1)

    # Stage-0 input: copy each space-to-depth image into its padded stripe.
    for b in range(Nb):
        base = b * stripe + pad_rows
        xpad_ref[base:base + M, :] = x_ref[b]

    def run_stage(inpad_ref, Cin, taps, w_ref, sh_ref, relu, write_out):
        """One conv stage over all row chunks of all Nb images.

        Tap windows (bf16) are stored into the shared slab scratch at static
        128-lane offsets, then ONE big-K matmul per chunk; the shift (+ ReLU)
        epilogue runs in f32 on the MXU result before the bf16 writeback.
        """
        K = len(taps) * Cin
        for c in range(n_chunks):
            r0 = c * Mc
            for b in range(Nb):
                src = b * stripe + pad_rows + r0
                for t, (dy, dx) in enumerate(taps):
                    s = src + dy * Wb + dx
                    win = inpad_ref[s:s + Mc, :]
                    if dx < 0:      # source col j + dx < 0  -> zero
                        win = jnp.where(col < -dx, zero, win)
                    elif dx > 0:    # source col j + dx >= Wb -> zero
                        win = jnp.where(col >= Wb - dx, zero, win)
                    slab_ref[b * Mc:(b + 1) * Mc, t * Cin:(t + 1) * Cin] = win
            y = jnp.dot(slab_ref[:, :K], w_ref[...], preferred_element_type=f32)
            z = y + sh_ref[...]
            if relu:
                z = jnp.maximum(z, 0.0)
            zb = z.astype(bf16)
            for b in range(Nb):
                write_out(b, r0, zb[b * Mc:(b + 1) * Mc, :])

    # ---- stage 0: stride-2 3x3 conv == 2x2 conv over space-to-depth blocks ----
    def write0(b, r0, v):
        base = b * stripe + pad_rows + r0
        a0pad_ref[base:base + Mc, :] = v
    run_stage(xpad_ref, pin, taps_2x2, w0_ref, sh0_ref, relu=False, write_out=write0)

    # ---- stage 1: 3x3 conv + folded BN + ReLU ----
    def write1(b, r0, v):
        base = b * stripe + pad_rows + r0
        a1pad_ref[base:base + Mc, :] = v
    run_stage(a0pad_ref, p0, taps_3x3, w1_ref, sh1_ref, relu=True, write_out=write1)

    # ---- stage 2: 3x3 conv + folded BN + ReLU, lane-dense bf16 store ----
    def write2(b, r0, v):
        o_ref[b, r0:r0 + Mc, :] = v
    run_stage(a1pad_ref, p1, taps_3x3, w2_ref, sh2_ref, relu=True, write_out=write2)


def _fold_bn(bias, gamma, beta, running_mean, running_var, eps=1e-5):
    """Fold conv bias + eval-mode BatchNorm into per-channel (scale, shift)."""
    s = gamma / jnp.sqrt(running_var + eps)
    shift = s * (bias - running_mean) + beta
    return s, shift


def _pack_params(params):
    """Fold BN scales into the conv weights and repack everything as 2-D,
    channel-padded matmul operands (bf16) + f32 per-channel shifts."""
    w0 = params["w0"].astype(jnp.float32)               # (3,3,cin,cin)  HWIO
    w1 = params["w1"].astype(jnp.float32)               # (3,3,cin,cout)
    w2 = params["w2"].astype(jnp.float32)               # (3,3,cout,cout)
    cin, cout = w0.shape[2], w1.shape[3]

    pin = _round_up(4 * cin, 128)   # space-to-depth input channels (padded)
    p0 = _round_up(cin, 128)        # conv0 output channels (padded)
    p1 = _round_up(cout, 128)       # conv1 output channels (padded)
    p2 = _round_up(cout, 128)       # conv2 output channels (padded)

    # conv0: stride-2 3x3  ->  2x2 conv over 2x2 space-to-depth blocks.
    #   w0_s2d[a, b, p, q] = w0[2a + p - 1, 2b + q - 1]   (zero if out of range)
    w0_s2d = jnp.zeros((2, 2, 2, 2, cin, cin), jnp.float32)
    for a in range(2):
        for b in range(2):
            for p in range(2):
                for q in range(2):
                    ky, kx = 2 * a + p - 1, 2 * b + q - 1
                    if 0 <= ky <= 2 and 0 <= kx <= 2:
                        w0_s2d = w0_s2d.at[a, b, p, q].set(w0[ky, kx])
    w0m = w0_s2d.reshape(4, 4 * cin, cin)
    w0m = jnp.pad(w0m, ((0, 0), (0, pin - 4 * cin), (0, p0 - cin)))
    w0m = w0m.reshape(4 * pin, p0).astype(jnp.bfloat16)
    sh0 = jnp.pad(params["b0"].astype(jnp.float32), (0, p0 - cin)).reshape(1, p0)

    # conv1: fold BN scale into weights, keep additive shift only.
    s1, t1 = _fold_bn(params["b1"], params["g1"], params["be1"],
                      params["rm1"], params["rv1"])
    w1m = (w1 * s1).reshape(9, cin, cout)
    w1m = jnp.pad(w1m, ((0, 0), (0, p0 - cin), (0, p1 - cout)))
    w1m = w1m.reshape(9 * p0, p1).astype(jnp.bfloat16)
    sh1 = jnp.pad(t1.astype(jnp.float32), (0, p1 - cout)).reshape(1, p1)

    # conv2: same.
    s2, t2 = _fold_bn(params["b2"], params["g2"], params["be2"],
                      params["rm2"], params["rv2"])
    w2m = (w2 * s2).reshape(9, cout, cout)
    w2m = jnp.pad(w2m, ((0, 0), (0, p1 - cout), (0, p2 - cout)))
    w2m = w2m.reshape(9 * p1, p2).astype(jnp.bfloat16)
    sh2 = jnp.pad(t2.astype(jnp.float32), (0, p2 - cout)).reshape(1, p2)

    return (w0m, w1m, w2m, sh0, sh1, sh2), (pin, p0, p1, p2)


@jax.jit
def convdown_forward(x_nchw, params):
    """Forward pass of `convdown` (dropout=None). Input/output are NCHW f32."""
    N, cin, H, W = x_nchw.shape
    assert H % 2 == 0 and W % 2 == 0, "space-to-depth path assumes even H, W"
    Hb, Wb = H // 2, W // 2
    M = Hb * Wb
    cout = params["w1"].shape[3]

    (w0m, w1m, w2m, sh0, sh1, sh2), (pin, p0, p1, p2) = _pack_params(params)

    # ---- per-step blocking: batch images when small, chunk rows when large ----
    # Keep the live bf16 im2col slab to a few MiB (fits v7x 64 MiB VMEM with
    # double-buffering headroom) while making the matmul M dim as large as the
    # budget allows so the 256-wide MXUs on v6e/v7x stay fed.
    kmax = max(4 * pin, 9 * p0, 9 * p1)
    slab_budget = 6 * 1024 * 1024                  # bytes for the bf16 slab
    rows_cap = max(Wb, slab_budget // (2 * kmax))
    if M <= rows_cap:
        Nb = _largest_divisor_leq(N, max(1, rows_cap // M))
        chunk_rows = Hb
    else:
        Nb = 1
        chunk_rows = _largest_divisor_leq(Hb, max(1, rows_cap // Wb))
    Mc = chunk_rows * Wb
    pad_rows = _round_up(Wb + 1, 8)
    stripe = M + 2 * pad_rows

    # NCHW -> space-to-depth, flat spatial, channel-padded, bf16 (cast BEFORE the
    # relayout so the HBM transpose traffic is half-width):
    #   x2d[n, i*Wb + j, (p*2 + q)*cin + c] = x[n, c, 2i + p, 2j + q]
    x = x_nchw.astype(jnp.bfloat16)
    x = x.reshape(N, cin, Hb, 2, Wb, 2)
    x = x.transpose(0, 2, 4, 3, 5, 1).reshape(N, M, 4 * cin)
    x = jnp.pad(x, ((0, 0), (0, 0), (0, pin - 4 * cin)))

    kernel = functools.partial(
        _convdown_kernel, Hb=Hb, Wb=Wb, Nb=Nb, chunk_rows=chunk_rows,
        pin=pin, p0=p0, p1=p1, p2=p2)

    flops = 2 * N * M * (4 * pin * p0 + 9 * p0 * p1 + 9 * p1 * p2)
    bytes_accessed = (x.size * 2 + N * M * p2 * 2
                      + (w0m.size + w1m.size + w2m.size) * 2
                      + (sh0.size + sh1.size + sh2.size) * 4)

    out = pl.pallas_call(
        kernel,
        out_shape=jax.ShapeDtypeStruct((N, M, p2), jnp.bfloat16),
        grid_spec=pltpu.PrefetchScalarGridSpec(
            num_scalar_prefetch=0,
            grid=(N // Nb,),
            in_specs=[
                pl.BlockSpec((Nb, M, pin), lambda n: (n, 0, 0)),
                pl.BlockSpec((4 * pin, p0), lambda n: (0, 0)),
                pl.BlockSpec((9 * p0, p1), lambda n: (0, 0)),
                pl.BlockSpec((9 * p1, p2), lambda n: (0, 0)),
                pl.BlockSpec((1, p0), lambda n: (0, 0)),
                pl.BlockSpec((1, p1), lambda n: (0, 0)),
                pl.BlockSpec((1, p2), lambda n: (0, 0)),
            ],
            out_specs=pl.BlockSpec((Nb, M, p2), lambda n: (n, 0, 0)),
            scratch_shapes=[
                pltpu.VMEM((Nb * stripe, pin), jnp.bfloat16),   # padded s2d input
                pltpu.VMEM((Nb * stripe, p0), jnp.bfloat16),    # conv0 activations
                pltpu.VMEM((Nb * stripe, p1), jnp.bfloat16),    # conv1 activations
                pltpu.VMEM((Nb * Mc, kmax), jnp.bfloat16),      # im2col slab
            ],
        ),
        compiler_params=pltpu.CompilerParams(
            dimension_semantics=("parallel",),
            vmem_limit_bytes=64 * 1024 * 1024),
        cost_estimate=pl.CostEstimate(
            flops=flops, transcendentals=0, bytes_accessed=bytes_accessed),
    )(x, w0m, w1m, w2m, sh0, sh1, sh2)

    # strip channel padding, restore NCHW; single fused relayout + f32 cast
    out = out[:, :, :cout].reshape(N, Hb, Wb, cout).transpose(0, 3, 1, 2)
    return out.astype(jnp.float32)


def convdown_reference(x, params, eps=1e-5):
    """Pure-JAX reference (eval-mode BN), for a loose correctness check."""
    def conv(x, w, b, stride):
        y = jax.lax.conv_general_dilated(
            x, w, window_strides=(stride, stride), padding=((1, 1), (1, 1)),
            dimension_numbers=("NCHW", "HWIO", "NCHW"))
        return y + b[None, :, None, None]

    def bn(y, g, be, rm, rv):
        s = g / jnp.sqrt(rv + eps)
        return s[None, :, None, None] * (y - rm[None, :, None, None]) \
            + be[None, :, None, None]

    y = conv(x, params["w0"], params["b0"], 2)
    y = jax.nn.relu(bn(conv(y, params["w1"], params["b1"], 1),
                       params["g1"], params["be1"], params["rm1"], params["rv1"]))
    y = jax.nn.relu(bn(conv(y, params["w2"], params["b2"], 1),
                       params["g2"], params["be2"], params["rm2"], params["rv2"]))
    return y


def init_convdown_params(key, in_ch, out_ch, dtype=jnp.float32):
    """Deterministic parameter init matching the module's shapes (weights HWIO)."""
    ks = jax.random.split(key, 12)

    def w_init(k, cin, cout):
        fan_in = cin * 9
        return jax.random.normal(k, (3, 3, cin, cout), dtype) / jnp.sqrt(fan_in)

    return {
        # downsample conv (in_ch -> in_ch, stride 2)
        "w0": w_init(ks[0], in_ch, in_ch),
        "b0": 0.01 * jax.random.normal(ks[1], (in_ch,), dtype),
        # double_conv conv1 (in_ch -> out_ch) + BN1
        "w1": w_init(ks[2], in_ch, out_ch),
        "b1": 0.01 * jax.random.normal(ks[3], (out_ch,), dtype),
        "g1": 1.0 + 0.1 * jax.random.normal(ks[4], (out_ch,), dtype),
        "be1": 0.1 * jax.random.normal(ks[5], (out_ch,), dtype),
        "rm1": 0.05 * jax.random.normal(ks[6], (out_ch,), dtype),
        "rv1": 1.0 + 0.1 * jax.random.uniform(ks[7], (out_ch,), dtype),
        # double_conv conv2 (out_ch -> out_ch) + BN2
        "w2": w_init(ks[8], out_ch, out_ch),
        "b2": 0.01 * jax.random.normal(ks[9], (out_ch,), dtype),
        "g2": 1.0 + 0.1 * jax.random.normal(ks[10], (out_ch,), dtype),
        "be2": 0.1 * jax.random.normal(ks[11], (out_ch,), dtype),
        "rm2": jnp.zeros((out_ch,), dtype),
        "rv2": jnp.ones((out_ch,), dtype),
    }


if __name__ == "__main__":
    key = jax.random.PRNGKey(0)
    k_x, k_p = jax.random.split(key)

    N, in_ch, H, W = 2, 4, 16, 16
    out_ch = 8

    x = jax.random.normal(k_x, (N, in_ch, H, W), jnp.float32)
    params = init_convdown_params(k_p, in_ch, out_ch)

    y = jax.block_until_ready(convdown_forward(x, params))

    assert y.shape == (N, out_ch, H // 2, W // 2), y.shape
    assert bool(jnp.all(jnp.isfinite(y)))

    # Loose parity check vs a pure-JAX f32 reference (kernel uses bf16 weights
    # and bf16 intermediate activations, so allow ~1e-1 absolute deviation).
    y_ref = jax.block_until_ready(convdown_reference(x, params))
    max_err = float(jnp.max(jnp.abs(y - y_ref)))
    assert max_err < 1e-1, f"max abs error vs reference too large: {max_err}"

    print("KERNEL_OK")
</pallas_src>

<mosaic_0001>
module attributes {stable_mosaic.version = 11 : i64} {
  func.func @_convdown_kernel(%arg0: i32, %arg1: memref<2x64x128xbf16, #tpu.memory_space<vmem>>, %arg2: memref<512x128xbf16, #tpu.memory_space<vmem>>, %arg3: memref<1152x128xbf16, #tpu.memory_space<vmem>>, %arg4: memref<1152x128xbf16, #tpu.memory_space<vmem>>, %arg5: memref<1x128xf32, #tpu.memory_space<vmem>>, %arg6: memref<1x128xf32, #tpu.memory_space<vmem>>, %arg7: memref<1x128xf32, #tpu.memory_space<vmem>>, %arg8: memref<2x64x128xbf16, #tpu.memory_space<vmem>>, %arg9: memref<192x128xbf16, #tpu.memory_space<vmem>>, %arg10: memref<192x128xbf16, #tpu.memory_space<vmem>>, %arg11: memref<192x128xbf16, #tpu.memory_space<vmem>>, %arg12: memref<128x1152xbf16, #tpu.memory_space<vmem>>) attributes {dimension_semantics = [#tpu.dimension_semantics<parallel>], iteration_bounds = array<i64: 1>, scalar_prefetch = 0 : i64, scratch_operands = 4 : i64, tpu.core_type = #tpu.core_type<tc>, window_params = [{transform_indices = @transform_0, window_bounds = array<i64: 2, 64, 128>}, {pipeline_mode = #tpu.pipeline_mode<synchronous>, transform_indices = @transform_1, window_bounds = array<i64: 512, 128>}, {pipeline_mode = #tpu.pipeline_mode<synchronous>, transform_indices = @transform_2, window_bounds = array<i64: 1152, 128>}, {pipeline_mode = #tpu.pipeline_mode<synchronous>, transform_indices = @transform_3, window_bounds = array<i64: 1152, 128>}, {pipeline_mode = #tpu.pipeline_mode<synchronous>, transform_indices = @transform_4, window_bounds = array<i64: 1, 128>}, {pipeline_mode = #tpu.pipeline_mode<synchronous>, transform_indices = @transform_5, window_bounds = array<i64: 1, 128>}, {pipeline_mode = #tpu.pipeline_mode<synchronous>, transform_indices = @transform_6, window_bounds = array<i64: 1, 128>}, {transform_indices = @transform_7, window_bounds = array<i64: 2, 64, 128>}]} {
    %0 = tpu.iota {dimensions = array<i32: 1>} : vector<8x8x1xi32>
    %1 = vector.shape_cast %0 : vector<8x8x1xi32> to vector<64x1xi32>
    %cst = arith.constant 0.000000e+00 : bf16
    %2 = vector.broadcast %cst : bf16 to vector<16x128xbf16>
    %c0 = arith.constant 0 : index
    %c0_0 = arith.constant 0 : index
    %3 = vector.load %arg9[%c0, %c0_0] : memref<192x128xbf16, #tpu.memory_space<vmem>>, vector<16x128xbf16>
    tpu.vector_store %arg9[%c0, %c0_0], %2 {strides = array<i32>} : memref<192x128xbf16, #tpu.memory_space<vmem>>, vector<16x128xbf16>,
    %c80 = arith.constant 80 : index
    %c0_1 = arith.constant 0 : index
    %4 = vector.load %arg9[%c80, %c0_1] : memref<192x128xbf16, #tpu.memory_space<vmem>>, vector<16x128xbf16>
    tpu.vector_store %arg9[%c80, %c0_1], %2 {strides = array<i32>} : memref<192x128xbf16, #tpu.memory_space<vmem>>, vector<16x128xbf16>,
    %c96 = arith.constant 96 : index
    %c0_2 = arith.constant 0 : index
    %5 = vector.load %arg9[%c96, %c0_2] : memref<192x128xbf16, #tpu.memory_space<vmem>>, vector<16x128xbf16>
    tpu.vector_store %arg9[%c96, %c0_2], %2 {strides = array<i32>} : memref<192x128xbf16, #tpu.memory_space<vmem>>, vector<16x128xbf16>,
    %c176 = arith.constant 176 : index
    %c0_3 = arith.constant 0 : index
    %6 = vector.load %arg9[%c176, %c0_3] : memref<192x128xbf16, #tpu.memory_space<vmem>>, vector<16x128xbf16>
    tpu.vector_store %arg9[%c176, %c0_3], %2 {strides = array<i32>} : memref<192x128xbf16, #tpu.memory_space<vmem>>, vector<16x128xbf16>,
    %cst_4 = arith.constant 0.000000e+00 : bf16
    %7 = vector.broadcast %cst_4 : bf16 to vector<16x128xbf16>
    %c0_5 = arith.constant 0 : index
    %c0_6 = arith.constant 0 : index
    %8 = vector.load %arg10[%c0_5, %c0_6] : memref<192x128xbf16, #tpu.memory_space<vmem>>, vector<16x128xbf16>
    tpu.vector_store %arg10[%c0_5, %c0_6], %7 {strides = array<i32>} : memref<192x128xbf16, #tpu.memory_space<vmem>>, vector<16x128xbf16>,
    %c80_7 = arith.constant 80 : index
    %c0_8 = arith.constant 0 : index
    %9 = vector.load %arg10[%c80_7, %c0_8] : memref<192x128xbf16, #tpu.memory_space<vmem>>, vector<16x128xbf16>
    tpu.vector_store %arg10[%c80_7, %c0_8], %7 {strides = array<i32>} : memref<192x128xbf16, #tpu.memory_space<vmem>>, vector<16x128xbf16>,
    %c96_9 = arith.constant 96 : index
    %c0_10 = arith.constant 0 : index
    %10 = vector.load %arg10[%c96_9, %c0_10] : memref<192x128xbf16, #tpu.memory_space<vmem>>, vector<16x128xbf16>
    tpu.vector_store %arg10[%c96_9, %c0_10], %7 {strides = array<i32>} : memref<192x128xbf16, #tpu.memory_space<vmem>>, vector<16x128xbf16>,
    %c176_11 = arith.constant 176 : index
    %c0_12 = arith.constant 0 : index
    %11 = vector.load %arg10[%c176_11, %c0_12] : memref<192x128xbf16, #tpu.memory_space<vmem>>, vector<16x128xbf16>
    tpu.vector_store %arg10[%c176_11, %c0_12], %7 {strides = array<i32>} : memref<192x128xbf16, #tpu.memory_space<vmem>>, vector<16x128xbf16>,
    %cst_13 = arith.constant 0.000000e+00 : bf16
    %12 = vector.broadcast %cst_13 : bf16 to vector<16x128xbf16>
    %c0_14 = arith.constant 0 : index
    %c0_15 = arith.constant 0 : index
    %13 = vector.load %arg11[%c0_14, %c0_15] : memref<192x128xbf16, #tpu.memory_space<vmem>>, vector<16x128xbf16>
    tpu.vector_store %arg11[%c0_14, %c0_15], %12 {strides = array<i32>} : memref<192x128xbf16, #tpu.memory_space<vmem>>, vector<16x128xbf16>,
    %c80_16 = arith.constant 80 : index
    %c0_17 = arith.constant 0 : index
    %14 = vector.load %arg11[%c80_16, %c0_17] : memref<192x128xbf16, #tpu.memory_space<vmem>>, vector<16x128xbf16>
    tpu.vector_store %arg11[%c80_16, %c0_17], %12 {strides = array<i32>} : memref<192x128xbf16, #tpu.memory_space<vmem>>, vector<16x128xbf16>,
    %c96_18 = arith.constant 96 : index
    %c0_19 = arith.constant 0 : index
    %15 = vector.load %arg11[%c96_18, %c0_19] : memref<192x128xbf16, #tpu.memory_space<vmem>>, vector<16x128xbf16>
    tpu.vector_store %arg11[%c96_18, %c0_19], %12 {strides = array<i32>} : memref<192x128xbf16, #tpu.memory_space<vmem>>, vector<16x128xbf16>,
    %c176_20 = arith.constant 176 : index
    %c0_21 = arith.constant 0 : index
    %16 = vector.load %arg11[%c176_20, %c0_21] : memref<192x128xbf16, #tpu.memory_space<vmem>>, vector<16x128xbf16>
    tpu.vector_store %arg11[%c176_20, %c0_21], %12 {strides = array<i32>} : memref<192x128xbf16, #tpu.memory_space<vmem>>, vector<16x128xbf16>,
    %c0_22 = arith.constant 0 : index
    %c0_23 = arith.constant 0 : index
    %c0_24 = arith.constant 0 : index
    %17 = vector.load %arg1[%c0_22, %c0_23, %c0_24] : memref<2x64x128xbf16, #tpu.memory_space<vmem>>, vector<1x64x128xbf16>
    %18 = vector.shape_cast %17 : vector<1x64x128xbf16> to vector<64x128xbf16>
    %c16 = arith.constant 16 : index
    %c0_25 = arith.constant 0 : index
    %19 = vector.load %arg9[%c16, %c0_25] : memref<192x128xbf16, #tpu.memory_space<vmem>>, vector<64x128xbf16>
    tpu.vector_store %arg9[%c16, %c0_25], %18 {strides = array<i32>} : memref<192x128xbf16, #tpu.memory_space<vmem>>, vector<64x128xbf16>,
    %c1 = arith.constant 1 : index
    %c0_26 = arith.constant 0 : index
    %c0_27 = arith.constant 0 : index
    %20 = vector.load %arg1[%c1, %c0_26, %c0_27] : memref<2x64x128xbf16, #tpu.memory_space<vmem>>, vector<1x64x128xbf16>
    %21 = vector.shape_cast %20 : vector<1x64x128xbf16> to vector<64x128xbf16>
    %c112 = arith.constant 112 : index
    %c0_28 = arith.constant 0 : index
    %22 = vector.load %arg9[%c112, %c0_28] : memref<192x128xbf16, #tpu.memory_space<vmem>>, vector<64x128xbf16>
    tpu.vector_store %arg9[%c112, %c0_28], %21 {strides = array<i32>} : memref<192x128xbf16, #tpu.memory_space<vmem>>, vector<64x128xbf16>,
    %c7 = arith.constant 7 : index
    %c0_29 = arith.constant 0 : index
    %23 = vector.load %arg9[%c7, %c0_29] : memref<192x128xbf16, #tpu.memory_space<vmem>>, vector<64x128xbf16>
    %c1_i32 = arith.constant 1 : i32
    %24 = vector.broadcast %c1_i32 : i32 to vector<64x1xi32>
    %25 = arith.cmpi slt, %1, %24 : vector<64x1xi32>
    %cst_30 = arith.constant 0.000000e+00 : bf16
    %26 = vector.shape_cast %25 : vector<64x1xi1> to vector<64x1xi1>
    %27 = vector.broadcast %26 : vector<64x1xi1> to vector<64x128xi1>
    %28 = vector.broadcast %cst_30 : bf16 to vector<64x128xbf16>
    %29 = arith.select %27, %28, %23 : vector<64x128xi1>, vector<64x128xbf16>
    %c0_31 = arith.constant 0 : index
    %c0_32 = arith.constant 0 : index
    %30 = vector.load %arg12[%c0_31, %c0_32] : memref<128x1152xbf16, #tpu.memory_space<vmem>>, vector<64x128xbf16>
    tpu.vector_store %arg12[%c0_31, %c0_32], %29 {strides = array<i32>} : memref<128x1152xbf16, #tpu.memory_space<vmem>>, vector<64x128xbf16>,
    %c8 = arith.constant 8 : index
    %c0_33 = arith.constant 0 : index
    %31 = vector.load %arg9[%c8, %c0_33] : memref<192x128xbf16, #tpu.memory_space<vmem>>, vector<64x128xbf16>
    %c0_34 = arith.constant 0 : index
    %c128 = arith.constant 128 : index
    %32 = vector.load %arg12[%c0_34, %c128] : memref<128x1152xbf16, #tpu.memory_space<vmem>>, vector<64x128xbf16>
    tpu.vector_store %arg12[%c0_34, %c128], %31 {strides = array<i32>} : memref<128x1152xbf16, #tpu.memory_space<vmem>>, vector<64x128xbf16>,
    %c15 = arith.constant 15 : index
    %c0_35 = arith.constant 0 : index
    %33 = vector.load %arg9[%c15, %c0_35] : memref<192x128xbf16, #tpu.memory_space<vmem>>, vector<64x128xbf16>
    %c1_i32_36 = arith.constant 1 : i32
    %34 = vector.broadcast %c1_i32_36 : i32 to vector<64x1xi32>
    %35 = arith.cmpi slt, %1, %34 : vector<64x1xi32>
    %cst_37 = arith.constant 0.000000e+00 : bf16
    %36 = vector.shape_cast %35 : vector<64x1xi1> to vector<64x1xi1>
    %37 = vector.broadcast %36 : vector<64x1xi1> to vector<64x128xi1>
    %38 = vector.broadcast %cst_37 : bf16 to vector<64x128xbf16>
    %39 = arith.select %37, %38, %33 : vector<64x128xi1>, vector<64x128xbf16>
    %c0_38 = arith.constant 0 : index
    %c256 = arith.constant 256 : index
    %40 = vector.load %arg12[%c0_38, %c256] : memref<128x1152xbf16, #tpu.memory_space<vmem>>, vector<64x128xbf16>
    tpu.vector_store %arg12[%c0_38, %c256], %39 {strides = array<i32>} : memref<128x1152xbf16, #tpu.memory_space<vmem>>, vector<64x128xbf16>,
    %c16_39 = arith.constant 16 : index
    %c0_40 = arith.constant 0 : index
    %41 = vector.load %arg9[%c16_39, %c0_40] : memref<192x128xbf16, #tpu.memory_space<vmem>>, vector<64x128xbf16>
    %c0_41 = arith.constant 0 : index
    %c384 = arith.constant 384 : index
    %42 = vector.load %arg12[%c0_41, %c384] : memref<128x1152xbf16, #tpu.memory_space<vmem>>, vector<64x128xbf16>
    tpu.vector_store %arg12[%c0_41, %c384], %41 {strides = array<i32>} : memref<128x1152xbf16, #tpu.memory_space<vmem>>, vector<64x128xbf16>,
    %c103 = arith.constant 103 : index
    %c0_42 = arith.constant 0 : index
    %43 = vector.load %arg9[%c103, %c0_42] : memref<192x128xbf16, #tpu.memory_space<vmem>>, vector<64x128xbf16>
    %c1_i32_43 = arith.constant 1 : i32
    %44 = vector.broadcast %c1_i32_43 : i32 to vector<64x1xi32>
    %45 = arith.cmpi slt, %1, %44 : vector<64x1xi32>
    %cst_44 = arith.constant 0.000000e+00 : bf16
    %46 = vector.shape_cast %45 : vector<64x1xi1> to vector<64x1xi1>
    %47 = vector.broadcast %46 : vector<64x1xi1> to vector<64x128xi1>
    %48 = vector.broadcast %cst_44 : bf16 to vector<64x128xbf16>
    %49 = arith.select %47, %48, %43 : vector<64x128xi1>, vector<64x128xbf16>
    %c64 = arith.constant 64 : index
    %c0_45 = arith.constant 0 : index
    %50 = vector.load %arg12[%c64, %c0_45] : memref<128x1152xbf16, #tpu.memory_space<vmem>>, vector<64x128xbf16>
    tpu.vector_store %arg12[%c64, %c0_45], %49 {strides = array<i32>} : memref<128x1152xbf16, #tpu.memory_space<vmem>>, vector<64x128xbf16>,
    %c104 = arith.constant 104 : index
    %c0_46 = arith.constant 0 : index
    %51 = vector.load %arg9[%c104, %c0_46] : memref<192x128xbf16, #tpu.memory_space<vmem>>, vector<64x128xbf16>
    %c64_47 = arith.constant 64 : index
    %c128_48 = arith.constant 128 : index
    %52 = vector.load %arg12[%c64_47, %c128_48] : memref<128x1152xbf16, #tpu.memory_space<vmem>>, vector<64x128xbf16>
    tpu.vector_store %arg12[%c64_47, %c128_48], %51 {strides = array<i32>} : memref<128x1152xbf16, #tpu.memory_space<vmem>>, vector<64x128xbf16>,
    %c111 = arith.constant 111 : index
    %c0_49 = arith.constant 0 : index
    %53 = vector.load %arg9[%c111, %c0_49] : memref<192x128xbf16, #tpu.memory_space<vmem>>, vector<64x128xbf16>
    %c1_i32_50 = arith.constant 1 : i32
    %54 = vector.broadcast %c1_i32_50 : i32 to vector<64x1xi32>
    %55 = arith.cmpi slt, %1, %54 : vector<64x1xi32>
    %cst_51 = arith.constant 0.000000e+00 : bf16
    %56 = vector.shape_cast %55 : vector<64x1xi1> to vector<64x1xi1>
    %57 = vector.broadcast %56 : vector<64x1xi1> to vector<64x128xi1>
    %58 = vector.broadcast %cst_51 : bf16 to vector<64x128xbf16>
    %59 = arith.select %57, %58, %53 : vector<64x128xi1>, vector<64x128xbf16>
    %c64_52 = arith.constant 64 : index
    %c256_53 = arith.constant 256 : index
    %60 = vector.load %arg12[%c64_52, %c256_53] : memref<128x1152xbf16, #tpu.memory_space<vmem>>, vector<64x128xbf16>
    tpu.vector_store %arg12[%c64_52, %c256_53], %59 {strides = array<i32>} : memref<128x1152xbf16, #tpu.memory_space<vmem>>, vector<64x128xbf16>,
    %c112_54 = arith.constant 112 : index
    %c0_55 = arith.constant 0 : index
    %61 = vector.load %arg9[%c112_54, %c0_55] : memref<192x128xbf16, #tpu.memory_space<vmem>>, vector<64x128xbf16>
    %c64_56 = arith.constant 64 : index
    %c384_57 = arith.constant 384 : index
    %62 = vector.load %arg12[%c64_56, %c384_57] : memref<128x1152xbf16, #tpu.memory_space<vmem>>, vector<64x128xbf16>
    tpu.vector_store %arg12[%c64_56, %c384_57], %61 {strides = array<i32>} : memref<128x1152xbf16, #tpu.memory_space<vmem>>, vector<64x128xbf16>,
    %c0_58 = arith.constant 0 : index
    %c0_59 = arith.constant 0 : index
    %63 = vector.load %arg12[%c0_58, %c0_59] : memref<128x1152xbf16, #tpu.memory_space<vmem>>, vector<128x512xbf16>
    %c0_60 = arith.constant 0 : index
    %c0_61 = arith.constant 0 : index
    %64 = vector.load %arg2[%c0_60, %c0_61] : memref<512x128xbf16, #tpu.memory_space<vmem>>, vector<512x128xbf16>
    %cst_62 = arith.constant dense<0.000000e+00> : vector<128x128xf32>
    %65 = tpu.matmul %63, %64, %cst_62 {dimension_numbers = #tpu.dot_dimension_numbers<[1], [0], [0], [1], [0, 0, 1, 1], [], []>} : vector<128x512xbf16>, vector<512x128xbf16>, vector<128x128xf32> -> vector<128x128xf32>
    %c0_63 = arith.constant 0 : index
    %c0_64 = arith.constant 0 : index
    %66 = vector.load %arg5[%c0_63, %c0_64] : memref<1x128xf32, #tpu.memory_space<vmem>>, vector<1x128xf32>
    %67 = vector.broadcast %66 : vector<1x128xf32> to vector<128x128xf32>
    %68 = arith.addf %65, %67 : vector<128x128xf32>
    %69 = arith.truncf %68 : vector<128x128xf32> to vector<128x128xbf16>
    %70 = vector.extract_strided_slice %69 {offsets = [0, 0], sizes = [64, 128], strides = [1, 1]} : vector<128x128xbf16> to vector<64x128xbf16>
    %c16_65 = arith.constant 16 : index
    %c0_66 = arith.constant 0 : index
    %71 = vector.load %arg10[%c16_65, %c0_66] : memref<192x128xbf16, #tpu.memory_space<vmem>>, vector<64x128xbf16>
    tpu.vector_store %arg10[%c16_65, %c0_66], %70 {strides = array<i32>} : memref<192x128xbf16, #tpu.memory_space<vmem>>, vector<64x128xbf16>,
    %72 = vector.extract_strided_slice %69 {offsets = [64, 0], sizes = [64, 128], strides = [1, 1]} : vector<128x128xbf16> to vector<64x128xbf16>
    %c112_67 = arith.constant 112 : index
    %c0_68 = arith.constant 0 : index
    %73 = vector.load %arg10[%c112_67, %c0_68] : memref<192x128xbf16, #tpu.memory_space<vmem>>, vector<64x128xbf16>
    tpu.vector_store %arg10[%c112_67, %c0_68], %72 {strides = array<i32>} : memref<192x128xbf16, #tpu.memory_space<vmem>>, vector<64x128xbf16>,
    %c7_69 = arith.constant 7 : index
    %c0_70 = arith.constant 0 : index
    %74 = vector.load %arg10[%c7_69, %c0_70] : memref<192x128xbf16, #tpu.memory_space<vmem>>, vector<64x128xbf16>
    %c1_i32_71 = arith.constant 1 : i32
    %75 = vector.broadcast %c1_i32_71 : i32 to vector<64x1xi32>
    %76 = arith.cmpi slt, %1, %75 : vector<64x1xi32>
    %cst_72 = arith.constant 0.000000e+00 : bf16
    %77 = vector.shape_cast %76 : vector<64x1xi1> to vector<64x1xi1>
    %78 = vector.broadcast %77 : vector<64x1xi1> to vector<64x128xi1>
    %79 = vector.broadcast %cst_72 : bf16 to vector<64x128xbf16>
    %80 = arith.select %78, %79, %74 : vector<64x128xi1>, vector<64x128xbf16>
    %c0_73 = arith.constant 0 : index
    %c0_74 = arith.constant 0 : index
    %81 = vector.load %arg12[%c0_73, %c0_74] : memref<128x1152xbf16, #tpu.memory_space<vmem>>, vector<64x128xbf16>
    tpu.vector_store %arg12[%c0_73, %c0_74], %80 {strides = array<i32>} : memref<128x1152xbf16, #tpu.memory_space<vmem>>, vector<64x128xbf16>,
    %c8_75 = arith.constant 8 : index
    %c0_76 = arith.constant 0 : index
    %82 = vector.load %arg10[%c8_75, %c0_76] : memref<192x128xbf16, #tpu.memory_space<vmem>>, vector<64x128xbf16>
    %c0_77 = arith.constant 0 : index
    %c128_78 = arith.constant 128 : index
    %83 = vector.load %arg12[%c0_77, %c128_78] : memref<128x1152xbf16, #tpu.memory_space<vmem>>, vector<64x128xbf16>
    tpu.vector_store %arg12[%c0_77, %c128_78], %82 {strides = array<i32>} : memref<128x1152xbf16, #tpu.memory_space<vmem>>, vector<64x128xbf16>,
    %c9 = arith.constant 9 : index
    %c0_79 = arith.constant 0 : index
    %84 = vector.load %arg10[%c9, %c0_79] : memref<192x128xbf16, #tpu.memory_space<vmem>>, vector<64x128xbf16>
    %c7_i32 = arith.constant 7 : i32
    %85 = vector.broadcast %c7_i32 : i32 to vector<64x1xi32>
    %86 = arith.cmpi sge, %1, %85 : vector<64x1xi32>
    %cst_80 = arith.constant 0.000000e+00 : bf16
    %87 = vector.shape_cast %86 : vector<64x1xi1> to vector<64x1xi1>
    %88 = vector.broadcast %87 : vector<64x1xi1> to vector<64x128xi1>
    %89 = vector.broadcast %cst_80 : bf16 to vector<64x128xbf16>
    %90 = arith.select %88, %89, %84 : vector<64x128xi1>, vector<64x128xbf16>
    %c0_81 = arith.constant 0 : index
    %c256_82 = arith.constant 256 : index
    %91 = vector.load %arg12[%c0_81, %c256_82] : memref<128x1152xbf16, #tpu.memory_space<vmem>>, vector<64x128xbf16>
    tpu.vector_store %arg12[%c0_81, %c256_82], %90 {strides = array<i32>} : memref<128x1152xbf16, #tpu.memory_space<vmem>>, vector<64x128xbf16>,
    %c15_83 = arith.constant 15 : index
    %c0_84 = arith.constant 0 : index
    %92 = vector.load %arg10[%c15_83, %c0_84] : memref<192x128xbf16, #tpu.memory_space<vmem>>, vector<64x128xbf16>
    %c1_i32_85 = arith.constant 1 : i32
    %93 = vector.broadcast %c1_i32_85 : i32 to vector<64x1xi32>
    %94 = arith.cmpi slt, %1, %93 : vector<64x1xi32>
    %cst_86 = arith.constant 0.000000e+00 : bf16
    %95 = vector.shape_cast %94 : vector<64x1xi1> to vector<64x1xi1>
    %96 = vector.broadcast %95 : vector<64x1xi1> to vector<64x128xi1>
    %97 = vector.broadcast %cst_86 : bf16 to vector<64x128xbf16>
    %98 = arith.select %96, %97, %92 : vector<64x128xi1>, vector<64x128xbf16>
    %c0_87 = arith.constant 0 : index
    %c384_88 = arith.constant 384 : index
    %99 = vector.load %arg12[%c0_87, %c384_88] : memref<128x1152xbf16, #tpu.memory_space<vmem>>, vector<64x128xbf16>
    tpu.vector_store %arg12[%c0_87, %c384_88], %98 {strides = array<i32>} : memref<128x1152xbf16, #tpu.memory_space<vmem>>, vector<64x128xbf16>,
    %c16_89 = arith.constant 16 : index
    %c0_90 = arith.constant 0 : index
    %100 = vector.load %arg10[%c16_89, %c0_90] : memref<192x128xbf16, #tpu.memory_space<vmem>>, vector<64x128xbf16>
    %c0_91 = arith.constant 0 : index
    %c512 = arith.constant 512 : index
    %101 = vector.load %arg12[%c0_91, %c512] : memref<128x1152xbf16, #tpu.memory_space<vmem>>, vector<64x128xbf16>
    tpu.vector_store %arg12[%c0_91, %c512], %100 {strides = array<i32>} : memref<128x1152xbf16, #tpu.memory_space<vmem>>, vector<64x128xbf16>,
    %c17 = arith.constant 17 : index
    %c0_92 = arith.constant 0 : index
    %102 = vector.load %arg10[%c17, %c0_92] : memref<192x128xbf16, #tpu.memory_space<vmem>>, vector<64x128xbf16>
    %c7_i32_93 = arith.constant 7 : i32
    %103 = vector.broadcast %c7_i32_93 : i32 to vector<64x1xi32>
    %104 = arith.cmpi sge, %1, %103 : vector<64x1xi32>
    %cst_94 = arith.constant 0.000000e+00 : bf16
    %105 = vector.shape_cast %104 : vector<64x1xi1> to vector<64x1xi1>
    %106 = vector.broadcast %105 : vector<64x1xi1> to vector<64x128xi1>
    %107 = vector.broadcast %cst_94 : bf16 to vector<64x128xbf16>
    %108 = arith.select %106, %107, %102 : vector<64x128xi1>, vector<64x128xbf16>
    %c0_95 = arith.constant 0 : index
    %c640 = arith.constant 640 : index
    %109 = vector.load %arg12[%c0_95, %c640] : memref<128x1152xbf16, #tpu.memory_space<vmem>>, vector<64x128xbf16>
    tpu.vector_store %arg12[%c0_95, %c640], %108 {strides = array<i32>} : memref<128x1152xbf16, #tpu.memory_space<vmem>>, vector<64x128xbf16>,
    %c23 = arith.constant 23 : index
    %c0_96 = arith.constant 0 : index
    %110 = vector.load %arg10[%c23, %c0_96] : memref<192x128xbf16, #tpu.memory_space<vmem>>, vector<64x128xbf16>
    %c1_i32_97 = arith.constant 1 : i32
    %111 = vector.broadcast %c1_i32_97 : i32 to vector<64x1xi32>
    %112 = arith.cmpi slt, %1, %111 : vector<64x1xi32>
    %cst_98 = arith.constant 0.000000e+00 : bf16
    %113 = vector.shape_cast %112 : vector<64x1xi1> to vector<64x1xi1>
    %114 = vector.broadcast %113 : vector<64x1xi1> to vector<64x128xi1>
    %115 = vector.broadcast %cst_98 : bf16 to vector<64x128xbf16>
    %116 = arith.select %114, %115, %110 : vector<64x128xi1>, vector<64x128xbf16>
    %c0_99 = arith.constant 0 : index
    %c768 = arith.constant 768 : index
    %117 = vector.load %arg12[%c0_99, %c768] : memref<128x1152xbf16, #tpu.memory_space<vmem>>, vector<64x128xbf16>
    tpu.vector_store %arg12[%c0_99, %c768], %116 {strides = array<i32>} : memref<128x1152xbf16, #tpu.memory_space<vmem>>, vector<64x128xbf16>,
    %c24 = arith.constant 24 : index
    %c0_100 = arith.constant 0 : index
    %118 = vector.load %arg10[%c24, %c0_100] : memref<192x128xbf16, #tpu.memory_space<vmem>>, vector<64x128xbf16>
    %c0_101 = arith.constant 0 : index
    %c896 = arith.constant 896 : index
    %119 = vector.load %arg12[%c0_101, %c896] : memref<128x1152xbf16, #tpu.memory_space<vmem>>, vector<64x128xbf16>
    tpu.vector_store %arg12[%c0_101, %c896], %118 {strides = array<i32>} : memref<128x1152xbf16, #tpu.memory_space<vmem>>, vector<64x128xbf16>,
    %c25 = arith.constant 25 : index
    %c0_102 = arith.constant 0 : index
    %120 = vector.load %arg10[%c25, %c0_102] : memref<192x128xbf16, #tpu.memory_space<vmem>>, vector<64x128xbf16>
    %c7_i32_103 = arith.constant 7 : i32
    %121 = vector.broadcast %c7_i32_103 : i32 to vector<64x1xi32>
    %122 = arith.cmpi sge, %1, %121 : vector<64x1xi32>
    %cst_104 = arith.constant 0.000000e+00 : bf16
    %123 = vector.shape_cast %122 : vector<64x1xi1> to vector<64x1xi1>
    %124 = vector.broadcast %123 : vector<64x1xi1> to vector<64x128xi1>
    %125 = vector.broadcast %cst_104 : bf16 to vector<64x128xbf16>
    %126 = arith.select %124, %125, %120 : vector<64x128xi1>, vector<64x128xbf16>
    %c0_105 = arith.constant 0 : index
    %c1024 = arith.constant 1024 : index
    %127 = vector.load %arg12[%c0_105, %c1024] : memref<128x1152xbf16, #tpu.memory_space<vmem>>, vector<64x128xbf16>
    tpu.vector_store %arg12[%c0_105, %c1024], %126 {strides = array<i32>} : memref<128x1152xbf16, #tpu.memory_space<vmem>>, vector<64x128xbf16>,
    %c103_106 = arith.constant 103 : index
    %c0_107 = arith.constant 0 : index
    %128 = vector.load %arg10[%c103_106, %c0_107] : memref<192x128xbf16, #tpu.memory_space<vmem>>, vector<64x128xbf16>
    %c1_i32_108 = arith.constant 1 : i32
    %129 = vector.broadcast %c1_i32_108 : i32 to vector<64x1xi32>
    %130 = arith.cmpi slt, %1, %129 : vector<64x1xi32>
    %cst_109 = arith.constant 0.000000e+00 : bf16
    %131 = vector.shape_cast %130 : vector<64x1xi1> to vector<64x1xi1>
    %132 = vector.broadcast %131 : vector<64x1xi1> to vector<64x128xi1>
    %133 = vector.broadcast %cst_109 : bf16 to vector<64x128xbf16>
    %134 = arith.select %132, %133, %128 : vector<64x128xi1>, vector<64x128xbf16>
    %c64_110 = arith.constant 64 : index
    %c0_111 = arith.constant 0 : index
    %135 = vector.load %arg12[%c64_110, %c0_111] : memref<128x1152xbf16, #tpu.memory_space<vmem>>, vector<64x128xbf16>
    tpu.vector_store %arg12[%c64_110, %c0_111], %134 {strides = array<i32>} : memref<128x1152xbf16, #tpu.memory_space<vmem>>, vector<64x128xbf16>,
    %c104_112 = arith.constant 104 : index
    %c0_113 = arith.constant 0 : index
    %136 = vector.load %arg10[%c104_112, %c0_113] : memref<192x128xbf16, #tpu.memory_space<vmem>>, vector<64x128xbf16>
    %c64_114 = arith.constant 64 : index
    %c128_115 = arith.constant 128 : index
    %137 = vector.load %arg12[%c64_114, %c128_115] : memref<128x1152xbf16, #tpu.memory_space<vmem>>, vector<64x128xbf16>
    tpu.vector_store %arg12[%c64_114, %c128_115], %136 {strides = array<i32>} : memref<128x1152xbf16, #tpu.memory_space<vmem>>, vector<64x128xbf16>,
    %c105 = arith.constant 105 : index
    %c0_116 = arith.constant 0 : index
    %138 = vector.load %arg10[%c105, %c0_116] : memref<192x128xbf16, #tpu.memory_space<vmem>>, vector<64x128xbf16>
    %c7_i32_117 = arith.constant 7 : i32
    %139 = vector.broadcast %c7_i32_117 : i32 to vector<64x1xi32>
    %140 = arith.cmpi sge, %1, %139 : vector<64x1xi32>
    %cst_118 = arith.constant 0.000000e+00 : bf16
    %141 = vector.shape_cast %140 : vector<64x1xi1> to vector<64x1xi1>
    %142 = vector.broadcast %141 : vector<64x1xi1> to vector<64x128xi1>
    %143 = vector.broadcast %cst_118 : bf16 to vector<64x128xbf16>
    %144 = arith.select %142, %143, %138 : vector<64x128xi1>, vector<64x128xbf16>
    %c64_119 = arith.constant 64 : index
    %c256_120 = arith.constant 256 : index
    %145 = vector.load %arg12[%c64_119, %c256_120] : memref<128x1152xbf16, #tpu.memory_space<vmem>>, vector<64x128xbf16>
    tpu.vector_store %arg12[%c64_119, %c256_120], %144 {strides = array<i32>} : memref<128x1152xbf16, #tpu.memory_space<vmem>>, vector<64x128xbf16>,
    %c111_121 = arith.constant 111 : index
    %c0_122 = arith.constant 0 : index
    %146 = vector.load %arg10[%c111_121, %c0_122] : memref<192x128xbf16, #tpu.memory_space<vmem>>, vector<64x128xbf16>
    %c1_i32_123 = arith.constant 1 : i32
    %147 = vector.broadcast %c1_i32_123 : i32 to vector<64x1xi32>
    %148 = arith.cmpi slt, %1, %147 : vector<64x1xi32>
    %cst_124 = arith.constant 0.000000e+00 : bf16
    %149 = vector.shape_cast %148 : vector<64x1xi1> to vector<64x1xi1>
    %150 = vector.broadcast %149 : vector<64x1xi1> to vector<64x128xi1>
    %151 = vector.broadcast %cst_124 : bf16 to vector<64x128xbf16>
    %152 = arith.select %150, %151, %146 : vector<64x128xi1>, vector<64x128xbf16>
    %c64_125 = arith.constant 64 : index
    %c384_126 = arith.constant 384 : index
    %153 = vector.load %arg12[%c64_125, %c384_126] : memref<128x1152xbf16, #tpu.memory_space<vmem>>, vector<64x128xbf16>
    tpu.vector_store %arg12[%c64_125, %c384_126], %152 {strides = array<i32>} : memref<128x1152xbf16, #tpu.memory_space<vmem>>, vector<64x128xbf16>,
    %c112_127 = arith.constant 112 : index
    %c0_128 = arith.constant 0 : index
    %154 = vector.load %arg10[%c112_127, %c0_128] : memref<192x128xbf16, #tpu.memory_space<vmem>>, vector<64x128xbf16>
    %c64_129 = arith.constant 64 : index
    %c512_130 = arith.constant 512 : index
    %155 = vector.load %arg12[%c64_129, %c512_130] : memref<128x1152xbf16, #tpu.memory_space<vmem>>, vector<64x128xbf16>
    tpu.vector_store %arg12[%c64_129, %c512_130], %154 {strides = array<i32>} : memref<128x1152xbf16, #tpu.memory_space<vmem>>, vector<64x128xbf16>,
    %c113 = arith.constant 113 : index
    %c0_131 = arith.constant 0 : index
    %156 = vector.load %arg10[%c113, %c0_131] : memref<192x128xbf16, #tpu.memory_space<vmem>>, vector<64x128xbf16>
    %c7_i32_132 = arith.constant 7 : i32
    %157 = vector.broadcast %c7_i32_132 : i32 to vector<64x1xi32>
    %158 = arith.cmpi sge, %1, %157 : vector<64x1xi32>
    %cst_133 = arith.constant 0.000000e+00 : bf16
    %159 = vector.shape_cast %158 : vector<64x1xi1> to vector<64x1xi1>
    %160 = vector.broadcast %159 : vector<64x1xi1> to vector<64x128xi1>
    %161 = vector.broadcast %cst_133 : bf16 to vector<64x128xbf16>
    %162 = arith.select %160, %161, %156 : vector<64x128xi1>, vector<64x128xbf16>
    %c64_134 = arith.constant 64 : index
    %c640_135 = arith.constant 640 : index
    %163 = vector.load %arg12[%c64_134, %c640_135] : memref<128x1152xbf16, #tpu.memory_space<vmem>>, vector<64x128xbf16>
    tpu.vector_store %arg12[%c64_134, %c640_135], %162 {strides = array<i32>} : memref<128x1152xbf16, #tpu.memory_space<vmem>>, vector<64x128xbf16>,
    %c119 = arith.constant 119 : index
    %c0_136 = arith.constant 0 : index
    %164 = vector.load %arg10[%c119, %c0_136] : memref<192x128xbf16, #tpu.memory_space<vmem>>, vector<64x128xbf16>
    %c1_i32_137 = arith.constant 1 : i32
    %165 = vector.broadcast %c1_i32_137 : i32 to vector<64x1xi32>
    %166 = arith.cmpi slt, %1, %165 : vector<64x1xi32>
    %cst_138 = arith.constant 0.000000e+00 : bf16
    %167 = vector.shape_cast %166 : vector<64x1xi1> to vector<64x1xi1>
    %168 = vector.broadcast %167 : vector<64x1xi1> to vector<64x128xi1>
    %169 = vector.broadcast %cst_138 : bf16 to vector<64x128xbf16>
    %170 = arith.select %168, %169, %164 : vector<64x128xi1>, vector<64x128xbf16>
    %c64_139 = arith.constant 64 : index
    %c768_140 = arith.constant 768 : index
    %171 = vector.load %arg12[%c64_139, %c768_140] : memref<128x1152xbf16, #tpu.memory_space<vmem>>, vector<64x128xbf16>
    tpu.vector_store %arg12[%c64_139, %c768_140], %170 {strides = array<i32>} : memref<128x1152xbf16, #tpu.memory_space<vmem>>, vector<64x128xbf16>,
    %c120 = arith.constant 120 : index
    %c0_141 = arith.constant 0 : index
    %172 = vector.load %arg10[%c120, %c0_141] : memref<192x128xbf16, #tpu.memory_space<vmem>>, vector<64x128xbf16>
    %c64_142 = arith.constant 64 : index
    %c896_143 = arith.constant 896 : index
    %173 = vector.load %arg12[%c64_142, %c896_143] : memref<128x1152xbf16, #tpu.memory_space<vmem>>, vector<64x128xbf16>
    tpu.vector_store %arg12[%c64_142, %c896_143], %172 {strides = array<i32>} : memref<128x1152xbf16, #tpu.memory_space<vmem>>, vector<64x128xbf16>,
    %c121 = arith.constant 121 : index
    %c0_144 = arith.constant 0 : index
    %174 = vector.load %arg10[%c121, %c0_144] : memref<192x128xbf16, #tpu.memory_space<vmem>>, vector<64x128xbf16>
    %c7_i32_145 = arith.constant 7 : i32
    %175 = vector.broadcast %c7_i32_145 : i32 to vector<64x1xi32>
    %176 = arith.cmpi sge, %1, %175 : vector<64x1xi32>
    %cst_146 = arith.constant 0.000000e+00 : bf16
    %177 = vector.shape_cast %176 : vector<64x1xi1> to vector<64x1xi1>
    %178 = vector.broadcast %177 : vector<64x1xi1> to vector<64x128xi1>
    %179 = vector.broadcast %cst_146 : bf16 to vector<64x128xbf16>
    %180 = arith.select %178, %179, %174 : vector<64x128xi1>, vector<64x128xbf16>
    %c64_147 = arith.constant 64 : index
    %c1024_148 = arith.constant 1024 : index
    %181 = vector.load %arg12[%c64_147, %c1024_148] : memref<128x1152xbf16, #tpu.memory_space<vmem>>, vector<64x128xbf16>
    tpu.vector_store %arg12[%c64_147, %c1024_148], %180 {strides = array<i32>} : memref<128x1152xbf16, #tpu.memory_space<vmem>>, vector<64x128xbf16>,
    %c0_149 = arith.constant 0 : index
    %c0_150 = arith.constant 0 : index
    %182 = vector.load %arg12[%c0_149, %c0_150] : memref<128x1152xbf16, #tpu.memory_space<vmem>>, vector<128x1152xbf16>
    %c0_151 = arith.constant 0 : index
    %c0_152 = arith.constant 0 : index
    %183 = vector.load %arg3[%c0_151, %c0_152] : memref<1152x128xbf16, #tpu.memory_space<vmem>>, vector<1152x128xbf16>
    %cst_153 = arith.constant dense<0.000000e+00> : vector<128x128xf32>
    %184 = tpu.matmul %182, %183, %cst_153 {dimension_numbers = #tpu.dot_dimension_numbers<[1], [0], [0], [1], [0, 0, 1, 1], [], []>} : vector<128x1152xbf16>, vector<1152x128xbf16>, vector<128x128xf32> -> vector<128x128xf32>
    %c0_154 = arith.constant 0 : index
    %c0_155 = arith.constant 0 : index
    %185 = vector.load %arg6[%c0_154, %c0_155] : memref<1x128xf32, #tpu.memory_space<vmem>>, vector<1x128xf32>
    %186 = vector.broadcast %185 : vector<1x128xf32> to vector<128x128xf32>
    %187 = arith.addf %184, %186 : vector<128x128xf32>
    %cst_156 = arith.constant 0.000000e+00 : f32
    %188 = vector.broadcast %cst_156 : f32 to vector<128x128xf32>
    %189 = arith.maximumf %187, %188 : vector<128x128xf32>
    %190 = arith.truncf %189 : vector<128x128xf32> to vector<128x128xbf16>
    %191 = vector.extract_strided_slice %190 {offsets = [0, 0], sizes = [64, 128], strides = [1, 1]} : vector<128x128xbf16> to vector<64x128xbf16>
    %c16_157 = arith.constant 16 : index
    %c0_158 = arith.constant 0 : index
    %192 = vector.load %arg11[%c16_157, %c0_158] : memref<192x128xbf16, #tpu.memory_space<vmem>>, vector<64x128xbf16>
    tpu.vector_store %arg11[%c16_157, %c0_158], %191 {strides = array<i32>} : memref<192x128xbf16, #tpu.memory_space<vmem>>, vector<64x128xbf16>,
    %193 = vector.extract_strided_slice %190 {offsets = [64, 0], sizes = [64, 128], strides = [1, 1]} : vector<128x128xbf16> to vector<64x128xbf16>
    %c112_159 = arith.constant 112 : index
    %c0_160 = arith.constant 0 : index
    %194 = vector.load %arg11[%c112_159, %c0_160] : memref<192x128xbf16, #tpu.memory_space<vmem>>, vector<64x128xbf16>
    tpu.vector_store %arg11[%c112_159, %c0_160], %193 {strides = array<i32>} : memref<192x128xbf16, #tpu.memory_space<vmem>>, vector<64x128xbf16>,
    %c7_161 = arith.constant 7 : index
    %c0_162 = arith.constant 0 : index
    %195 = vector.load %arg11[%c7_161, %c0_162] : memref<192x128xbf16, #tpu.memory_space<vmem>>, vector<64x128xbf16>
    %c1_i32_163 = arith.constant 1 : i32
    %196 = vector.broadcast %c1_i32_163 : i32 to vector<64x1xi32>
    %197 = arith.cmpi slt, %1, %196 : vector<64x1xi32>
    %cst_164 = arith.constant 0.000000e+00 : bf16
    %198 = vector.shape_cast %197 : vector<64x1xi1> to vector<64x1xi1>
    %199 = vector.broadcast %198 : vector<64x1xi1> to vector<64x128xi1>
    %200 = vector.broadcast %cst_164 : bf16 to vector<64x128xbf16>
    %201 = arith.select %199, %200, %195 : vector<64x128xi1>, vector<64x128xbf16>
    %c0_165 = arith.constant 0 : index
    %c0_166 = arith.constant 0 : index
    %202 = vector.load %arg12[%c0_165, %c0_166] : memref<128x1152xbf16, #tpu.memory_space<vmem>>, vector<64x128xbf16>
    tpu.vector_store %arg12[%c0_165, %c0_166], %201 {strides = array<i32>} : memref<128x1152xbf16, #tpu.memory_space<vmem>>, vector<64x128xbf16>,
    %c8_167 = arith.constant 8 : index
    %c0_168 = arith.constant 0 : index
    %203 = vector.load %arg11[%c8_167, %c0_168] : memref<192x128xbf16, #tpu.memory_space<vmem>>, vector<64x128xbf16>
    %c0_169 = arith.constant 0 : index
    %c128_170 = arith.constant 128 : index
    %204 = vector.load %arg12[%c0_169, %c128_170] : memref<128x1152xbf16, #tpu.memory_space<vmem>>, vector<64x128xbf16>
    tpu.vector_store %arg12[%c0_169, %c128_170], %203 {strides = array<i32>} : memref<128x1152xbf16, #tpu.memory_space<vmem>>, vector<64x128xbf16>,
    %c9_171 = arith.constant 9 : index
    %c0_172 = arith.constant 0 : index
    %205 = vector.load %arg11[%c9_171, %c0_172] : memref<192x128xbf16, #tpu.memory_space<vmem>>, vector<64x128xbf16>
    %c7_i32_173 = arith.constant 7 : i32
    %206 = vector.broadcast %c7_i32_173 : i32 to vector<64x1xi32>
    %207 = arith.cmpi sge, %1, %206 : vector<64x1xi32>
    %cst_174 = arith.constant 0.000000e+00 : bf16
    %208 = vector.shape_cast %207 : vector<64x1xi1> to vector<64x1xi1>
    %209 = vector.broadcast %208 : vector<64x1xi1> to vector<64x128xi1>
    %210 = vector.broadcast %cst_174 : bf16 to vector<64x128xbf16>
    %211 = arith.select %209, %210, %205 : vector<64x128xi1>, vector<64x128xbf16>
    %c0_175 = arith.constant 0 : index
    %c256_176 = arith.constant 256 : index
    %212 = vector.load %arg12[%c0_175, %c256_176] : memref<128x1152xbf16, #tpu.memory_space<vmem>>, vector<64x128xbf16>
    tpu.vector_store %arg12[%c0_175, %c256_176], %211 {strides = array<i32>} : memref<128x1152xbf16, #tpu.memory_space<vmem>>, vector<64x128xbf16>,
    %c15_177 = arith.constant 15 : index
    %c0_178 = arith.constant 0 : index
    %213 = vector.load %arg11[%c15_177, %c0_178] : memref<192x128xbf16, #tpu.memory_space<vmem>>, vector<64x128xbf16>
    %c1_i32_179 = arith.constant 1 : i32
    %214 = vector.broadcast %c1_i32_179 : i32 to vector<64x1xi32>
    %215 = arith.cmpi slt, %1, %214 : vector<64x1xi32>
    %cst_180 = arith.constant 0.000000e+00 : bf16
    %216 = vector.shape_cast %215 : vector<64x1xi1> to vector<64x1xi1>
    %217 = vector.broadcast %216 : vector<64x1xi1> to vector<64x128xi1>
    %218 = vector.broadcast %cst_180 : bf16 to vector<64x128xbf16>
    %219 = arith.select %217, %218, %213 : vector<64x128xi1>, vector<64x128xbf16>
    %c0_181 = arith.constant 0 : index
    %c384_182 = arith.constant 384 : index
    %220 = vector.load %arg12[%c0_181, %c384_182] : memref<128x1152xbf16, #tpu.memory_space<vmem>>, vector<64x128xbf16>
    tpu.vector_store %arg12[%c0_181, %c384_182], %219 {strides = array<i32>} : memref<128x1152xbf16, #tpu.memory_space<vmem>>, vector<64x128xbf16>,
    %c16_183 = arith.constant 16 : index
    %c0_184 = arith.constant 0 : index
    %221 = vector.load %arg11[%c16_183, %c0_184] : memref<192x128xbf16, #tpu.memory_space<vmem>>, vector<64x128xbf16>
    %c0_185 = arith.constant 0 : index
    %c512_186 = arith.constant 512 : index
    %222 = vector.load %arg12[%c0_185, %c512_186] : memref<128x1152xbf16, #tpu.memory_space<vmem>>, vector<64x128xbf16>
    tpu.vector_store %arg12[%c0_185, %c512_186], %221 {strides = array<i32>} : memref<128x1152xbf16, #tpu.memory_space<vmem>>, vector<64x128xbf16>,
    %c17_187 = arith.constant 17 : index
    %c0_188 = arith.constant 0 : index
    %223 = vector.load %arg11[%c17_187, %c0_188] : memref<192x128xbf16, #tpu.memory_space<vmem>>, vector<64x128xbf16>
    %c7_i32_189 = arith.constant 7 : i32
    %224 = vector.broadcast %c7_i32_189 : i32 to vector<64x1xi32>
    %225 = arith.cmpi sge, %1, %224 : vector<64x1xi32>
    %cst_190 = arith.constant 0.000000e+00 : bf16
    %226 = vector.shape_cast %225 : vector<64x1xi1> to vector<64x1xi1>
    %227 = vector.broadcast %226 : vector<64x1xi1> to vector<64x128xi1>
    %228 = vector.broadcast %cst_190 : bf16 to vector<64x128xbf16>
    %229 = arith.select %227, %228, %223 : vector<64x128xi1>, vector<64x128xbf16>
    %c0_191 = arith.constant 0 : index
    %c640_192 = arith.constant 640 : index
    %230 = vector.load %arg12[%c0_191, %c640_192] : memref<128x1152xbf16, #tpu.memory_space<vmem>>, vector<64x128xbf16>
    tpu.vector_store %arg12[%c0_191, %c640_192], %229 {strides = array<i32>} : memref<128x1152xbf16, #tpu.memory_space<vmem>>, vector<64x128xbf16>,
    %c23_193 = arith.constant 23 : index
    %c0_194 = arith.constant 0 : index
    %231 = vector.load %arg11[%c23_193, %c0_194] : memref<192x128xbf16, #tpu.memory_space<vmem>>, vector<64x128xbf16>
    %c1_i32_195 = arith.constant 1 : i32
    %232 = vector.broadcast %c1_i32_195 : i32 to vector<64x1xi32>
    %233 = arith.cmpi slt, %1, %232 : vector<64x1xi32>
    %cst_196 = arith.constant 0.000000e+00 : bf16
    %234 = vector.shape_cast %233 : vector<64x1xi1> to vector<64x1xi1>
    %235 = vector.broadcast %234 : vector<64x1xi1> to vector<64x128xi1>
    %236 = vector.broadcast %cst_196 : bf16 to vector<64x128xbf16>
    %237 = arith.select %235, %236, %231 : vector<64x128xi1>, vector<64x128xbf16>
    %c0_197 = arith.constant 0 : index
    %c768_198 = arith.constant 768 : index
    %238 = vector.load %arg12[%c0_197, %c768_198] : memref<128x1152xbf16, #tpu.memory_space<vmem>>, vector<64x128xbf16>
    tpu.vector_store %arg12[%c0_197, %c768_198], %237 {strides = array<i32>} : memref<128x1152xbf16, #tpu.memory_space<vmem>>, vector<64x128xbf16>,
    %c24_199 = arith.constant 24 : index
    %c0_200 = arith.constant 0 : index
    %239 = vector.load %arg11[%c24_199, %c0_200] : memref<192x128xbf16, #tpu.memory_space<vmem>>, vector<64x128xbf16>
    %c0_201 = arith.constant 0 : index
    %c896_202 = arith.constant 896 : index
    %240 = vector.load %arg12[%c0_201, %c896_202] : memref<128x1152xbf16, #tpu.memory_space<vmem>>, vector<64x128xbf16>
    tpu.vector_store %arg12[%c0_201, %c896_202], %239 {strides = array<i32>} : memref<128x1152xbf16, #tpu.memory_space<vmem>>, vector<64x128xbf16>,
    %c25_203 = arith.constant 25 : index
    %c0_204 = arith.constant 0 : index
    %241 = vector.load %arg11[%c25_203, %c0_204] : memref<192x128xbf16, #tpu.memory_space<vmem>>, vector<64x128xbf16>
    %c7_i32_205 = arith.constant 7 : i32
    %242 = vector.broadcast %c7_i32_205 : i32 to vector<64x1xi32>
    %243 = arith.cmpi sge, %1, %242 : vector<64x1xi32>
    %cst_206 = arith.constant 0.000000e+00 : bf16
    %244 = vector.shape_cast %243 : vector<64x1xi1> to vector<64x1xi1>
    %245 = vector.broadcast %244 : vector<64x1xi1> to vector<64x128xi1>
    %246 = vector.broadcast %cst_206 : bf16 to vector<64x128xbf16>
    %247 = arith.select %245, %246, %241 : vector<64x128xi1>, vector<64x128xbf16>
    %c0_207 = arith.constant 0 : index
    %c1024_208 = arith.constant 1024 : index
    %248 = vector.load %arg12[%c0_207, %c1024_208] : memref<128x1152xbf16, #tpu.memory_space<vmem>>, vector<64x128xbf16>
    tpu.vector_store %arg12[%c0_207, %c1024_208], %247 {strides = array<i32>} : memref<128x1152xbf16, #tpu.memory_space<vmem>>, vector<64x128xbf16>,
    %c103_209 = arith.constant 103 : index
    %c0_210 = arith.constant 0 : index
    %249 = vector.load %arg11[%c103_209, %c0_210] : memref<192x128xbf16, #tpu.memory_space<vmem>>, vector<64x128xbf16>
    %c1_i32_211 = arith.constant 1 : i32
    %250 = vector.broadcast %c1_i32_211 : i32 to vector<64x1xi32>
    %251 = arith.cmpi slt, %1, %250 : vector<64x1xi32>
    %cst_212 = arith.constant 0.000000e+00 : bf16
    %252 = vector.shape_cast %251 : vector<64x1xi1> to vector<64x1xi1>
    %253 = vector.broadcast %252 : vector<64x1xi1> to vector<64x128xi1>
    %254 = vector.broadcast %cst_212 : bf16 to vector<64x128xbf16>
    %255 = arith.select %253, %254, %249 : vector<64x128xi1>, vector<64x128xbf16>
    %c64_213 = arith.constant 64 : index
    %c0_214 = arith.constant 0 : index
    %256 = vector.load %arg12[%c64_213, %c0_214] : memref<128x1152xbf16, #tpu.memory_space<vmem>>, vector<64x128xbf16>
    tpu.vector_store %arg12[%c64_213, %c0_214], %255 {strides = array<i32>} : memref<128x1152xbf16, #tpu.memory_space<vmem>>, vector<64x128xbf16>,
    %c104_215 = arith.constant 104 : index
    %c0_216 = arith.constant 0 : index
    %257 = vector.load %arg11[%c104_215, %c0_216] : memref<192x128xbf16, #tpu.memory_space<vmem>>, vector<64x128xbf16>
    %c64_217 = arith.constant 64 : index
    %c128_218 = arith.constant 128 : index
    %258 = vector.load %arg12[%c64_217, %c128_218] : memref<128x1152xbf16, #tpu.memory_space<vmem>>, vector<64x128xbf16>
    tpu.vector_store %arg12[%c64_217, %c128_218], %257 {strides = array<i32>} : memref<128x1152xbf16, #tpu.memory_space<vmem>>, vector<64x128xbf16>,
    %c105_219 = arith.constant 105 : index
    %c0_220 = arith.constant 0 : index
    %259 = vector.load %arg11[%c105_219, %c0_220] : memref<192x128xbf16, #tpu.memory_space<vmem>>, vector<64x128xbf16>
    %c7_i32_221 = arith.constant 7 : i32
    %260 = vector.broadcast %c7_i32_221 : i32 to vector<64x1xi32>
    %261 = arith.cmpi sge, %1, %260 : vector<64x1xi32>
    %cst_222 = arith.constant 0.000000e+00 : bf16
    %262 = vector.shape_cast %261 : vector<64x1xi1> to vector<64x1xi1>
    %263 = vector.broadcast %262 : vector<64x1xi1> to vector<64x128xi1>
    %264 = vector.broadcast %cst_222 : bf16 to vector<64x128xbf16>
    %265 = arith.select %263, %264, %259 : vector<64x128xi1>, vector<64x128xbf16>
    %c64_223 = arith.constant 64 : index
    %c256_224 = arith.constant 256 : index
    %266 = vector.load %arg12[%c64_223, %c256_224] : memref<128x1152xbf16, #tpu.memory_space<vmem>>, vector<64x128xbf16>
    tpu.vector_store %arg12[%c64_223, %c256_224], %265 {strides = array<i32>} : memref<128x1152xbf16, #tpu.memory_space<vmem>>, vector<64x128xbf16>,
    %c111_225 = arith.constant 111 : index
    %c0_226 = arith.constant 0 : index
    %267 = vector.load %arg11[%c111_225, %c0_226] : memref<192x128xbf16, #tpu.memory_space<vmem>>, vector<64x128xbf16>
    %c1_i32_227 = arith.constant 1 : i32
    %268 = vector.broadcast %c1_i32_227 : i32 to vector<64x1xi32>
    %269 = arith.cmpi slt, %1, %268 : vector<64x1xi32>
    %cst_228 = arith.constant 0.000000e+00 : bf16
    %270 = vector.shape_cast %269 : vector<64x1xi1> to vector<64x1xi1>
    %271 = vector.broadcast %270 : vector<64x1xi1> to vector<64x128xi1>
    %272 = vector.broadcast %cst_228 : bf16 to vector<64x128xbf16>
    %273 = arith.select %271, %272, %267 : vector<64x128xi1>, vector<64x128xbf16>
    %c64_229 = arith.constant 64 : index
    %c384_230 = arith.constant 384 : index
    %274 = vector.load %arg12[%c64_229, %c384_230] : memref<128x1152xbf16, #tpu.memory_space<vmem>>, vector<64x128xbf16>
    tpu.vector_store %arg12[%c64_229, %c384_230], %273 {strides = array<i32>} : memref<128x1152xbf16, #tpu.memory_space<vmem>>, vector<64x128xbf16>,
    %c112_231 = arith.constant 112 : index
    %c0_232 = arith.constant 0 : index
    %275 = vector.load %arg11[%c112_231, %c0_232] : memref<192x128xbf16, #tpu.memory_space<vmem>>, vector<64x128xbf16>
    %c64_233 = arith.constant 64 : index
    %c512_234 = arith.constant 512 : index
    %276 = vector.load %arg12[%c64_233, %c512_234] : memref<128x1152xbf16, #tpu.memory_space<vmem>>, vector<64x128xbf16>
    tpu.vector_store %arg12[%c64_233, %c512_234], %275 {strides = array<i32>} : memref<128x1152xbf16, #tpu.memory_space<vmem>>, vector<64x128xbf16>,
    %c113_235 = arith.constant 113 : index
    %c0_236 = arith.constant 0 : index
    %277 = vector.load %arg11[%c113_235, %c0_236] : memref<192x128xbf16, #tpu.memory_space<vmem>>, vector<64x128xbf16>
    %c7_i32_237 = arith.constant 7 : i32
    %278 = vector.broadcast %c7_i32_237 : i32 to vector<64x1xi32>
    %279 = arith.cmpi sge, %1, %278 : vector<64x1xi32>
    %cst_238 = arith.constant 0.000000e+00 : bf16
    %280 = vector.shape_cast %279 : vector<64x1xi1> to vector<64x1xi1>
    %281 = vector.broadcast %280 : vector<64x1xi1> to vector<64x128xi1>
    %282 = vector.broadcast %cst_238 : bf16 to vector<64x128xbf16>
    %283 = arith.select %281, %282, %277 : vector<64x128xi1>, vector<64x128xbf16>
    %c64_239 = arith.constant 64 : index
    %c640_240 = arith.constant 640 : index
    %284 = vector.load %arg12[%c64_239, %c640_240] : memref<128x1152xbf16, #tpu.memory_space<vmem>>, vector<64x128xbf16>
    tpu.vector_store %arg12[%c64_239, %c640_240], %283 {strides = array<i32>} : memref<128x1152xbf16, #tpu.memory_space<vmem>>, vector<64x128xbf16>,
    %c119_241 = arith.constant 119 : index
    %c0_242 = arith.constant 0 : index
    %285 = vector.load %arg11[%c119_241, %c0_242] : memref<192x128xbf16, #tpu.memory_space<vmem>>, vector<64x128xbf16>
    %c1_i32_243 = arith.constant 1 : i32
    %286 = vector.broadcast %c1_i32_243 : i32 to vector<64x1xi32>
    %287 = arith.cmpi slt, %1, %286 : vector<64x1xi32>
    %cst_244 = arith.constant 0.000000e+00 : bf16
    %288 = vector.shape_cast %287 : vector<64x1xi1> to vector<64x1xi1>
    %289 = vector.broadcast %288 : vector<64x1xi1> to vector<64x128xi1>
    %290 = vector.broadcast %cst_244 : bf16 to vector<64x128xbf16>
    %291 = arith.select %289, %290, %285 : vector<64x128xi1>, vector<64x128xbf16>
    %c64_245 = arith.constant 64 : index
    %c768_246 = arith.constant 768 : index
    %292 = vector.load %arg12[%c64_245, %c768_246] : memref<128x1152xbf16, #tpu.memory_space<vmem>>, vector<64x128xbf16>
    tpu.vector_store %arg12[%c64_245, %c768_246], %291 {strides = array<i32>} : memref<128x1152xbf16, #tpu.memory_space<vmem>>, vector<64x128xbf16>,
    %c120_247 = arith.constant 120 : index
    %c0_248 = arith.constant 0 : index
    %293 = vector.load %arg11[%c120_247, %c0_248] : memref<192x128xbf16, #tpu.memory_space<vmem>>, vector<64x128xbf16>
    %c64_249 = arith.constant 64 : index
    %c896_250 = arith.constant 896 : index
    %294 = vector.load %arg12[%c64_249, %c896_250] : memref<128x1152xbf16, #tpu.memory_space<vmem>>, vector<64x128xbf16>
    tpu.vector_store %arg12[%c64_249, %c896_250], %293 {strides = array<i32>} : memref<128x1152xbf16, #tpu.memory_space<vmem>>, vector<64x128xbf16>,
    %c121_251 = arith.constant 121 : index
    %c0_252 = arith.constant 0 : index
    %295 = vector.load %arg11[%c121_251, %c0_252] : memref<192x128xbf16, #tpu.memory_space<vmem>>, vector<64x128xbf16>
    %c7_i32_253 = arith.constant 7 : i32
    %296 = vector.broadcast %c7_i32_253 : i32 to vector<64x1xi32>
    %297 = arith.cmpi sge, %1, %296 : vector<64x1xi32>
    %cst_254 = arith.constant 0.000000e+00 : bf16
    %298 = vector.shape_cast %297 : vector<64x1xi1> to vector<64x1xi1>
    %299 = vector.broadcast %298 : vector<64x1xi1> to vector<64x128xi1>
    %300 = vector.broadcast %cst_254 : bf16 to vector<64x128xbf16>
    %301 = arith.select %299, %300, %295 : vector<64x128xi1>, vector<64x128xbf16>
    %c64_255 = arith.constant 64 : index
    %c1024_256 = arith.constant 1024 : index
    %302 = vector.load %arg12[%c64_255, %c1024_256] : memref<128x1152xbf16, #tpu.memory_space<vmem>>, vector<64x128xbf16>
    tpu.vector_store %arg12[%c64_255, %c1024_256], %301 {strides = array<i32>} : memref<128x1152xbf16, #tpu.memory_space<vmem>>, vector<64x128xbf16>,
    %c0_257 = arith.constant 0 : index
    %c0_258 = arith.constant 0 : index
    %303 = vector.load %arg12[%c0_257, %c0_258] : memref<128x1152xbf16, #tpu.memory_space<vmem>>, vector<128x1152xbf16>
    %c0_259 = arith.constant 0 : index
    %c0_260 = arith.constant 0 : index
    %304 = vector.load %arg4[%c0_259, %c0_260] : memref<1152x128xbf16, #tpu.memory_space<vmem>>, vector<1152x128xbf16>
    %cst_261 = arith.constant dense<0.000000e+00> : vector<128x128xf32>
    %305 = tpu.matmul %303, %304, %cst_261 {dimension_numbers = #tpu.dot_dimension_numbers<[1], [0], [0], [1], [0, 0, 1, 1], [], []>} : vector<128x1152xbf16>, vector<1152x128xbf16>, vector<128x128xf32> -> vector<128x128xf32>
    %c0_262 = arith.constant 0 : index
    %c0_263 = arith.constant 0 : index
    %306 = vector.load %arg7[%c0_262, %c0_263] : memref<1x128xf32, #tpu.memory_space<vmem>>, vector<1x128xf32>
    %307 = vector.broadcast %306 : vector<1x128xf32> to vector<128x128xf32>
    %308 = arith.addf %305, %307 : vector<128x128xf32>
    %cst_264 = arith.constant 0.000000e+00 : f32
    %309 = vector.broadcast %cst_264 : f32 to vector<128x128xf32>
    %310 = arith.maximumf %308, %309 : vector<128x128xf32>
    %311 = arith.truncf %310 : vector<128x128xf32> to vector<128x128xbf16>
    %312 = vector.extract_strided_slice %311 {offsets = [0, 0], sizes = [64, 128], strides = [1, 1]} : vector<128x128xbf16> to vector<64x128xbf16>
    %c0_265 = arith.constant 0 : index
    %c0_266 = arith.constant 0 : index
    %c0_267 = arith.constant 0 : index
    %313 = vector.load %arg8[%c0_265, %c0_266, %c0_267] : memref<2x64x128xbf16, #tpu.memory_space<vmem>>, vector<1x64x128xbf16>
    %314 = vector.shape_cast %313 : vector<1x64x128xbf16> to vector<64x128xbf16>
    %315 = vector.shape_cast %312 : vector<64x128xbf16> to vector<1x64x128xbf16>
    tpu.vector_store %arg8[%c0_265, %c0_266, %c0_267], %315 {strides = array<i32>} : memref<2x64x128xbf16, #tpu.memory_space<vmem>>, vector<1x64x128xbf16>,
    %316 = vector.extract_strided_slice %311 {offsets = [64, 0], sizes = [64, 128], strides = [1, 1]} : vector<128x128xbf16> to vector<64x128xbf16>
    %c1_268 = arith.constant 1 : index
    %c0_269 = arith.constant 0 : index
    %c0_270 = arith.constant 0 : index
    %317 = vector.load %arg8[%c1_268, %c0_269, %c0_270] : memref<2x64x128xbf16, #tpu.memory_space<vmem>>, vector<1x64x128xbf16>
    %318 = vector.shape_cast %317 : vector<1x64x128xbf16> to vector<64x128xbf16>
    %319 = vector.shape_cast %316 : vector<64x128xbf16> to vector<1x64x128xbf16>
    tpu.vector_store %arg8[%c1_268, %c0_269, %c0_270], %319 {strides = array<i32>} : memref<2x64x128xbf16, #tpu.memory_space<vmem>>, vector<1x64x128xbf16>,
    return
  }
  func.func @transform_0(%arg0: i32) -> (i32, i32, i32) {
    %c0_i32 = arith.constant 0 : i32
    %c0_i32_0 = arith.constant 0 : i32
    %c0_i32_1 = arith.constant 0 : i32
    return %arg0, %c0_i32, %c0_i32_0 : i32, i32, i32
  }
  func.func @transform_1(%arg0: i32) -> (i32, i32) {
    %c0_i32 = arith.constant 0 : i32
    %c0_i32_0 = arith.constant 0 : i32
    %c0_i32_1 = arith.constant 0 : i32
    return %c0_i32, %c0_i32_0 : i32, i32
  }
  func.func @transform_2(%arg0: i32) -> (i32, i32) {
    %c0_i32 = arith.constant 0 : i32
    %c0_i32_0 = arith.constant 0 : i32
    %c0_i32_1 = arith.constant 0 : i32
    return %c0_i32, %c0_i32_0 : i32, i32
  }
  func.func @transform_3(%arg0: i32) -> (i32, i32) {
    %c0_i32 = arith.constant 0 : i32
    %c0_i32_0 = arith.constant 0 : i32
    %c0_i32_1 = arith.constant 0 : i32
    return %c0_i32, %c0_i32_0 : i32, i32
  }
  func.func @transform_4(%arg0: i32) -> (i32, i32) {
    %c0_i32 = arith.constant 0 : i32
    %c0_i32_0 = arith.constant 0 : i32
    %c0_i32_1 = arith.constant 0 : i32
    return %c0_i32, %c0_i32_0 : i32, i32
  }
  func.func @transform_5(%arg0: i32) -> (i32, i32) {
    %c0_i32 = arith.constant 0 : i32
    %c0_i32_0 = arith.constant 0 : i32
    %c0_i32_1 = arith.constant 0 : i32
    return %c0_i32, %c0_i32_0 : i32, i32
  }
  func.func @transform_6(%arg0: i32) -> (i32, i32) {
    %c0_i32 = arith.constant 0 : i32
    %c0_i32_0 = arith.constant 0 : i32
    %c0_i32_1 = arith.constant 0 : i32
    return %c0_i32, %c0_i32_0 : i32, i32
  }
  func.func @transform_7(%arg0: i32) -> (i32, i32, i32) {
    %c0_i32 = arith.constant 0 : i32
    %c0_i32_0 = arith.constant 0 : i32
    %c0_i32_1 = arith.constant 0 : i32
    return %arg0, %c0_i32, %c0_i32_0 : i32, i32, i32
  }
}

</mosaic_0001>

<bundles_post_ra>
// kernel: convdown_forward.1
= control target key start
LH: loop header
LB: loop body
LE: loop exit
PB: predicated region body
PF: predicated region fallthrough
CT: control target
= control target key end

     0   :  { %v9293_v1 = vmov 0   ;;  %v29_v24 = vlaneseq  ;;  %vm102_vm2 = vsmask.f32 3328  ;;  %vm103_vm3 = vsmask.f32 7440  ;;  %s13166_s1 = inlined_call_operand.vmem [shape: bf16[512,128], index: 1, kind: input, shape index: {}]   ;;  %s13167_s0 = inlined_call_operand.vmem [shape: bf16[2,64,128], index: 0, kind: input, shape index: {}]   ;;  %s13168_s2 = inlined_call_operand.vmem [shape: bf16[1152,128], index: 2, kind: input, shape index: {}]   ;;  %s13169_s4 = inlined_call_operand.vmem [shape: f32[1,128], index: 4, kind: input, shape index: {}]   ;;  %s13170_s5 = inlined_call_operand.vmem [shape: f32[1,128], index: 5, kind: input, shape index: {}]   ;;  %s13171_s3 = inlined_call_operand.vmem [shape: bf16[1152,128], index: 3, kind: input, shape index: {}]   ;;  %s13172_s6 = inlined_call_operand.vmem [shape: f32[1,128], index: 6, kind: input, shape index: {}]   ;;  %s13173_s7 = inlined_call_operand.vmem [shape: bf16[2,64,128], index: 7, kind: output, shape index: {}]  }
   0x1   :  { %v8882_v0 = vld [vmem:[%s13166_s1 + $0x78] sm:$0xff]   ;;  %31 = vst [vmem:[#allocation2] sm:$0xf] %v9293_v1  ;;  %32 = vst [vmem:[#allocation2 + $0x4] sm:$0xf] %v9293_v1  ;;  %v8886_v5 = vld [vmem:[%s13166_s1 + $0x70] sm:$0xff]  }
   0x2   :  { %35 = vst [vmem:[#allocation2 + $0x30] sm:$0xf] %v9293_v1  ;;  %36 = vst [vmem:[#allocation2 + $0x34] sm:$0xf] %v9293_v1  ;;  %v8883_v2 = vld [vmem:[%s13166_s1 + $0xf8] sm:$0xff]   ;;  %8145 = vmatprep.subr.bf16.mxu0 %v8882_v0  ;;  %v8887_v6 = vld [vmem:[%s13166_s1 + $0xf0] sm:$0xff]  }
   0x3   :  { %39 = vst [vmem:[#allocation3] sm:$0xf] %v9293_v1  ;;  %40 = vst [vmem:[#allocation3 + $0x4] sm:$0xf] %v9293_v1  ;;  %v8884_v3 = vld [vmem:[%s13166_s1 + $0x38] sm:$0xff]   ;;  %8209 = vmatprep.subr.bf16.mxu1 %v8883_v2  ;;  %v8888_v7 = vld [vmem:[%s13166_s1 + $0x30] sm:$0xff]  }
   0x4   :  { %41 = vst [vmem:[#allocation3 + $0x28] sm:$0xf] %v9293_v1  ;;  %42 = vst [vmem:[#allocation3 + $0x2c] sm:$0xf] %v9293_v1  ;;  %v8885_v4 = vld [vmem:[%s13166_s1 + $0xb8] sm:$0xff]   ;;  %8146 = vmatpush3.bf16.msra.mxu0 %v8884_v3  ;;  %v8889_v8 = vld [vmem:[%s13166_s1 + $0xb0] sm:$0xff]  }
   0x5   :  { %43 = vst [vmem:[#allocation3 + $0x30] sm:$0xf] %v9293_v1  ;;  %44 = vst [vmem:[#allocation3 + $0x34] sm:$0xf] %v9293_v1  ;;  %8210 = vmatpush3.bf16.msra.mxu1 %v8885_v4  ;;  %8147 = vmatprep.subr.bf16.mxu0 %v8886_v5  ;;  %v8890_v9 = vld [vmem:[%s13166_s1 + $0x68] sm:$0xff]   ;;  %v8894_v13 = vld [vmem:[%s13166_s1 + $0x60] sm:$0xff]  }
   0x6   :  { %45 = vst [vmem:[#allocation3 + $0x58] sm:$0xf] %v9293_v1  ;;  %46 = vst [vmem:[#allocation3 + $0x5c] sm:$0xf] %v9293_v1  ;;  %8211 = vmatprep.subr.bf16.mxu1 %v8887_v6  ;;  %v8891_v10 = vld [vmem:[%s13166_s1 + $0xe8] sm:$0xff]   ;;  %v8895_v14 = vld [vmem:[%s13166_s1 + $0xe0] sm:$0xff]  }
   0x7   :  { %47 = vst [vmem:[#allocation4] sm:$0xf] %v9293_v1  ;;  %48 = vst [vmem:[#allocation4 + $0x4] sm:$0xf] %v9293_v1  ;;  %v8892_v11 = vld [vmem:[%s13166_s1 + $0x28] sm:$0xff]   ;;  %v8896_v15 = vld [vmem:[%s13166_s1 + $0x20] sm:$0xff]  }
   0x8   :  { %49 = vst [vmem:[#allocation4 + $0x28] sm:$0xf] %v9293_v1  ;;  %50 = vst [vmem:[#allocation4 + $0x2c] sm:$0xf] %v9293_v1  ;;  %8148 = vmatpush3.bf16.msra.mxu0 %v8888_v7  ;;  %v8893_v12 = vld [vmem:[%s13166_s1 + $0xa8] sm:$0xff]   ;;  %v8897_v16 = vld [vmem:[%s13166_s1 + $0xa0] sm:$0xff]  }
   0x9   :  { %51 = vst [vmem:[#allocation4 + $0x30] sm:$0xf] %v9293_v1  ;;  %52 = vst [vmem:[#allocation4 + $0x34] sm:$0xf] %v9293_v1  ;;  %8212 = vmatpush3.bf16.msra.mxu1 %v8889_v8  ;;  %8149 = vmatprep.subr.bf16.mxu0 %v8890_v9  ;;  %v8898_v17 = vld [vmem:[%s13166_s1 + $0x58] sm:$0xff]   ;;  %v8902_v21 = vld [vmem:[%s13166_s1 + $0x50] sm:$0xff]  }
   0xa   :  { %53 = vst [vmem:[#allocation4 + $0x58] sm:$0xf] %v9293_v1  ;;  %54 = vst [vmem:[#allocation4 + $0x5c] sm:$0xf] %v9293_v1  ;;  %8213 = vmatprep.subr.bf16.mxu1 %v8891_v10  ;;  %v8899_v18 = vld [vmem:[%s13166_s1 + $0xd8] sm:$0xff]   ;;  %v8903_v22 = vld [vmem:[%s13166_s1 + $0xd0] sm:$0xff]  }
   0xb   :  { %v8900_v19 = vld [vmem:[%s13166_s1 + $0x18] sm:$0xff]   ;;  %v8904_v23 = vld [vmem:[%s13166_s1 + $0x10] sm:$0xff]   ;;  %v8906_v26 = vld [vmem:[%s13166_s1 + $0x48] sm:$0xff]   ;;  %v9435_v29 = vshrl.u32 %v29_v24, 7  ;;  %vm127_vm4 = vsmask.f32 256 }
   0xc   :  { %8150 = vmatpush3.bf16.msra.mxu0 %v8892_v11  ;;  %v8901_v20 = vld [vmem:[%s13166_s1 + $0x98] sm:$0xff]   ;;  %v8905_v25 = vld [vmem:[%s13166_s1 + $0x90] sm:$0xff]   ;;  %v8907_v27 = vld [vmem:[%s13166_s1 + $0xc8] sm:$0xff]   ;;  %v13332_v57 = vmov 0  ;;  %vm128_vm7 = vsmask.f32 4368 }
   0xd   :  { %8214 = vmatpush3.bf16.msra.mxu1 %v8893_v12  ;;  %8151 = vmatprep.subr.bf16.mxu0 %v8894_v13  ;;  %v8908_v28 = vld [vmem:[%s13166_s1 + $0x8] sm:$0xff]   ;;  %v8910_v31 = vld [vmem:[%s13166_s1 + $0x40] sm:$0xff]   ;;  %vm97_vm0 = vcmp.lt.s32.totalorder %v9435_v29, 1  ;;  %v59_v41 = vld [vmem:[%s13167_s0 + $0x10] sm:$0xff]   ;;  %v13336_v9 = vmov 0  ;;  %vm1480_vm11 = vcmp.ge.s32.totalorder %v9435_v29, 7 }
   0xe   :  { %8215 = vmatprep.subr.bf16.mxu1 %v8895_v14  ;;  %v8909_v30 = vld [vmem:[%s13166_s1 + $0x88] sm:$0xff]   ;;  %v8911_v32 = vld [vmem:[%s13166_s1 + $0xc0] sm:$0xff]   ;;  %vm100_vm1 = vmpackc.low %vm97_vm0, %vm97_vm0  ;;  %67 = vst [vmem:[#allocation2 + $0x18] sm:$0xff] %v59_v41  }
   0xf   :  { %v8912_v33 = vld [vmem:[%s13166_s1] sm:$0xff]   ;;  %v101_v37 = vsel %vm100_vm1, 65537, %v9293_v1  ;;  %v57_v38 = vld [vmem:[%s13167_s0 + $0x8] sm:$0xff]   ;;  %v61_v42 = vld [vmem:[%s13167_s0 + $0x18] sm:$0xff]  }
  0x10   :  { %8152 = vmatpush3.bf16.msra.mxu0 %v8896_v15  ;;  %v8913_v34 = vld [vmem:[%s13166_s1 + $0x80] sm:$0xff]   ;;  %v106_v39 = vshll.u32 %v101_v37, 16  ;;  %v109_v40 = vshrl.u32 %v101_v37, 16  ;;  %65 = vst [vmem:[#allocation2 + $0x10] sm:$0xff] %v57_v38   ;;  %69 = vst [vmem:[#allocation2 + $0x20] sm:$0xff] %v61_v42   ;;  %v7521_v50 = vld [vmem:[%s13167_s0 + $0x28] sm:$0xff]  }
  0x11   :  { %8216 = vmatpush3.bf16.msra.mxu1 %v8897_v16  ;;  %8153 = vmatprep.subr.bf16.mxu0 %v8898_v17  ;;  %v55_v35 = vld [vmem:[%s13167_s0] sm:$0xff]   ;;  %v474_v48 = vld [vmem:[#allocation2 + $0x34] sm:$0xf]  ;;  %v364_v49 = vld [vmem:[#allocation2 + $0x30] sm:$0x8]  ;;  %82 = vst [vmem:[#allocation2 + $0x40] sm:$0xff] %v7521_v50  }
  0x12   :  { %8217 = vmatprep.subr.bf16.mxu1 %v8899_v18  ;;  %63 = vst [vmem:[#allocation2 + $0x8] sm:$0xff] %v55_v35   ;;  %v222_v36 = vld [vmem:[#allocation2 + $0x4] sm:$0xf]  ;;  %v88_v43 = vld [vmem:[#allocation2] sm:$0x8]  ;;  %v9469_v45 = vrot.slane %v106_v39, 5  ;;  %vm9487_vm6 = vmor %vm102_vm2, %vm103_vm3 }
  0x13   :  { %230 = vst [vmem:[#allocation5 + $0x4] sm:$0xf] %v222_v36  ;;  %v7519_v44 = vld [vmem:[%s13167_s0 + $0x20] sm:$0xff]   ;;  %v111_v46 = vrot.slane %v109_v40, 4  ;;  %482 = vst [vmem:[#allocation5 + $0x124] sm:$0xf] %v474_v48 }
  0x14   :  { %8154 = vmatpush3.bf16.msra.mxu0 %v8900_v19  ;;  %13331 = vst [vmem:[#allocation6_spill] sm:$0xff] %v9469_v45  ;;  %v238_v47 = vld [vmem:[#allocation2 + $0x4] sm:$0x8]  ;;  %80 = vst [vmem:[#allocation2 + $0x38] sm:$0xff] %v7519_v44   ;;  %v7523_v51 = vld [vmem:[%s13167_s0 + $0x30] sm:$0xff]   ;;  %vm115_vm5 = vcmp.ne.s16.totalorder %v9469_v45, 0 }
  0x15   :  { %8218 = vmatpush3.bf16.msra.mxu1 %v8901_v20  ;;  %8155 = vmatprep.subr.bf16.mxu0 %v8902_v21  ;;  %v7525_v52 = vld [vmem:[%s13167_s0 + $0x38] sm:$0xff]   ;;  %v112_v53 = vor.u32 %v111_v46, %v9469_v45  ;;  %84 = vst [vmem:[#allocation2 + $0x48] sm:$0xff] %v7523_v51   ;;  %v89_v55 = vld [vmem:[#allocation2 + $0x4] sm:$0xf]  ;;  %v13333_v57 = vsel %vm9487_vm6, 4294967295, %v13332_v57  ;;  %v118_v58 = vsel %vm115_vm5, 0, %v88_v43  ;;  %vm9523_vm9 = vmor %vm127_vm4, %vm128_vm7 }
  0x16   :  { %8219 = vmatprep.subr.bf16.mxu1 %v8903_v22  ;;  %86 = vst [vmem:[#allocation2 + $0x50] sm:$0xff] %v7525_v52   ;;  %v8954_v54 = vld [vmem:[%s13168_s2 + $0x78] sm:$0xff]   ;;  %13334 = vst [vmem:[#allocation7_spill] sm:$0xff] %v13333_v57  ;;  %v247_v60 = vsel %vm115_vm5, 0, %v238_v47  ;;  %v131_v62 = vshrl.u32 %v118_v58, 16  ;;  %v9503_v8 = vsel %vm115_vm5, 0, %v364_v49 }
  0x17   :  { %v9495_v61 = vrot.slane %v112_v53, 4  ;;  %v257_v2 = vshrl.u32 %v247_v60, 16  ;;  %v225_v12 = vld [vmem:[#allocation2 + $0x10] sm:$0xf]  ;;  %v226_v43 = vld [vmem:[#allocation2 + $0x14] sm:$0xf]  ;;  %vm1483_vm12 = vmpackc.low %vm1480_vm11, %vm1480_vm11 }
  0x18   :  { %8156 = vmatpush3.bf16.msra.mxu0 %v8904_v23  ;;  %v7527_v6 = vrot.slane %v131_v62, 11  ;;  %v92_v17 = vld [vmem:[#allocation2 + $0x10] sm:$0xf]  ;;  %233 = vst [vmem:[#allocation5 + $0x70] sm:$0xf] %v225_v12 }
  0x19   :  { %8220 = vmatpush3.bf16.msra.mxu1 %v8905_v25  ;;  %8157 = vmatprep.subr.bf16.mxu0 %v8906_v26  ;;  %v90_v56 = vld [vmem:[#allocation2 + $0x8] sm:$0xf]  ;;  %13335 = vst [vmem:[#allocation8_spill] sm:$0xff] %v9495_v61  ;;  %v240_v0 = vld [vmem:[#allocation2 + $0xc] sm:$0xf]  ;;  %v114_v5 = vsel %vm9487_vm6, %v9495_v61, %v9469_v45  ;;  %v7528_v10 = vrot.slane %v257_v2, 11 }
  0x1a   :  { %8221 = vmatprep.subr.bf16.mxu1 %v8907_v27  ;;  %v223_v59 = vld [vmem:[#allocation2 + $0x8] sm:$0xf]  ;;  %v349_v4 = vld [vmem:[#allocation2 + $0xc] sm:$0xf]  ;;  %vm9505_vm8 = vcmp.ne.s16.totalorder %v114_v5, 0  ;;  %vm117_vm10 = vcmp.ne.s16.totalorder %v9495_v61, 0 }
  0x1b   :  { %231 = vst [vmem:[#allocation5 + $0x28] sm:$0xf] %v223_v59  ;;  %v239_v63 = vld [vmem:[#allocation2 + $0x8] sm:$0xf]  ;;  %357 = vst [vmem:[#allocation5 + $0x30] sm:$0xf] %v349_v4 }
  0x1c   :  { %8158 = vmatpush3.bf16.msra.mxu0 %v8908_v28  ;;  %v348_v3 = vld [vmem:[#allocation2 + $0x8] sm:$0xf]  ;;  %v91_v7 = vld [vmem:[#allocation2 + $0xc] sm:$0xf]  ;;  %v13337_v9 = vsel %vm9505_vm8, 4294967295, %v13336_v9  ;;  %v119_v13 = vsel %vm9505_vm8, 0, %v89_v55 }
  0x1d   :  { %8222 = vmatpush3.bf16.msra.mxu1 %v8909_v30  ;;  %8159 = vmatprep.subr.bf16.mxu0 %v8910_v31  ;;  %356 = vst [vmem:[#allocation5 + $0xc] sm:$0xf] %v348_v3  ;;  %13338 = vst [vmem:[#allocation9_spill] sm:$0xff] %v13337_v9  ;;  %v224_v11 = vld [vmem:[#allocation2 + $0xc] sm:$0xf]  ;;  %v120_v14 = vsel %vm9505_vm8, 0, %v90_v56 }
  0x1e   :  { %8223 = vmatprep.subr.bf16.mxu1 %v8911_v32  ;;  %v248_v15 = vsel %vm9505_vm8, 0, %v239_v63  ;;  %v249_v16 = vsel %vm9505_vm8, 0, %v240_v0  ;;  %232 = vst [vmem:[#allocation5 + $0x4c] sm:$0xf] %v224_v11  ;;  %v136_v18 = vshrl.u32 %v119_v13, 16  ;;  %v139_v19 = vshll.u32 %v119_v13, 16 }
  0x1f   :  { %v145_v20 = vshrl.u32 %v120_v14, 16  ;;  %v148_v21 = vshll.u32 %v120_v14, 16  ;;  %v262_v22 = vshrl.u32 %v248_v15, 16  ;;  %v265_v23 = vshll.u32 %v248_v15, 16  ;;  %v350_v26 = vld [vmem:[#allocation2 + $0x10] sm:$0xf] }
  0x20   :  { %8160 = vmatpush3.bf16.msra.mxu0 %v8912_v33  ;;  %v271_v24 = vshrl.u32 %v249_v16, 16  ;;  %v274_v25 = vshll.u32 %v249_v16, 16  ;;  %v138_v27 = vrot.slane %v136_v18, 7  ;;  %v121_v30 = vsel %vm9505_vm8, 0, %v91_v7  ;;  %v351_v32 = vld [vmem:[#allocation2 + $0x14] sm:$0xf] }
  0x21   :  { %8224 = vmatpush3.bf16.msra.mxu1 %v8913_v34  ;;  %8273 = vmatprep.subr.bf16.mxu0 %v8954_v54  ;;  %v147_v28 = vrot.slane %v145_v20, 7  ;;  %v122_v31 = vsel %vm9505_vm8, 0, %v92_v17  ;;  %358 = vst [vmem:[#allocation5 + $0x54] sm:$0xf] %v350_v26  ;;  %v13339_v33 = vmov 0  ;;  %v264_v34 = vrot.slane %v262_v22, 7 }
  0x22   :  { %v13340_v33 = vsel %vm9523_vm9, 4294967295, %v13339_v33  ;;  %v9527_v35 = vrot.slane %v271_v24, 7  ;;  %v154_v36 = vshrl.u32 %v121_v30, 16  ;;  %v157_v37 = vshll.u32 %v121_v30, 16  ;;  %359 = vst [vmem:[#allocation5 + $0x78] sm:$0xf] %v351_v32 }
  0x23   :  { %13341 = vst [vmem:[#allocation10_spill] sm:$0xff] %v13340_v33  ;;  %v141_v38 = vor.u32 %v139_v19, %v138_v27  ;;  %v143_v39 = vrot.slane %v138_v27, 4  ;;  %v150_v40 = vor.u32 %v148_v21, %v147_v28  ;;  %v152_v41 = vrot.slane %v147_v28, 4  ;;  %v241_v42 = vld [vmem:[#allocation2 + $0x10] sm:$0xf]  ;;  %v8955_v28 = vld [vmem:[%s13168_s2 + $0x38] sm:$0xff]  }
  0x24   :  { %v267_v44 = vor.u32 %v265_v23, %v264_v34  ;;  %v269_v46 = vrot.slane %v264_v34, 4  ;;  %v276_v47 = vor.u32 %v274_v25, %v9527_v35  ;;  %v156_v48 = vrot.slane %v154_v36, 7  ;;  %v242_v49 = vld [vmem:[#allocation2 + $0x14] sm:$0xf]  ;;  %v227_v50 = vld [vmem:[#allocation2 + $0x18] sm:$0xf] }
  0x25   :  { %234 = vst [vmem:[#allocation5 + $0x94] sm:$0xf] %v226_v43  ;;  %v142_v51 = vsel %vm9523_vm9, %v7527_v6, %v141_v38  ;;  %v151_v52 = vsel %vm9523_vm9, %v143_v39, %v150_v40  ;;  %v163_v53 = vshrl.u32 %v122_v31, 16  ;;  %v166_v54 = vshll.u32 %v122_v31, 16  ;;  %v93_v55 = vld [vmem:[#allocation2 + $0x14] sm:$0xf] }
  0x26   :  { %235 = vst [vmem:[#allocation5 + $0xb8] sm:$0xf] %v227_v50  ;;  %v352_v56 = vld [vmem:[#allocation2 + $0x18] sm:$0xf]  ;;  %214 = vst [vmem:[#allocation5] sm:$0xf] %v142_v51  ;;  %v268_v58 = vsel %vm9523_vm9, %v7528_v10, %v267_v44  ;;  %v277_v59 = vsel %vm9523_vm9, %v269_v46, %v276_v47  ;;  %v159_v60 = vor.u32 %v157_v37, %v156_v48 }
  0x27   :  { %215 = vst [vmem:[#allocation5 + $0x24] sm:$0xf] %v151_v52  ;;  %v161_v62 = vrot.slane %v156_v48, 4  ;;  %v94_v63 = vld [vmem:[#allocation2 + $0x18] sm:$0xf]  ;;  %v9539_v2 = vrot.slane %v163_v53, 7 }
  0x28   :  { %v353_v0 = vld [vmem:[#allocation2 + $0x1c] sm:$0xf]  ;;  %360 = vst [vmem:[#allocation5 + $0x9c] sm:$0xf] %v352_v56  ;;  %340 = vst [vmem:[#allocation5 + $0x8] sm:$0xf] %v268_v58  ;;  %v160_v6 = vsel %vm9523_vm9, %v152_v41, %v159_v60 }
  0x29   :  { %341 = vst [vmem:[#allocation5 + $0x2c] sm:$0xf] %v277_v59  ;;  %v250_v3 = vsel %vm9505_vm8, 0, %v241_v42  ;;  %v251_v4 = vsel %vm9505_vm8, 0, %v242_v49  ;;  %v278_v5 = vrot.slane %v9527_v35, 4  ;;  %v168_v13 = vor.u32 %v166_v54, %v9539_v2  ;;  %v8956_v39 = vld [vmem:[%s13168_s2 + $0x70] sm:$0xff]  }
  0x2a   :  { %361 = vst [vmem:[#allocation5 + $0xc0] sm:$0xf] %v353_v0  ;;  %v280_v7 = vshrl.u32 %v250_v3, 16  ;;  %v283_v10 = vshll.u32 %v250_v3, 16  ;;  %v289_v11 = vshrl.u32 %v251_v4, 16  ;;  %v292_v14 = vshll.u32 %v251_v4, 16 }
  0x2b   :  { %v228_v12 = vld [vmem:[#allocation2 + $0x1c] sm:$0xf]  ;;  %216 = vst [vmem:[#allocation5 + $0x48] sm:$0xf] %v160_v6  ;;  %v123_v15 = vsel %vm9505_vm8, 0, %v93_v55  ;;  %v124_v16 = vsel %vm9505_vm8, 0, %v94_v63  ;;  %v169_v23 = vsel %vm9523_vm9, %v161_v62, %v168_v13 }
  0x2c   :  { %v229_v17 = vld [vmem:[#allocation2 + $0x20] sm:$0xf]  ;;  %236 = vst [vmem:[#allocation5 + $0xdc] sm:$0xf] %v228_v12  ;;  %v282_v18 = vrot.slane %v280_v7, 7  ;;  %v9553_v19 = vrot.slane %v289_v11, 7 }
  0x2d   :  { %v170_v20 = vrot.slane %v9539_v2, 4  ;;  %v172_v21 = vshrl.u32 %v123_v15, 16  ;;  %v243_v22 = vld [vmem:[#allocation2 + $0x18] sm:$0xf]  ;;  %237 = vst [vmem:[#allocation5 + $0x100] sm:$0xf] %v229_v17 }
  0x2e   :  { %v175_v24 = vshll.u32 %v123_v15, 16  ;;  %v181_v25 = vshrl.u32 %v124_v16, 16  ;;  %v184_v26 = vshll.u32 %v124_v16, 16  ;;  %v244_v27 = vld [vmem:[#allocation2 + $0x1c] sm:$0xf]  ;;  %v285_v30 = vor.u32 %v283_v10, %v282_v18  ;;  %v616_v40 = vld [vmem:[#allocation5] sm:$0xff] }
  0x2f   :  { %217 = vst [vmem:[#allocation5 + $0x6c] sm:$0xf] %v169_v23  ;;  %v287_v31 = vrot.slane %v282_v18, 4  ;;  %v294_v32 = vor.u32 %v292_v14, %v9553_v19  ;;  %v174_v34 = vrot.slane %v172_v21, 7  ;;  %v95_v35 = vld [vmem:[#allocation2 + $0x1c] sm:$0xf] }
  0x30   :  { %v96_v36 = vld [vmem:[#allocation2 + $0x20] sm:$0xf]  ;;  %v355_v38 = vld [vmem:[#allocation2 + $0x24] sm:$0xf]  ;;  %v9565_v43 = vrot.slane %v181_v25, 7  ;;  %v252_v44 = vsel %vm9505_vm8, 0, %v243_v22  ;;  %v286_v48 = vsel %vm9523_vm9, %v278_v5, %v285_v30 }
  0x31   :  { %v354_v37 = vld [vmem:[#allocation2 + $0x20] sm:$0xf]  ;;  %v618_v41 = vld [vmem:[#allocation5 + $0x24] sm:$0xff]  ;;  %363 = vst [vmem:[#allocation5 + $0x108] sm:$0xf] %v355_v38  ;;  %v295_v49 = vsel %vm9523_vm9, %v287_v31, %v294_v32  ;;  %v177_v50 = vor.u32 %v175_v24, %v174_v34  ;;  %v179_v52 = vrot.slane %v174_v34, 4 }
  0x32   :  { %v8914_v42 = vld [vmem:[#allocation5 + $0x4] ss:$36 sps:$4 sm:$0xff]   ;;  %362 = vst [vmem:[#allocation5 + $0xe4] sm:$0xf] %v354_v37  ;;  %v8916_v46 = vld [vmem:[#allocation5 + $0xc] ss:$36 sps:$4 sm:$0xff]   ;;  %v7532_v47 = vcombine.low %v616_v40, %v618_v41  ;;  %v186_v53 = vor.u32 %v184_v26, %v9565_v43 }
  0x33   :  { %1103 = vmatprep.mubr.bf16.mxu0 %v8914_v42  ;;  %v8918_v51 = vld [vmem:[#allocation5 + $0x8] ss:$36 sps:$4 sm:$0xff]   ;;  %342 = vst [vmem:[#allocation5 + $0x50] sm:$0xf] %v286_v48  ;;  %343 = vst [vmem:[#allocation5 + $0x74] sm:$0xf] %v295_v49  ;;  %1200 = vmatprep.mubr.bf16.mxu1 %v8916_v46  ;;  %v178_v56 = vsel %vm9523_vm9, %v170_v20, %v177_v50 }
  0x34   :  { %v253_v54 = vsel %vm9505_vm8, 0, %v244_v27  ;;  %v296_v55 = vrot.slane %v9553_v19, 4  ;;  %1104 = vmatmul.mubr.bf16.vlgmr.msra.gmra.mxu0 %v7532_v47  ;;  %v298_v58 = vshrl.u32 %v252_v44, 16  ;;  %v301_v59 = vshll.u32 %v252_v44, 16  ;;  %v245_v62 = vld [vmem:[#allocation2 + $0x20] sm:$0xf]  ;;  %1201 = vmatmul.mubr.bf16.vlgmr.msra.gmra.mxu1 %v8918_v51 }
  0x35   :  { %v307_v60 = vshrl.u32 %v253_v54, 16  ;;  %v246_v63 = vld [vmem:[#allocation2 + $0x24] sm:$0xf]  ;;  %v8957_v0 = vld [vmem:[%s13168_s2 + $0x30] sm:$0xff]   ;;  %v620_v2 = vld [vmem:[#allocation5 + $0x48] sm:$0xff]  ;;  %v187_v3 = vsel %vm9523_vm9, %v179_v52, %v186_v53  ;;  %v310_v4 = vshll.u32 %v253_v54, 16  ;;  %8274 = vmatpush3.bf16.msra.mxu0 %v8955_v28 }
  0x36   :  { %218 = vst [vmem:[#allocation5 + $0x90] sm:$0xf] %v178_v56  ;;  %v125_v5 = vsel %vm9505_vm8, 0, %v95_v35  ;;  %v126_v6 = vsel %vm117_vm10, 0, %v96_v36  ;;  %v475_v7 = vld [vmem:[#allocation2 + $0x38] sm:$0xf]  ;;  %8275 = vmatprep.subr.bf16.mxu0 %v8956_v39 }
  0x37   :  { %219 = vst [vmem:[#allocation5 + $0xb4] sm:$0xf] %v187_v3  ;;  %v300_v10 = vrot.slane %v298_v58, 7  ;;  %v9588_v11 = vrot.slane %v307_v60, 7  ;;  %v188_v12 = vrot.slane %v9565_v43, 4  ;;  %v190_v13 = vshrl.u32 %v125_v5, 16 }
  0x38   :  { %483 = vst [vmem:[#allocation5 + $0x148] sm:$0xf] %v475_v7  ;;  %v8958_v14 = vld [vmem:[%s13168_s2 + $0x68] sm:$0xff]   ;;  %v193_v17 = vshll.u32 %v125_v5, 16  ;;  %v199_v18 = vshrl.u32 %v126_v6, 16  ;;  %v202_v19 = vshll.u32 %v126_v6, 16 }
  0x39   :  { %v622_v15 = vld [vmem:[#allocation5 + $0x6c] sm:$0xff]  ;;  %v365_v20 = vld [vmem:[#allocation2 + $0x34] sm:$0xf]  ;;  %v303_v22 = vor.u32 %v301_v59, %v300_v10  ;;  %v305_v23 = vrot.slane %v300_v10, 4  ;;  %v312_v24 = vor.u32 %v310_v4, %v9588_v11  ;;  %v366_v25 = vld [vmem:[#allocation2 + $0x38] sm:$0xf]  ;;  %8276 = vmatpush3.bf16.msra.mxu0 %v8957_v0 }
  0x3a   :  { %v8919_v16 = vld [vmem:[#allocation5 + $0x4c] ss:$36 sps:$4 sm:$0xff]   ;;  %v7536_v21 = vcombine.low %v620_v2, %v622_v15  ;;  %v600_v26 = vld [vmem:[#allocation2 + $0x38] sm:$0xf]  ;;  %v192_v28 = vrot.slane %v190_v13, 7  ;;  %v201_v30 = vrot.slane %v199_v18, 7  ;;  %8277 = vmatprep.subr.bf16.mxu0 %v8958_v14 }
  0x3b   :  { %v8959_v27 = vld [vmem:[%s13168_s2 + $0x28] sm:$0xff]   ;;  %1111 = vmatprep.mubr.bf16.mxu0 %v8919_v16  ;;  %v254_v31 = vsel %vm9505_vm8, 0, %v245_v62  ;;  %v255_v32 = vsel %vm117_vm10, 0, %v246_v63  ;;  %v601_v34 = vld [vmem:[#allocation2 + $0x3c] sm:$0xf]  ;;  %v304_v36 = vsel %vm9523_vm9, %v296_v55, %v303_v22  ;;  %v313_v37 = vsel %vm9523_vm9, %v305_v23, %v312_v24 }
  0x3c   :  { %608 = vst [vmem:[#allocation5 + $0x12c] sm:$0xf] %v600_v26  ;;  %v8921_v35 = vld [vmem:[#allocation5 + $0x54] ss:$36 sps:$4 sm:$0xff]   ;;  %v314_v38 = vrot.slane %v9588_v11, 4  ;;  %v316_v39 = vshrl.u32 %v254_v31, 16  ;;  %v195_v41 = vor.u32 %v193_v17, %v192_v28  ;;  %v204_v43 = vor.u32 %v202_v19, %v201_v30  ;;  %1112 = vmatmul.mubr.bf16.gmra.mxu0 %v7536_v21 }
  0x3d   :  { %609 = vst [vmem:[#allocation5 + $0x150] sm:$0xf] %v601_v34  ;;  %v8923_v40 = vld [vmem:[#allocation5 + $0x50] ss:$36 sps:$4 sm:$0xff]   ;;  %344 = vst [vmem:[#allocation5 + $0x98] sm:$0xf] %v304_v36  ;;  %1208 = vmatprep.mubr.bf16.mxu1 %v8921_v35  ;;  %8278 = vmatpush3.bf16.msra.mxu0 %v8959_v27 }
  0x3e   :  { %345 = vst [vmem:[#allocation5 + $0xbc] sm:$0xf] %v313_v37  ;;  %v197_v42 = vrot.slane %v192_v28, 4  ;;  %v319_v44 = vshll.u32 %v254_v31, 16  ;;  %v490_v46 = vld [vmem:[#allocation2 + $0x34] sm:$0x8]  ;;  %1209 = vmatmul.mubr.bf16.gmra.mxu1 %v8923_v40  ;;  %v196_v55 = vsel %vm9523_vm9, %v188_v12, %v195_v41 }
  0x3f   :  { %v624_v47 = vld [vmem:[#allocation5 + $0x90] sm:$0xff]  ;;  %v318_v48 = vrot.slane %v316_v39, 7  ;;  %v325_v49 = vshrl.u32 %v255_v32, 16  ;;  %v328_v50 = vshll.u32 %v255_v32, 16  ;;  %v374_v51 = vsel %vm9505_vm8, 0, %v365_v20 }
  0x40   :  { %v491_v52 = vld [vmem:[#allocation2 + $0x38] sm:$0xf]  ;;  %v205_v56 = vsel %vm9523_vm9, %v197_v42, %v204_v43  ;;  %v375_v58 = vsel %vm9505_vm8, 0, %v366_v25  ;;  %v383_v59 = vshrl.u32 %v9503_v8, 16  ;;  %220 = vst [vmem:[#allocation5 + $0xd8] sm:$0xf] %v196_v55 }
  0x41   :  { %v626_v53 = vld [vmem:[#allocation5 + $0xb4] sm:$0xff]  ;;  %221 = vst [vmem:[#allocation5 + $0xfc] sm:$0xf] %v205_v56  ;;  %v321_v62 = vor.u32 %v319_v44, %v318_v48  ;;  %v323_v63 = vrot.slane %v318_v48, 4  ;;  %v327_v0 = vrot.slane %v325_v49, 7  ;;  %v388_v5 = vshrl.u32 %v374_v51, 16 }
  0x42   :  { %v8924_v54 = vld [vmem:[#allocation5 + $0x94] ss:$36 sps:$4 sm:$0xff]   ;;  %v7540_v60 = vcombine.low %v624_v47, %v626_v53  ;;  %v492_v2 = vld [vmem:[#allocation2 + $0x3c] sm:$0xf]  ;;  %v7529_v4 = vrot.slane %v383_v59, 11  ;;  %v391_v6 = vshll.u32 %v374_v51, 16 }
  0x43   :  { %v476_v3 = vld [vmem:[#allocation2 + $0x3c] sm:$0xf]  ;;  %1119 = vmatprep.mubr.bf16.mxu0 %v8924_v54  ;;  %v397_v7 = vshrl.u32 %v375_v58, 16  ;;  %v477_v10 = vld [vmem:[#allocation2 + $0x40] sm:$0xf]  ;;  %v322_v11 = vsel %vm9523_vm9, %v314_v38, %v321_v62  ;;  %v330_v8 = vor.u32 %v328_v50, %v327_v0  ;;  %v400_v12 = vshll.u32 %v375_v58, 16 }
  0x44   :  { %484 = vst [vmem:[#allocation5 + $0x16c] sm:$0xf] %v476_v3  ;;  %v499_v13 = vsel %vm115_vm5, 0, %v490_v46  ;;  %v367_v14 = vld [vmem:[#allocation2 + $0x3c] sm:$0xf]  ;;  %v390_v16 = vrot.slane %v388_v5, 7  ;;  %1120 = vmatmul.mubr.bf16.gmra.mxu0 %v7540_v60 }
  0x45   :  { %v368_v15 = vld [vmem:[#allocation2 + $0x40] sm:$0xf]  ;;  %485 = vst [vmem:[#allocation5 + $0x190] sm:$0xf] %v477_v10  ;;  %346 = vst [vmem:[#allocation5 + $0xe0] sm:$0xf] %v322_v11  ;;  %v331_v22 = vsel %vm9523_vm9, %v323_v63, %v330_v8 }
  0x46   :  { %v9620_v17 = vrot.slane %v397_v7, 7  ;;  %v500_v18 = vsel %vm9505_vm8, 0, %v491_v52  ;;  %v501_v19 = vsel %vm9505_vm8, 0, %v492_v2  ;;  %v602_v20 = vld [vmem:[#allocation2 + $0x40] sm:$0xf]  ;;  %v509_v23 = vshrl.u32 %v499_v13, 16 }
  0x47   :  { %v8926_v21 = vld [vmem:[#allocation5 + $0x9c] ss:$36 sps:$4 sm:$0xff]   ;;  %v514_v24 = vshrl.u32 %v500_v18, 16  ;;  %610 = vst [vmem:[#allocation5 + $0x174] sm:$0xf] %v602_v20  ;;  %v393_v26 = vor.u32 %v391_v6, %v390_v16  ;;  %v395_v27 = vrot.slane %v390_v16, 4 }
  0x48   :  { %v8928_v25 = vld [vmem:[#allocation5 + $0x98] ss:$36 sps:$4 sm:$0xff]   ;;  %347 = vst [vmem:[#allocation5 + $0x104] sm:$0xf] %v331_v22  ;;  %v402_v28 = vor.u32 %v400_v12, %v9620_v17  ;;  %v517_v30 = vshll.u32 %v500_v18, 16  ;;  %1216 = vmatprep.mubr.bf16.mxu1 %v8926_v21  ;;  %v7530_v32 = vrot.slane %v509_v23, 11 }
  0x49   :  { %v603_v31 = vld [vmem:[#allocation2 + $0x44] sm:$0xf]  ;;  %v516_v34 = vrot.slane %v514_v24, 7  ;;  %v523_v35 = vshrl.u32 %v501_v19, 16  ;;  %v526_v36 = vshll.u32 %v501_v19, 16  ;;  %1217 = vmatmul.mubr.bf16.gmra.mxu1 %v8928_v25  ;;  %v628_v38 = vld [vmem:[#allocation5 + $0xd8] sm:$0xff]  ;;  %v394_v41 = vsel %vm9523_vm9, %v7529_v4, %v393_v26 }
  0x4a   :  { %v493_v37 = vld [vmem:[#allocation2 + $0x40] sm:$0xf]  ;;  %611 = vst [vmem:[#allocation5 + $0x198] sm:$0xf] %v603_v31  ;;  %v403_v42 = vsel %vm9523_vm9, %v395_v27, %v402_v28  ;;  %v376_v43 = vsel %vm9505_vm8, 0, %v367_v14  ;;  %v377_v44 = vsel %vm9505_vm8, 0, %v368_v15 }
  0x4b   :  { %v630_v39 = vld [vmem:[#allocation5 + $0xfc] sm:$0xff]  ;;  %466 = vst [vmem:[#allocation5 + $0x120] sm:$0xf] %v394_v41  ;;  %467 = vst [vmem:[#allocation5 + $0x144] sm:$0xf] %v403_v42  ;;  %v519_v47 = vor.u32 %v517_v30, %v516_v34  ;;  %v521_v48 = vrot.slane %v516_v34, 4 }
  0x4c   :  { %v8929_v40 = vld [vmem:[#allocation5 + $0xdc] ss:$36 sps:$4 sm:$0xff]   ;;  %v7544_v46 = vcombine.low %v628_v38, %v630_v39  ;;  %v9637_v49 = vrot.slane %v523_v35, 7  ;;  %v494_v50 = vld [vmem:[#allocation2 + $0x44] sm:$0xf]  ;;  %v404_v52 = vrot.slane %v9620_v17, 4 }
  0x4d   :  { %v478_v51 = vld [vmem:[#allocation2 + $0x44] sm:$0xf]  ;;  %1127 = vmatprep.mubr.bf16.mxu0 %v8929_v40  ;;  %v406_v53 = vshrl.u32 %v376_v43, 16  ;;  %v409_v54 = vshll.u32 %v376_v43, 16  ;;  %v415_v55 = vshrl.u32 %v377_v44, 16  ;;  %v520_v58 = vsel %vm9523_vm9, %v7530_v32, %v519_v47 }
  0x4e   :  { %v479_v56 = vld [vmem:[#allocation2 + $0x48] sm:$0xf]  ;;  %486 = vst [vmem:[#allocation5 + $0x1b4] sm:$0xf] %v478_v51  ;;  %v528_v59 = vor.u32 %v526_v36, %v9637_v49  ;;  %v418_v60 = vshll.u32 %v377_v44, 16  ;;  %v502_v62 = vsel %vm9505_vm8, 0, %v493_v37  ;;  %1128 = vmatmul.mubr.bf16.gmra.mxu0 %v7544_v46 }
  0x4f   :  { %v369_v63 = vld [vmem:[#allocation2 + $0x44] sm:$0xf]  ;;  %487 = vst [vmem:[#allocation5 + $0x1d8] sm:$0xf] %v479_v56  ;;  %592 = vst [vmem:[#allocation5 + $0x128] sm:$0xf] %v520_v58 }
  0x50   :  { %v408_v0 = vrot.slane %v406_v53, 7  ;;  %v9645_v2 = vrot.slane %v415_v55, 7  ;;  %v503_v3 = vsel %vm9505_vm8, 0, %v494_v50  ;;  %v530_v4 = vrot.slane %v9637_v49, 4  ;;  %v370_v5 = vld [vmem:[#allocation2 + $0x48] sm:$0xf] }
  0x51   :  { %v8931_v6 = vld [vmem:[#allocation5 + $0xe4] ss:$36 sps:$4 sm:$0xff]   ;;  %v529_v10 = vsel %vm9523_vm9, %v521_v48, %v528_v59  ;;  %v532_v11 = vshrl.u32 %v502_v62, 16  ;;  %v535_v14 = vshll.u32 %v502_v62, 16  ;;  %v605_v17 = vld [vmem:[#allocation2 + $0x4c] sm:$0xf] }
  0x52   :  { %v8933_v7 = vld [vmem:[#allocation5 + $0xe0] ss:$36 sps:$4 sm:$0xff]   ;;  %593 = vst [vmem:[#allocation5 + $0x14c] sm:$0xf] %v529_v10  ;;  %v411_v8 = vor.u32 %v409_v54, %v408_v0  ;;  %v413_v12 = vrot.slane %v408_v0, 4  ;;  %v420_v13 = vor.u32 %v418_v60, %v9645_v2  ;;  %1224 = vmatprep.mubr.bf16.mxu1 %v8931_v6  ;;  %v541_v19 = vshrl.u32 %v503_v3, 16 }
  0x53   :  { %v495_v15 = vld [vmem:[#allocation2 + $0x48] sm:$0xf]  ;;  %v534_v18 = vrot.slane %v532_v11, 7  ;;  %v544_v20 = vshll.u32 %v503_v3, 16  ;;  %v378_v21 = vsel %vm9505_vm8, 0, %v369_v63  ;;  %1225 = vmatmul.mubr.bf16.gmra.mxu1 %v8933_v7  ;;  %v632_v23 = vld [vmem:[#allocation5 + $0x120] sm:$0xff] }
  0x54   :  { %v604_v16 = vld [vmem:[#allocation2 + $0x48] sm:$0xf]  ;;  %v496_v22 = vld [vmem:[#allocation2 + $0x4c] sm:$0xf]  ;;  %613 = vst [vmem:[#allocation5 + $0x1e0] sm:$0xf] %v605_v17  ;;  %v412_v26 = vsel %vm9523_vm9, %v404_v52, %v411_v8  ;;  %v421_v27 = vsel %vm9523_vm9, %v413_v12, %v420_v13 }
  0x55   :  { %612 = vst [vmem:[#allocation5 + $0x1bc] sm:$0xf] %v604_v16  ;;  %v634_v24 = vld [vmem:[#allocation5 + $0x144] sm:$0xff]  ;;  %v379_v28 = vsel %vm9505_vm8, 0, %v370_v5  ;;  %v422_v30 = vrot.slane %v9645_v2, 4  ;;  %v537_v32 = vor.u32 %v535_v14, %v534_v18  ;;  %v539_v34 = vrot.slane %v534_v18, 4 }
  0x56   :  { %v8934_v25 = vld [vmem:[#allocation5 + $0x124] ss:$36 sps:$4 sm:$0xff]   ;;  %v7548_v31 = vcombine.low %v632_v23, %v634_v24  ;;  %468 = vst [vmem:[#allocation5 + $0x168] sm:$0xf] %v412_v26  ;;  %469 = vst [vmem:[#allocation5 + $0x18c] sm:$0xf] %v421_v27 }
  0x57   :  { %v543_v35 = vrot.slane %v541_v19, 7  ;;  %v480_v36 = vld [vmem:[#allocation2 + $0x4c] sm:$0xf]  ;;  %1135 = vmatprep.mubr.bf16.mxu0 %v8934_v25  ;;  %v424_v37 = vshrl.u32 %v378_v21, 16  ;;  %v427_v38 = vshll.u32 %v378_v21, 16  ;;  %v433_v39 = vshrl.u32 %v379_v28, 16 }
  0x58   :  { %v436_v40 = vshll.u32 %v379_v28, 16  ;;  %v481_v41 = vld [vmem:[#allocation2 + $0x50] sm:$0xf]  ;;  %488 = vst [vmem:[#allocation5 + $0x1fc] sm:$0xf] %v480_v36  ;;  %v538_v42 = vsel %vm9523_vm9, %v530_v4, %v537_v32  ;;  %v504_v44 = vsel %vm9505_vm8, 0, %v495_v15  ;;  %1136 = vmatmul.mubr.bf16.gmra.mxu0 %v7548_v31 }
  0x59   :  { %v546_v43 = vor.u32 %v544_v20, %v543_v35  ;;  %v505_v46 = vsel %vm9505_vm8, 0, %v496_v22  ;;  %v371_v47 = vld [vmem:[#allocation2 + $0x4c] sm:$0xf]  ;;  %489 = vst [vmem:[#allocation5 + $0x220] sm:$0xf] %v481_v41  ;;  %v426_v48 = vrot.slane %v424_v37, 7 }
  0x5a   :  { %594 = vst [vmem:[#allocation5 + $0x170] sm:$0xf] %v538_v42  ;;  %v9668_v49 = vrot.slane %v433_v39, 7  ;;  %v548_v50 = vrot.slane %v543_v35, 4  ;;  %v550_v51 = vshrl.u32 %v504_v44, 16  ;;  %v553_v56 = vshll.u32 %v504_v44, 16 }
  0x5b   :  { %v372_v52 = vld [vmem:[#allocation2 + $0x50] sm:$0xf]  ;;  %v8938_v54 = vld [vmem:[#allocation5 + $0x128] ss:$36 sps:$4 sm:$0xff]   ;;  %v547_v55 = vsel %vm9523_vm9, %v539_v34, %v546_v43  ;;  %v429_v58 = vor.u32 %v427_v38, %v426_v48  ;;  %v431_v59 = vrot.slane %v426_v48, 4  ;;  %v559_v4 = vshrl.u32 %v505_v46, 16 }
  0x5c   :  { %v8936_v53 = vld [vmem:[#allocation5 + $0x12c] ss:$36 sps:$4 sm:$0xff]   ;;  %595 = vst [vmem:[#allocation5 + $0x194] sm:$0xf] %v547_v55  ;;  %v438_v60 = vor.u32 %v436_v40, %v9668_v49  ;;  %v552_v62 = vrot.slane %v550_v51, 7  ;;  %v562_v5 = vshll.u32 %v505_v46, 16 }
  0x5d   :  { %v497_v63 = vld [vmem:[#allocation2 + $0x50] sm:$0xf]  ;;  %v498_v0 = vld [vmem:[#allocation2 + $0x54] sm:$0xf]  ;;  %1232 = vmatprep.mubr.bf16.mxu1 %v8936_v53  ;;  %v380_v6 = vsel %vm9505_vm8, 0, %v371_v47  ;;  %v381_v7 = vsel %vm117_vm10, 0, %v372_v52  ;;  %v430_v12 = vsel %vm9523_vm9, %v422_v30, %v429_v58 }
  0x5e   :  { %v606_v2 = vld [vmem:[#allocation2 + $0x50] sm:$0xf]  ;;  %v607_v3 = vld [vmem:[#allocation2 + $0x54] sm:$0xf]  ;;  %1233 = vmatmul.mubr.bf16.gmra.mxu1 %v8938_v54  ;;  %v636_v10 = vld [vmem:[#allocation5 + $0x168] sm:$0xff]  ;;  %v439_v13 = vsel %vm9523_vm9, %v431_v59, %v438_v60  ;;  %v555_v14 = vor.u32 %v553_v56, %v552_v62  ;;  %v557_v15 = vrot.slane %v552_v62, 4 }
  0x5f   :  { %614 = vst [vmem:[#allocation5 + $0x204] sm:$0xf] %v606_v2  ;;  %615 = vst [vmem:[#allocation5 + $0x228] sm:$0xf] %v607_v3  ;;  %v638_v11 = vld [vmem:[#allocation5 + $0x18c] sm:$0xff]  ;;  %v561_v17 = vrot.slane %v559_v4, 7 }
  0x60   :  { %v8939_v8 = vld [vmem:[#allocation5 + $0x16c] ss:$36 sps:$4 sm:$0xff]   ;;  %v7552_v16 = vcombine.low %v636_v10, %v638_v11  ;;  %470 = vst [vmem:[#allocation5 + $0x1b0] sm:$0xf] %v430_v12  ;;  %471 = vst [vmem:[#allocation5 + $0x1d4] sm:$0xf] %v439_v13  ;;  %v556_v20 = vsel %vm9523_vm9, %v548_v50, %v555_v14 }
  0x61   :  { %v440_v18 = vrot.slane %v9668_v49, 4  ;;  %v442_v19 = vshrl.u32 %v380_v6, 16  ;;  %1143 = vmatprep.mubr.bf16.mxu0 %v8939_v8  ;;  %v445_v21 = vshll.u32 %v380_v6, 16  ;;  %v451_v22 = vshrl.u32 %v381_v7, 16  ;;  %596 = vst [vmem:[#allocation5 + $0x1b8] sm:$0xf] %v556_v20 }
  0x62   :  { %v454_v23 = vshll.u32 %v381_v7, 16  ;;  %v564_v24 = vor.u32 %v562_v5, %v561_v17  ;;  %v506_v26 = vsel %vm9505_vm8, 0, %v497_v63  ;;  %v507_v27 = vsel %vm117_vm10, 0, %v498_v0  ;;  %v8941_v34 = vld [vmem:[#allocation5 + $0x174] ss:$36 sps:$4 sm:$0xff]   ;;  %1144 = vmatmul.mubr.bf16.gmra.mxu0 %v7552_v16  ;;  %v8960_v3 = vld [vmem:[%s13168_s2 + $0x60] sm:$0xff]  }
  0x63   :  { %v444_v25 = vrot.slane %v442_v19, 7  ;;  %v453_v28 = vrot.slane %v451_v22, 7  ;;  %v566_v30 = vrot.slane %v561_v17, 4  ;;  %v568_v31 = vshrl.u32 %v506_v26, 16  ;;  %v8943_v35 = vld [vmem:[#allocation5 + $0x170] ss:$36 sps:$4 sm:$0xff]   ;;  %1240 = vmatprep.mubr.bf16.mxu1 %v8941_v34  ;;  %8279 = vmatprep.subr.bf16.mxu0 %v8960_v3 }
  0x64   :  { %v571_v32 = vshll.u32 %v506_v26, 16  ;;  %v565_v36 = vsel %vm9523_vm9, %v557_v15, %v564_v24  ;;  %v577_v41 = vshrl.u32 %v507_v27, 16  ;;  %v580_v42 = vshll.u32 %v507_v27, 16  ;;  %v8944_v47 = vld [vmem:[#allocation5 + $0x1b4] ss:$36 sps:$4 sm:$0xff]   ;;  %v8961_v4 = vld [vmem:[%s13168_s2 + $0x20] sm:$0xff]  }
  0x65   :  { %v447_v37 = vor.u32 %v445_v21, %v444_v25  ;;  %v449_v38 = vrot.slane %v444_v25, 4  ;;  %597 = vst [vmem:[#allocation5 + $0x1dc] sm:$0xf] %v565_v36  ;;  %v456_v39 = vor.u32 %v454_v23, %v453_v28  ;;  %v570_v40 = vrot.slane %v568_v31, 7  ;;  %1151 = vmatprep.mubr.bf16.mxu0 %v8944_v47  ;;  %v8946_v56 = vld [vmem:[#allocation5 + $0x1bc] ss:$36 sps:$4 sm:$0xff]   ;;  %8280 = vmatpush3.bf16.msra.mxu0 %v8961_v4 }
  0x66   :  { %1241 = vmatmul.mubr.bf16.gmra.mxu1 %v8943_v35  ;;  %v579_v51 = vrot.slane %v577_v41, 7  ;;  %v8949_v62 = vld [vmem:[#allocation5 + $0x1fc] ss:$36 sps:$4 sm:$0xff]   ;;  %v8951_v0 = vld [vmem:[#allocation5 + $0x204] ss:$36 sps:$4 sm:$0xff]   ;;  %v8966_v7 = vld [vmem:[%s13168_s2 + $0xf0] sm:$0xff]  }
  0x67   :  { %v448_v43 = vsel %vm9523_vm9, %v440_v18, %v447_v37  ;;  %v640_v44 = vld [vmem:[#allocation5 + $0x1b0] sm:$0xff]  ;;  %v457_v48 = vsel %vm9523_vm9, %v449_v38, %v456_v39  ;;  %v573_v49 = vor.u32 %v571_v32, %v570_v40  ;;  %v575_v50 = vrot.slane %v570_v40, 4  ;;  %1248 = vmatprep.mubr.bf16.mxu1 %v8946_v56  ;;  %v8964_v5 = vld [vmem:[%s13168_s2 + $0xf8] sm:$0xff]   ;;  %v8970_v12 = vld [vmem:[%s13168_s2 + $0xe8] sm:$0xff]  }
  0x68   :  { %v642_v46 = vld [vmem:[#allocation5 + $0x1d4] sm:$0xff]  ;;  %472 = vst [vmem:[#allocation5 + $0x1f8] sm:$0xf] %v448_v43  ;;  %473 = vst [vmem:[#allocation5 + $0x21c] sm:$0xf] %v457_v48  ;;  %v582_v53 = vor.u32 %v580_v42, %v579_v51  ;;  %8337 = vmatprep.subr.bf16.mxu1 %v8964_v5  ;;  %v8971_v13 = vld [vmem:[%s13168_s2 + $0xa8] sm:$0xff]  }
  0x69   :  { %v574_v52 = vsel %vm9523_vm9, %v566_v30, %v573_v49  ;;  %v7556_v54 = vcombine.low %v640_v44, %v642_v46  ;;  %v8965_v6 = vld [vmem:[%s13168_s2 + $0xb8] sm:$0xff]   ;;  %v8968_v11 = vld [vmem:[%s13168_s2 + $0xb0] sm:$0xff]   ;;  %v8972_v16 = vld [vmem:[%s13168_s2 + $0xe0] sm:$0xff]   ;;  %v1484_v44 = vsel %vm1483_vm12, 65537, %v9293_v1 }
  0x6a   :  { %598 = vst [vmem:[#allocation5 + $0x200] sm:$0xf] %v574_v52  ;;  %v583_v55 = vsel %vm9523_vm9, %v575_v50, %v582_v53  ;;  %8338 = vmatpush3.bf16.msra.mxu1 %v8965_v6  ;;  %v8962_v10 = vld [vmem:[%s13168_s2 + $0x58] sm:$0xff]   ;;  %v8967_v14 = vld [vmem:[%s13168_s2 + $0x50] sm:$0xff]   ;;  %v8974_v17 = vld [vmem:[%s13168_s2 + $0xa0] sm:$0xff]   ;;  %v1486_v46 = vshrl.u32 %v1484_v44, 16 }
  0x6b   :  { %599 = vst [vmem:[#allocation5 + $0x224] sm:$0xf] %v583_v55  ;;  %1152 = vmatmul.mubr.bf16.gmra.mxu0 %v7556_v54  ;;  %v8963_v8 = vld [vmem:[%s13168_s2 + $0x18] sm:$0xff]   ;;  %8339 = vmatprep.subr.bf16.mxu1 %v8966_v7  ;;  %v8969_v15 = vld [vmem:[%s13168_s2 + $0x10] sm:$0xff]   ;;  %v8973_v20 = vld [vmem:[%s13168_s2 + $0x48] sm:$0xff]   ;;  %v1489_v49 = vshll.u32 %v1484_v44, 16 }
  0x6c   :  { %v8948_v58 = vld [vmem:[#allocation5 + $0x1b8] ss:$36 sps:$4 sm:$0xff]   ;;  %1159 = vmatprep.mubr.bf16.mxu0 %v8949_v62  ;;  %8281 = vmatprep.subr.bf16.mxu0 %v8962_v10  ;;  %v8975_v21 = vld [vmem:[%s13168_s2 + $0x8] sm:$0xff]   ;;  %v8978_v22 = vld [vmem:[%s13168_s2 + $0xd0] sm:$0xff]   ;;  %v9790_v48 = vrot.slane %v1486_v46, 7 }
  0x6d   :  { %8282 = vmatpush3.bf16.msra.mxu0 %v8963_v8  ;;  %v8976_v18 = vld [vmem:[%s13168_s2 + $0xd8] sm:$0xff]   ;;  %v1346_v23 = vld [vmem:[#allocation3 + $0x4] sm:$0xf]  ;;  %v8980_v24 = vld [vmem:[%s13168_s2 + $0x90] sm:$0xff]  }
  0x6e   :  { %1249 = vmatmul.mubr.bf16.gmra.mxu1 %v8948_v58  ;;  %8283 = vmatprep.subr.bf16.mxu0 %v8967_v14  ;;  %v8977_v19 = vld [vmem:[%s13168_s2 + $0x98] sm:$0xff]   ;;  %v1355_v25 = vsel %vm9505_vm8, 0, %v1346_v23  ;;  %v1345_v26 = vld [vmem:[#allocation3] sm:$0x8]  ;;  %v8982_v30 = vld [vmem:[%s13168_s2 + $0xc8] sm:$0xff]   ;;  %13342 = vst [vmem:[#allocation11_spill] sm:$0xff] %v9790_v48  ;;  %v9793_v51 = vor.u32 %v1489_v49, %v9790_v48 }
  0x6f   :  { %v644_v59 = vld [vmem:[#allocation5 + $0x1f8] sm:$0xff]  ;;  %1256 = vmatprep.mubr.bf16.mxu1 %v8951_v0  ;;  %8340 = vmatpush3.bf16.msra.mxu1 %v8968_v11  ;;  %v1369_v27 = vshrl.u32 %v1355_v25, 16  ;;  %v1354_v28 = vsel %vm115_vm5, 0, %v1345_v26  ;;  %v1372_v34 = vshll.u32 %v1355_v25, 16  ;;  %v8983_v35 = vld [vmem:[%s13168_s2 + $0x88] sm:$0xff]   ;;  %v8979_v36 = vld [vmem:[%s13168_s2 + $0x40] sm:$0xff]  }
  0x70   :  { %v646_v60 = vld [vmem:[#allocation5 + $0x21c] sm:$0xff]  ;;  %8341 = vmatprep.subr.bf16.mxu1 %v8970_v12  ;;  %v1364_v31 = vshrl.u32 %v1354_v28, 16  ;;  %v1455_v41 = vld [vmem:[#allocation3 + $0x4] sm:$0xf]  ;;  %13343 = vst [vmem:[#allocation12_spill] sm:$0xff] %v9793_v51  ;;  %vm1494_vm13 = vcmp.ne.s16.totalorder %v9793_v51, 0 }
  0x71   :  { %v7560_v63 = vcombine.low %v644_v59, %v646_v60  ;;  %8284 = vmatpush3.bf16.msra.mxu0 %v8969_v15  ;;  %v9765_v32 = vrot.slane %v1369_v27, 7  ;;  %v8981_v39 = vld [vmem:[%s13168_s2] sm:$0xff]   ;;  %1463 = vst [vmem:[#allocation5 + $0x4] sm:$0xf] %v1455_v41  ;;  %v8988_v47 = vld [vmem:[%s13168_s2 + $0x178] sm:$0xff]  }
  0x72   :  { %v8953_v2 = vld [vmem:[#allocation5 + $0x200] ss:$36 sps:$4 sm:$0xff]   ;;  %8285 = vmatprep.subr.bf16.mxu0 %v8973_v20  ;;  %v7612_v37 = vrot.slane %v1364_v31, 11  ;;  %v13174_v20 = vrot.slane %v9790_v48, 4 }
  0x73   :  { %1160 = vmatmul.mubr.bf16.gmra.mxu0 %v7560_v63  ;;  %8342 = vmatpush3.bf16.msra.mxu1 %v8971_v13  ;;  %v1374_v38 = vor.u32 %v1372_v34, %v9765_v32  ;;  %v8984_v42 = vld [vmem:[%s13168_s2 + $0xc0] sm:$0xff]  }
  0x74   :  { %8343 = vmatprep.subr.bf16.mxu1 %v8972_v16  ;;  %v8987_v43 = vld [vmem:[%s13168_s2 + $0x80] sm:$0xff]  }
  0x75   :  { %8286 = vmatpush3.bf16.msra.mxu0 %v8975_v21  ;;  %v1375_v40 = vsel %vm9523_vm9, %v7612_v37, %v1374_v38  ;;  %v9798_v1 = vld [vmem:[%s13169_s4] ss:$0 sm:$0xff]  ;;  %v1471_v56 = vld [vmem:[#allocation3 + $0x4] sm:$0xf] }
  0x76   :  { %1257 = vmatmul.mubr.bf16.gmra.mxu1 %v8953_v2  ;;  %8287 = vmatprep.subr.bf16.mxu0 %v8979_v36  ;;  %1447 = vst [vmem:[#allocation5] sm:$0xf] %v1375_v40  ;;  %v1497_v0 = vsel %vm1494_vm13, 0, %v1471_v56  ;;  %v4439_v10 = vld [vmem:[#allocation4 + $0x4] sm:$0xf] }
  0x77   :  { %8344 = vmatpush3.bf16.msra.mxu1 %v8974_v17  ;;  %v1507_v11 = vshrl.u32 %v1497_v0, 16  ;;  %v1510_v8 = vshll.u32 %v1497_v0, 16  ;;  %v1606_v38 = vld [vmem:[#allocation3 + $0x4] sm:$0x8] }
  0x78   :  { %8345 = vmatprep.subr.bf16.mxu1 %v8976_v18 }
  0x79   :  { %8288 = vmatpush3.bf16.msra.mxu0 %v8981_v39  ;;  %v1509_v23 = vrot.slane %v1507_v11, 4  ;;  %v9817_v39 = vsel %vm9523_vm9, %v13174_v20, %v9793_v51 }
  0x7a   :  { %8401 = vmatprep.subr.bf16.mxu0 %v8988_v47  ;;  %13344 = vst [vmem:[#allocation13_spill] sm:$0xff] %v9817_v39  ;;  %vm1495_vm14 = vcmp.ne.s16.totalorder %v9817_v39, 0 }
  0x7b   :  { %8346 = vmatpush3.bf16.msra.mxu1 %v8977_v19  ;;  %v4448_v19 = vsel %vm9505_vm8, 0, %v4439_v10 }
  0x7c   :  { %8347 = vmatprep.subr.bf16.mxu1 %v8978_v22  ;;  %v4438_v22 = vld [vmem:[#allocation4] sm:$0x8] }
  0x7d   :  { %v4447_v37 = vsel %vm115_vm5, 0, %v4438_v22 }
  0x7e   :  { %v4457_v47 = vshrl.u32 %v4447_v37, 16 }
  0x7f   :  { %8348 = vmatpush3.bf16.msra.mxu1 %v8980_v24  ;;  %v1512_v24 = vrot.slane %v1510_v8, 5 }
  0x80   :  { %8349 = vmatprep.subr.bf16.mxu1 %v8982_v30  ;;  %v4462_v30 = vshrl.u32 %v4448_v19, 16  ;;  %v9833_v10 = vrot.slane %v4457_v47, 11 }
  0x81   :  { %v1513_v41 = vor.u32 %v1512_v24, %v1509_v23 }
  0x82   :  { %v9819_v49 = vrot.slane %v4462_v30, 7  ;;  %13346 = vst [vmem:[#allocation15_spill] sm:$0xff] %v9833_v10 }
  0x83   :  { %8350 = vmatpush3.bf16.msra.mxu1 %v8983_v35 }
  0x84   :  { %8351 = vmatprep.subr.bf16.mxu1 %v8984_v42  ;;  %13345 = vst [vmem:[#allocation14_spill] sm:$0xff] %v9819_v49 }
  0x87   :  { %8352 = vmatpush3.bf16.msra.mxu1 %v8987_v43 }
  0xf4   :  { %v8161_v50 = vpop.f32.mrf.mxu0  ;;  %v8225_v52 = vpop.f32.mrf.mxu1 }
  0xf6   :  { %v8162_v53 = vpop.f32.mrf.mxu0  ;;  %v8226_v29 = vpop.f32.mrf.mxu1 }
  0xf7   :  { %v8163_v54 = vadd.f32 %v8162_v53, %v8161_v50  ;;  %v8227_v3 = vadd.f32 %v8226_v29, %v8225_v52  ;;  %v4465_v50 = vshll.u32 %v4448_v19, 16  ;;  %v1615_v52 = vsel %vm115_vm5, 0, %v1606_v38 }
  0xf8   :  { %v8164_v55 = vpop.f32.mrf.mxu0  ;;  %v8228_v58 = vpop.f32.mrf.mxu1 }
  0xf9   :  { %v1106_v60 = vadd.f32 %v8163_v54, %v9798_v1  ;;  %v9836_v11 = vor.u32 %v4465_v50, %v9819_v49 }
  0xfa   :  { %v8165_v59 = vpop.f32.mrf.mxu0  ;;  %v8229_v63 = vpop.f32.mrf.mxu1 }
  0xfb   :  { %v8166_v62 = vadd.f32 %v8165_v59, %v8164_v55  ;;  %v8230_v5 = vadd.f32 %v8229_v63, %v8228_v58  ;;  %v1203_v12 = vadd.f32 %v8227_v3, %v1106_v60  ;;  %v9825_v60 = vrot.slane %v1513_v41, 4  ;;  %13347 = vst [vmem:[#allocation16_spill] sm:$0xff] %v9836_v11 }
  0xfc   :  { %v8167_v2 = vpop.f32.mrf.mxu0  ;;  %v1625_v3 = vshrl.u32 %v1615_v52, 16 }
  0xfd   :  { %v1109_v4 = vadd.f32 %v8166_v62, %v9798_v1 }
  0xfe   :  { %v8231_v6 = vpop.f32.mrf.mxu1  ;;  %v8168_v7 = vpop.f32.mrf.mxu0  ;;  %v9866_v41 = vrot.slane %v1625_v3, 11 }
  0xff   :  { %v1206_v13 = vadd.f32 %v8230_v5, %v1109_v4  ;;  %v8169_v14 = vadd.f32 %v8168_v7, %v8167_v2 }
 0x100   :  { %v8232_v15 = vpop.f32.mrf.mxu1  ;;  %v8170_v16 = vpop.f32.mrf.mxu0 }
 0x101   :  { %v8005_v17 = vpack.c.bf16 %v1206_v13, %v1203_v12  ;;  %v1114_v25 = vadd.f32 %v8169_v14, %v9798_v1  ;;  %v8233_v31 = vadd.f32 %v8232_v15, %v8231_v6 }
 0x102   :  { %v8234_v18 = vpop.f32.mrf.mxu1  ;;  %v8171_v21 = vpop.f32.mrf.mxu0 }
 0x103   :  { %8122 = vst [vmem:[#allocation3 + $0x8] sm:$0xff] %v8005_v17   ;;  %v8172_v26 = vadd.f32 %v8171_v21, %v8170_v16  ;;  %v1211_v42 = vadd.f32 %v8233_v31, %v1114_v25 }
 0x104   :  { %v8235_v27 = vpop.f32.mrf.mxu1  ;;  %v8173_v28 = vpop.f32.mrf.mxu0 }
 0x105   :  { %v1117_v34 = vadd.f32 %v8172_v26, %v9798_v1  ;;  %v8236_v35 = vadd.f32 %v8235_v27, %v8234_v18 }
 0x106   :  { %v8174_v40 = vpop.f32.mrf.mxu0 }
 0x107   :  { %v1214_v43 = vadd.f32 %v8236_v35, %v1117_v34  ;;  %v8175_v54 = vadd.f32 %v8174_v40, %v8173_v28 }
 0x108   :  { %v8176_v46 = vpop.f32.mrf.mxu0 }
 0x109   :  { %v8237_v36 = vpop.f32.mrf.mxu1  ;;  %v8010_v53 = vpack.c.bf16 %v1214_v43, %v1211_v42  ;;  %v1122_v16 = vadd.f32 %v8175_v54, %v9798_v1 }
 0x10a   :  { %v1348_v55 = vld [vmem:[#allocation3 + $0xc] sm:$0xf]  ;;  %v1456_v56 = vld [vmem:[#allocation3 + $0x8] sm:$0xf]  ;;  %v8177_v58 = vpop.f32.mrf.mxu0 }
 0x10b   :  { %v8238_v44 = vpop.f32.mrf.mxu1  ;;  %v1357_v62 = vsel %vm9505_vm8, 0, %v1348_v55  ;;  %v1457_v63 = vld [vmem:[#allocation3 + $0xc] sm:$0xf]  ;;  %v1472_v0 = vld [vmem:[#allocation3 + $0x8] sm:$0xf]  ;;  %8123 = vst [vmem:[#allocation3 + $0x10] sm:$0xff] %v8010_v53   ;;  %v8178_v23 = vadd.f32 %v8177_v58, %v8176_v46 }
 0x10c   :  { %1464 = vst [vmem:[#allocation5 + $0x28] sm:$0xf] %v1456_v56  ;;  %v1387_v4 = vshrl.u32 %v1357_v62, 16  ;;  %v1473_v5 = vld [vmem:[#allocation3 + $0xc] sm:$0xf]  ;;  %v1498_v6 = vsel %vm1495_vm14, 0, %v1472_v0  ;;  %v8239_v30 = vadd.f32 %v8238_v44, %v8237_v36 }
 0x10d   :  { %v8240_v29 = vpop.f32.mrf.mxu1  ;;  %1465 = vst [vmem:[#allocation5 + $0x4c] sm:$0xf] %v1457_v63  ;;  %v1347_v8 = vld [vmem:[#allocation3 + $0x8] sm:$0xf]  ;;  %v1499_v12 = vsel %vm1495_vm14, 0, %v1473_v5  ;;  %v1516_v13 = vshll.u32 %v1498_v6, 16  ;;  %v1125_v53 = vadd.f32 %v8178_v23, %v9798_v1 }
 0x10e   :  { %v9831_v7 = vpop.f32.mrf.mxu0  ;;  %v1520_v14 = vshrl.u32 %v1498_v6, 16  ;;  %v1607_v15 = vld [vmem:[#allocation3 + $0x8] sm:$0xf]  ;;  %v1526_v18 = vshll.u32 %v1499_v12, 16  ;;  %v1530_v19 = vshrl.u32 %v1499_v12, 16  ;;  %v9849_v25 = vrot.slane %v1387_v4, 7 }
 0x10f   :  { %v8241_v2 = vpop.f32.mrf.mxu1  ;;  %v1608_v21 = vld [vmem:[#allocation3 + $0xc] sm:$0xf]  ;;  %v9845_v22 = vsel %vm9505_vm8, 0, %v1607_v15  ;;  %v9851_v26 = vrot.slane %v1516_v13, 5  ;;  %v1716_v28 = vld [vmem:[#allocation3 + $0x8] sm:$0xf]  ;;  %v9870_v46 = vadd.f32 %v8239_v30, %v1122_v16 }
 0x110   :  { %v9847_v24 = vpop.f32.mrf.mxu0  ;;  %v1522_v27 = vrot.slane %v1520_v14, 4  ;;  %v9857_v34 = vsel %vm9505_vm8, 0, %v1608_v21  ;;  %v1630_v35 = vshrl.u32 %v9845_v22, 16  ;;  %v1717_v37 = vld [vmem:[#allocation3 + $0xc] sm:$0xf]  ;;  %v1390_v36 = vshll.u32 %v1357_v62, 16 }
 0x111   :  { %1724 = vst [vmem:[#allocation5 + $0x10] sm:$0xf] %v1716_v28  ;;  %v9868_v42 = vrot.slane %v1526_v18, 5  ;;  %v1532_v43 = vrot.slane %v1530_v19, 4  ;;  %1725 = vst [vmem:[#allocation5 + $0x34] sm:$0xf] %v1717_v37  ;;  %v8242_v54 = vadd.f32 %v8241_v2, %v8240_v29 }
 0x112   :  { %v9860_v38 = vpop.f32.mrf.mxu0  ;;  %v1732_v44 = vld [vmem:[#allocation3 + $0x8] sm:$0xf]  ;;  %v1733_v50 = vld [vmem:[#allocation3 + $0xc] sm:$0xf]  ;;  %v9881_v56 = vsel %vm9505_vm8, 0, %v1347_v8  ;;  %v9884_v58 = vor.u32 %v1390_v36, %v9849_v25  ;;  %v1523_v63 = vor.u32 %v1522_v27, %v9851_v26  ;;  %v1639_v0 = vshrl.u32 %v9857_v34, 16 }
 0x113   :  { %v9841_v17 = vpop.f32.mrf.mxu1  ;;  %v1741_v52 = vsel %vm1494_vm13, 0, %v1732_v44  ;;  %v1850_v3 = vld [vmem:[#allocation3 + $0x8] sm:$0x8]  ;;  %v1851_v4 = vld [vmem:[#allocation3 + $0xc] sm:$0xf]  ;;  %v9891_v29 = vrot.slane %v1630_v35, 7  ;;  %v1533_v14 = vor.u32 %v1532_v43, %v9868_v42  ;;  %v9924_v40 = vadd.f32 %v8242_v54, %v1125_v53 }
 0x114   :  { %v9877_v55 = vpop.f32.mrf.mxu0  ;;  %v1742_v2 = vsel %vm1495_vm14, 0, %v1733_v50  ;;  %v1751_v6 = vshrl.u32 %v1741_v52, 16  ;;  %v1754_v8 = vshll.u32 %v1741_v52, 16  ;;  %v1960_v12 = vld [vmem:[#allocation3 + $0xc] sm:$0xf]  ;;  %v1859_v27 = vsel %vm115_vm5, 0, %v1850_v3 }
 0x115   :  { %v9853_v31 = vpop.f32.mrf.mxu1  ;;  %v1760_v16 = vshll.u32 %v1742_v2, 16  ;;  %v1764_v18 = vshrl.u32 %v1742_v2, 16  ;;  %1968 = vst [vmem:[#allocation5 + $0x1c] sm:$0xf] %v1960_v12  ;;  %v1976_v19 = vld [vmem:[#allocation3 + $0xc] sm:$0xf] }
 0x116   :  { %v1753_v21 = vrot.slane %v1751_v6, 4  ;;  %v1756_v23 = vrot.slane %v1754_v8, 5  ;;  %v9903_v28 = vsel %vm9505_vm8, 0, %v1851_v4  ;;  %v1349_v30 = vld [vmem:[#allocation3 + $0x10] sm:$0xf]  ;;  %v9907_v37 = vrot.slane %v1639_v0, 7 }
 0x117   :  { %v9872_v47 = vpop.f32.mrf.mxu1  ;;  %13348 = vst [vmem:[#allocation17_spill] sm:$0xff] %v9903_v28  ;;  %v9909_v36 = vrot.slane %v1760_v16, 5  ;;  %v1766_v43 = vrot.slane %v1764_v18, 4  ;;  %v1874_v44 = vshrl.u32 %v9903_v28, 16  ;;  %v1350_v50 = vld [vmem:[#allocation3 + $0x14] sm:$0xf] }
 0x118   :  { %v9895_v13 = vpop.f32.mrf.mxu0  ;;  %13349 = vst [vmem:[#allocation18_spill] sm:$0xff] %v9907_v37  ;;  %v1757_v2 = vor.u32 %v1756_v23, %v1753_v21  ;;  %v1869_v6 = vshrl.u32 %v1859_v27, 16  ;;  %v1985_v3 = vsel %vm1494_vm13, 0, %v1976_v19  ;;  %v9918_v4 = vsel %vm9505_vm8, 0, %v1349_v30  ;;  %v1458_v8 = vld [vmem:[#allocation3 + $0x10] sm:$0xf] }
 0x119   :  { %v9889_v5 = vpop.f32.mrf.mxu1  ;;  %13350 = vst [vmem:[#allocation19_spill] sm:$0xff] %v9909_v36  ;;  %v9920_v0 = vrot.slane %v1523_v63, 4  ;;  %v1642_v12 = vshll.u32 %v9857_v34, 16  ;;  %v1767_v16 = vor.u32 %v1766_v43, %v9909_v36  ;;  %v1459_v18 = vld [vmem:[#allocation3 + $0x14] sm:$0xf]  ;;  %v9926_v21 = vrot.slane %v1874_v44, 7 }
 0x11a   :  { %v9912_v52 = vpop.f32.mrf.mxu0  ;;  %1466 = vst [vmem:[#allocation5 + $0x70] sm:$0xf] %v1458_v8  ;;  %v1995_v23 = vshrl.u32 %v1985_v3, 16  ;;  %v1359_v19 = vsel %vm9505_vm8, 0, %v1350_v50  ;;  %v1396_v27 = vshrl.u32 %v9918_v4, 16  ;;  %v9933_v20 = vrot.slane %v1533_v14, 4 }
 0x11b   :  { %13351 = vst [vmem:[#allocation20_spill] sm:$0xff] %v9926_v21  ;;  %v1474_v30 = vld [vmem:[#allocation3 + $0x10] sm:$0xf]  ;;  %1467 = vst [vmem:[#allocation5 + $0x94] sm:$0xf] %v1459_v18  ;;  %v9940_v8 = vrot.slane %v1757_v2, 4 }
 0x11c   :  { %13352 = vst [vmem:[#allocation21_spill] sm:$0xff] %v9933_v20  ;;  %v1475_v54 = vld [vmem:[#allocation3 + $0x14] sm:$0xf]  ;;  %v9938_v44 = vpop.f32.mrf.mxu0  ;;  %v9942_v50 = vrot.slane %v1869_v6, 11  ;;  %v1998_v62 = vshll.u32 %v1985_v3, 16  ;;  %v1405_v59 = vshrl.u32 %v1359_v19, 16 }
 0x11d   :  { %13353 = vst [vmem:[#allocation22_spill] sm:$0xff] %v9940_v8  ;;  %v1609_v18 = vld [vmem:[#allocation3 + $0x10] sm:$0xf]  ;;  %v9944_v15 = vrot.slane %v1767_v16, 4  ;;  %v9946_v14 = vrot.slane %v1396_v27, 7  ;;  %v1500_v34 = vsel %vm1495_vm14, 0, %v1474_v30 }
 0x11e   :  { %v9905_v35 = vpop.f32.mrf.mxu1  ;;  %13354 = vst [vmem:[#allocation23_spill] sm:$0xff] %v9942_v50  ;;  %v1501_v53 = vsel %vm1495_vm14, 0, %v1475_v54  ;;  %v1610_v43 = vld [vmem:[#allocation3 + $0x14] sm:$0xf]  ;;  %v9953_v2 = vrot.slane %v1995_v23, 4  ;;  %v1536_v6 = vshll.u32 %v1500_v34, 16  ;;  %v9965_v49 = vpop.f32.mrf.mxu0 }
 0x11f   :  { %13355 = vst [vmem:[#allocation24_spill] sm:$0xff] %v9944_v15  ;;  %13356 = vst [vmem:[#allocation25_spill] sm:$0xff] %v9946_v14  ;;  %v9957_v3 = vsel %vm9505_vm8, 0, %v1609_v18  ;;  %v1718_v16 = vld [vmem:[#allocation3 + $0x10] sm:$0xf]  ;;  %v1540_v27 = vshrl.u32 %v1500_v34, 16 }
 0x120   :  { %v9931_v63 = vpop.f32.mrf.mxu1  ;;  %13357 = vst [vmem:[#allocation26_spill] sm:$0xff] %v9953_v2  ;;  %v1546_v15 = vshll.u32 %v1501_v53, 16  ;;  %v1550_v28 = vshrl.u32 %v1501_v53, 16  ;;  %v9963_v30 = vsel %vm9505_vm8, 0, %v1610_v43  ;;  %v1719_v54 = vld [vmem:[#allocation3 + $0x14] sm:$0xf] }
 0x121   :  { %1726 = vst [vmem:[#allocation5 + $0x58] sm:$0xf] %v1718_v16  ;;  %v9967_v23 = vrot.slane %v1998_v62, 5  ;;  %v1399_v2 = vshll.u32 %v9918_v4, 16  ;;  %v9970_v18 = vrot.slane %v1405_v59, 7  ;;  %v1408_v21 = vshll.u32 %v1359_v19, 16 }
 0x122   :  { %v9959_v50 = vpop.f32.mrf.mxu1  ;;  %1727 = vst [vmem:[#allocation5 + $0x7c] sm:$0xf] %v1719_v54  ;;  %v1734_v8 = vld [vmem:[#allocation3 + $0x10] sm:$0xf]  ;;  %v9973_v53 = vrot.slane %v1536_v6, 5  ;;  %v1542_v36 = vrot.slane %v1540_v27, 4  ;;  %v9989_v6 = vor.u32 %v1642_v12, %v9907_v37 }
 0x123   :  { %13358 = vst [vmem:[#allocation27_spill] sm:$0xff] %v9967_v23  ;;  %13359 = vst [vmem:[#allocation28_spill] sm:$0xff] %v9970_v18  ;;  %v1648_v43 = vshrl.u32 %v9957_v3, 16  ;;  %v1735_v20 = vld [vmem:[#allocation3 + $0x14] sm:$0xf]  ;;  %v9976_v16 = vrot.slane %v1546_v15, 5  ;;  %v9993_v23 = vpop.f32.mrf.mxu0  ;;  %v9999_v11 = vor.u32 %v1408_v21, %v9970_v18 }
 0x124   :  { %13360 = vst [vmem:[#allocation29_spill] sm:$0xff] %v9973_v53  ;;  %v1552_v45 = vrot.slane %v1550_v28, 4  ;;  %v1657_v62 = vshrl.u32 %v9963_v30, 16  ;;  %v1743_v59 = vsel %vm1495_vm14, 0, %v1734_v8  ;;  %v9981_v4 = vpop.f32.mrf.mxu1  ;;  %v13362_v19 = vshll.u32 %v9845_v22, 16 }
 0x125   :  { %13361 = vst [vmem:[#allocation30_spill] sm:$0xff] %v9976_v16  ;;  %v1744_v15 = vsel %vm1495_vm14, 0, %v1735_v20  ;;  %v1770_v27 = vshll.u32 %v1743_v59, 16  ;;  %v1852_v28 = vld [vmem:[#allocation3 + $0x10] sm:$0xf]  ;;  %v9996_v8 = vor.u32 %v1399_v2, %v9946_v14  ;;  %13363 = vst [vmem:[#allocation31_spill] sm:$0xff] %v9999_v11  ;;  %v1543_v37 = vor.u32 %v1542_v36, %v9973_v53 }
 0x126   :  { %v9986_v54 = vor.u32 %v13362_v19, %v9891_v29  ;;  %v1961_v34 = vld [vmem:[#allocation3 + $0x10] sm:$0xf]  ;;  %v1774_v19 = vshrl.u32 %v1743_v59, 16  ;;  %v1853_v10 = vld [vmem:[#allocation3 + $0x14] sm:$0xf]  ;;  %v10003_v20 = vrot.slane %v1648_v43, 7  ;;  %v1553_v2 = vor.u32 %v1552_v45, %v9976_v16  ;;  %v10010_v59 = vpop.f32.mrf.mxu1  ;;  %v8192_v43 = vpop.f32.mrf.mxu0 }
 0x127   :  { %v1962_v12 = vld [vmem:[#allocation3 + $0x14] sm:$0xf]  ;;  %1969 = vst [vmem:[#allocation5 + $0x40] sm:$0xf] %v1961_v34  ;;  %v10005_v51 = vrot.slane %v1770_v27, 5  ;;  %v1780_v61 = vshll.u32 %v1744_v15, 16 }
 0x128   :  { %1970 = vst [vmem:[#allocation5 + $0x64] sm:$0xf] %v1962_v12  ;;  %v1977_v48 = vld [vmem:[#allocation3 + $0x10] sm:$0xf]  ;;  %v10008_v14 = vrot.slane %v1657_v62, 7  ;;  %v1776_v21 = vrot.slane %v1774_v19, 4  ;;  %v10045_v39 = vpop.f32.mrf.mxu0 }
 0x129   :  { %13364 = vst [vmem:[#allocation32_spill] sm:$0xff] %v10005_v51  ;;  %v1784_v11 = vshrl.u32 %v1744_v15, 16  ;;  %v1978_v22 = vld [vmem:[#allocation3 + $0x14] sm:$0xf]  ;;  %v10012_v18 = vrot.slane %v1780_v61, 5  ;;  %v10016_v36 = vsel %vm9505_vm8, 0, %v1852_v28 }
 0x12a   :  { %13366 = vst [vmem:[#allocation34_spill] sm:$0xff] %v10016_v36  ;;  %v10020_v34 = vsel %vm9505_vm8, 0, %v1853_v10  ;;  %v10024_v45 = vsel %vm1495_vm14, 0, %v1977_v48  ;;  %v1777_v15 = vor.u32 %v1776_v21, %v10005_v51  ;;  %v1883_v61 = vshrl.u32 %v10016_v36, 16 }
 0x12b   :  { %13365 = vst [vmem:[#allocation33_spill] sm:$0xff] %v10012_v18  ;;  %13367 = vst [vmem:[#allocation35_spill] sm:$0xff] %v10020_v34  ;;  %v1786_v27 = vrot.slane %v1784_v11, 4  ;;  %v1892_v28 = vshrl.u32 %v10020_v34, 16  ;;  %v1987_v10 = vsel %vm1495_vm14, 0, %v1978_v22  ;;  %v2004_v12 = vshll.u32 %v10024_v45, 16  ;;  %v10040_v11 = vpop.f32.mrf.mxu1 }
 0x12c   :  { %v10034_v16 = vrot.slane %v1543_v37, 4  ;;  %v10036_v48 = vrot.slane %v1553_v2, 4  ;;  %v10043_v19 = vrot.slane %v1883_v61, 7  ;;  %v2014_v53 = vshll.u32 %v1987_v10, 16  ;;  %v13421_v34 = vld [vmem:[#allocation15_spill] sm:$0xff] }
 0x12d   :  { %v1787_v21 = vor.u32 %v1786_v27, %v10012_v18  ;;  %v2018_v9 = vshrl.u32 %v1987_v10, 16  ;;  %v10047_v22 = vrot.slane %v1777_v15, 4  ;;  %v2008_v62 = vshrl.u32 %v10024_v45, 16  ;;  %v10066_v37 = vpop.f32.mrf.mxu1 }
 0x12e   :  { %13368 = vst [vmem:[#allocation36_spill] sm:$0xff] %v10036_v48  ;;  %13369 = vst [vmem:[#allocation37_spill] sm:$0xff] %v10043_v19  ;;  %v10052_v48 = vrot.slane %v1892_v28, 7  ;;  %v10054_v27 = vrot.slane %v2004_v12, 5  ;;  %v10056_v18 = vrot.slane %v2014_v53, 5  ;;  %v8015_v10 = vpack.c.bf16 %v9924_v40, %v9870_v46  ;;  %v10074_v12 = vpop.f32.mrf.mxu0 }
 0x12f   :  { %13370 = vst [vmem:[#allocation38_spill] sm:$0xff] %v10047_v22  ;;  %v2020_v61 = vrot.slane %v2018_v9, 4  ;;  %v10058_v51 = vrot.slane %v1787_v21, 4  ;;  %v8181_v15 = vadd.f32 %v9847_v24, %v9831_v7  ;;  %v8184_v2 = vadd.f32 %v9877_v55, %v9860_v38  ;;  %v2204_v40 = vld [vmem:[#allocation3 + $0x34] sm:$0xf] }
 0x130   :  { %13371 = vst [vmem:[#allocation39_spill] sm:$0xff] %v10052_v48  ;;  %13372 = vst [vmem:[#allocation40_spill] sm:$0xff] %v10054_v27  ;;  %v8245_v9 = vadd.f32 %v9853_v31, %v9841_v17  ;;  %v8187_v53 = vadd.f32 %v9912_v52, %v9895_v13  ;;  %v8248_v38 = vadd.f32 %v9889_v5, %v9872_v47  ;;  %v1378_v13 = vshrl.u32 %v9881_v56, 16  ;;  %v8259_v5 = vpop.f32.mrf.mxu1 }
 0x131   :  { %13373 = vst [vmem:[#allocation41_spill] sm:$0xff] %v10056_v18  ;;  %13374 = vst [vmem:[#allocation42_spill] sm:$0xff] %v10058_v51  ;;  %v2021_v28 = vor.u32 %v2020_v61, %v10056_v18  ;;  %v1130_v7 = vadd.f32 %v8181_v15, %v9798_v1  ;;  %v1133_v24 = vadd.f32 %v8184_v2, %v9798_v1 }
 0x132   :  { %8124 = vst [vmem:[#allocation3 + $0x18] sm:$0xff] %v8015_v10   ;;  %v8190_v46 = vadd.f32 %v9965_v49, %v9938_v44  ;;  %2212 = vst [vmem:[#allocation5 + $0x124] sm:$0xf] %v2204_v40  ;;  %v1138_v17 = vadd.f32 %v8187_v53, %v9798_v1  ;;  %v8251_v31 = vadd.f32 %v9931_v63, %v9905_v35  ;;  %v1380_v49 = vrot.slane %v1378_v13, 7  ;;  %v8197_v63 = vpop.f32.mrf.mxu0  ;;  %v8261_v40 = vpop.f32.mrf.mxu1 }
 0x133   :  { %v8254_v55 = vadd.f32 %v9981_v4, %v9959_v50  ;;  %v1227_v52 = vadd.f32 %v8245_v9, %v1130_v7  ;;  %v1230_v21 = vadd.f32 %v8248_v38, %v1133_v24  ;;  %v8193_v47 = vadd.f32 %v8192_v43, %v9993_v23 }
 0x134   :  { %v1141_v2 = vadd.f32 %v8190_v46, %v9798_v1  ;;  %v1235_v61 = vadd.f32 %v8251_v31, %v1138_v17  ;;  %v1381_v44 = vshll.u32 %v9881_v56, 16  ;;  %v1519_v35 = vsel %vm9487_vm6, %v9825_v60, %v9851_v26  ;;  %v8198_v46 = vpop.f32.mrf.mxu0 }
 0x135   :  { %v8020_v50 = vpack.c.bf16 %v1230_v21, %v1227_v52  ;;  %v1146_v10 = vadd.f32 %v8193_v47, %v9798_v1  ;;  %v1529_v23 = vsel %vm9487_vm6, %v9920_v0, %v9868_v42  ;;  %1598 = vst [vmem:[#allocation5 + $0x8] sm:$0xf] %v1519_v35  ;;  %v1385_v15 = vrot.slane %v1380_v49, 4 }
 0x136   :  { %v1238_v4 = vadd.f32 %v8254_v55, %v1141_v2  ;;  %v1383_v43 = vor.u32 %v1381_v44, %v1380_v49  ;;  %1599 = vst [vmem:[#allocation5 + $0x2c] sm:$0xf] %v1529_v23  ;;  %v1636_v56 = vsel %vm9523_vm9, %v9866_v41, %v9986_v54  ;;  %v13375_v60 = vrot.slane %v9891_v29, 4 }
 0x137   :  { %v10110_v53 = vrot.slane %v2008_v62, 4  ;;  %v10112_v42 = vrot.slane %v2021_v28, 4  ;;  %8125 = vst [vmem:[#allocation3 + $0x20] sm:$0xff] %v8020_v50   ;;  %1708 = vst [vmem:[#allocation5 + $0xc] sm:$0xf] %v1636_v56  ;;  %v13378_v54 = vrot.slane %v9765_v32, 4  ;;  %v1393_v62 = vsel %vm9523_vm9, %v1385_v15, %v9884_v58 }
 0x138   :  { %v1645_v26 = vsel %vm9523_vm9, %v13375_v60, %v9989_v6  ;;  %v8025_v0 = vpack.c.bf16 %v1238_v4, %v1235_v61  ;;  %v8257_v6 = vadd.f32 %v10040_v11, %v10010_v59  ;;  %v13379_v28 = vrot.slane %v9849_v25, 4  ;;  %1449 = vst [vmem:[#allocation5 + $0x48] sm:$0xf] %v1393_v62  ;;  %v8262_v4 = vpop.f32.mrf.mxu1 }
 0x139   :  { %13376 = vst [vmem:[#allocation43_spill] sm:$0xff] %v10110_v53  ;;  %13377 = vst [vmem:[#allocation44_spill] sm:$0xff] %v10112_v42  ;;  %v1351_v7 = vld [vmem:[#allocation3 + $0x18] sm:$0xf]  ;;  %v1352_v24 = vld [vmem:[#allocation3 + $0x1c] sm:$0xf]  ;;  %v1384_v29 = vsel %vm9523_vm9, %v13378_v54, %v1383_v43  ;;  %v8196_v21 = vadd.f32 %v10074_v12, %v10045_v39  ;;  %v8260_v35 = vadd.f32 %v8259_v5, %v10066_v37 }
 0x13a   :  { %1709 = vst [vmem:[#allocation5 + $0x30] sm:$0xf] %v1645_v26  ;;  %v1460_v41 = vld [vmem:[#allocation3 + $0x18] sm:$0xf]  ;;  %v1402_v38 = vsel %vm9523_vm9, %v13379_v28, %v9996_v8  ;;  %v13380_v32 = vshll.u32 %v9957_v3, 16  ;;  %v13381_v31 = vshll.u32 %v9963_v30, 16  ;;  %v10148_v52 = vadd.f32 %v8257_v6, %v1146_v10 }
 0x13b   :  { %v10140_v58 = vsel %vm9505_vm8, 0, %v1351_v7  ;;  %v10144_v25 = vsel %vm9505_vm8, 0, %v1352_v24  ;;  %v1461_v8 = vld [vmem:[#allocation3 + $0x1c] sm:$0xf]  ;;  %v1476_v55 = vld [vmem:[#allocation3 + $0x18] sm:$0xf]  ;;  %v8199_v50 = vadd.f32 %v8198_v46, %v8197_v63  ;;  %v1149_v24 = vadd.f32 %v8196_v21, %v9798_v1 }
 0x13c   :  { %v10131_v17 = vor.u32 %v13380_v32, %v10003_v20  ;;  %v10136_v59 = vor.u32 %v13381_v31, %v10008_v14  ;;  %1468 = vst [vmem:[#allocation5 + $0xb8] sm:$0xf] %v1460_v41  ;;  %8126 = vst [vmem:[#allocation3 + $0x38] sm:$0xff] %v8025_v0   ;;  %v1414_v3 = vshrl.u32 %v10140_v58, 16  ;;  %v1423_v30 = vshrl.u32 %v10144_v25, 16 }
 0x13d   :  { %1448 = vst [vmem:[#allocation5 + $0x24] sm:$0xf] %v1384_v29  ;;  %1450 = vst [vmem:[#allocation5 + $0x6c] sm:$0xf] %v1402_v38  ;;  %v1477_v13 = vld [vmem:[#allocation3 + $0x1c] sm:$0xf]  ;;  %v10172_v41 = vadd.f32 %v8262_v4, %v8261_v40 }
 0x13e   :  { %1469 = vst [vmem:[#allocation5 + $0xdc] sm:$0xf] %v1461_v8  ;;  %v1502_v47 = vsel %vm1495_vm14, 0, %v1476_v55  ;;  %v1503_v61 = vsel %vm1495_vm14, 0, %v1477_v13  ;;  %v1611_v49 = vld [vmem:[#allocation3 + $0x18] sm:$0xf] }
 0x13f   :  { %v1612_v44 = vld [vmem:[#allocation3 + $0x1c] sm:$0xf]  ;;  %v10157_v23 = vrot.slane %v1414_v3, 7  ;;  %v10159_v43 = vrot.slane %v1423_v30, 7  ;;  %v1556_v10 = vshll.u32 %v1502_v47, 16  ;;  %v1560_v15 = vshrl.u32 %v1502_v47, 16 }
 0x140   :  { %v1720_v56 = vld [vmem:[#allocation3 + $0x18] sm:$0xf]  ;;  %v1566_v39 = vshll.u32 %v1503_v61, 16  ;;  %v1570_v12 = vshrl.u32 %v1503_v61, 16  ;;  %v10163_v60 = vsel %vm9505_vm8, 0, %v1611_v49  ;;  %v10167_v26 = vsel %vm9505_vm8, 0, %v1612_v44 }
 0x141   :  { %v1721_v37 = vld [vmem:[#allocation3 + $0x1c] sm:$0xf]  ;;  %1728 = vst [vmem:[#allocation5 + $0xa0] sm:$0xf] %v1720_v56  ;;  %v1417_v5 = vshll.u32 %v10140_v58, 16  ;;  %v1426_v63 = vshll.u32 %v10144_v25, 16 }
 0x142   :  { %1729 = vst [vmem:[#allocation5 + $0xc4] sm:$0xf] %v1721_v37  ;;  %v1736_v0 = vld [vmem:[#allocation3 + $0x18] sm:$0xf]  ;;  %v1737_v7 = vld [vmem:[#allocation3 + $0x1c] sm:$0xf]  ;;  %v10201_v37 = vadd.f32 %v8199_v50, %v9798_v1 }
 0x143   :  { %v10174_v54 = vrot.slane %v1556_v10, 5  ;;  %v1562_v29 = vrot.slane %v1560_v15, 4  ;;  %v10176_v6 = vrot.slane %v1566_v39, 5  ;;  %v1572_v62 = vrot.slane %v1570_v12, 4  ;;  %v1854_v8 = vld [vmem:[#allocation3 + $0x18] sm:$0xf] }
 0x144   :  { %v1666_v46 = vshrl.u32 %v10163_v60, 16  ;;  %v1675_v32 = vshrl.u32 %v10167_v26, 16  ;;  %v1745_v40 = vsel %vm1495_vm14, 0, %v1736_v0  ;;  %v1746_v25 = vsel %vm1495_vm14, 0, %v1737_v7  ;;  %v1963_v55 = vld [vmem:[#allocation3 + $0x18] sm:$0xf] }
 0x145   :  { %v1563_v31 = vor.u32 %v1562_v29, %v10174_v54  ;;  %v1573_v58 = vor.u32 %v1572_v62, %v10176_v6  ;;  %v1964_v3 = vld [vmem:[#allocation3 + $0x1c] sm:$0xf]  ;;  %v1790_v21 = vshll.u32 %v1745_v40, 16  ;;  %v1794_v47 = vshrl.u32 %v1745_v40, 16  ;;  %1971 = vst [vmem:[#allocation5 + $0x88] sm:$0xf] %v1963_v55 }
 0x146   :  { %v10188_v30 = vrot.slane %v1666_v46, 7  ;;  %v10190_v13 = vrot.slane %v1675_v32, 7  ;;  %v1855_v61 = vld [vmem:[#allocation3 + $0x1c] sm:$0xf]  ;;  %1972 = vst [vmem:[#allocation5 + $0xac] sm:$0xf] %v1964_v3  ;;  %v10198_v12 = vadd.f32 %v8260_v35, %v1149_v24 }
 0x147   :  { %v13384_v49 = vld [vmem:[#allocation11_spill] sm:$0xff]  ;;  %v13386_v4 = vmov 0  ;;  %v1800_v10 = vshll.u32 %v1746_v25, 16  ;;  %v1804_v15 = vshrl.u32 %v1746_v25, 16  ;;  %v1979_v56 = vld [vmem:[#allocation3 + $0x18] sm:$0xf] }
 0x148   :  { %v13385_v44 = vrot.slane %v13384_v49, 4  ;;  %v1980_v39 = vld [vmem:[#allocation3 + $0x1c] sm:$0xf]  ;;  %v10203_v0 = vrot.slane %v1563_v31, 4  ;;  %v10205_v7 = vrot.slane %v1573_v58, 4  ;;  %v10209_v32 = vrot.slane %v1790_v21, 5 }
 0x149   :  { %v1462_v46 = vld [vmem:[#allocation3 + $0x20] sm:$0xf]  ;;  %v1796_v40 = vrot.slane %v1794_v47, 4  ;;  %v10211_v25 = vrot.slane %v1800_v10, 5  ;;  %v1806_v55 = vrot.slane %v1804_v15, 4  ;;  %v10215_v1 = vsel %vm9505_vm8, 0, %v1854_v8 }
 0x14a   :  { %vm10194_vm15 = vcmp.ne.s16.totalorder %v13385_v44, 0  ;;  %13389 = vst [vmem:[#allocation45_spill] sm:$0xff] %v10209_v32  ;;  %1470 = vst [vmem:[#allocation5 + $0x100] sm:$0xf] %v1462_v46  ;;  %v10219_v35 = vsel %vm9505_vm8, 0, %v1855_v61  ;;  %v1988_v50 = vsel %vm1495_vm14, 0, %v1979_v56  ;;  %v10232_v56 = vor.u32 %v1417_v5, %v10157_v23 }
 0x14b   :  { %v13387_v4 = vsel %vm10194_vm15, 4294967295, %v13386_v4  ;;  %13390 = vst [vmem:[#allocation46_spill] sm:$0xff] %v10211_v25  ;;  %13391 = vst [vmem:[#allocation47_spill] sm:$0xff] %v10215_v1  ;;  %v1989_v24 = vsel %vm1495_vm14, 0, %v1980_v39  ;;  %v1797_v3 = vor.u32 %v1796_v40, %v10209_v32  ;;  %v1901_v21 = vshrl.u32 %v10215_v1, 16 }
 0x14c   :  { %13388 = vst [vmem:[#allocation11_spill] sm:$0xff] %v13387_v4  ;;  %13392 = vst [vmem:[#allocation48_spill] sm:$0xff] %v10219_v35  ;;  %v1353_v8 = vld [vmem:[#allocation3 + $0x20] sm:$0xf]  ;;  %v1807_v47 = vor.u32 %v1806_v55, %v10211_v25  ;;  %v1910_v61 = vshrl.u32 %v10219_v35, 16  ;;  %v2024_v49 = vshll.u32 %v1988_v50, 16  ;;  %v10235_v39 = vor.u32 %v1426_v63, %v10159_v43 }
 0x14d   :  { %v2028_v44 = vshrl.u32 %v1988_v50, 16  ;;  %v1478_v10 = vld [vmem:[#allocation3 + $0x20] sm:$0xf]  ;;  %v10237_v46 = vrot.slane %v1901_v21, 7  ;;  %v2034_v40 = vshll.u32 %v1989_v24, 16  ;;  %v2038_v50 = vshrl.u32 %v1989_v24, 16 }
 0x14e   :  { %v1722_v15 = vld [vmem:[#allocation3 + $0x20] sm:$0xf]  ;;  %v1479_v9 = vld [vmem:[#allocation3 + $0x24] sm:$0x1]  ;;  %v10239_v58 = vrot.slane %v1910_v61, 7  ;;  %v10241_v55 = vrot.slane %v2024_v49, 5 }
 0x14f   :  { %13393 = vst [vmem:[#allocation49_spill] sm:$0xff] %v10237_v46  ;;  %v1723_v45 = vld [vmem:[#allocation3 + $0x24] sm:$0xf]  ;;  %1730 = vst [vmem:[#allocation5 + $0xe8] sm:$0xf] %v1722_v15  ;;  %v2030_v38 = vrot.slane %v2028_v44, 4 }
 0x150   :  { %13394 = vst [vmem:[#allocation50_spill] sm:$0xff] %v10239_v58  ;;  %13395 = vst [vmem:[#allocation51_spill] sm:$0xff] %v10241_v55  ;;  %v1613_v28 = vld [vmem:[#allocation3 + $0x20] sm:$0xf]  ;;  %v10243_v31 = vrot.slane %v1797_v3, 4  ;;  %v1362_v62 = vsel %vm117_vm10, 0, %v1353_v8 }
 0x151   :  { %1731 = vst [vmem:[#allocation5 + $0x10c] sm:$0xf] %v1723_v45  ;;  %v1614_v29 = vld [vmem:[#allocation3 + $0x24] sm:$0xf]  ;;  %v10249_v18 = vrot.slane %v1807_v47, 4  ;;  %v10253_v44 = vrot.slane %v2034_v40, 5  ;;  %v2031_v45 = vor.u32 %v2030_v38, %v10241_v55 }
 0x152   :  { %13396 = vst [vmem:[#allocation52_spill] sm:$0xff] %v10243_v31  ;;  %v1738_v24 = vld [vmem:[#allocation3 + $0x20] sm:$0xf]  ;;  %v1432_v3 = vshrl.u32 %v1362_v62, 16  ;;  %v1504_v15 = vsel %vm1495_vm14, 0, %v1478_v10  ;;  %v1505_v63 = vsel %vm10194_vm15, 0, %v1479_v9 }
 0x153   :  { %13398 = vst [vmem:[#allocation53_spill] sm:$0xff] %v10249_v18  ;;  %13399 = vst [vmem:[#allocation54_spill] sm:$0xff] %v10253_v44  ;;  %v1965_v8 = vld [vmem:[#allocation3 + $0x20] sm:$0xf]  ;;  %v10260_v5 = vrot.slane %v2038_v50, 4  ;;  %v1576_v47 = vshll.u32 %v1504_v15, 16 }
 0x154   :  { %v1580_v42 = vshrl.u32 %v1504_v15, 16  ;;  %v10262_v61 = vshll.u32 %v1505_v63, 16  ;;  %v1966_v49 = vld [vmem:[#allocation3 + $0x24] sm:$0xf]  ;;  %1973 = vst [vmem:[#allocation5 + $0xd0] sm:$0xf] %v1965_v8 }
 0x155   :  { %13400 = vst [vmem:[#allocation55_spill] sm:$0xff] %v10260_v5  ;;  %v1435_v40 = vshll.u32 %v1362_v62, 16  ;;  %v1622_v38 = vsel %vm9505_vm8, 0, %v1613_v28  ;;  %v1623_v44 = vsel %vm117_vm10, 0, %v1614_v29  ;;  %v1739_v10 = vld [vmem:[#allocation3 + $0x24] sm:$0xf] }
 0x156   :  { %v1747_v9 = vsel %vm1495_vm14, 0, %v1738_v24  ;;  %1974 = vst [vmem:[#allocation5 + $0xf4] sm:$0xf] %v1966_v49  ;;  %v1434_v50 = vrot.slane %v1432_v3, 7  ;;  %v10270_v5 = vrot.slane %v1576_v47, 5  ;;  %v1582_v15 = vrot.slane %v1580_v42, 4 }
 0x157   :  { %v1684_v63 = vshrl.u32 %v1622_v38, 16  ;;  %v13401_v8 = vshll.u32 %v10163_v60, 16  ;;  %v10277_v55 = vrot.slane %v2031_v45, 4  ;;  %v1693_v29 = vshrl.u32 %v1623_v44, 16  ;;  %v1856_v53 = vld [vmem:[#allocation3 + $0x20] sm:$0xf] }
 0x158   :  { %v1857_v27 = vld [vmem:[#allocation3 + $0x24] sm:$0xf]  ;;  %v1981_v18 = vld [vmem:[#allocation3 + $0x20] sm:$0xf]  ;;  %v13403_v49 = vshll.u32 %v10167_v26, 16  ;;  %v1687_v42 = vshll.u32 %v1622_v38, 16  ;;  %v1583_v45 = vor.u32 %v1582_v15, %v10270_v5  ;;  %v10288_v25 = vor.u32 %v1435_v40, %v1434_v50 }
 0x159   :  { %v10275_v62 = vor.u32 %v13401_v8, %v10188_v30  ;;  %13402 = vst [vmem:[#allocation56_spill] sm:$0xff] %v10277_v55  ;;  %v1748_v3 = vsel %vm1495_vm14, 0, %v1739_v10  ;;  %v1810_v60 = vshll.u32 %v1747_v9, 16  ;;  %v1982_v47 = vld [vmem:[#allocation3 + $0x24] sm:$0xf]  ;;  %v1814_v8 = vshrl.u32 %v1747_v9, 16 }
 0x15a   :  { %v10283_v24 = vor.u32 %v13403_v49, %v10190_v13  ;;  %v1820_v55 = vshll.u32 %v1748_v3, 16  ;;  %v1824_v28 = vshrl.u32 %v1748_v3, 16  ;;  %v2205_v31 = vld [vmem:[#allocation3 + $0x38] sm:$0xf]  ;;  %v10290_v51 = vrot.slane %v1684_v63, 7 }
 0x15b   :  { %v1696_v32 = vshll.u32 %v1623_v44, 16  ;;  %v10292_v26 = vrot.slane %v1810_v60, 5  ;;  %v2206_v49 = vld [vmem:[#allocation3 + $0x3c] sm:$0xf]  ;;  %2213 = vst [vmem:[#allocation5 + $0x148] sm:$0xf] %v2205_v31 }
 0x15c   :  { %v1695_v38 = vrot.slane %v1693_v29, 7  ;;  %v1816_v22 = vrot.slane %v1814_v8, 4  ;;  %v10294_v10 = vrot.slane %v1820_v55, 5  ;;  %v1826_v4 = vrot.slane %v1824_v28, 4  ;;  %2214 = vst [vmem:[#allocation5 + $0x16c] sm:$0xf] %v2206_v49  ;;  %v10317_v8 = vpop.f32.mrf.mxu0 }
 0x15d   :  { %13404 = vst [vmem:[#allocation57_spill] sm:$0xff] %v10292_v26  ;;  %v10298_v9 = vsel %vm9505_vm8, 0, %v1856_v53  ;;  %v10302_v40 = vsel %vm9505_vm8, 0, %v1857_v27  ;;  %v1990_v44 = vsel %vm1495_vm14, 0, %v1981_v18  ;;  %v10308_v31 = vsel %vm1495_vm14, 0, %v1982_v47  ;;  %v10327_v27 = vpop.f32.mrf.mxu1 }
 0x15e   :  { %13405 = vst [vmem:[#allocation58_spill] sm:$0xff] %v10294_v10  ;;  %13406 = vst [vmem:[#allocation59_spill] sm:$0xff] %v10298_v9  ;;  %v10310_v50 = vrot.slane %v1583_v45, 4  ;;  %v1817_v55 = vor.u32 %v1816_v22, %v10292_v26  ;;  %v1827_v15 = vor.u32 %v1826_v4, %v10294_v10  ;;  %v1919_v53 = vshrl.u32 %v10298_v9, 16  ;;  %v2097_v63 = vld [vmem:[#allocation3 + $0x3c] sm:$0xf] }
 0x15f   :  { %13407 = vst [vmem:[#allocation60_spill] sm:$0xff] %v10302_v40  ;;  %13408 = vst [vmem:[#allocation61_spill] sm:$0xff] %v10308_v31  ;;  %v2221_v28 = vld [vmem:[#allocation3 + $0x38] sm:$0xf]  ;;  %v1928_v29 = vshrl.u32 %v10302_v40, 16  ;;  %v2044_v3 = vshll.u32 %v1990_v44, 16  ;;  %v10320_v47 = vor.u32 %v1687_v42, %v10290_v51  ;;  %v10322_v45 = vor.u32 %v1696_v32, %v1695_v38 }
 0x160   :  { %v2048_v18 = vshrl.u32 %v1990_v44, 16  ;;  %v2448_v60 = vld [vmem:[#allocation3 + $0x38] sm:$0xf]  ;;  %v10324_v22 = vrot.slane %v1919_v53, 7  ;;  %v2054_v4 = vshll.u32 %v10308_v31, 16  ;;  %v10329_v26 = vrot.slane %v1817_v55, 4 }
 0x161   :  { %v2222_v49 = vld [vmem:[#allocation3 + $0x3c] sm:$0xf]  ;;  %2456 = vst [vmem:[#allocation5 + $0x130] sm:$0xf] %v2448_v60  ;;  %v10335_v42 = vsel %vm9505_vm8, 0, %v2097_v63  ;;  %v10337_v38 = vrot.slane %v1827_v15, 4  ;;  %v10351_v15 = vpop.f32.mrf.mxu0 }
 0x162   :  { %13409 = vst [vmem:[#allocation62_spill] sm:$0xff] %v10324_v22  ;;  %v2449_v10 = vld [vmem:[#allocation3 + $0x3c] sm:$0xf]  ;;  %13410 = vst [vmem:[#allocation63_spill] sm:$0xff] %v10329_v26  ;;  %v2339_v32 = vld [vmem:[#allocation3 + $0x38] sm:$0xf]  ;;  %v10357_v26 = vpop.f32.mrf.mxu1 }
 0x163   :  { %13411 = vst [vmem:[#allocation64_spill] sm:$0xff] %v10335_v42  ;;  %2457 = vst [vmem:[#allocation5 + $0x154] sm:$0xf] %v2449_v10  ;;  %v10339_v53 = vrot.slane %v1928_v29, 7  ;;  %v10341_v31 = vrot.slane %v2044_v3, 5  ;;  %v2136_v60 = vshrl.u32 %v10335_v42, 16  ;;  %v10373_v46 = vpop.f32.mrf.mxu0 }
 0x164   :  { %13412 = vst [vmem:[#allocation65_spill] sm:$0xff] %v10337_v38  ;;  %v2340_v55 = vld [vmem:[#allocation3 + $0x3c] sm:$0xf]  ;;  %v10345_v44 = vrot.slane %v2048_v18, 4  ;;  %v10347_v21 = vrot.slane %v2054_v4, 5  ;;  %v2230_v63 = vsel %vm1495_vm14, 0, %v2221_v28 }
 0x165   :  { %13413 = vst [vmem:[#allocation66_spill] sm:$0xff] %v10339_v53  ;;  %13414 = vst [vmem:[#allocation67_spill] sm:$0xff] %v10341_v31  ;;  %v2464_v40 = vld [vmem:[#allocation3 + $0x38] sm:$0xf]  ;;  %v4548_v10 = vld [vmem:[#allocation4 + $0x4] sm:$0xf]  ;;  %v10405_v2 = vpop.f32.mrf.mxu0 }
 0x166   :  { %13415 = vst [vmem:[#allocation68_spill] sm:$0xff] %v10345_v44  ;;  %13416 = vst [vmem:[#allocation69_spill] sm:$0xff] %v10347_v21  ;;  %v10353_v29 = vrot.slane %v2136_v60, 7  ;;  %v2231_v3 = vsel %vm1495_vm14, 0, %v2222_v49  ;;  %v2248_v31 = vshll.u32 %v2230_v63, 16  ;;  %v2252_v38 = vshrl.u32 %v2230_v63, 16 }
 0x167   :  { %v2465_v9 = vld [vmem:[#allocation3 + $0x3c] sm:$0xf]  ;;  %v2258_v18 = vshll.u32 %v2231_v3, 16  ;;  %v2262_v4 = vshrl.u32 %v2231_v3, 16  ;;  %v2348_v21 = vsel %vm9505_vm8, 0, %v2339_v32  ;;  %v2349_v28 = vsel %vm9505_vm8, 0, %v2340_v55 }
 0x168   :  { %13417 = vst [vmem:[#allocation70_spill] sm:$0xff] %v10353_v29  ;;  %v2692_v44 = vld [vmem:[#allocation3 + $0x3c] sm:$0xf]  ;;  %v10365_v35 = vrot.slane %v2248_v31, 5  ;;  %v2254_v49 = vrot.slane %v2252_v38, 4  ;;  %v2362_v1 = vshrl.u32 %v2348_v21, 16  ;;  %v10383_v29 = vpop.f32.mrf.mxu1 }
 0x169   :  { %2700 = vst [vmem:[#allocation5 + $0x13c] sm:$0xf] %v2692_v44  ;;  %v9024_v63 = vld [vmem:[%s13168_s2 + $0x1f8] sm:$0xff]   ;;  %v10371_v58 = vrot.slane %v2258_v18, 5  ;;  %v2264_v32 = vrot.slane %v2262_v4, 4  ;;  %v2365_v22 = vshll.u32 %v2348_v21, 16 }
 0x16a   :  { %13418 = vst [vmem:[#allocation71_spill] sm:$0xff] %v10365_v35  ;;  %v8985_v55 = vld [vmem:[#allocation5 + $0x4] ss:$36 sps:$4 sm:$0xff]   ;;  %v2255_v60 = vor.u32 %v2254_v49, %v10365_v35  ;;  %v2371_v31 = vshrl.u32 %v2349_v28, 16  ;;  %v2473_v44 = vsel %vm1494_vm13, 0, %v2464_v40  ;;  %v13422_v3 = vld [vmem:[#allocation16_spill] sm:$0xff]  ;;  %8465 = vmatprep.subr.bf16.mxu1 %v9024_v63 }
 0x16b   :  { %13419 = vst [vmem:[#allocation72_spill] sm:$0xff] %v10371_v58  ;;  %v2582_v38 = vld [vmem:[#allocation3 + $0x38] sm:$0x8]  ;;  %v2583_v53 = vld [vmem:[#allocation3 + $0x3c] sm:$0xf]  ;;  %v13423_v18 = vsel %vm9523_vm9, %v13421_v34, %v13422_v3  ;;  %v2265_v49 = vor.u32 %v2264_v32, %v10371_v58  ;;  %v10389_v40 = vrot.slane %v2362_v1, 7  ;;  %3889 = vmatprep.mubr.bf16.mxu0 %v8985_v55 }
 0x16c   :  { %4540 = vst [vmem:[#allocation5] sm:$0xf] %v13423_v18  ;;  %4556 = vst [vmem:[#allocation5 + $0x4] sm:$0xf] %v4548_v10  ;;  %v8990_v4 = vld [vmem:[#allocation5 + $0xc] ss:$36 sps:$4 sm:$0xff]  }
 0x16d   :  { %v9025_v21 = vld [vmem:[%s13168_s2 + $0x1b8] sm:$0xff]   ;;  %13424 = vst [vmem:[#allocation15_spill] sm:$0xff] %v10389_v40  ;;  %v2474_v35 = vsel %vm1495_vm14, 0, %v2465_v9  ;;  %v2483_v48 = vshrl.u32 %v2473_v44, 16  ;;  %v8992_v34 = vld [vmem:[#allocation5 + $0x8] ss:$36 sps:$4 sm:$0xff]   ;;  %3986 = vmatprep.mubr.bf16.mxu1 %v8990_v4  ;;  %v10403_v9 = vor.u32 %v2365_v22, %v10389_v40 }
 0x16e   :  { %v9026_v10 = vld [vmem:[%s13168_s2 + $0x1f0] sm:$0xff]   ;;  %v10396_v3 = vrot.slane %v2371_v31, 7  ;;  %v2374_v63 = vshll.u32 %v2349_v28, 16  ;;  %v2486_v18 = vshll.u32 %v2473_v44, 16  ;;  %v2492_v36 = vshll.u32 %v2474_v35, 16  ;;  %3987 = vmatmul.mubr.bf16.vlgmr.msra.gmra.mxu1 %v8992_v34 }
 0x16f   :  { %v2708_v19 = vld [vmem:[#allocation3 + $0x3c] sm:$0xf]  ;;  %v10398_v32 = vrot.slane %v2255_v60, 4  ;;  %v10400_v1 = vrot.slane %v2265_v49, 4  ;;  %13428 = vst [vmem:[#allocation75_spill] sm:$0xff] %v10403_v9  ;;  %v2485_v55 = vrot.slane %v2483_v48, 4  ;;  %8466 = vmatpush3.bf16.msra.mxu1 %v9025_v21 }
 0x170   :  { %13425 = vst [vmem:[#allocation16_spill] sm:$0xff] %v10396_v3  ;;  %v10409_v31 = vor.u32 %v2374_v63, %v10396_v3  ;;  %v2488_v28 = vrot.slane %v2486_v18, 5  ;;  %v10411_v44 = vrot.slane %v2492_v36, 5  ;;  %v2831_v60 = vld [vmem:[#allocation5 + $0x24] sm:$0xff]  ;;  %v9030_v48 = vld [vmem:[%s13168_s2 + $0x1b0] sm:$0xff]   ;;  %v2496_v22 = vshrl.u32 %v2474_v35, 16  ;;  %8467 = vmatprep.subr.bf16.mxu1 %v9026_v10  ;;  %v8206_v10 = vpop.f32.mrf.mxu0 }
 0x171   :  { %13426 = vst [vmem:[#allocation73_spill] sm:$0xff] %v10398_v32  ;;  %13427 = vst [vmem:[#allocation74_spill] sm:$0xff] %v10400_v1  ;;  %v10413_v32 = vpop.f32.mrf.mxu1  ;;  %v2591_v34 = vsel %vm115_vm5, 0, %v2582_v38  ;;  %v10422_v63 = vsel %vm9505_vm8, 0, %v2583_v53  ;;  %v2717_v36 = vsel %vm1494_vm13, 0, %v2708_v19  ;;  %v8989_v35 = vld [vmem:[%s13168_s2 + $0x138] sm:$0xff]  }
 0x172   :  { %13429 = vst [vmem:[#allocation76_spill] sm:$0xff] %v10411_v44  ;;  %v2489_v58 = vor.u32 %v2488_v28, %v2485_v55  ;;  %v2601_v21 = vshrl.u32 %v2591_v34, 16  ;;  %v2606_v9 = vshrl.u32 %v10422_v63, 16  ;;  %v8993_v1 = vld [vmem:[#allocation5 + $0x4c] ss:$36 sps:$4 sm:$0xff]   ;;  %v2498_v38 = vrot.slane %v2496_v22, 4 }
 0x173   :  { %v2826_v4 = vld [vmem:[#allocation5] sm:$0xff]  ;;  %v2727_v49 = vshrl.u32 %v2717_v36, 16  ;;  %v2730_v40 = vshll.u32 %v2717_v36, 16  ;;  %v8995_v19 = vld [vmem:[%s13168_s2 + $0x170] sm:$0xff]   ;;  %v9036_v55 = vld [vmem:[%s13168_s2 + $0x1e8] sm:$0xff]   ;;  %v8030_v22 = vpack.c.bf16 %v10198_v12, %v10148_v52  ;;  %v8270_v36 = vpop.f32.mrf.mxu1  ;;  %8468 = vmatpush3.bf16.msra.mxu1 %v9030_v48 }
 0x174   :  { %v7619_v53 = vcombine.low %v2826_v4, %v2831_v60  ;;  %v10437_v28 = vrot.slane %v2489_v58, 4  ;;  %v10439_v34 = vrot.slane %v2606_v9, 7  ;;  %v9037_v4 = vld [vmem:[%s13168_s2 + $0x1a8] sm:$0xff]   ;;  %v2499_v60 = vor.u32 %v2498_v38, %v10411_v44  ;;  %8469 = vmatprep.subr.bf16.mxu1 %v9036_v55  ;;  %v9038_v52 = vld [vmem:[%s13168_s2 + $0x1e0] sm:$0xff]   ;;  %v13436_v48 = vld [vmem:[#allocation29_spill] sm:$0xff] }
 0x175   :  { %v10448_v3 = vrot.slane %v2601_v21, 11  ;;  %v10450_v42 = vrot.slane %v2727_v49, 4  ;;  %v10452_v58 = vrot.slane %v2730_v40, 5  ;;  %8127 = vst [vmem:[#allocation3 + $0x40] sm:$0xff] %v8030_v22   ;;  %v10460_v9 = vadd.f32 %v10172_v41, %v10201_v37  ;;  %v8997_v40 = vld [vmem:[%s13168_s2 + $0x130] sm:$0xff]   ;;  %v13437_v49 = vld [vmem:[#allocation21_spill] sm:$0xff] }
 0x176   :  { %13431 = vst [vmem:[#allocation77_spill] sm:$0xff] %v10437_v28  ;;  %13432 = vst [vmem:[#allocation78_spill] sm:$0xff] %v10439_v34  ;;  %3890 = vmatmul.mubr.bf16.vlgmr.msra.gmra.mxu0 %v7619_v53  ;;  %v1539_v21 = vsel %vm9487_vm6, %v13437_v49, %v13436_v48  ;;  %v13438_v38 = vld [vmem:[#allocation30_spill] sm:$0xff]  ;;  %v10473_v53 = vrot.slane %v2499_v60, 4  ;;  %v13442_v55 = vrot.slane %v10003_v20, 4  ;;  %v8207_v60 = vpop.f32.mrf.mxu0  ;;  %v8266_v48 = vadd.f32 %v10357_v26, %v10327_v27  ;;  %v13444_v49 = vld [vmem:[#allocation25_spill] sm:$0xff] }
 0x177   :  { %13433 = vst [vmem:[#allocation79_spill] sm:$0xff] %v10448_v3  ;;  %13434 = vst [vmem:[#allocation80_spill] sm:$0xff] %v10450_v42  ;;  %8402 = vmatpush3.bf16.msra.mxu0 %v8989_v35  ;;  %3897 = vmatprep.mubr.bf16.mxu0 %v8993_v1  ;;  %v1549_v35 = vsel %vm9487_vm6, %v10034_v16, %v13438_v38  ;;  %v13440_v41 = vld [vmem:[#allocation18_spill] sm:$0xff]  ;;  %v8202_v16 = vadd.f32 %v10351_v15, %v10317_v8  ;;  %v8996_v27 = vld [vmem:[#allocation5 + $0x48] ss:$36 sps:$4 sm:$0xff]  }
 0x178   :  { %13435 = vst [vmem:[#allocation81_spill] sm:$0xff] %v10452_v58  ;;  %13439 = vst [vmem:[#allocation29_spill] sm:$0xff] %v10473_v53  ;;  %8403 = vmatprep.subr.bf16.mxu0 %v8995_v19  ;;  %v13441_v37 = vrot.slane %v13440_v41, 4  ;;  %v1663_v22 = vsel %vm9523_vm9, %v13442_v55, %v10136_v59  ;;  %v9003_v19 = vld [vmem:[%s13168_s2 + $0x168] sm:$0xff]   ;;  %v13446_v59 = vld [vmem:[#allocation28_spill] sm:$0xff]  ;;  %v8205_v15 = vadd.f32 %v10405_v2, %v10373_v46  ;;  %8470 = vmatpush3.bf16.msra.mxu1 %v9037_v4 }
 0x179   :  { %1600 = vst [vmem:[#allocation5 + $0x50] sm:$0xf] %v1539_v21  ;;  %1601 = vst [vmem:[#allocation5 + $0x74] sm:$0xf] %v1549_v35  ;;  %v13445_v21 = vrot.slane %v13444_v49, 4  ;;  %v13447_v38 = vrot.slane %v13446_v59, 4  ;;  %v8271_v35 = vpop.f32.mrf.mxu1  ;;  %v1569_v46 = vsel %vm9487_vm6, %v10203_v0, %v10176_v6  ;;  %8471 = vmatprep.subr.bf16.mxu1 %v9038_v52  ;;  %v8208_v0 = vadd.f32 %v8207_v60, %v8206_v10 }
 0x17a   :  { %v1654_v1 = vsel %vm9523_vm9, %v13441_v37, %v10131_v17  ;;  %1711 = vst [vmem:[#allocation5 + $0x78] sm:$0xf] %v1663_v22  ;;  %v13443_v17 = vld [vmem:[#allocation31_spill] sm:$0xff]  ;;  %v9042_v26 = vld [vmem:[%s13168_s2 + $0x1a0] sm:$0xff]   ;;  %1603 = vst [vmem:[#allocation5 + $0xbc] sm:$0xf] %v1569_v46 }
 0x17b   :  { %1710 = vst [vmem:[#allocation5 + $0x54] sm:$0xf] %v1654_v1  ;;  %v1411_v20 = vsel %vm9523_vm9, %v13445_v21, %v13443_v17  ;;  %v1420_v8 = vsel %vm9523_vm9, %v13447_v38, %v10232_v56  ;;  %v9291_v41 = vld [vmem:[%s13169_s4] ss:$0 sm:$0xff]  ;;  %v8269_v56 = vadd.f32 %v10413_v32, %v10383_v29  ;;  %v13448_v1 = vld [vmem:[#allocation36_spill] sm:$0xff]  ;;  %8404 = vmatpush3.bf16.msra.mxu0 %v8997_v40  ;;  %v9005_v55 = vld [vmem:[%s13168_s2 + $0x128] sm:$0xff]  }
 0x17c   :  { %v1157_v37 = vadd.f32 %v9291_v41, %v8202_v16  ;;  %1451 = vst [vmem:[#allocation5 + $0x90] sm:$0xf] %v1411_v20  ;;  %1452 = vst [vmem:[#allocation5 + $0xb4] sm:$0xf] %v1420_v8  ;;  %v1559_v2 = vsel %vm9487_vm6, %v13448_v1, %v10174_v54  ;;  %v1162_v4 = vadd.f32 %v9291_v41, %v8205_v15  ;;  %v13449_v29 = vrot.slane %v10008_v14, 4  ;;  %v9048_v52 = vld [vmem:[%s13168_s2 + $0x1d8] sm:$0xff]  }
 0x17d   :  { %1602 = vst [vmem:[#allocation5 + $0x98] sm:$0xf] %v1559_v2  ;;  %v13450_v32 = vrot.slane %v10188_v30, 4  ;;  %v1967_v40 = vld [vmem:[#allocation3 + $0x28] sm:$0xf]  ;;  %8405 = vmatprep.subr.bf16.mxu0 %v9003_v19  ;;  %v8272_v14 = vadd.f32 %v8271_v35, %v8270_v36  ;;  %v9011_v16 = vld [vmem:[%s13168_s2 + $0x160] sm:$0xff]   ;;  %v1165_v36 = vadd.f32 %v9291_v41, %v8208_v0  ;;  %8472 = vmatpush3.bf16.msra.mxu1 %v9042_v26 }
 0x17e   :  { %v1672_v54 = vsel %vm9523_vm9, %v13449_v29, %v10275_v62  ;;  %v1254_v22 = vadd.f32 %v8266_v48, %v1157_v37  ;;  %v13451_v62 = vrot.slane %v10157_v23, 4  ;;  %1975 = vst [vmem:[#allocation5 + $0x118] sm:$0xf] %v1967_v40  ;;  %v10549_v19 = vadd.f32 %v8269_v56, %v1162_v4  ;;  %v9013_v23 = vld [vmem:[%s13168_s2 + $0x120] sm:$0xff]   ;;  %v9049_v60 = vld [vmem:[%s13168_s2 + $0x198] sm:$0xff]   ;;  %v9050_v48 = vld [vmem:[%s13168_s2 + $0x1d0] sm:$0xff]   ;;  %3898 = vmatmul.mubr.bf16.gmra.mxu0 %v8996_v27 }
 0x17f   :  { %v1681_v6 = vsel %vm9523_vm9, %v13450_v32, %v10283_v24  ;;  %1712 = vst [vmem:[#allocation5 + $0x9c] sm:$0xf] %v1672_v54  ;;  %v13452_v24 = vrot.slane %v10159_v43, 4  ;;  %v1579_v43 = vsel %vm9487_vm6, %v10205_v7, %v10270_v5  ;;  %v2098_v17 = vld [vmem:[#allocation3 + $0x40] sm:$0xf]  ;;  %v13454_v5 = vrot.slane %v10190_v13, 4  ;;  %8406 = vmatpush3.bf16.msra.mxu0 %v9005_v55  ;;  %8473 = vmatprep.subr.bf16.mxu1 %v9048_v52 }
 0x180   :  { %1713 = vst [vmem:[#allocation5 + $0xc0] sm:$0xf] %v1681_v6  ;;  %v1429_v30 = vsel %vm9523_vm9, %v13451_v62, %v10235_v39  ;;  %v2099_v49 = vld [vmem:[#allocation3 + $0x44] sm:$0xf]  ;;  %v2207_v21 = vld [vmem:[#allocation3 + $0x40] sm:$0xf]  ;;  %v8035_v7 = vpack.c.bf16 %v1254_v22, %v10460_v9  ;;  %8407 = vmatprep.subr.bf16.mxu0 %v9011_v16 }
 0x181   :  { %v1438_v10 = vsel %vm9523_vm9, %v13452_v24, %v10288_v25  ;;  %1453 = vst [vmem:[#allocation5 + $0xd8] sm:$0xf] %v1429_v30  ;;  %v13453_v25 = vrot.slane %v10262_v61, 5  ;;  %1604 = vst [vmem:[#allocation5 + $0xe0] sm:$0xf] %v1579_v43  ;;  %v1690_v61 = vsel %vm9523_vm9, %v13454_v5, %v10320_v47  ;;  %v9019_v59 = vld [vmem:[%s13168_s2 + $0x158] sm:$0xff]   ;;  %8474 = vmatpush3.bf16.msra.mxu1 %v9049_v60 }
 0x182   :  { %1454 = vst [vmem:[#allocation5 + $0xfc] sm:$0xf] %v1438_v10  ;;  %v13456_v38 = vld [vmem:[#allocation72_spill] sm:$0xff]  ;;  %v13457_v9 = vld [vmem:[#allocation73_spill] sm:$0xff]  ;;  %v10589_v13 = vsel %vm9505_vm8, 0, %v2098_v17  ;;  %v10593_v47 = vsel %vm9505_vm8, 0, %v2099_v49  ;;  %8475 = vmatprep.subr.bf16.mxu1 %v9050_v48 }
 0x183   :  { %v1589_v39 = vsel %vm9487_vm6, %v10310_v50, %v13453_v25  ;;  %v13455_v50 = vrot.slane %v10290_v51, 4  ;;  %v2261_v8 = vsel %vm9487_vm6, %v13457_v9, %v13456_v38  ;;  %v2208_v51 = vld [vmem:[#allocation3 + $0x44] sm:$0xf]  ;;  %v2223_v15 = vld [vmem:[#allocation3 + $0x40] sm:$0xf]  ;;  %v13458_v35 = vld [vmem:[#allocation15_spill] sm:$0xff]  ;;  %8408 = vmatpush3.bf16.msra.mxu0 %v9013_v23 }
 0x184   :  { %1605 = vst [vmem:[#allocation5 + $0x104] sm:$0xf] %v1589_v39  ;;  %2215 = vst [vmem:[#allocation5 + $0x190] sm:$0xf] %v2207_v21  ;;  %v13459_v26 = vrot.slane %v13458_v35, 4  ;;  %v9054_v41 = vld [vmem:[%s13168_s2 + $0x190] sm:$0xff]   ;;  %8409 = vmatprep.subr.bf16.mxu0 %v9019_v59 }
 0x185   :  { %v1699_v20 = vsel %vm9523_vm9, %v13455_v50, %v10322_v45  ;;  %v1262_v45 = vadd.f32 %v8272_v14, %v1165_v36  ;;  %1714 = vst [vmem:[#allocation5 + $0xe4] sm:$0xf] %v1690_v61  ;;  %2331 = vst [vmem:[#allocation5 + $0x14c] sm:$0xf] %v2261_v8  ;;  %v2145_v37 = vshrl.u32 %v10589_v13, 16  ;;  %v2154_v1 = vshrl.u32 %v10593_v47, 16  ;;  %8476 = vmatpush3.bf16.msra.mxu1 %v9054_v41 }
 0x186   :  { %1715 = vst [vmem:[#allocation5 + $0x108] sm:$0xf] %v1699_v20  ;;  %v2377_v27 = vsel %vm9523_vm9, %v13459_v26, %v10409_v31  ;;  %v2224_v2 = vld [vmem:[#allocation3 + $0x44] sm:$0xf]  ;;  %2216 = vst [vmem:[#allocation5 + $0x1b4] sm:$0xf] %v2208_v51 }
 0x187   :  { %8128 = vst [vmem:[#allocation3 + $0x48] sm:$0xff] %v8035_v7   ;;  %2441 = vst [vmem:[#allocation5 + $0x150] sm:$0xf] %v2377_v27  ;;  %v9062_v31 = vld [vmem:[%s13168_s2 + $0x1c8] sm:$0xff]   ;;  %v2232_v4 = vsel %vm1495_vm14, 0, %v2223_v15  ;;  %v2233_v55 = vsel %vm1495_vm14, 0, %v2224_v2  ;;  %v8040_v32 = vpack.c.bf16 %v1262_v45, %v10549_v19 }
 0x188   :  { %v2341_v29 = vld [vmem:[#allocation3 + $0x40] sm:$0xf]  ;;  %v2342_v54 = vld [vmem:[#allocation3 + $0x44] sm:$0xf]  ;;  %v9020_v6 = vld [vmem:[%s13168_s2 + $0x118] sm:$0xff]   ;;  %v10621_v22 = vrot.slane %v2145_v37, 7  ;;  %8477 = vmatprep.subr.bf16.mxu1 %v9062_v31 }
 0x189   :  { %v13461_v0 = vld [vmem:[#allocation19_spill] sm:$0xff]  ;;  %v13462_v52 = vld [vmem:[#allocation22_spill] sm:$0xff]  ;;  %v10623_v14 = vrot.slane %v2154_v1, 7  ;;  %v2268_v62 = vshll.u32 %v2232_v4, 16  ;;  %v2272_v30 = vshrl.u32 %v2232_v4, 16  ;;  %v9029_v10 = vld [vmem:[%s13168_s2 + $0x150] sm:$0xff]   ;;  %8410 = vmatpush3.bf16.msra.mxu0 %v9020_v6 }
 0x18a   :  { %v1763_v40 = vsel %vm9487_vm6, %v13462_v52, %v13461_v0  ;;  %v2450_v24 = vld [vmem:[#allocation3 + $0x40] sm:$0xf]  ;;  %v2278_v16 = vshll.u32 %v2233_v55, 16  ;;  %v2282_v19 = vshrl.u32 %v2233_v55, 16  ;;  %v10630_v36 = vsel %vm9505_vm8, 0, %v2341_v29  ;;  %8129 = vst [vmem:[#allocation3 + $0x50] sm:$0xff] %v8040_v32   ;;  %8411 = vmatprep.subr.bf16.mxu0 %v9029_v10 }
 0x18b   :  { %1842 = vst [vmem:[#allocation5 + $0x14] sm:$0xf] %v1763_v40  ;;  %v10634_v43 = vsel %vm9505_vm8, 0, %v2342_v54  ;;  %v2451_v25 = vld [vmem:[#allocation3 + $0x44] sm:$0xf]  ;;  %v10639_v21 = vrot.slane %v2268_v62, 5 }
 0x18c   :  { %2458 = vst [vmem:[#allocation5 + $0x178] sm:$0xf] %v2450_v24  ;;  %2459 = vst [vmem:[#allocation5 + $0x19c] sm:$0xf] %v2451_v25  ;;  %v2466_v48 = vld [vmem:[#allocation3 + $0x40] sm:$0xf] }
 0x18d   :  { %v2467_v17 = vld [vmem:[#allocation3 + $0x44] sm:$0xf]  ;;  %v2274_v7 = vrot.slane %v2272_v30, 4  ;;  %v10641_v5 = vrot.slane %v2278_v16, 5  ;;  %v9032_v61 = vld [vmem:[%s13168_s2 + $0x110] sm:$0xff]   ;;  %v9063_v23 = vld [vmem:[%s13168_s2 + $0x188] sm:$0xff]  }
 0x18e   :  { %v2284_v50 = vrot.slane %v2282_v19, 4  ;;  %v2380_v20 = vshrl.u32 %v10630_v36, 16  ;;  %v2389_v38 = vshrl.u32 %v10634_v43, 16  ;;  %v9041_v9 = vld [vmem:[%s13168_s2 + $0x148] sm:$0xff]   ;;  %v9066_v8 = vld [vmem:[%s13168_s2 + $0x1c0] sm:$0xff]   ;;  %v2475_v51 = vsel %vm1495_vm14, 0, %v2466_v48  ;;  %8478 = vmatpush3.bf16.msra.mxu1 %v9063_v23  ;;  %8412 = vmatpush3.bf16.msra.mxu0 %v9032_v61 }
 0x18f   :  { %v2476_v15 = vsel %vm1495_vm14, 0, %v2467_v17  ;;  %v2584_v45 = vld [vmem:[#allocation3 + $0x40] sm:$0xf]  ;;  %v2694_v26 = vld [vmem:[#allocation3 + $0x44] sm:$0xf]  ;;  %v2275_v27 = vor.u32 %v2274_v7, %v10639_v21  ;;  %v2502_v37 = vshll.u32 %v2475_v51, 16  ;;  %8479 = vmatprep.subr.bf16.mxu1 %v9066_v8  ;;  %8413 = vmatprep.subr.bf16.mxu0 %v9041_v9 }
 0x190   :  { %v2693_v35 = vld [vmem:[#allocation3 + $0x40] sm:$0xf]  ;;  %v2506_v1 = vshrl.u32 %v2475_v51, 16  ;;  %v2585_v2 = vld [vmem:[#allocation3 + $0x44] sm:$0xf]  ;;  %v13463_v4 = vld [vmem:[#allocation20_spill] sm:$0xff]  ;;  %v2285_v17 = vor.u32 %v2284_v50, %v10641_v5 }
 0x191   :  { %2701 = vst [vmem:[#allocation5 + $0x160] sm:$0xf] %v2693_v35  ;;  %2702 = vst [vmem:[#allocation5 + $0x184] sm:$0xf] %v2694_v26  ;;  %v9067_v31 = vld [vmem:[%s13168_s2 + $0x180] sm:$0xff]   ;;  %v13464_v55 = vld [vmem:[#allocation17_spill] sm:$0xff] }
 0x192   :  { %v13465_v29 = vshll.u32 %v13464_v55, 16  ;;  %v13467_v32 = vld [vmem:[#allocation37_spill] sm:$0xff]  ;;  %v13468_v6 = vld [vmem:[#allocation34_spill] sm:$0xff]  ;;  %v2512_v40 = vshll.u32 %v2476_v15, 16  ;;  %v2516_v62 = vshrl.u32 %v2476_v15, 16  ;;  %v9044_v10 = vld [vmem:[%s13168_s2 + $0x108] sm:$0xff]   ;;  %8480 = vmatpush3.bf16.msra.mxu1 %v9067_v31 }
 0x193   :  { %v13469_v0 = vshll.u32 %v13468_v6, 16  ;;  %v2709_v30 = vld [vmem:[#allocation3 + $0x40] sm:$0xf]  ;;  %v2710_v24 = vld [vmem:[#allocation3 + $0x44] sm:$0xf]  ;;  %v13471_v16 = vld [vmem:[#allocation39_spill] sm:$0xff]  ;;  %8414 = vmatpush3.bf16.msra.mxu0 %v9044_v10 }
 0x194   :  { %v10670_v54 = vor.u32 %v13465_v29, %v13463_v4  ;;  %v13472_v19 = vld [vmem:[#allocation35_spill] sm:$0xff]  ;;  %v10686_v7 = vrot.slane %v2380_v20, 7  ;;  %v10688_v51 = vrot.slane %v2389_v38, 7  ;;  %v8998_v35 = vld [vmem:[#allocation5 + $0x54] ss:$36 sps:$4 sm:$0xff]   ;;  %v10690_v15 = vrot.slane %v2502_v37, 5 }
 0x195   :  { %v10675_v52 = vor.u32 %v13469_v0, %v13467_v32  ;;  %v13473_v25 = vshll.u32 %v13472_v19, 16  ;;  %v2508_v26 = vrot.slane %v2506_v1, 4  ;;  %v10692_v55 = vrot.slane %v2512_v40, 5  ;;  %v9000_v23 = vld [vmem:[#allocation5 + $0x50] ss:$36 sps:$4 sm:$0xff]   ;;  %3994 = vmatprep.mubr.bf16.mxu1 %v8998_v35  ;;  %v9053_v38 = vld [vmem:[%s13168_s2 + $0x140] sm:$0xff]  }
 0x196   :  { %13466 = vst [vmem:[#allocation21_spill] sm:$0xff] %v10670_v54  ;;  %13475 = vst [vmem:[#allocation31_spill] sm:$0xff] %v10690_v15  ;;  %v2518_v29 = vrot.slane %v2516_v62, 4  ;;  %v10694_v6 = vrot.slane %v2275_v27, 4  ;;  %v10698_v0 = vsel %vm9505_vm8, 0, %v2584_v45  ;;  %v10702_v50 = vsel %vm9505_vm8, 0, %v2585_v2  ;;  %3995 = vmatmul.mubr.bf16.gmra.mxu1 %v9000_v23  ;;  %8415 = vmatprep.subr.bf16.mxu0 %v9053_v38 }
 0x197   :  { %13470 = vst [vmem:[#allocation30_spill] sm:$0xff] %v10675_v52  ;;  %v10683_v48 = vor.u32 %v13473_v25, %v13471_v16  ;;  %13476 = vst [vmem:[#allocation25_spill] sm:$0xff] %v10692_v55  ;;  %v2718_v20 = vsel %vm1495_vm14, 0, %v2709_v30  ;;  %v2509_v61 = vor.u32 %v2508_v26, %v10690_v15  ;;  %v2615_v45 = vshrl.u32 %v10698_v0, 16  ;;  %v2100_v37 = vld [vmem:[#allocation3 + $0x48] sm:$0xf] }
 0x198   :  { %v2519_v8 = vor.u32 %v2518_v29, %v10692_v55  ;;  %v2719_v27 = vsel %vm1495_vm14, 0, %v2710_v24  ;;  %v2209_v1 = vld [vmem:[#allocation3 + $0x48] sm:$0xf]  ;;  %v9056_v9 = vld [vmem:[%s13168_s2 + $0x100] sm:$0xff]   ;;  %v10717_v2 = vrot.slane %v2285_v17, 4  ;;  %v2624_v40 = vshrl.u32 %v10702_v50, 16 }
 0x199   :  { %13474 = vst [vmem:[#allocation18_spill] sm:$0xff] %v10683_v48  ;;  %v2736_v62 = vshll.u32 %v2718_v20, 16  ;;  %v2740_v30 = vshrl.u32 %v2718_v20, 16  ;;  %v2210_v19 = vld [vmem:[#allocation3 + $0x4c] sm:$0xf]  ;;  %v9068_v24 = vld [vmem:[%s13168_s2 + $0x238] sm:$0xff]   ;;  %8416 = vmatpush3.bf16.msra.mxu0 %v9056_v9 }
 0x19a   :  { %2217 = vst [vmem:[#allocation5 + $0x1d8] sm:$0xf] %v2209_v1  ;;  %v2101_v29 = vld [vmem:[#allocation3 + $0x4c] sm:$0xf]  ;;  %2218 = vst [vmem:[#allocation5 + $0x1fc] sm:$0xf] %v2210_v19  ;;  %8817 = vmatprep.subr.bf16.mxu0 %v9068_v24 }
 0x19b   :  { %v10727_v23 = vrot.slane %v2509_v61, 4  ;;  %v10729_v20 = vrot.slane %v2519_v8, 4  ;;  %v10731_v31 = vrot.slane %v2615_v45, 7  ;;  %v2746_v1 = vshll.u32 %v2719_v27, 16  ;;  %v2225_v12 = vld [vmem:[#allocation3 + $0x48] sm:$0xf] }
 0x19c   :  { %v13480_v49 = vld [vmem:[#allocation49_spill] sm:$0xff]  ;;  %v13481_v39 = vld [vmem:[#allocation47_spill] sm:$0xff]  ;;  %v13484_v26 = vld [vmem:[#allocation50_spill] sm:$0xff]  ;;  %v10750_v45 = vsel %vm9505_vm8, 0, %v2100_v37  ;;  %v10752_v56 = vrot.slane %v2624_v40, 7  ;;  %v2750_v40 = vshrl.u32 %v2719_v27, 16 }
 0x19d   :  { %13477 = vst [vmem:[#allocation28_spill] sm:$0xff] %v10727_v23  ;;  %13478 = vst [vmem:[#allocation36_spill] sm:$0xff] %v10729_v20  ;;  %v13482_v25 = vshll.u32 %v13481_v39, 16  ;;  %v13485_v41 = vld [vmem:[#allocation48_spill] sm:$0xff]  ;;  %v13488_v10 = vld [vmem:[#allocation62_spill] sm:$0xff]  ;;  %v10754_v39 = vrot.slane %v2736_v62, 5 }
 0x19e   :  { %13479 = vst [vmem:[#allocation72_spill] sm:$0xff] %v10731_v31  ;;  %v13486_v17 = vshll.u32 %v13485_v41, 16  ;;  %v13489_v61 = vld [vmem:[#allocation59_spill] sm:$0xff]  ;;  %13492 = vst [vmem:[#allocation22_spill] sm:$0xff] %v10752_v56  ;;  %v10760_v41 = vsel %vm9505_vm8, 0, %v2101_v29  ;;  %v13499_v58 = vld [vmem:[#allocation70_spill] sm:$0xff] }
 0x19f   :  { %v10736_v35 = vor.u32 %v13482_v25, %v13480_v49  ;;  %v13490_v19 = vshll.u32 %v13489_v61, 16  ;;  %v2226_v38 = vld [vmem:[#allocation3 + $0x4c] sm:$0xf]  ;;  %v2343_v60 = vld [vmem:[#allocation3 + $0x48] sm:$0xf]  ;;  %13493 = vst [vmem:[#allocation17_spill] sm:$0xff] %v10754_v39 }
 0x1a0   :  { %v10741_v59 = vor.u32 %v13486_v17, %v13484_v26  ;;  %v10756_v25 = vrot.slane %v2740_v30, 4  ;;  %v13495_v17 = vld [vmem:[#allocation66_spill] sm:$0xff]  ;;  %v13496_v61 = vld [vmem:[#allocation60_spill] sm:$0xff]  ;;  %v2163_v62 = vshrl.u32 %v10750_v45, 16  ;;  %v2344_v39 = vld [vmem:[#allocation3 + $0x4c] sm:$0xf] }
 0x1a1   :  { %13483 = vst [vmem:[#allocation73_spill] sm:$0xff] %v10736_v35  ;;  %v10746_v8 = vor.u32 %v13490_v19, %v13488_v10  ;;  %v13497_v19 = vshll.u32 %v13496_v61, 16  ;;  %v13500_v37 = vld [vmem:[#allocation64_spill] sm:$0xff]  ;;  %v2452_v30 = vld [vmem:[#allocation3 + $0x48] sm:$0xf]  ;;  %v2234_v29 = vsel %vm1495_vm14, 0, %v2225_v12 }
 0x1a2   :  { %13487 = vst [vmem:[#allocation15_spill] sm:$0xff] %v10741_v59  ;;  %13494 = vst [vmem:[#allocation34_spill] sm:$0xff] %v10756_v25  ;;  %v13501_v42 = vshll.u32 %v13500_v37, 16  ;;  %v2172_v25 = vshrl.u32 %v10760_v41, 16  ;;  %v2235_v61 = vsel %vm1495_vm14, 0, %v2226_v38  ;;  %v10783_v37 = vrot.slane %v2746_v1, 5 }
 0x1a3   :  { %13491 = vst [vmem:[#allocation19_spill] sm:$0xff] %v10746_v8  ;;  %v10765_v18 = vor.u32 %v13497_v19, %v13495_v17  ;;  %v10780_v19 = vsel %vm9505_vm8, 0, %v2343_v60  ;;  %2460 = vst [vmem:[#allocation5 + $0x1c0] sm:$0xf] %v2452_v30  ;;  %v2288_v9 = vshll.u32 %v2234_v29, 16  ;;  %v2292_v17 = vshrl.u32 %v2234_v29, 16 }
 0x1a4   :  { %v10770_v20 = vor.u32 %v13501_v42, %v13499_v58  ;;  %v2453_v42 = vld [vmem:[#allocation3 + $0x4c] sm:$0xf]  ;;  %13502 = vst [vmem:[#allocation47_spill] sm:$0xff] %v10783_v37  ;;  %v2298_v12 = vshll.u32 %v2235_v61, 16  ;;  %v2302_v55 = vshrl.u32 %v2235_v61, 16  ;;  %v10788_v38 = vsel %vm9505_vm8, 0, %v2344_v39 }
 0x1a5   :  { %13498 = vst [vmem:[#allocation35_spill] sm:$0xff] %v10765_v18  ;;  %2461 = vst [vmem:[#allocation5 + $0x1e4] sm:$0xf] %v2453_v42  ;;  %v2468_v60 = vld [vmem:[#allocation3 + $0x48] sm:$0xf]  ;;  %v10790_v3 = vrot.slane %v2750_v40, 4 }
 0x1a6   :  { %v2398_v1 = vshrl.u32 %v10780_v19, 16  ;;  %v2469_v27 = vld [vmem:[#allocation3 + $0x4c] sm:$0xf]  ;;  %v10795_v29 = vrot.slane %v2163_v62, 7  ;;  %v10797_v42 = vrot.slane %v2172_v25, 7  ;;  %v10799_v23 = vrot.slane %v2288_v9, 5 }
 0x1a7   :  { %13503 = vst [vmem:[#allocation48_spill] sm:$0xff] %v10790_v3  ;;  %v2294_v61 = vrot.slane %v2292_v17, 4  ;;  %v2695_v37 = vld [vmem:[#allocation3 + $0x48] sm:$0xf]  ;;  %v10801_v39 = vrot.slane %v2298_v12, 5  ;;  %v2304_v53 = vrot.slane %v2302_v55, 4 }
 0x1a8   :  { %v2407_v40 = vshrl.u32 %v10788_v38, 16  ;;  %v2477_v24 = vsel %vm1495_vm14, 0, %v2468_v60  ;;  %v2696_v30 = vld [vmem:[#allocation3 + $0x4c] sm:$0xf]  ;;  %2703 = vst [vmem:[#allocation5 + $0x1a8] sm:$0xf] %v2695_v37 }
 0x1a9   :  { %v13504_v62 = vshll.u32 %v10422_v63, 16  ;;  %v13506_v25 = vshll.u32 %v10589_v13, 16  ;;  %v2478_v55 = vsel %vm1495_vm14, 0, %v2469_v27  ;;  %v2522_v9 = vshll.u32 %v2477_v24, 16  ;;  %v2586_v12 = vld [vmem:[#allocation3 + $0x48] sm:$0xf] }
 0x1aa   :  { %v2587_v15 = vld [vmem:[#allocation3 + $0x4c] sm:$0xf]  ;;  %2704 = vst [vmem:[#allocation5 + $0x1cc] sm:$0xf] %v2696_v30  ;;  %v2295_v60 = vor.u32 %v2294_v61, %v10799_v23  ;;  %v10819_v37 = vrot.slane %v2398_v1, 7  ;;  %v2401_v63 = vshll.u32 %v10780_v19, 16  ;;  %v2305_v44 = vor.u32 %v2304_v53, %v10801_v39 }
 0x1ab   :  { %v10809_v3 = vor.u32 %v13504_v62, %v10439_v34  ;;  %v10814_v17 = vor.u32 %v13506_v25, %v10621_v22  ;;  %v2526_v62 = vshrl.u32 %v2477_v24, 16  ;;  %v9001_v34 = vld [vmem:[#allocation5 + $0x94] ss:$36 sps:$4 sm:$0xff]   ;;  %v10824_v25 = vrot.slane %v2522_v9, 5  ;;  %v9006_v1 = vld [vmem:[#allocation5 + $0x9c] ss:$36 sps:$4 sm:$0xff]  }
 0x1ac   :  { %v2532_v28 = vshll.u32 %v2478_v55, 16  ;;  %v9004_v27 = vld [vmem:[#allocation5 + $0x90] ss:$36 sps:$4 sm:$0xff]   ;;  %v10827_v10 = vrot.slane %v2407_v40, 7  ;;  %v2536_v61 = vshrl.u32 %v2478_v55, 16  ;;  %3905 = vmatprep.mubr.bf16.mxu0 %v9001_v34  ;;  %v13508_v19 = vshll.u32 %v10593_v47, 16  ;;  %4002 = vmatprep.mubr.bf16.mxu1 %v9006_v1 }
 0x1ad   :  { %13505 = vst [vmem:[#allocation59_spill] sm:$0xff] %v10809_v3  ;;  %13507 = vst [vmem:[#allocation60_spill] sm:$0xff] %v10824_v25  ;;  %v2528_v30 = vrot.slane %v2526_v62, 4  ;;  %v13509_v13 = vshll.u32 %v10630_v36, 16  ;;  %v10841_v3 = vsel %vm9505_vm8, 0, %v2586_v12  ;;  %v10845_v53 = vsel %vm9505_vm8, 0, %v2587_v15  ;;  %3906 = vmatmul.mubr.bf16.gmra.mxu0 %v9004_v27 }
 0x1ae   :  { %v10832_v24 = vor.u32 %v13508_v19, %v10623_v14  ;;  %v2711_v34 = vld [vmem:[#allocation3 + $0x48] sm:$0xf]  ;;  %v9008_v40 = vld [vmem:[#allocation5 + $0x98] ss:$36 sps:$4 sm:$0xff]   ;;  %v13510_v47 = vshll.u32 %v10634_v43, 16  ;;  %v10852_v62 = vrot.slane %v2295_v60, 4 }
 0x1af   :  { %v10837_v9 = vor.u32 %v13509_v13, %v10686_v7  ;;  %v2410_v13 = vshll.u32 %v10788_v38, 16  ;;  %v2712_v12 = vld [vmem:[#allocation3 + $0x4c] sm:$0xf]  ;;  %v2529_v19 = vor.u32 %v2528_v30, %v10824_v25  ;;  %v10857_v15 = vrot.slane %v2532_v28, 5  ;;  %4003 = vmatmul.mubr.bf16.gmra.mxu1 %v9008_v40  ;;  %v2211_v26 = vld [vmem:[#allocation3 + $0x50] sm:$0xf] }
 0x1b0   :  { %v10850_v55 = vor.u32 %v13510_v47, %v10688_v51  ;;  %v2538_v18 = vrot.slane %v2536_v61, 4  ;;  %v2633_v27 = vshrl.u32 %v10841_v3, 16  ;;  %v10860_v43 = vrot.slane %v2305_v44, 4  ;;  %2219 = vst [vmem:[#allocation5 + $0x220] sm:$0xf] %v2211_v26 }
 0x1b1   :  { %13511 = vst [vmem:[#allocation70_spill] sm:$0xff] %v10857_v15  ;;  %v2642_v47 = vshrl.u32 %v10845_v53, 16  ;;  %v10866_v38 = vsel %vm1495_vm14, 0, %v2711_v34  ;;  %v13513_v28 = vshll.u32 %v10698_v0, 16  ;;  %v13515_v61 = vshll.u32 %v10702_v50, 16 }
 0x1b2   :  { %13512 = vst [vmem:[#allocation64_spill] sm:$0xff] %v10866_v38  ;;  %v2636_v44 = vshll.u32 %v10841_v3, 16  ;;  %v2645_v40 = vshll.u32 %v10845_v53, 16  ;;  %v2102_v60 = vld [vmem:[#allocation3 + $0x50] sm:$0xf]  ;;  %v13517_v34 = vshll.u32 %v10750_v45, 16  ;;  %v10891_v50 = vor.u32 %v2401_v63, %v10819_v37 }
 0x1b3   :  { %v10871_v30 = vor.u32 %v13513_v28, %v10731_v31  ;;  %v10876_v1 = vor.u32 %v13515_v61, %v10752_v56  ;;  %v2227_v36 = vld [vmem:[#allocation3 + $0x50] sm:$0xf]  ;;  %v13518_v0 = vshll.u32 %v10760_v41, 16  ;;  %v10895_v3 = vsel %vm1495_vm14, 0, %v2712_v12  ;;  %v2228_v53 = vld [vmem:[#allocation3 + $0x54] sm:$0x1] }
 0x1b4   :  { %v10883_v26 = vor.u32 %v13517_v34, %v10795_v29  ;;  %13519 = vst [vmem:[#allocation84_spill] sm:$0xff] %v10895_v3  ;;  %v2345_v61 = vld [vmem:[#allocation3 + $0x50] sm:$0xf]  ;;  %v10897_v56 = vrot.slane %v2529_v19, 4  ;;  %v2539_v45 = vor.u32 %v2538_v18, %v10857_v15  ;;  %v10900_v34 = vrot.slane %v2633_v27, 7 }
 0x1b5   :  { %13514 = vst [vmem:[#allocation82_spill] sm:$0xff] %v10871_v30  ;;  %13516 = vst [vmem:[#allocation83_spill] sm:$0xff] %v10876_v1  ;;  %v10888_v28 = vor.u32 %v13518_v0, %v10797_v42  ;;  %v2346_v41 = vld [vmem:[#allocation3 + $0x54] sm:$0xf]  ;;  %v10903_v0 = vrot.slane %v2642_v47, 7  ;;  %v10907_v63 = vsel %vm117_vm10, 0, %v2102_v60 }
 0x1b6   :  { %13520 = vst [vmem:[#allocation85_spill] sm:$0xff] %v10897_v56  ;;  %13521 = vst [vmem:[#allocation86_spill] sm:$0xff] %v10900_v34  ;;  %v2236_v12 = vsel %vm1495_vm14, 0, %v2227_v36  ;;  %v10913_v19 = vsel %vm9505_vm8, 0, %v2345_v61  ;;  %v2454_v56 = vld [vmem:[#allocation3 + $0x50] sm:$0xf] }
 0x1b7   :  { %13522 = vst [vmem:[#allocation87_spill] sm:$0xff] %v10903_v0  ;;  %v2237_v31 = vsel %vm10194_vm15, 0, %v2228_v53  ;;  %v2308_v15 = vshll.u32 %v2236_v12, 16  ;;  %v2312_v47 = vshrl.u32 %v2236_v12, 16  ;;  %v2455_v25 = vld [vmem:[#allocation3 + $0x54] sm:$0xf] }
 0x1b8   :  { %2462 = vst [vmem:[#allocation5 + $0x208] sm:$0xf] %v2454_v56  ;;  %v2181_v36 = vshrl.u32 %v10907_v63, 16  ;;  %v10923_v61 = vsel %vm117_vm10, 0, %v2346_v41  ;;  %2463 = vst [vmem:[#allocation5 + $0x22c] sm:$0xf] %v2455_v25  ;;  %v10937_v25 = vor.u32 %v2410_v13, %v10827_v10 }
 0x1b9   :  { %v2470_v8 = vld [vmem:[#allocation3 + $0x50] sm:$0xf]  ;;  %v10925_v18 = vrot.slane %v2539_v45, 4  ;;  %v10927_v38 = vrot.slane %v2308_v15, 5  ;;  %v2314_v53 = vrot.slane %v2312_v47, 4  ;;  %v2416_v12 = vshrl.u32 %v10913_v19, 16 }
 0x1ba   :  { %v2471_v56 = vld [vmem:[#allocation3 + $0x54] sm:$0xf]  ;;  %v10932_v3 = vshll.u32 %v2237_v31, 16  ;;  %v2479_v41 = vsel %vm1495_vm14, 0, %v2470_v8  ;;  %v2588_v1 = vld [vmem:[#allocation3 + $0x50] sm:$0xf]  ;;  %v10940_v15 = vor.u32 %v2636_v44, %v10900_v34  ;;  %v10946_v31 = vor.u32 %v2645_v40, %v10903_v0 }
 0x1bb   :  { %13525 = vst [vmem:[#allocation88_spill] sm:$0xff] %v10925_v18  ;;  %v2425_v45 = vshrl.u32 %v10923_v61, 16  ;;  %v2480_v47 = vsel %vm1495_vm14, 0, %v2471_v56  ;;  %v2589_v60 = vld [vmem:[#allocation3 + $0x54] sm:$0xf]  ;;  %v2183_v30 = vrot.slane %v2181_v36, 7  ;;  %v2315_v13 = vor.u32 %v2314_v53, %v10927_v38 }
 0x1bc   :  { %13526 = vst [vmem:[#allocation89_spill] sm:$0xff] %v10940_v15  ;;  %v2697_v18 = vld [vmem:[#allocation3 + $0x50] sm:$0xf]  ;;  %13527 = vst [vmem:[#allocation90_spill] sm:$0xff] %v10946_v31  ;;  %v2542_v27 = vshll.u32 %v2479_v41, 16  ;;  %v2546_v8 = vshrl.u32 %v2479_v41, 16 }
 0x1bd   :  { %v2698_v49 = vld [vmem:[#allocation3 + $0x54] sm:$0xf]  ;;  %2705 = vst [vmem:[#allocation5 + $0x1f0] sm:$0xf] %v2697_v18  ;;  %v10949_v59 = vrot.slane %v2416_v12, 7  ;;  %v2552_v44 = vshll.u32 %v2480_v47, 16 }
 0x1be   :  { %v2556_v34 = vshrl.u32 %v2480_v47, 16  ;;  %2706 = vst [vmem:[#allocation5 + $0x214] sm:$0xf] %v2698_v49  ;;  %v10951_v15 = vrot.slane %v2542_v27, 5  ;;  %v2548_v56 = vrot.slane %v2546_v8, 4  ;;  %v2597_v46 = vsel %vm9505_vm8, 0, %v2588_v1 }
 0x1bf   :  { %v10957_v40 = vsel %vm9505_vm8, 0, %v2589_v60  ;;  %v2427_v36 = vrot.slane %v2425_v45, 7  ;;  %v10959_v41 = vrot.slane %v2552_v44, 5  ;;  %v2651_v53 = vshrl.u32 %v2597_v46, 16  ;;  %v9009_v12 = vld [vmem:[#allocation5 + $0xdc] ss:$36 sps:$4 sm:$0xff]  }
 0x1c0   :  { %13528 = vst [vmem:[#allocation91_spill] sm:$0xff] %v10951_v15  ;;  %v2558_v18 = vrot.slane %v2556_v34, 4  ;;  %v2096_v0 = vld [vmem:[#allocation3 + $0x38] sm:$0xf]  ;;  %v2184_v47 = vshll.u32 %v10907_v63, 16  ;;  %v2419_v49 = vshll.u32 %v10913_v19, 16  ;;  %v2549_v27 = vor.u32 %v2548_v56, %v10951_v15  ;;  %3913 = vmatprep.mubr.bf16.mxu0 %v9009_v12 }
 0x1c1   :  { %13529 = vst [vmem:[#allocation92_spill] sm:$0xff] %v10959_v41  ;;  %v2660_v8 = vshrl.u32 %v10957_v40, 16  ;;  %v9012_v1 = vld [vmem:[#allocation5 + $0xd8] ss:$36 sps:$4 sm:$0xff]   ;;  %v2094_v31 = vld [vmem:[#allocation3 + $0x30] sm:$0x8] }
 0x1c2   :  { %v2095_v16 = vld [vmem:[#allocation3 + $0x34] sm:$0xf]  ;;  %v2428_v45 = vshll.u32 %v10923_v61, 16  ;;  %v2559_v34 = vor.u32 %v2558_v18, %v10959_v41  ;;  %v10968_v44 = vrot.slane %v2651_v53, 7  ;;  %v9014_v35 = vld [vmem:[#allocation5 + $0xe4] ss:$36 sps:$4 sm:$0xff]   ;;  %v10970_v63 = vor.u32 %v2184_v47, %v2183_v30  ;;  %3914 = vmatmul.mubr.bf16.gmra.mxu0 %v9012_v1 }
 0x1c3   :  { %v10973_v19 = vor.u32 %v2419_v49, %v10949_v59  ;;  %v2654_v15 = vshll.u32 %v2597_v46, 16  ;;  %v9016_v32 = vld [vmem:[#allocation5 + $0xe0] ss:$36 sps:$4 sm:$0xff]   ;;  %v5170_v48 = vld [vmem:[#allocation4 + $0x30] sm:$0x8]  ;;  %v10976_v4 = vrot.slane %v2315_v13, 4  ;;  %4010 = vmatprep.mubr.bf16.mxu1 %v9014_v35 }
 0x1c4   :  { %13530 = vst [vmem:[#allocation93_spill] sm:$0xff] %v10968_v44  ;;  %v2220_v60 = vld [vmem:[#allocation3 + $0x34] sm:$0xf]  ;;  %v10978_v61 = vor.u32 %v2428_v45, %v2427_v36  ;;  %v10980_v18 = vrot.slane %v2549_v27, 4  ;;  %v2663_v53 = vshll.u32 %v10957_v40, 16  ;;  %v10983_v12 = vrot.slane %v2559_v34, 4  ;;  %4011 = vmatmul.mubr.bf16.gmra.mxu1 %v9016_v32 }
 0x1c5   :  { %v2699_v30 = vld [vmem:[#allocation3 + $0x58] sm:$0xf]  ;;  %v10986_v47 = vor.u32 %v2654_v15, %v10968_v44  ;;  %v10989_v49 = vrot.slane %v2660_v8, 7  ;;  %v5171_v13 = vld [vmem:[#allocation4 + $0x34] sm:$0xf]  ;;  %v2103_v27 = vsel %vm115_vm5, 0, %v2094_v31 }
 0x1c6   :  { %13531 = vst [vmem:[#allocation94_spill] sm:$0xff] %v10980_v18  ;;  %13532 = vst [vmem:[#allocation95_spill] sm:$0xff] %v10983_v12  ;;  %v2104_v40 = vsel %vm9505_vm8, 0, %v2095_v16  ;;  %v2105_v35 = vsel %vm9505_vm8, 0, %v2096_v0  ;;  %v5179_v15 = vsel %vm115_vm5, 0, %v5170_v48  ;;  %v2113_v1 = vshrl.u32 %v2103_v27, 16 }
 0x1c7   :  { %13533 = vst [vmem:[#allocation96_spill] sm:$0xff] %v10986_v47  ;;  %2707 = vst [vmem:[#allocation5 + $0x238] sm:$0xf] %v2699_v30  ;;  %v2118_v45 = vshrl.u32 %v2104_v40, 16  ;;  %v2121_v34 = vshll.u32 %v2104_v40, 16  ;;  %v2127_v8 = vshrl.u32 %v2105_v35, 16 }
 0x1c8   :  { %v2130_v46 = vshll.u32 %v2105_v35, 16  ;;  %v5180_v32 = vsel %vm9505_vm8, 0, %v5171_v13  ;;  %v5189_v30 = vshrl.u32 %v5179_v15, 16  ;;  %v2229_v31 = vsel %vm1494_vm13, 0, %v2220_v60  ;;  %v2338_v0 = vld [vmem:[#allocation3 + $0x34] sm:$0x8] }
 0x1c9   :  { %v7615_v12 = vrot.slane %v2113_v1, 11  ;;  %v2120_v16 = vrot.slane %v2118_v45, 7  ;;  %v2129_v44 = vrot.slane %v2127_v8, 7  ;;  %v5194_v18 = vshrl.u32 %v5180_v32, 16 }
 0x1ca   :  { %v11003_v41 = vrot.slane %v5189_v30, 11  ;;  %v5197_v48 = vshll.u32 %v5180_v32, 16  ;;  %v2239_v27 = vshrl.u32 %v2229_v31, 16  ;;  %v2242_v47 = vshll.u32 %v2229_v31, 16  ;;  %v13538_v32 = vld [vmem:[#allocation74_spill] sm:$0xff] }
 0x1cb   :  { %v2123_v40 = vor.u32 %v2121_v34, %v2120_v16  ;;  %v2125_v52 = vrot.slane %v2120_v16, 4  ;;  %v2132_v35 = vor.u32 %v2130_v46, %v2129_v44  ;;  %v2134_v54 = vrot.slane %v2129_v44, 4 }
 0x1cc   :  { %v11005_v11 = vrot.slane %v5194_v18, 7  ;;  %v2241_v13 = vrot.slane %v2239_v27, 4  ;;  %v2244_v15 = vrot.slane %v2242_v47, 5  ;;  %v2347_v60 = vsel %vm115_vm5, 0, %v2338_v0  ;;  %v5280_v27 = vld [vmem:[#allocation4 + $0x34] sm:$0xf] }
 0x1cd   :  { %v2124_v1 = vsel %vm9523_vm9, %v7615_v12, %v2123_v40  ;;  %v2133_v45 = vsel %vm9523_vm9, %v2125_v52, %v2132_v35  ;;  %v2357_v8 = vshrl.u32 %v2347_v60, 16  ;;  %v2142_v34 = vsel %vm9523_vm9, %v2134_v54, %v10770_v20  ;;  %v13555_v40 = vld [vmem:[#allocation21_spill] sm:$0xff]  ;;  %v13557_v35 = vld [vmem:[#allocation30_spill] sm:$0xff]  ;;  %v1740_v60 = vld [vmem:[#allocation3 + $0x28] sm:$0x1] }
 0x1ce   :  { %13536 = vst [vmem:[#allocation97_spill] sm:$0xff] %v11005_v11  ;;  %v11017_v44 = vor.u32 %v2663_v53, %v10989_v49  ;;  %2196 = vst [vmem:[#allocation5 + $0x120] sm:$0xf] %v2124_v1  ;;  %v5199_v18 = vor.u32 %v5197_v48, %v11005_v11  ;;  %v2245_v47 = vor.u32 %v2244_v15, %v2241_v13  ;;  %v13537_v46 = vrot.slane %v13499_v58, 4  ;;  %v13539_v53 = vld [vmem:[#allocation16_spill] sm:$0xff] }
 0x1cf   :  { %2197 = vst [vmem:[#allocation5 + $0x144] sm:$0xf] %v2133_v45  ;;  %2198 = vst [vmem:[#allocation5 + $0x168] sm:$0xf] %v2142_v34  ;;  %v7616_v52 = vrot.slane %v2357_v8, 11  ;;  %v2271_v54 = vsel %vm9487_vm6, %v13538_v32, %v10639_v21  ;;  %v2281_v20 = vsel %vm9487_vm6, %v10694_v6, %v10641_v5  ;;  %v13540_v30 = vrot.slane %v13539_v53, 4 }
 0x1d0   :  { %v2151_v12 = vsel %vm9523_vm9, %v13537_v46, %v10814_v17  ;;  %v5200_v17 = vsel %vm9523_vm9, %v11003_v41, %v5199_v18  ;;  %v2246_v31 = vrot.slane %v2245_v47, 4  ;;  %2332 = vst [vmem:[#allocation5 + $0x170] sm:$0xf] %v2271_v54  ;;  %2333 = vst [vmem:[#allocation5 + $0x194] sm:$0xf] %v2281_v20  ;;  %v13541_v21 = vrot.slane %v10686_v7, 4 }
 0x1d1   :  { %2199 = vst [vmem:[#allocation5 + $0x18c] sm:$0xf] %v2151_v12  ;;  %v2386_v58 = vsel %vm9523_vm9, %v13540_v30, %v10837_v9  ;;  %v13542_v5 = vrot.slane %v10621_v22, 4  ;;  %v13543_v9 = vld [vmem:[#allocation75_spill] sm:$0xff]  ;;  %v13544_v0 = vrot.slane %v10623_v14, 4  ;;  %v2291_v22 = vsel %vm9487_vm6, %v10717_v2, %v10799_v23  ;;  %v13558_v13 = vld [vmem:[#allocation20_spill] sm:$0xff] }
 0x1d2   :  { %v2395_v16 = vsel %vm9523_vm9, %v13541_v21, %v10850_v55  ;;  %2442 = vst [vmem:[#allocation5 + $0x174] sm:$0xf] %v2386_v58  ;;  %v2368_v41 = vsel %vm9523_vm9, %v7616_v52, %v13543_v9  ;;  %v13545_v55 = vld [vmem:[#allocation71_spill] sm:$0xff]  ;;  %2334 = vst [vmem:[#allocation5 + $0x1b8] sm:$0xf] %v2291_v22  ;;  %v13546_v14 = vrot.slane %v10688_v51, 4 }
 0x1d3   :  { %v2160_v6 = vsel %vm9523_vm9, %v13542_v5, %v10832_v24  ;;  %2443 = vst [vmem:[#allocation5 + $0x198] sm:$0xf] %v2395_v16  ;;  %v2169_v7 = vsel %vm9523_vm9, %v13544_v0, %v10883_v26  ;;  %v2301_v24 = vsel %vm9487_vm6, %v10852_v62, %v10801_v39  ;;  %v2251_v48 = vsel %vm9487_vm6, %v2246_v31, %v13545_v55  ;;  %v1858_v1 = vld [vmem:[#allocation3 + $0x28] sm:$0xf]  ;;  %v13560_v34 = vld [vmem:[#allocation33_spill] sm:$0xff]  ;;  %v13561_v18 = vld [vmem:[#allocation38_spill] sm:$0xff] }
 0x1d4   :  { %2200 = vst [vmem:[#allocation5 + $0x1b0] sm:$0xf] %v2160_v6  ;;  %2440 = vst [vmem:[#allocation5 + $0x12c] sm:$0xf] %v2368_v41  ;;  %v2404_v26 = vsel %vm9523_vm9, %v13546_v14, %v10891_v50  ;;  %v13547_v2 = vrot.slane %v10819_v37, 4  ;;  %v13548_v39 = vrot.slane %v10795_v29, 4  ;;  %v2311_v37 = vsel %vm9487_vm6, %v10860_v43, %v10927_v38 }
 0x1d5   :  { %2201 = vst [vmem:[#allocation5 + $0x1d4] sm:$0xf] %v2169_v7  ;;  %2335 = vst [vmem:[#allocation5 + $0x1dc] sm:$0xf] %v2301_v24  ;;  %v13549_v51 = vrot.slane %v10797_v42, 4  ;;  %v13550_v29 = vrot.slane %v10932_v3, 5  ;;  %v1783_v47 = vsel %vm9487_vm6, %v13561_v18, %v13560_v34 }
 0x1d6   :  { %v2413_v23 = vsel %vm9523_vm9, %v13547_v2, %v10937_v25  ;;  %v2178_v62 = vsel %vm9523_vm9, %v13548_v39, %v10888_v28  ;;  %2330 = vst [vmem:[#allocation5 + $0x128] sm:$0xf] %v2251_v48  ;;  %2444 = vst [vmem:[#allocation5 + $0x1bc] sm:$0xf] %v2404_v26  ;;  %v13551_v25 = vrot.slane %v10827_v10, 4  ;;  %v13553_v38 = vld [vmem:[#allocation32_spill] sm:$0xff] }
 0x1d7   :  { %2445 = vst [vmem:[#allocation5 + $0x1e0] sm:$0xf] %v2413_v23  ;;  %v2187_v50 = vsel %vm9523_vm9, %v13549_v51, %v10970_v63  ;;  %2202 = vst [vmem:[#allocation5 + $0x1f8] sm:$0xf] %v2178_v62  ;;  %v2321_v28 = vsel %vm9487_vm6, %v10976_v4, %v13550_v29  ;;  %v13552_v63 = vrot.slane %v10949_v59, 4  ;;  %v13554_v3 = vld [vmem:[#allocation24_spill] sm:$0xff] }
 0x1d8   :  { %v2422_v42 = vsel %vm9523_vm9, %v13551_v25, %v10973_v19  ;;  %2203 = vst [vmem:[#allocation5 + $0x21c] sm:$0xf] %v2187_v50  ;;  %2336 = vst [vmem:[#allocation5 + $0x200] sm:$0xf] %v2311_v37  ;;  %v1773_v4 = vsel %vm9487_vm6, %v13554_v3, %v13553_v38  ;;  %v13556_v10 = vld [vmem:[#allocation23_spill] sm:$0xff]  ;;  %v13559_v15 = vrot.slane %v13558_v13, 4 }
 0x1d9   :  { %2337 = vst [vmem:[#allocation5 + $0x224] sm:$0xf] %v2321_v28  ;;  %v2431_v43 = vsel %vm9523_vm9, %v13552_v63, %v10978_v61  ;;  %2446 = vst [vmem:[#allocation5 + $0x204] sm:$0xf] %v2422_v42  ;;  %v1880_v19 = vsel %vm9523_vm9, %v13556_v10, %v13555_v40  ;;  %v2866_v61 = vld [vmem:[#allocation5 + $0x120] sm:$0xff]  ;;  %v13562_v46 = vld [vmem:[#allocation45_spill] sm:$0xff] }
 0x1da   :  { %v1889_v59 = vsel %vm9523_vm9, %v13559_v15, %v13557_v35  ;;  %v2871_v45 = vld [vmem:[#allocation5 + $0x144] sm:$0xff]  ;;  %2447 = vst [vmem:[#allocation5 + $0x228] sm:$0xf] %v2431_v43  ;;  %1843 = vst [vmem:[#allocation5 + $0x38] sm:$0xf] %v1773_v4  ;;  %v13565_v54 = vld [vmem:[#allocation37_spill] sm:$0xff] }
 0x1db   :  { %v9017_v8 = vld [vmem:[#allocation5 + $0x124] ss:$36 sps:$4 sm:$0xff]   ;;  %1952 = vst [vmem:[#allocation5 + $0x18] sm:$0xf] %v1880_v19  ;;  %1953 = vst [vmem:[#allocation5 + $0x3c] sm:$0xf] %v1889_v59  ;;  %v7655_v16 = vcombine.low %v2866_v61, %v2871_v45 }
 0x1dc   :  { %v13563_v12 = vld [vmem:[#allocation42_spill] sm:$0xff]  ;;  %v13566_v20 = vrot.slane %v13565_v54, 4  ;;  %v13567_v30 = vld [vmem:[#allocation73_spill] sm:$0xff]  ;;  %v13568_v58 = vld [vmem:[#allocation39_spill] sm:$0xff]  ;;  %5272 = vst [vmem:[#allocation5 + $0x120] sm:$0xf] %v5200_v17  ;;  %3921 = vmatprep.mubr.bf16.mxu0 %v9017_v8 }
 0x1dd   :  { %v1793_v52 = vsel %vm9487_vm6, %v13563_v12, %v13562_v46  ;;  %v13564_v32 = vld [vmem:[#allocation18_spill] sm:$0xff]  ;;  %v13569_v31 = vrot.slane %v13568_v58, 4  ;;  %5288 = vst [vmem:[#allocation5 + $0x124] sm:$0xf] %v5280_v27  ;;  %v9027_v5 = vld [vmem:[#allocation5 + $0x16c] ss:$36 sps:$4 sm:$0xff]   ;;  %3922 = vmatmul.mubr.bf16.gmra.mxu0 %v7655_v16 }
 0x1de   :  { %v1898_v53 = vsel %vm9523_vm9, %v13566_v20, %v13564_v32  ;;  %1844 = vst [vmem:[#allocation5 + $0x5c] sm:$0xf] %v1783_v47  ;;  %1845 = vst [vmem:[#allocation5 + $0x80] sm:$0xf] %v1793_v52  ;;  %v13570_v6 = vld [vmem:[#allocation46_spill] sm:$0xff]  ;;  %v13571_v9 = vld [vmem:[#allocation52_spill] sm:$0xff]  ;;  %3929 = vmatprep.mubr.bf16.mxu0 %v9027_v5 }
 0x1df   :  { %v1907_v21 = vsel %vm9523_vm9, %v13569_v31, %v13567_v30  ;;  %1954 = vst [vmem:[#allocation5 + $0x60] sm:$0xf] %v1898_v53  ;;  %v1803_v41 = vsel %vm9487_vm6, %v13571_v9, %v13570_v6  ;;  %v13572_v0 = vld [vmem:[#allocation57_spill] sm:$0xff]  ;;  %v13574_v24 = vld [vmem:[#allocation15_spill] sm:$0xff]  ;;  %v13578_v26 = vld [vmem:[#allocation50_spill] sm:$0xff]  ;;  %v1749_v62 = vsel %vm10194_vm15, 0, %v1740_v60 }
 0x1e0   :  { %1955 = vst [vmem:[#allocation5 + $0x84] sm:$0xf] %v1907_v21  ;;  %v13573_v7 = vld [vmem:[#allocation53_spill] sm:$0xff]  ;;  %1846 = vst [vmem:[#allocation5 + $0xa4] sm:$0xf] %v1803_v41  ;;  %v13577_v14 = vld [vmem:[#allocation19_spill] sm:$0xff] }
 0x1e1   :  { %v1813_v22 = vsel %vm9487_vm6, %v13573_v7, %v13572_v0  ;;  %v13575_v55 = vld [vmem:[#allocation49_spill] sm:$0xff]  ;;  %v13579_v2 = vrot.slane %v13578_v26, 4  ;;  %v13581_v27 = vld [vmem:[#allocation58_spill] sm:$0xff]  ;;  %v13582_v51 = vld [vmem:[#allocation63_spill] sm:$0xff]  ;;  %v1867_v29 = vsel %vm117_vm10, 0, %v1858_v1  ;;  %v1830_v28 = vshll.u32 %v1749_v62, 16 }
 0x1e2   :  { %v13576_v17 = vrot.slane %v13575_v55, 4  ;;  %1847 = vst [vmem:[#allocation5 + $0xc8] sm:$0xf] %v1813_v22  ;;  %v1823_v50 = vsel %vm9487_vm6, %v13582_v51, %v13581_v27  ;;  %v13584_v25 = vld [vmem:[#allocation35_spill] sm:$0xff]  ;;  %v13585_v42 = vld [vmem:[#allocation62_spill] sm:$0xff]  ;;  %v13587_v38 = vld [vmem:[#allocation76_spill] sm:$0xff] }
 0x1e3   :  { %v1925_v23 = vsel %vm9523_vm9, %v13579_v2, %v13577_v14  ;;  %1848 = vst [vmem:[#allocation5 + $0xec] sm:$0xf] %v1823_v50  ;;  %v13586_v63 = vrot.slane %v13585_v42, 4  ;;  %v13588_v3 = vld [vmem:[#allocation77_spill] sm:$0xff]  ;;  %v13589_v40 = vld [vmem:[#allocation31_spill] sm:$0xff]  ;;  %v1937_v15 = vshrl.u32 %v1867_v29, 16 }
 0x1e4   :  { %v1916_v48 = vsel %vm9523_vm9, %v13576_v17, %v13574_v24  ;;  %1957 = vst [vmem:[#allocation5 + $0xcc] sm:$0xf] %v1925_v23  ;;  %v2495_v4 = vsel %vm9487_vm6, %v13588_v3, %v13587_v38  ;;  %v13590_v10 = vld [vmem:[#allocation29_spill] sm:$0xff]  ;;  %v1940_v59 = vshll.u32 %v1867_v29, 16  ;;  %v13591_v60 = vld [vmem:[#allocation59_spill] sm:$0xff]  ;;  %v13593_v45 = vld [vmem:[#allocation82_spill] sm:$0xff] }
 0x1e5   :  { %1956 = vst [vmem:[#allocation5 + $0xa8] sm:$0xf] %v1916_v48  ;;  %v1934_v43 = vsel %vm9523_vm9, %v13586_v63, %v13584_v25  ;;  %v2505_v19 = vsel %vm9487_vm6, %v13590_v10, %v13589_v40  ;;  %v2472_v35 = vld [vmem:[#allocation3 + $0x58] sm:$0x1]  ;;  %2574 = vst [vmem:[#allocation5 + $0x134] sm:$0xf] %v2495_v4 }
 0x1e6   :  { %v9033_v13 = vld [vmem:[#allocation5 + $0x174] ss:$36 sps:$4 sm:$0xff]   ;;  %1958 = vst [vmem:[#allocation5 + $0xf0] sm:$0xf] %v1934_v43  ;;  %2575 = vst [vmem:[#allocation5 + $0x158] sm:$0xf] %v2505_v19 }
 0x1e7   :  { %v13592_v1 = vld [vmem:[#allocation79_spill] sm:$0xff]  ;;  %v13594_v8 = vld [vmem:[#allocation78_spill] sm:$0xff]  ;;  %v1832_v12 = vrot.slane %v1830_v28, 5  ;;  %v13596_v52 = vld [vmem:[#allocation25_spill] sm:$0xff]  ;;  %v1939_v5 = vrot.slane %v1937_v15, 7  ;;  %v2481_v63 = vsel %vm10194_vm15, 0, %v2472_v35 }
 0x1e8   :  { %v2612_v61 = vsel %vm9523_vm9, %v13592_v1, %v13591_v60  ;;  %v13595_v34 = vrot.slane %v13594_v8, 4  ;;  %v9021_v47 = vld [vmem:[#allocation5 + $0x12c] ss:$36 sps:$4 sm:$0xff]   ;;  %v13603_v6 = vld [vmem:[#allocation89_spill] sm:$0xff]  ;;  %v13604_v9 = vld [vmem:[#allocation22_spill] sm:$0xff]  ;;  %v2562_v19 = vshll.u32 %v2481_v63, 16 }
 0x1e9   :  { %v9023_v46 = vld [vmem:[#allocation5 + $0x128] ss:$36 sps:$4 sm:$0xff]   ;;  %2684 = vst [vmem:[#allocation5 + $0x138] sm:$0xf] %v2612_v61  ;;  %v13597_v32 = vld [vmem:[#allocation28_spill] sm:$0xff]  ;;  %v13605_v41 = vrot.slane %v13604_v9, 4  ;;  %4018 = vmatprep.mubr.bf16.mxu1 %v9021_v47  ;;  %v1942_v3 = vor.u32 %v1940_v59, %v1939_v5 }
 0x1ea   :  { %v2621_v18 = vsel %vm9523_vm9, %v13595_v34, %v13593_v45  ;;  %v2515_v54 = vsel %vm9487_vm6, %v13597_v32, %v13596_v52  ;;  %v13598_v20 = vld [vmem:[#allocation60_spill] sm:$0xff]  ;;  %v13600_v58 = vld [vmem:[#allocation83_spill] sm:$0xff]  ;;  %v13606_v7 = vld [vmem:[#allocation70_spill] sm:$0xff]  ;;  %4019 = vmatmul.mubr.bf16.gmra.mxu1 %v9023_v46 }
 0x1eb   :  { %2685 = vst [vmem:[#allocation5 + $0x15c] sm:$0xf] %v2621_v18  ;;  %v13599_v53 = vld [vmem:[#allocation36_spill] sm:$0xff]  ;;  %2576 = vst [vmem:[#allocation5 + $0x17c] sm:$0xf] %v2515_v54  ;;  %v2639_v0 = vsel %vm9523_vm9, %v13605_v41, %v13603_v6  ;;  %v13607_v22 = vld [vmem:[#allocation85_spill] sm:$0xff]  ;;  %4026 = vmatprep.mubr.bf16.mxu1 %v9033_v13 }
 0x1ec   :  { %v2525_v30 = vsel %vm9487_vm6, %v13599_v53, %v13598_v20  ;;  %v13601_v31 = vld [vmem:[#allocation72_spill] sm:$0xff]  ;;  %v2535_v24 = vsel %vm9487_vm6, %v13607_v22, %v13606_v7  ;;  %v13608_v55 = vld [vmem:[#allocation91_spill] sm:$0xff]  ;;  %v2590_v14 = vld [vmem:[#allocation3 + $0x58] sm:$0xf]  ;;  %2687 = vst [vmem:[#allocation5 + $0x1a4] sm:$0xf] %v2639_v0 }
 0x1ed   :  { %v13602_v21 = vrot.slane %v13601_v31, 4  ;;  %2577 = vst [vmem:[#allocation5 + $0x1a0] sm:$0xf] %v2525_v30  ;;  %v13609_v17 = vld [vmem:[#allocation88_spill] sm:$0xff]  ;;  %v9031_v26 = vld [vmem:[#allocation5 + $0x168] ss:$36 sps:$4 sm:$0xff]  }
 0x1ee   :  { %v2545_v48 = vsel %vm9487_vm6, %v13609_v17, %v13608_v55  ;;  %v13610_v2 = vld [vmem:[#allocation65_spill] sm:$0xff]  ;;  %2578 = vst [vmem:[#allocation5 + $0x1c4] sm:$0xf] %v2535_v24  ;;  %v13611_v62 = vld [vmem:[#allocation90_spill] sm:$0xff]  ;;  %v13614_v29 = vld [vmem:[#allocation96_spill] sm:$0xff]  ;;  %v2599_v35 = vsel %vm117_vm10, 0, %v2590_v14  ;;  %3930 = vmatmul.mubr.bf16.gmra.mxu0 %v9031_v26 }
 0x1ef   :  { %v2630_v16 = vsel %vm9523_vm9, %v13602_v21, %v13600_v58  ;;  %v1833_v23 = vsel %vm9487_vm6, %v13610_v2, %v1832_v12  ;;  %2579 = vst [vmem:[#allocation5 + $0x1e8] sm:$0xf] %v2545_v48  ;;  %v13612_v27 = vld [vmem:[#allocation86_spill] sm:$0xff]  ;;  %v13615_v28 = vld [vmem:[#allocation87_spill] sm:$0xff]  ;;  %v2713_v43 = vld [vmem:[#allocation3 + $0x50] sm:$0xf] }
 0x1f0   :  { %2686 = vst [vmem:[#allocation5 + $0x180] sm:$0xf] %v2630_v16  ;;  %v13613_v51 = vrot.slane %v13612_v27, 4  ;;  %v13616_v25 = vrot.slane %v13615_v28, 4  ;;  %v9039_v38 = vld [vmem:[#allocation5 + $0x1b4] ss:$36 sps:$4 sm:$0xff]  }
 0x1f1   :  { %1849 = vst [vmem:[#allocation5 + $0x110] sm:$0xf] %v1833_v23  ;;  %v13617_v4 = vld [vmem:[#allocation92_spill] sm:$0xff]  ;;  %v13618_v40 = vld [vmem:[#allocation94_spill] sm:$0xff]  ;;  %v13619_v15 = vld [vmem:[#allocation93_spill] sm:$0xff]  ;;  %v2564_v13 = vrot.slane %v2562_v19, 5  ;;  %3937 = vmatprep.mubr.bf16.mxu0 %v9039_v38 }
 0x1f2   :  { %v2648_v50 = vsel %vm9523_vm9, %v13613_v51, %v13611_v62  ;;  %v2657_v42 = vsel %vm9523_vm9, %v13616_v25, %v13614_v29  ;;  %v2555_v10 = vsel %vm9487_vm6, %v13618_v40, %v13617_v4  ;;  %v13620_v60 = vrot.slane %v13619_v15, 4  ;;  %v13621_v59 = vld [vmem:[#allocation26_spill] sm:$0xff]  ;;  %v13622_v61 = vld [vmem:[#allocation27_spill] sm:$0xff]  ;;  %v13623_v8 = vld [vmem:[#allocation40_spill] sm:$0xff] }
 0x1f3   :  { %2688 = vst [vmem:[#allocation5 + $0x1c8] sm:$0xf] %v2648_v50  ;;  %2689 = vst [vmem:[#allocation5 + $0x1ec] sm:$0xf] %v2657_v42  ;;  %v2001_v45 = vor.u32 %v13622_v61, %v13621_v59  ;;  %v13624_v34 = vld [vmem:[#allocation43_spill] sm:$0xff]  ;;  %v13626_v46 = vld [vmem:[#allocation44_spill] sm:$0xff] }
 0x1f4   :  { %v2666_v1 = vsel %vm9523_vm9, %v13620_v60, %v11017_v44  ;;  %2580 = vst [vmem:[#allocation5 + $0x20c] sm:$0xf] %v2555_v10  ;;  %v2011_v18 = vor.u32 %v13624_v34, %v13623_v8  ;;  %v13625_v47 = vld [vmem:[#allocation51_spill] sm:$0xff]  ;;  %v13627_v52 = vld [vmem:[#allocation66_spill] sm:$0xff]  ;;  %v13630_v20 = vld [vmem:[#allocation56_spill] sm:$0xff]  ;;  %v11260_v16 = vsel %vm1495_vm14, 0, %v2713_v43 }
 0x1f5   :  { %2690 = vst [vmem:[#allocation5 + $0x210] sm:$0xf] %v2666_v1  ;;  %v2027_v12 = vsel %vm9487_vm6, %v13626_v46, %v13625_v47  ;;  %v13628_v32 = vrot.slane %v13627_v52, 4  ;;  %v13629_v54 = vld [vmem:[#allocation54_spill] sm:$0xff]  ;;  %v13631_v30 = vld [vmem:[#allocation55_spill] sm:$0xff]  ;;  %v2669_v5 = vshrl.u32 %v2599_v35, 16 }
 0x1f6   :  { %v2037_v53 = vsel %vm9487_vm6, %v13630_v20, %v13629_v54  ;;  %2088 = vst [vmem:[#allocation5 + $0x68] sm:$0xf] %v2027_v12  ;;  %v2041_v58 = vor.u32 %v13631_v30, %v13629_v54  ;;  %v1983_v31 = vld [vmem:[#allocation3 + $0x28] sm:$0xf]  ;;  %v2672_v6 = vshll.u32 %v2599_v35, 16  ;;  %v13634_v41 = vld [vmem:[#allocation68_spill] sm:$0xff] }
 0x1f7   :  { %v1943_v44 = vsel %vm9523_vm9, %v13628_v32, %v1942_v3  ;;  %2089 = vst [vmem:[#allocation5 + $0x8c] sm:$0xf] %v2037_v53  ;;  %v13633_v9 = vld [vmem:[#allocation67_spill] sm:$0xff]  ;;  %v2667_v22 = vrot.slane %v10989_v49, 4  ;;  %v9035_v24 = vld [vmem:[#allocation5 + $0x170] ss:$36 sps:$4 sm:$0xff]  }
 0x1f8   :  { %1959 = vst [vmem:[#allocation5 + $0x114] sm:$0xf] %v1943_v44  ;;  %v2051_v0 = vor.u32 %v13634_v41, %v13633_v9  ;;  %v1984_v7 = vld [vmem:[#allocation3 + $0x2c] sm:$0x1]  ;;  %v2002_v48 = vrot.slane %v2001_v45, 4  ;;  %v2012_v14 = vrot.slane %v2011_v18, 4  ;;  %4027 = vmatmul.mubr.bf16.gmra.mxu1 %v9035_v24 }
 0x1f9   :  { %v13635_v55 = vld [vmem:[#allocation95_spill] sm:$0xff]  ;;  %v9045_v2 = vld [vmem:[#allocation5 + $0x1bc] ss:$36 sps:$4 sm:$0xff]   ;;  %v2671_v26 = vrot.slane %v2669_v5, 7  ;;  %v2042_v23 = vrot.slane %v2041_v58, 4  ;;  %v1992_v29 = vsel %vm1495_vm14, 0, %v1983_v31 }
 0x1fa   :  { %v2565_v17 = vsel %vm9487_vm6, %v13635_v55, %v2564_v13  ;;  %v5043_v62 = vld [vmem:[#allocation4 + $0x28] sm:$0xf]  ;;  %v2007_v27 = vsel %vm9487_vm6, %v2002_v48, %v13623_v8  ;;  %v13636_v51 = vld [vmem:[#allocation41_spill] sm:$0xff]  ;;  %v2052_v50 = vrot.slane %v2051_v0, 4  ;;  %v2714_v28 = vld [vmem:[#allocation3 + $0x54] sm:$0xf]  ;;  %4034 = vmatprep.mubr.bf16.mxu1 %v9045_v2 }
 0x1fb   :  { %2581 = vst [vmem:[#allocation5 + $0x230] sm:$0xf] %v2565_v17  ;;  %v2017_v49 = vsel %vm9487_vm6, %v2012_v14, %v13636_v51  ;;  %v2776_v25 = vshll.u32 %v11260_v16, 16  ;;  %v9043_v42 = vld [vmem:[#allocation5 + $0x1b0] ss:$36 sps:$4 sm:$0xff]   ;;  %v2674_v63 = vor.u32 %v2672_v6, %v2671_v26  ;;  %v2047_v43 = vsel %vm9487_vm6, %v2042_v23, %v13633_v9  ;;  %v13637_v3 = vld [vmem:[#allocation69_spill] sm:$0xff] }
 0x1fc   :  { %2086 = vst [vmem:[#allocation5 + $0x20] sm:$0xf] %v2007_v27  ;;  %2087 = vst [vmem:[#allocation5 + $0x44] sm:$0xf] %v2017_v49  ;;  %v9051_v38 = vld [vmem:[#allocation5 + $0x1fc] ss:$36 sps:$4 sm:$0xff]   ;;  %v2057_v4 = vsel %vm9487_vm6, %v2052_v50, %v13637_v3  ;;  %3938 = vmatmul.mubr.bf16.gmra.mxu0 %v9043_v42 }
 0x1fd   :  { %2090 = vst [vmem:[#allocation5 + $0xb0] sm:$0xf] %v2047_v43  ;;  %v1993_v40 = vsel %vm10194_vm15, 0, %v1984_v7  ;;  %v13638_v10 = vld [vmem:[#allocation61_spill] sm:$0xff]  ;;  %v2064_v15 = vshll.u32 %v1992_v29, 16  ;;  %v13639_v60 = vld [vmem:[#allocation64_spill] sm:$0xff]  ;;  %v2675_v45 = vsel %vm9523_vm9, %v2667_v22, %v2674_v63  ;;  %3945 = vmatprep.mubr.bf16.mxu0 %v9051_v38 }
 0x1fe   :  { %v2058_v19 = vshrl.u32 %v13638_v10, 16  ;;  %v13640_v1 = vshll.u32 %v13639_v60, 16  ;;  %v13641_v59 = vshrl.u32 %v13639_v60, 16  ;;  %2091 = vst [vmem:[#allocation5 + $0xd4] sm:$0xf] %v2057_v4  ;;  %v2068_v8 = vshrl.u32 %v1992_v29, 16 }
 0x1ff   :  { %v5059_v34 = vld [vmem:[#allocation4 + $0x28] sm:$0xf]  ;;  %v13642_v18 = vld [vmem:[#allocation84_spill] sm:$0xff]  ;;  %2691 = vst [vmem:[#allocation5 + $0x234] sm:$0xf] %v2675_v45  ;;  %v2066_v13 = vrot.slane %v2064_v15, 5 }
 0x200   :  { %v11288_v35 = vrot.slane %v13640_v1, 5  ;;  %v11292_v61 = vrot.slane %v13641_v59, 4  ;;  %v13643_v47 = vshll.u32 %v13642_v18, 16  ;;  %v13644_v12 = vshrl.u32 %v13642_v18, 16  ;;  %v11304_v32 = vld [vmem:[#allocation5 + $0xf4] ss:$36 sps:$4 sm:$0xff]  }
 0x201   :  { %v2060_v44 = vrot.slane %v2058_v19, 4  ;;  %v11308_v54 = vsel %vm1495_vm14, 0, %v2714_v28  ;;  %v2780_v20 = vshrl.u32 %v11260_v16, 16  ;;  %5051 = vst [vmem:[#allocation5 + $0x118] sm:$0xf] %v5043_v62  ;;  %v2070_v53 = vrot.slane %v2068_v8, 4 }
 0x202   :  { %v11298_v46 = vrot.slane %v13643_v47, 5  ;;  %v11302_v52 = vrot.slane %v13644_v12, 4  ;;  %v2074_v30 = vshll.u32 %v1993_v40, 16  ;;  %v5060_v58 = vld [vmem:[#allocation4 + $0x2c] sm:$0x1]  ;;  %v11311_v31 = vrot.slane %v2776_v25, 5 }
 0x203   :  { %v9047_v5 = vld [vmem:[#allocation5 + $0x1b8] ss:$36 sps:$4 sm:$0xff]   ;;  %v2061_v6 = vor.u32 %v2060_v44, %v13637_v3  ;;  %v5068_v9 = vsel %vm1495_vm14, 0, %v5059_v34  ;;  %v9057_v41 = vld [vmem:[#allocation5 + $0x204] ss:$36 sps:$4 sm:$0xff]   ;;  %v2071_v0 = vor.u32 %v2070_v53, %v2066_v13  ;;  %v13645_v24 = vld [vmem:[#allocation80_spill] sm:$0xff]  ;;  %v2763_v19 = vor.u32 %v11292_v61, %v11288_v35 }
 0x204   :  { %v2076_v7 = vrot.slane %v2074_v30, 5  ;;  %v5140_v22 = vshll.u32 %v5068_v9, 16  ;;  %v13646_v16 = vld [vmem:[#allocation81_spill] sm:$0xff]  ;;  %v5069_v48 = vsel %vm10194_vm15, 0, %v5060_v58  ;;  %v5144_v14 = vshrl.u32 %v5068_v9, 16  ;;  %v13648_v26 = vld [vmem:[#allocation34_spill] sm:$0xff]  ;;  %4035 = vmatmul.mubr.bf16.gmra.mxu1 %v9047_v5 }
 0x205   :  { %v2733_v55 = vor.u32 %v13646_v16, %v13645_v24  ;;  %v2062_v17 = vrot.slane %v2061_v6, 4  ;;  %v13647_v2 = vld [vmem:[#allocation17_spill] sm:$0xff]  ;;  %v2782_v62 = vrot.slane %v2780_v20, 4  ;;  %v2072_v51 = vrot.slane %v2071_v0, 4  ;;  %v13650_v50 = vld [vmem:[#allocation47_spill] sm:$0xff]  ;;  %v13651_v29 = vld [vmem:[#allocation48_spill] sm:$0xff]  ;;  %4042 = vmatprep.mubr.bf16.mxu1 %v9057_v41 }
 0x206   :  { %v2743_v23 = vor.u32 %v13648_v26, %v13647_v2  ;;  %v9055_v27 = vld [vmem:[#allocation5 + $0x1f8] ss:$36 sps:$4 sm:$0xff]   ;;  %v11322_v49 = vrot.slane %v5140_v22, 5  ;;  %v2753_v28 = vor.u32 %v13651_v29, %v13650_v50  ;;  %v5146_v42 = vrot.slane %v5144_v14, 4  ;;  %v2828_v60 = vld [vmem:[#allocation5 + $0x10] sm:$0xff] }
 0x207   :  { %v2067_v25 = vsel %vm9487_vm6, %v2062_v17, %v2066_v13  ;;  %v2786_v63 = vshll.u32 %v11308_v54, 16  ;;  %v5775_v43 = vld [vmem:[#allocation4 + $0x58] sm:$0xf]  ;;  %v2077_v38 = vsel %vm9487_vm6, %v2072_v51, %v2076_v7  ;;  %v5150_v3 = vshll.u32 %v5069_v48, 16  ;;  %3946 = vmatmul.mubr.bf16.gmra.mxu0 %v9055_v27  ;;  %v2716_v12 = vld [vmem:[#allocation3 + $0x5c] sm:$0x1] }
 0x208   :  { %13649 = vst [vmem:[#allocation74_spill] sm:$0xff] %v11322_v49  ;;  %2092 = vst [vmem:[#allocation5 + $0xf8] sm:$0xf] %v2067_v25  ;;  %v2734_v4 = vrot.slane %v2733_v55, 4  ;;  %v9059_v40 = vld [vmem:[#allocation5 + $0x14] ss:$36 sps:$4 sm:$0xff]   ;;  %v2773_v15 = vor.u32 %v11302_v52, %v11298_v46  ;;  %v5147_v45 = vor.u32 %v5146_v42, %v11322_v49  ;;  %v2783_v18 = vor.u32 %v2782_v62, %v11311_v31 }
 0x209   :  { %2093 = vst [vmem:[#allocation5 + $0x11c] sm:$0xf] %v2077_v38  ;;  %v2744_v10 = vrot.slane %v2743_v23, 4  ;;  %v2833_v1 = vld [vmem:[#allocation5 + $0x34] sm:$0xff]  ;;  %v2754_v34 = vrot.slane %v2753_v28, 4  ;;  %4083 = vmatprep.mubr.bf16.mxu0 %v9059_v40  ;;  %v2788_v13 = vrot.slane %v2786_v63, 5 }
 0x20a   :  { %v11335_v59 = vld [vmem:[#allocation5 + $0x214] ss:$36 sps:$4 sm:$0xff]   ;;  %v2739_v8 = vsel %vm9487_vm6, %v2734_v4, %v13647_v2  ;;  %v9061_v44 = vld [vmem:[#allocation5 + $0x200] ss:$36 sps:$4 sm:$0xff]   ;;  %v5152_v20 = vrot.slane %v5150_v3, 5  ;;  %v7623_v58 = vcombine.low %v2828_v60, %v2833_v1  ;;  %v5148_v6 = vrot.slane %v5147_v45, 4 }
 0x20b   :  { %v2715_v47 = vld [vmem:[#allocation3 + $0x58] sm:$0xf]  ;;  %5783 = vst [vmem:[#allocation5 + $0x238] sm:$0xf] %v5775_v43  ;;  %v2749_v52 = vsel %vm9487_vm6, %v2744_v10, %v13650_v50  ;;  %2818 = vst [vmem:[#allocation5 + $0x140] sm:$0xf] %v2739_v8  ;;  %v2759_v53 = vsel %vm9487_vm6, %v2754_v34, %v11288_v35 }
 0x20c   :  { %v5791_v61 = vld [vmem:[#allocation4 + $0x58] sm:$0xf]  ;;  %2819 = vst [vmem:[#allocation5 + $0x164] sm:$0xf] %v2749_v52  ;;  %v9064_v30 = vld [vmem:[#allocation5 + $0x1c] ss:$36 sps:$4 sm:$0xff]   ;;  %4043 = vmatmul.mubr.bf16.gmra.mxu1 %v9061_v44  ;;  %v5153_v55 = vsel %vm9487_vm6, %v5148_v6, %v5152_v20 }
 0x20d   :  { %2820 = vst [vmem:[#allocation5 + $0x188] sm:$0xf] %v2759_v53  ;;  %v9074_v5 = vld [vmem:[%s13168_s2 + $0x230] sm:$0xff]   ;;  %v2764_v9 = vrot.slane %v2763_v19, 4  ;;  %v2774_v41 = vrot.slane %v2773_v15, 4  ;;  %v2784_v0 = vrot.slane %v2783_v18, 4  ;;  %4180 = vmatprep.mubr.bf16.mxu1 %v9064_v30 }
 0x20e   :  { %v2724_v7 = vsel %vm1495_vm14, 0, %v2715_v47  ;;  %v2725_v22 = vsel %vm10194_vm15, 0, %v2716_v12  ;;  %v2790_v35 = vshrl.u32 %v11308_v54, 16  ;;  %v5800_v24 = vsel %vm1495_vm14, 0, %v5791_v61  ;;  %v5792_v14 = vld [vmem:[#allocation4 + $0x5c] sm:$0x1] }
 0x20f   :  { %v2769_v17 = vsel %vm9487_vm6, %v2764_v9, %v11298_v46  ;;  %v2779_v48 = vsel %vm9487_vm6, %v2774_v41, %v11311_v31  ;;  %v2789_v54 = vsel %vm9487_vm6, %v2784_v0, %v2788_v13  ;;  %v9069_v2 = vld [vmem:[#allocation5 + $0x5c] ss:$36 sps:$4 sm:$0xff]   ;;  %v2796_v23 = vshll.u32 %v2724_v7, 16  ;;  %4084 = vmatmul.mubr.bf16.vlgmr.msra.gmra.mxu0 %v7623_v58  ;;  %v9080_v25 = vld [vmem:[%s13168_s2 + $0x228] sm:$0xff]   ;;  %v9097_v6 = vld [vmem:[%s13168_s2 + $0x210] sm:$0xff]  }
 0x210   :  { %v11358_v16 = vld [vmem:[#allocation5 + $0xf8] ss:$36 sps:$4 sm:$0xff]   ;;  %2821 = vst [vmem:[#allocation5 + $0x1ac] sm:$0xf] %v2769_v17  ;;  %2822 = vst [vmem:[#allocation5 + $0x1d0] sm:$0xf] %v2779_v48  ;;  %4091 = vmatprep.mubr.bf16.mxu0 %v9069_v2 }
 0x211   :  { %5169 = vst [vmem:[#allocation5 + $0x11c] sm:$0xf] %v5153_v55  ;;  %2823 = vst [vmem:[#allocation5 + $0x1f4] sm:$0xf] %v2789_v54  ;;  %v2792_v26 = vrot.slane %v2790_v35, 4  ;;  %v2800_v62 = vshrl.u32 %v2724_v7, 16 }
 0x212   :  { %v2806_v27 = vshll.u32 %v2725_v22, 16  ;;  %v5872_v51 = vshll.u32 %v5800_v24, 16  ;;  %v5876_v46 = vshrl.u32 %v5800_v24, 16  ;;  %v9292_v31 = vld [vmem:[%s13168_s2 + $0x238] sm:$0xff]   ;;  %v2798_v29 = vrot.slane %v2796_v23, 5  ;;  %v9086_v18 = vld [vmem:[%s13168_s2 + $0x220] sm:$0xff]  }
 0x213   :  { %8818 = vmatpush3.bf16.msra.mxu0 %v9292_v31  ;;  %v2793_v50 = vor.u32 %v2792_v26, %v2788_v13  ;;  %v2802_v28 = vrot.slane %v2800_v62, 4  ;;  %v5801_v42 = vsel %vm10194_vm15, 0, %v5792_v14  ;;  %v2843_v38 = vld [vmem:[#allocation5 + $0x7c] sm:$0xff]  ;;  %v9072_v19 = vld [vmem:[#allocation5 + $0x64] ss:$36 sps:$4 sm:$0xff]   ;;  %v2863_v22 = vld [vmem:[#allocation5 + $0x10c] sm:$0xff] }
 0x214   :  { %8819 = vmatprep.subr.bf16.mxu0 %v9074_v5  ;;  %v11378_v63 = vrot.slane %v5872_v51, 5  ;;  %v5878_v43 = vrot.slane %v5876_v46, 4  ;;  %v9071_v3 = vld [vmem:[#allocation5 + $0x18] ss:$36 sps:$4 sm:$0xff]   ;;  %v2808_v10 = vrot.slane %v2806_v27, 5  ;;  %v5882_v8 = vshll.u32 %v5801_v42, 16 }
 0x215   :  { %v2794_v4 = vrot.slane %v2793_v50, 4  ;;  %v2803_v40 = vor.u32 %v2802_v28, %v2798_v29  ;;  %v2838_v15 = vld [vmem:[#allocation5 + $0x58] sm:$0xff]  ;;  %4181 = vmatmul.mubr.bf16.vlgmr.msra.gmra.mxu1 %v9071_v3  ;;  %v9075_v47 = vld [vmem:[#allocation5 + $0xa4] ss:$36 sps:$4 sm:$0xff]   ;;  %v9078_v53 = vld [vmem:[#allocation5 + $0xac] ss:$36 sps:$4 sm:$0xff]  }
 0x216   :  { %13652 = vst [vmem:[#allocation16_spill] sm:$0xff] %v11378_v63  ;;  %v5879_v45 = vor.u32 %v5878_v43, %v11378_v63  ;;  %4188 = vmatprep.mubr.bf16.mxu1 %v9072_v19  ;;  %v7632_v34 = vcombine.low %v2838_v15, %v2843_v38  ;;  %v5884_v44 = vrot.slane %v5882_v8, 5  ;;  %v9091_v52 = vld [vmem:[%s13168_s2 + $0x218] sm:$0xff]   ;;  %v2853_v13 = vld [vmem:[#allocation5 + $0xc4] sm:$0xff]  ;;  %v9081_v9 = vld [vmem:[#allocation5 + $0xec] ss:$36 sps:$4 sm:$0xff]  }
 0x217   :  { %8820 = vmatpush3.bf16.msra.mxu0 %v9074_v5  ;;  %v2799_v60 = vsel %vm9487_vm6, %v2794_v4, %v2798_v29  ;;  %v2804_v1 = vrot.slane %v2803_v40, 4  ;;  %v9077_v20 = vld [vmem:[#allocation5 + $0x60] ss:$36 sps:$4 sm:$0xff]   ;;  %v9103_v0 = vld [vmem:[%s13168_s2 + $0x208] sm:$0xff]   ;;  %v9087_v17 = vld [vmem:[#allocation5 + $0x134] ss:$36 sps:$4 sm:$0xff]  }
 0x218   :  { %8821 = vmatprep.subr.bf16.mxu0 %v9080_v25  ;;  %2824 = vst [vmem:[#allocation5 + $0x218] sm:$0xf] %v2799_v60  ;;  %4092 = vmatmul.mubr.bf16.gmra.mxu0 %v7632_v34  ;;  %v5880_v61 = vrot.slane %v5879_v45, 4  ;;  %v2848_v30 = vld [vmem:[#allocation5 + $0xa0] sm:$0xff]  ;;  %v2858_v7 = vld [vmem:[#allocation5 + $0xe8] sm:$0xff]  ;;  %v2859_v48 = vld [vmem:[#allocation5 + $0xf0] sm:$0xff] }
 0x219   :  { %v2809_v12 = vsel %vm9487_vm6, %v2804_v1, %v2808_v10  ;;  %4099 = vmatprep.mubr.bf16.mxu0 %v9075_v47  ;;  %v7641_v5 = vcombine.low %v2848_v30, %v2853_v13  ;;  %v9083_v35 = vld [vmem:[#allocation5 + $0xa8] ss:$36 sps:$4 sm:$0xff]   ;;  %v7650_v24 = vcombine.low %v2858_v7, %v2863_v22  ;;  %v9109_v55 = vld [vmem:[%s13168_s2 + $0x200] sm:$0xff]   ;;  %v2864_v54 = vld [vmem:[#allocation5 + $0x114] sm:$0xff] }
 0x21a   :  { %2825 = vst [vmem:[#allocation5 + $0x23c] sm:$0xf] %v2809_v12  ;;  %v5885_v58 = vsel %vm9487_vm6, %v5880_v61, %v5884_v44  ;;  %v2873_v14 = vld [vmem:[#allocation5 + $0x154] sm:$0xff]  ;;  %v7652_v2 = vcombine.low %v2859_v48, %v2864_v54  ;;  %v9089_v26 = vld [vmem:[#allocation5 + $0x13c] ss:$36 sps:$4 sm:$0xff]   ;;  %v2893_v28 = vld [vmem:[#allocation5 + $0x1e4] sm:$0xff] }
 0x21b   :  { %8822 = vmatpush3.bf16.msra.mxu0 %v9080_v25  ;;  %v2868_v23 = vld [vmem:[#allocation5 + $0x130] sm:$0xff]  ;;  %v9092_v62 = vld [vmem:[#allocation5 + $0x17c] ss:$36 sps:$4 sm:$0xff]   ;;  %v9095_v46 = vld [vmem:[#allocation5 + $0x184] ss:$36 sps:$4 sm:$0xff]  }
 0x21c   :  { %8823 = vmatprep.subr.bf16.mxu0 %v9086_v18  ;;  %v2883_v27 = vld [vmem:[#allocation5 + $0x19c] sm:$0xff]  ;;  %v9098_v29 = vld [vmem:[#allocation5 + $0x1c4] ss:$36 sps:$4 sm:$0xff]   ;;  %v9101_v42 = vld [vmem:[#allocation5 + $0x1cc] ss:$36 sps:$4 sm:$0xff]  }
 0x21d   :  { %4189 = vmatmul.mubr.bf16.gmra.mxu1 %v9077_v20  ;;  %v9094_v51 = vld [vmem:[#allocation5 + $0x138] ss:$36 sps:$4 sm:$0xff]   ;;  %v9100_v25 = vld [vmem:[#allocation5 + $0x180] ss:$36 sps:$4 sm:$0xff]   ;;  %v9104_v3 = vld [vmem:[#allocation5 + $0x20c] ss:$36 sps:$4 sm:$0xff]  }
 0x21e   :  { %4196 = vmatprep.mubr.bf16.mxu1 %v9078_v53  ;;  %v2878_v31 = vld [vmem:[#allocation5 + $0x178] sm:$0xff]  ;;  %v2888_v43 = vld [vmem:[#allocation5 + $0x1c0] sm:$0xff]  ;;  %v2898_v4 = vld [vmem:[#allocation5 + $0x208] sm:$0xff] }
 0x21f   :  { %8824 = vmatpush3.bf16.msra.mxu0 %v9086_v18  ;;  %v7668_v50 = vcombine.low %v2878_v31, %v2883_v27  ;;  %v7677_v38 = vcombine.low %v2888_v43, %v2893_v28  ;;  %v2903_v40 = vld [vmem:[#allocation5 + $0x22c] sm:$0xff]  ;;  %v9110_v15 = vld [vmem:[#allocation5 + $0x20] ss:$36 sps:$4 sm:$0xff]   ;;  %v2904_v1 = vld [vmem:[#allocation5 + $0x234] sm:$0xff] }
 0x220   :  { %8825 = vmatprep.subr.bf16.mxu0 %v9091_v52  ;;  %4100 = vmatmul.mubr.bf16.gmra.mxu0 %v7641_v5  ;;  %v9106_v10 = vld [vmem:[#allocation5 + $0x1c8] ss:$36 sps:$4 sm:$0xff]   ;;  %v7686_v19 = vcombine.low %v2898_v4, %v2903_v40  ;;  %v2899_v60 = vld [vmem:[#allocation5 + $0x210] sm:$0xff]  ;;  %v9114_v18 = vld [vmem:[#allocation5 + $0x140] ss:$36 sps:$4 sm:$0xff]  }
 0x221   :  { %v11396_v41 = vld [vmem:[#allocation5 + $0x218] ss:$36 sps:$4 sm:$0xff]   ;;  %4107 = vmatprep.mubr.bf16.mxu0 %v9081_v9  ;;  %v7688_v45 = vcombine.low %v2899_v60, %v2904_v1  ;;  %v9111_v8 = vld [vmem:[#allocation5 + $0x68] ss:$36 sps:$4 sm:$0xff]   ;;  %v9112_v34 = vld [vmem:[#allocation5 + $0xb0] ss:$36 sps:$4 sm:$0xff]  }
 0x222   :  { %5901 = vst [vmem:[#allocation5 + $0x23c] sm:$0xf] %v5885_v58  ;;  %v9116_v44 = vld [vmem:[#allocation5 + $0x1d0] ss:$36 sps:$4 sm:$0xff]   ;;  %v11410_v20 = vld [vmem:[%s13170_s5] ss:$0 sm:$0xff] }
 0x223   :  { %8826 = vmatpush3.bf16.msra.mxu0 %v9091_v52  ;;  %v9120_v28 = vld [vmem:[%s13171_s3 + $0x70] sm:$0xff]   ;;  %v9122_v43 = vld [vmem:[%s13171_s3 + $0x68] sm:$0xff]  }
 0x224   :  { %8827 = vmatprep.subr.bf16.mxu0 %v9097_v6 }
 0x225   :  { %4197 = vmatmul.mubr.bf16.gmra.mxu1 %v9083_v35 }
 0x226   :  { %4204 = vmatprep.mubr.bf16.mxu1 %v11304_v32  ;;  %v7659_v32 = vcombine.low %v2868_v23, %v2873_v14 }
 0x227   :  { %8828 = vmatpush3.bf16.msra.mxu0 %v9097_v6 }
 0x228   :  { %8829 = vmatprep.subr.bf16.mxu0 %v9103_v0  ;;  %4108 = vmatmul.mubr.bf16.gmra.mxu0 %v7650_v24 }
 0x229   :  { %4115 = vmatprep.mubr.bf16.mxu0 %v9087_v17 }
 0x22b   :  { %8830 = vmatpush3.bf16.msra.mxu0 %v9103_v0 }
 0x22c   :  { %8831 = vmatprep.subr.bf16.mxu0 %v9109_v55 }
 0x22d   :  { %4205 = vmatmul.mubr.bf16.gmra.mxu1 %v7652_v2 }
 0x22e   :  { %4212 = vmatprep.mubr.bf16.mxu1 %v9089_v26  ;;  %v8353_v47 = vpop.f32.mrf.mxu1 }
 0x22f   :  { %8832 = vmatpush3.bf16.msra.mxu0 %v9109_v55 }
 0x230   :  { %4116 = vmatmul.mubr.bf16.gmra.mxu0 %v7659_v32  ;;  %v8354_v12 = vpop.f32.mrf.mxu1 }
 0x231   :  { %4123 = vmatprep.mubr.bf16.mxu0 %v9092_v62  ;;  %v8355_v61 = vadd.f32 %v8354_v12, %v8353_v47  ;;  %v9118_v62 = vld [vmem:[%s13171_s3 + $0x78] sm:$0xff]  }
 0x232   :  { %v8356_v13 = vpop.f32.mrf.mxu1  ;;  %8545 = vmatprep.subr.bf16.mxu1 %v9118_v62 }
 0x234   :  { %v8357_v5 = vpop.f32.mrf.mxu1 }
 0x235   :  { %4213 = vmatmul.mubr.bf16.gmra.mxu1 %v9094_v51  ;;  %v8358_v7 = vadd.f32 %v8357_v5, %v8356_v13 }
 0x236   :  { %4220 = vmatprep.mubr.bf16.mxu1 %v9095_v46  ;;  %v8289_v52 = vpop.f32.mrf.mxu0  ;;  %v9119_v46 = vld [vmem:[%s13171_s3 + $0x38] sm:$0xff]  }
 0x237   :  { %8546 = vmatpush3.bf16.msra.mxu1 %v9119_v46 }
 0x238   :  { %4124 = vmatmul.mubr.bf16.gmra.mxu0 %v7668_v50  ;;  %v8290_v53 = vpop.f32.mrf.mxu0  ;;  %8547 = vmatprep.subr.bf16.mxu1 %v9120_v28 }
 0x239   :  { %4131 = vmatprep.mubr.bf16.mxu0 %v9098_v29  ;;  %v8291_v30 = vadd.f32 %v8290_v53, %v8289_v52 }
 0x23a   :  { %v8292_v58 = vpop.f32.mrf.mxu0 }
 0x23c   :  { %v8293_v6 = vpop.f32.mrf.mxu0 }
 0x23d   :  { %4221 = vmatmul.mubr.bf16.gmra.mxu1 %v9100_v25  ;;  %v8294_v0 = vadd.f32 %v8293_v6, %v8292_v58  ;;  %v9121_v25 = vld [vmem:[%s13171_s3 + $0x30] sm:$0xff]  }
 0x23e   :  { %4228 = vmatprep.mubr.bf16.mxu1 %v9101_v42  ;;  %v8295_v22 = vpop.f32.mrf.mxu0  ;;  %8548 = vmatpush3.bf16.msra.mxu1 %v9121_v25 }
 0x23f   :  { %v3895_v35 = vadd.f32 %v8294_v0, %v11410_v20  ;;  %8549 = vmatprep.subr.bf16.mxu1 %v9122_v43 }
 0x240   :  { %4132 = vmatmul.mubr.bf16.gmra.mxu0 %v7677_v38  ;;  %v8296_v24 = vpop.f32.mrf.mxu0 }
 0x241   :  { %4139 = vmatprep.mubr.bf16.mxu0 %v9104_v3  ;;  %v11417_v55 = vadd.f32 %v8358_v7, %v3895_v35  ;;  %v8297_v17 = vadd.f32 %v8296_v24, %v8295_v22 }
 0x242   :  { %v8298_v48 = vpop.f32.mrf.mxu0 }
 0x243   :  { %v3900_v2 = vadd.f32 %v8297_v17, %v11410_v20 }
 0x244   :  { %v8299_v54 = vpop.f32.mrf.mxu0 }
 0x245   :  { %4229 = vmatmul.mubr.bf16.gmra.mxu1 %v9106_v10  ;;  %v8300_v26 = vadd.f32 %v8299_v54, %v8298_v48 }
 0x246   :  { %4236 = vmatprep.mubr.bf16.mxu1 %v11335_v59  ;;  %v9115_v59 = vld [vmem:[#allocation5 + $0x188] ss:$36 sps:$4 sm:$0xff]  }
 0x247   :  { %v3903_v51 = vadd.f32 %v8300_v26, %v11410_v20 }
 0x248   :  { %4140 = vmatmul.mubr.bf16.gmra.mxu0 %v7686_v19  ;;  %v9123_v19 = vld [vmem:[%s13171_s3 + $0x28] sm:$0xff]  }
 0x249   :  { %8833 = vmatprep.mubr.bf16.mxu0 %v9110_v15  ;;  %8550 = vmatpush3.bf16.msra.mxu1 %v9123_v19 }
 0x24d   :  { %4237 = vmatmul.mubr.bf16.gmra.mxu1 %v7688_v45 }
 0x250   :  { %8834 = vmatmul.mubr.bf16.vlgmr.msra.gmra.mxu0 %v9111_v8 }
 0x251   :  { %8837 = vmatprep.mubr.bf16.mxu0 %v9112_v34 }
 0x256   :  { %v8359_v14 = vpop.f32.mrf.mxu1 }
 0x258   :  { %8838 = vmatmul.mubr.bf16.gmra.mxu0 %v11358_v16  ;;  %v3892_v16 = vadd.f32 %v8291_v30, %v11410_v20  ;;  %v8360_v23 = vpop.f32.mrf.mxu1 }
 0x259   :  { %8841 = vmatprep.mubr.bf16.mxu0 %v9114_v18  ;;  %v8361_v32 = vadd.f32 %v8360_v23, %v8359_v14 }
 0x25a   :  { %v11413_v9 = vadd.f32 %v8355_v61, %v3892_v16  ;;  %v9124_v61 = vld [vmem:[%s13171_s3 + $0x60] sm:$0xff]  }
 0x25b   :  { %v11423_v27 = vadd.f32 %v8361_v32, %v3900_v2  ;;  %8551 = vmatprep.subr.bf16.mxu1 %v9124_v61 }
 0x260   :  { %8842 = vmatmul.mubr.bf16.gmra.mxu0 %v9115_v59 }
 0x261   :  { %8845 = vmatprep.mubr.bf16.mxu0 %v9116_v44  ;;  %v9125_v44 = vld [vmem:[%s13171_s3 + $0x20] sm:$0xff]  }
 0x262   :  { %8552 = vmatpush3.bf16.msra.mxu1 %v9125_v44 }
 0x268   :  { %8846 = vmatmul.mubr.bf16.gmra.mxu0 %v11396_v41  ;;  %v8362_v41 = vpop.f32.mrf.mxu1 }
 0x26a   :  { %v8363_v31 = vpop.f32.mrf.mxu1 }
 0x26b   :  { %v8364_v50 = vadd.f32 %v8363_v31, %v8362_v41 }
 0x26d   :  { %v11429_v29 = vadd.f32 %v8364_v50, %v3903_v51  ;;  %v8301_v42 = vpop.f32.mrf.mxu0 }
 0x26f   :  { %v8302_v38 = vpop.f32.mrf.mxu0  ;;  %v8365_v3 = vpop.f32.mrf.mxu1 }
 0x270   :  { %v8303_v4 = vadd.f32 %v8302_v38, %v8301_v42 }
 0x271   :  { %v8304_v40 = vpop.f32.mrf.mxu0  ;;  %v8366_v10 = vpop.f32.mrf.mxu1 }
 0x272   :  { %v3908_v15 = vadd.f32 %v8303_v4, %v11410_v20  ;;  %v8367_v60 = vadd.f32 %v8366_v10, %v8365_v3 }
 0x273   :  { %v8305_v1 = vpop.f32.mrf.mxu0  ;;  %v8368_v45 = vpop.f32.mrf.mxu1 }
 0x274   :  { %v11444_v8 = vadd.f32 %v8367_v60, %v3908_v15  ;;  %v8306_v34 = vadd.f32 %v8305_v1, %v8304_v40 }
 0x275   :  { %v8369_v18 = vpop.f32.mrf.mxu1 }
 0x276   :  { %v3911_v47 = vadd.f32 %v8306_v34, %v11410_v20  ;;  %v8370_v12 = vadd.f32 %v8369_v18, %v8368_v45 }
 0x278   :  { %v11450_v59 = vadd.f32 %v8370_v12, %v3911_v47 }
 0x282   :  { %v8307_v52 = vpop.f32.mrf.mxu0 }
 0x284   :  { %v8308_v13 = vpop.f32.mrf.mxu0  ;;  %v8371_v53 = vpop.f32.mrf.mxu1 }
 0x285   :  { %v8309_v30 = vadd.f32 %v8308_v13, %v8307_v52 }
 0x286   :  { %v8372_v58 = vpop.f32.mrf.mxu1  ;;  %v11458_v0 = vpop.f32.mrf.mxu0 }
 0x287   :  { %v3916_v5 = vadd.f32 %v8309_v30, %v11410_v20  ;;  %v8373_v16 = vadd.f32 %v8372_v58, %v8371_v53 }
 0x288   :  { %v11460_v7 = vpop.f32.mrf.mxu0  ;;  %v11462_v22 = vpop.f32.mrf.mxu1 }
 0x289   :  { %v11456_v6 = vadd.f32 %v8373_v16, %v3916_v5 }
 0x28a   :  { %v11464_v24 = vpop.f32.mrf.mxu1 }
 0x29d   :  { %v8313_v35 = vpop.f32.mrf.mxu0 }
 0x29f   :  { %v8314_v17 = vpop.f32.mrf.mxu0 }
 0x2a0   :  { %v8315_v48 = vadd.f32 %v8314_v17, %v8313_v35 }
 0x2a1   :  { %v8316_v54 = vpop.f32.mrf.mxu0 }
 0x2a2   :  { %v3924_v2 = vadd.f32 %v8315_v48, %v11410_v20 }
 0x2a3   :  { %v8317_v26 = vpop.f32.mrf.mxu0 }
 0x2a4   :  { %v8318_v32 = vadd.f32 %v8317_v26, %v8316_v54 }
 0x2a6   :  { %v3927_v31 = vadd.f32 %v8318_v32, %v11410_v20  ;;  %v9127_v32 = vld [vmem:[%s13171_s3 + $0x18] sm:$0xff]  }
 0x2aa   :  { %v8377_v14 = vpop.f32.mrf.mxu1 }
 0x2ac   :  { %v8378_v23 = vpop.f32.mrf.mxu1 }
 0x2ad   :  { %v8379_v62 = vadd.f32 %v8378_v23, %v8377_v14  ;;  %v9126_v23 = vld [vmem:[%s13171_s3 + $0x58] sm:$0xff]  }
 0x2ae   :  { %v8319_v41 = vpop.f32.mrf.mxu0  ;;  %v8380_v51 = vpop.f32.mrf.mxu1  ;;  %8553 = vmatprep.subr.bf16.mxu1 %v9126_v23 }
 0x2af   :  { %v11467_v46 = vadd.f32 %v8379_v62, %v3924_v2  ;;  %v9128_v62 = vld [vmem:[%s13171_s3 + $0xf8] sm:$0xff]   ;;  %8554 = vmatpush3.bf16.msra.mxu1 %v9127_v32 }
 0x2b0   :  { %v8320_v50 = vpop.f32.mrf.mxu0  ;;  %v8381_v28 = vpop.f32.mrf.mxu1  ;;  %8609 = vmatprep.subr.bf16.mxu0 %v9128_v62 }
 0x2b1   :  { %v8321_v25 = vadd.f32 %v8320_v50, %v8319_v41  ;;  %v8382_v42 = vadd.f32 %v8381_v28, %v8380_v51 }
 0x2b2   :  { %v8322_v43 = vpop.f32.mrf.mxu0 }
 0x2b3   :  { %v11470_v3 = vadd.f32 %v8382_v42, %v3927_v31  ;;  %v3932_v4 = vadd.f32 %v8321_v25, %v11410_v20  ;;  %v9129_v31 = vld [vmem:[%s13171_s3 + $0xb8] sm:$0xff]  }
 0x2b4   :  { %v8323_v40 = vpop.f32.mrf.mxu0  ;;  %8610 = vmatpush3.bf16.msra.mxu0 %v9129_v31  ;;  %v9131_v31 = vld [vmem:[%s13171_s3 + $0x50] sm:$0xff]  }
 0x2b5   :  { %v8324_v19 = vadd.f32 %v8323_v40, %v8322_v43  ;;  %8555 = vmatprep.subr.bf16.mxu1 %v9131_v31 }
 0x2b7   :  { %v3935_v34 = vadd.f32 %v8324_v19, %v11410_v20 }
 0x2b8   :  { %v8383_v38 = vpop.f32.mrf.mxu1 }
 0x2ba   :  { %v8384_v10 = vpop.f32.mrf.mxu1 }
 0x2bb   :  { %v8385_v15 = vadd.f32 %v8384_v10, %v8383_v38 }
 0x2bc   :  { %v8325_v60 = vpop.f32.mrf.mxu0  ;;  %v8386_v1 = vpop.f32.mrf.mxu1 }
 0x2bd   :  { %v11473_v45 = vadd.f32 %v8385_v15, %v3932_v4 }
 0x2be   :  { %v8326_v18 = vpop.f32.mrf.mxu0  ;;  %v8387_v47 = vpop.f32.mrf.mxu1 }
 0x2bf   :  { %v8327_v12 = vadd.f32 %v8326_v18, %v8325_v60  ;;  %v8388_v61 = vadd.f32 %v8387_v47, %v8386_v1 }
 0x2c0   :  { %v8328_v44 = vpop.f32.mrf.mxu0 }
 0x2c1   :  { %v11476_v13 = vadd.f32 %v8388_v61, %v3935_v34  ;;  %v3940_v53 = vadd.f32 %v8327_v12, %v11410_v20 }
 0x2c2   :  { %v8329_v30 = vpop.f32.mrf.mxu0 }
 0x2c3   :  { %v8330_v5 = vadd.f32 %v8329_v30, %v8328_v44  ;;  %v9130_v30 = vld [vmem:[%s13171_s3 + $0xf0] sm:$0xff]  }
 0x2c4   :  { %v8389_v52 = vpop.f32.mrf.mxu1  ;;  %8611 = vmatprep.subr.bf16.mxu0 %v9130_v30  ;;  %v9133_v30 = vld [vmem:[%s13171_s3 + $0x10] sm:$0xff]  }
 0x2c5   :  { %v3943_v54 = vadd.f32 %v8330_v5, %v11410_v20  ;;  %v9132_v5 = vld [vmem:[%s13171_s3 + $0xb0] sm:$0xff]   ;;  %8556 = vmatpush3.bf16.msra.mxu1 %v9133_v30 }
 0x2c6   :  { %v8390_v58 = vpop.f32.mrf.mxu1  ;;  %8612 = vmatpush3.bf16.msra.mxu0 %v9132_v5 }
 0x2c7   :  { %v8391_v16 = vadd.f32 %v8390_v58, %v8389_v52  ;;  %v8331_v35 = vpop.f32.mrf.mxu0 }
 0x2c8   :  { %v8392_v17 = vpop.f32.mrf.mxu1 }
 0x2c9   :  { %v11479_v48 = vadd.f32 %v8391_v16, %v3940_v53  ;;  %v8332_v14 = vpop.f32.mrf.mxu0 }
 0x2ca   :  { %v8393_v2 = vpop.f32.mrf.mxu1  ;;  %v8333_v26 = vadd.f32 %v8332_v14, %v8331_v35 }
 0x2cb   :  { %v8394_v41 = vadd.f32 %v8393_v2, %v8392_v17  ;;  %v8334_v51 = vpop.f32.mrf.mxu0 }
 0x2cc   :  { %v8395_v50 = vpop.f32.mrf.mxu1  ;;  %v3948_v25 = vadd.f32 %v8333_v26, %v11410_v20 }
 0x2cd   :  { %v11494_v28 = vadd.f32 %v8394_v41, %v3943_v54  ;;  %v8335_v42 = vpop.f32.mrf.mxu0 }
 0x2ce   :  { %v8396_v43 = vpop.f32.mrf.mxu1  ;;  %v8336_v38 = vadd.f32 %v8335_v42, %v8334_v51 }
 0x2cf   :  { %v8397_v4 = vadd.f32 %v8396_v43, %v8395_v50  ;;  %v8417_v40 = vpop.f32.mrf.mxu0  ;;  %v9135_v43 = vld [vmem:[%s13171_s3 + $0xa8] sm:$0xff]  }
 0x2d0   :  { %v8398_v10 = vpop.f32.mrf.mxu1  ;;  %v3951_v15 = vadd.f32 %v8336_v38, %v11410_v20 }
 0x2d1   :  { %v11497_v19 = vadd.f32 %v8397_v4, %v3948_v25  ;;  %v8418_v60 = vpop.f32.mrf.mxu0  ;;  %v9134_v25 = vld [vmem:[%s13171_s3 + $0xe8] sm:$0xff]  }
 0x2d2   :  { %v8399_v1 = vpop.f32.mrf.mxu1  ;;  %v8419_v34 = vadd.f32 %v8418_v60, %v8417_v40  ;;  %8613 = vmatprep.subr.bf16.mxu0 %v9134_v25 }
 0x2d3   :  { %v8400_v18 = vadd.f32 %v8399_v1, %v8398_v10  ;;  %v11500_v47 = vpop.f32.mrf.mxu0  ;;  %8614 = vmatpush3.bf16.msra.mxu0 %v9135_v43 }
 0x2d4   :  { %v11503_v12 = vadd.f32 %v8419_v34, %v11413_v9 }
 0x2d5   :  { %v11505_v61 = vpop.f32.mrf.mxu1  ;;  %v11507_v44 = vadd.f32 %v8400_v18, %v3951_v15  ;;  %v11509_v52 = vpop.f32.mrf.mxu0 }
 0x2d7   :  { %v11511_v53 = vpop.f32.mrf.mxu1 }
 0x2d8   :  { %v11516_v58 = vpop.f32.mrf.mxu0 }
 0x2d9   :  { %v11521_v9 = vpop.f32.mrf.mxu1 }
 0x2da   :  { %v11523_v16 = vpop.f32.mrf.mxu0 }
 0x2db   :  { %v11525_v35 = vpop.f32.mrf.mxu1 }
 0x2dc   :  { %v11527_v17 = vpop.f32.mrf.mxu0 }
 0x2dd   :  { %v11529_v54 = vpop.f32.mrf.mxu1 }
 0x2de   :  { %v11531_v14 = vpop.f32.mrf.mxu0 }
 0x2df   :  { %v11533_v2 = vpop.f32.mrf.mxu1 }
 0x2e0   :  { %v11535_v26 = vpop.f32.mrf.mxu0 }
 0x2e1   :  { %v11537_v23 = vpop.f32.mrf.mxu1 }
 0x2e2   :  { %v11539_v32 = vpop.f32.mrf.mxu0 }
 0x2e3   :  { %v11541_v62 = vpop.f32.mrf.mxu1 }
 0x2e4   :  { %v11543_v41 = vpop.f32.mrf.mxu0 }
 0x2e5   :  { %v11545_v51 = vpop.f32.mrf.mxu1 }
 0x2e6   :  { %v11550_v50 = vpop.f32.mrf.mxu0 }
 0x2e7   :  { %v11555_v42 = vpop.f32.mrf.mxu1 }
 0x2e8   :  { %v11560_v38 = vpop.f32.mrf.mxu0 }
 0x2e9   :  { %v11562_v4 = vpop.f32.mrf.mxu1 }
 0x2ea   :  { %v11564_v40 = vpop.f32.mrf.mxu0 }
 0x2eb   :  { %v11566_v10 = vpop.f32.mrf.mxu1 }
 0x2ec   :  { %v11568_v15 = vpop.f32.mrf.mxu0 }
 0x2ed   :  { %v11570_v60 = vpop.f32.mrf.mxu1 }
 0x2ee   :  { %v11572_v1 = vpop.f32.mrf.mxu0 }
 0x2ef   :  { %v11574_v34 = vpop.f32.mrf.mxu1 }
 0x2f0   :  { %v8441_v18 = vpop.f32.mrf.mxu0 }
 0x2f1   :  { %v11579_v5 = vpop.f32.mrf.mxu1 }
 0x2f2   :  { %v8442_v31 = vpop.f32.mrf.mxu0 }
 0x2f3   :  { %v11581_v25 = vpop.f32.mrf.mxu1  ;;  %v8443_v43 = vadd.f32 %v8442_v31, %v8441_v18 }
 0x2f4   :  { %v8444_v63 = vpop.f32.mrf.mxu0 }
 0x2f5   :  { %v11584_v49 = vadd.f32 %v8443_v43, %v11467_v46  ;;  %v11586_v33 = vpop.f32.mrf.mxu1 }
 0x2f6   :  { %13654 = vst [vmem:[#allocation71_spill] sm:$0xff] %v11586_v33  ;;  %v8445_v57 = vpop.f32.mrf.mxu0 }
 0x2f7   :  { %13653 = vst [vmem:[#allocation75_spill] sm:$0xff] %v11584_v49  ;;  %v11588_v39 = vpop.f32.mrf.mxu1  ;;  %v8446_v37 = vadd.f32 %v8445_v57, %v8444_v63 }
 0x2f8   :  { %v8447_v36 = vpop.f32.mrf.mxu0 }
 0x2f9   :  { %v11591_v56 = vadd.f32 %v8446_v37, %v11470_v3  ;;  %v11593_v21 = vpop.f32.mrf.mxu1 }
 0x2fa   :  { %13656 = vst [vmem:[#allocation24_spill] sm:$0xff] %v11593_v21  ;;  %v8448_v30 = vpop.f32.mrf.mxu0 }
 0x2fb   :  { %13655 = vst [vmem:[#allocation32_spill] sm:$0xff] %v11591_v56  ;;  %v11595_v11 = vpop.f32.mrf.mxu1  ;;  %v8449_v18 = vadd.f32 %v8448_v30, %v8447_v36 }
 0x2fc   :  { %v8450_v31 = vpop.f32.mrf.mxu0 }
 0x2fd   :  { %v11598_v46 = vadd.f32 %v8449_v18, %v11473_v45  ;;  %v11600_v43 = vpop.f32.mrf.mxu1 }
 0x2fe   :  { %13658 = vst [vmem:[#allocation23_spill] sm:$0xff] %v11600_v43  ;;  %v8451_v49 = vpop.f32.mrf.mxu0 }
 0x2ff   :  { %13657 = vst [vmem:[#allocation21_spill] sm:$0xff] %v11598_v46  ;;  %v11602_v33 = vpop.f32.mrf.mxu1  ;;  %v8452_v57 = vadd.f32 %v8451_v49, %v8450_v31 }
 0x300   :  { %v8453_v63 = vpop.f32.mrf.mxu0 }
 0x301   :  { %v11605_v37 = vadd.f32 %v8452_v57, %v11476_v13  ;;  %v11607_v3 = vpop.f32.mrf.mxu1  ;;  %v9136_v13 = vld [vmem:[%s13171_s3 + $0xe0] sm:$0xff]  }
 0x302   :  { %v8454_v56 = vpop.f32.mrf.mxu0  ;;  %v9138_v57 = vld [vmem:[%s13171_s3 + $0xa0] sm:$0xff]   ;;  %8615 = vmatprep.subr.bf16.mxu0 %v9136_v13 }
 0x303   :  { %13659 = vst [vmem:[#allocation30_spill] sm:$0xff] %v11605_v37  ;;  %v11609_v21 = vpop.f32.mrf.mxu1  ;;  %v8455_v36 = vadd.f32 %v8454_v56, %v8453_v63  ;;  %v8425_v56 = vadd.f32 %v11523_v16, %v11516_v58  ;;  %8616 = vmatpush3.bf16.msra.mxu0 %v9138_v57  ;;  %v8312_v37 = vadd.f32 %v11460_v7, %v11458_v0 }
 0x304   :  { %v8456_v30 = vpop.f32.mrf.mxu0  ;;  %v8483_v7 = vadd.f32 %v11511_v53, %v11505_v61  ;;  %v8437_v61 = vadd.f32 %v11564_v40, %v11560_v38  ;;  %v8434_v38 = vadd.f32 %v11550_v50, %v11543_v41  ;;  %v8504_v41 = vadd.f32 %v11581_v25, %v11579_v5  ;;  %v13661_v25 = vld [vmem:[#allocation71_spill] sm:$0xff] }
 0x305   :  { %v11612_v45 = vadd.f32 %v8455_v36, %v11479_v48  ;;  %v11614_v18 = vpop.f32.mrf.mxu1 }
 0x306   :  { %v8457_v46 = vpop.f32.mrf.mxu0 }
 0x307   :  { %13660 = vst [vmem:[#allocation20_spill] sm:$0xff] %v11612_v45  ;;  %v11616_v43 = vpop.f32.mrf.mxu1  ;;  %v8458_v49 = vadd.f32 %v8457_v46, %v8456_v30  ;;  %v8428_v46 = vadd.f32 %v11531_v14, %v11527_v17  ;;  %v9140_v45 = vld [vmem:[%s13171_s3 + $0xd8] sm:$0xff]   ;;  %v4094_v17 = vadd.f32 %v8425_v56, %v11423_v27  ;;  %v8489_v14 = vadd.f32 %v11533_v2, %v11529_v54 }
 0x308   :  { %v8459_v31 = vpop.f32.mrf.mxu0  ;;  %8617 = vmatprep.subr.bf16.mxu0 %v9140_v45  ;;  %v3919_v27 = vadd.f32 %v8312_v37, %v11410_v20  ;;  %v8376_v54 = vadd.f32 %v11464_v24, %v11462_v22  ;;  %v8486_v2 = vadd.f32 %v11525_v35, %v11521_v9  ;;  %v9137_v20 = vld [vmem:[%s13171_s3 + $0x48] sm:$0xff]   ;;  %v8431_v22 = vadd.f32 %v11539_v32, %v11535_v26 }
 0x309   :  { %v11627_v48 = vadd.f32 %v8458_v49, %v11494_v28  ;;  %v11629_v63 = vpop.f32.mrf.mxu1  ;;  %v8422_v28 = vadd.f32 %v11509_v52, %v11500_v47  ;;  %v9141_v49 = vld [vmem:[%s13171_s3 + $0x98] sm:$0xff]   ;;  %v4097_v47 = vadd.f32 %v8428_v46, %v11429_v29  ;;  %v8492_v52 = vadd.f32 %v11541_v62, %v11537_v23  ;;  %v9139_v9 = vld [vmem:[%s13171_s3 + $0x8] sm:$0xff]   ;;  %8557 = vmatprep.subr.bf16.mxu1 %v9137_v20 }
 0x30a   :  { %v8460_v36 = vpop.f32.mrf.mxu0  ;;  %8618 = vmatpush3.bf16.msra.mxu0 %v9141_v49  ;;  %v4191_v53 = vadd.f32 %v8489_v14, %v4094_v17  ;;  %v4016_v62 = vadd.f32 %v8376_v54, %v3919_v27  ;;  %8558 = vmatpush3.bf16.msra.mxu1 %v9139_v9  ;;  %v4110_v32 = vadd.f32 %v8437_v61, %v11456_v6 }
 0x30b   :  { %v8461_v30 = vadd.f32 %v8460_v36, %v8459_v31  ;;  %v11640_v58 = vpop.f32.mrf.mxu1  ;;  %v4194_v23 = vadd.f32 %v8492_v52, %v4097_v47  ;;  %v4102_v36 = vadd.f32 %v8431_v22, %v11444_v8  ;;  %v4105_v6 = vadd.f32 %v8434_v38, %v11450_v59  ;;  %v13666_v38 = vld [vmem:[#allocation75_spill] sm:$0xff] }
 0x30c   :  { %v8462_v16 = vpop.f32.mrf.mxu0  ;;  %v8507_v52 = vadd.f32 %v11588_v39, %v13661_v25  ;;  %v8516_v61 = vadd.f32 %v11609_v21, %v11607_v3  ;;  %v8522_v39 = vadd.f32 %v11640_v58, %v11629_v63  ;;  %v13667_v21 = vld [vmem:[#allocation32_spill] sm:$0xff]  ;;  %v13668_v63 = vld [vmem:[#allocation21_spill] sm:$0xff] }
 0x30d   :  { %v11649_v13 = vadd.f32 %v8461_v30, %v11497_v19  ;;  %v4089_v19 = vadd.f32 %v8422_v28, %v11417_v55  ;;  %v8523_v45 = vpop.f32.mrf.mxu1  ;;  %v8440_v55 = vadd.f32 %v11572_v1, %v11568_v15  ;;  %v8501_v15 = vadd.f32 %v11574_v34, %v11570_v60 }
 0x30e   :  { %v8463_v0 = vpop.f32.mrf.mxu0  ;;  %v8498_v60 = vadd.f32 %v11566_v10, %v11562_v4  ;;  %v13663_v10 = vld [vmem:[#allocation23_spill] sm:$0xff] }
 0x30f   :  { %v8464_v31 = vadd.f32 %v8463_v0, %v8462_v16  ;;  %v8524_v40 = vpop.f32.mrf.mxu1  ;;  %v4186_v26 = vadd.f32 %v8486_v2, %v4089_v19  ;;  %v4113_v46 = vadd.f32 %v8440_v55, %v4016_v62  ;;  %v4207_v0 = vadd.f32 %v8501_v15, %v4110_v32 }
 0x310   :  { %v8835_v57 = vpop.f32.mrf.mxu0  ;;  %v8513_v54 = vadd.f32 %v11602_v33, %v13663_v10  ;;  %v8525_v20 = vadd.f32 %v8524_v40, %v8523_v45  ;;  %v13664_v33 = vld [vmem:[#allocation14_spill] sm:$0xff] }
 0x311   :  { %v11665_v29 = vadd.f32 %v8464_v31, %v11507_v44  ;;  %v4288_v35 = vadd.f32 %v8835_v57, %v4191_v53  ;;  %v4183_v44 = vadd.f32 %v8483_v7, %v11503_v12  ;;  %v8495_v12 = vadd.f32 %v11555_v42, %v11545_v51  ;;  %v8526_v34 = vpop.f32.mrf.mxu1  ;;  %v13662_v31 = vld [vmem:[#allocation24_spill] sm:$0xff] }
 0x312   :  { %v4279_v24 = vpop.f32.mrf.mxu0  ;;  %v4210_v5 = vadd.f32 %v8504_v41, %v4113_v46  ;;  %v8510_v59 = vadd.f32 %v11595_v11, %v13662_v31  ;;  %v4202_v57 = vadd.f32 %v8498_v60, %v4105_v6  ;;  %v8519_v53 = vadd.f32 %v11616_v43, %v11614_v18 }
 0x313   :  { %v4280_v1 = vadd.f32 %v4279_v24, %v4183_v44  ;;  %v4344_v50 = vmax.f32 %v4288_v35, 0.0  ;;  %v4199_v47 = vadd.f32 %v8495_v12, %v4102_v36  ;;  %v8527_v27 = vpop.f32.mrf.mxu1  ;;  %v4223_v58 = vadd.f32 %v8513_v54, %v13668_v63  ;;  %v13670_v12 = vld [vmem:[#allocation20_spill] sm:$0xff] }
 0x314   :  { %v8836_v37 = vpop.f32.mrf.mxu0  ;;  %v8528_v22 = vadd.f32 %v8527_v27, %v8526_v34  ;;  %v11707_v3 = vadd.f32 %v8510_v59, %v13667_v21  ;;  %v11712_v36 = vadd.f32 %v8525_v20, %v11649_v13  ;;  %v11715_v46 = vadd.f32 %v8519_v53, %v13670_v12 }
 0x315   :  { %v4291_v56 = vadd.f32 %v8836_v37, %v4194_v23  ;;  %v4342_v17 = vmax.f32 %v4280_v1, 0.0  ;;  %v4215_v37 = vadd.f32 %v8507_v52, %v13666_v38  ;;  %v13669_v1 = vld [vmem:[#allocation30_spill] sm:$0xff] }
 0x316   :  { %v4282_v30 = vpop.f32.mrf.mxu0  ;;  %v11725_v13 = vadd.f32 %v8528_v22, %v11665_v29 }
 0x317   :  { %v4345_v28 = vmax.f32 %v4291_v56, 0.0  ;;  %v4283_v16 = vadd.f32 %v4282_v30, %v4186_v26  ;;  %v4226_v56 = vadd.f32 %v8516_v61, %v13669_v1  ;;  %v11718_v30 = vadd.f32 %v8522_v39, %v11627_v48 }
 0x318   :  { %v8839_v49 = vpop.f32.mrf.mxu0 }
 0x319   :  { %v8050_v8 = vpack.c.bf16 %v4345_v28, %v4344_v50  ;;  %v4343_v14 = vmax.f32 %v4283_v16, 0.0  ;;  %v4304_v7 = vadd.f32 %v8839_v49, %v4207_v0 }
 0x31a   :  { %v4295_v51 = vpop.f32.mrf.mxu0 }
 0x31b   :  { %8131 = vst [vmem:[#allocation4 + $0x10] sm:$0xff] %v8050_v8   ;;  %v8045_v42 = vpack.c.bf16 %v4343_v14, %v4342_v17  ;;  %v4296_v19 = vadd.f32 %v4295_v51, %v4199_v47  ;;  %v4348_v55 = vmax.f32 %v4304_v7, 0.0 }
 0x31c   :  { %v8840_v4 = vpop.f32.mrf.mxu0 }
 0x31d   :  { %8130 = vst [vmem:[#allocation4 + $0x8] sm:$0xff] %v8045_v42   ;;  %v4307_v2 = vadd.f32 %v8840_v4, %v4210_v5  ;;  %v4346_v43 = vmax.f32 %v4296_v19, 0.0 }
 0x31e   :  { %v4298_v11 = vpop.f32.mrf.mxu0 }
 0x31f   :  { %v4349_v24 = vmax.f32 %v4307_v2, 0.0  ;;  %v4299_v9 = vadd.f32 %v4298_v11, %v4202_v57 }
 0x320   :  { %v8843_v62 = vpop.f32.mrf.mxu0 }
 0x321   :  { %v8060_v18 = vpack.c.bf16 %v4349_v24, %v4348_v55  ;;  %v4347_v26 = vmax.f32 %v4299_v9, 0.0  ;;  %v11731_v47 = vadd.f32 %v8843_v62, %v4223_v58 }
 0x322   :  { %v4442_v45 = vld [vmem:[#allocation4 + $0x10] sm:$0xf]  ;;  %v4443_v40 = vld [vmem:[#allocation4 + $0x14] sm:$0xf]  ;;  %v4311_v15 = vpop.f32.mrf.mxu0 }
 0x323   :  { %v4551_v32 = vld [vmem:[#allocation4 + $0x10] sm:$0xf]  ;;  %v4451_v50 = vsel %vm9505_vm8, 0, %v4442_v45  ;;  %v4452_v28 = vsel %vm9505_vm8, 0, %v4443_v40  ;;  %v4552_v16 = vld [vmem:[#allocation4 + $0x14] sm:$0xf]  ;;  %v8055_v60 = vpack.c.bf16 %v4347_v26, %v4346_v43  ;;  %v11733_v5 = vadd.f32 %v4311_v15, %v4215_v37 }
 0x324   :  { %v4567_v6 = vld [vmem:[#allocation4 + $0x10] sm:$0xf]  ;;  %4559 = vst [vmem:[#allocation5 + $0x70] sm:$0xf] %v4551_v32  ;;  %8133 = vst [vmem:[#allocation4 + $0x20] sm:$0xff] %v8060_v18   ;;  %v4489_v34 = vshrl.u32 %v4451_v50, 16  ;;  %v8844_v29 = vpop.f32.mrf.mxu0 }
 0x325   :  { %v4492_v49 = vshll.u32 %v4451_v50, 16  ;;  %v4498_v17 = vshrl.u32 %v4452_v28, 16  ;;  %v4501_v8 = vshll.u32 %v4452_v28, 16  ;;  %v4568_v48 = vld [vmem:[#allocation4 + $0x14] sm:$0xf]  ;;  %v4576_v0 = vsel %vm1495_vm14, 0, %v4567_v6 }
 0x326   :  { %4560 = vst [vmem:[#allocation5 + $0x94] sm:$0xf] %v4552_v16  ;;  %v4577_v51 = vsel %vm1495_vm14, 0, %v4568_v48  ;;  %v4685_v42 = vld [vmem:[#allocation4 + $0x10] sm:$0xf]  ;;  %8132 = vst [vmem:[#allocation4 + $0x18] sm:$0xff] %v8055_v60   ;;  %v11750_v11 = vadd.f32 %v8844_v29, %v4226_v56 }
 0x327   :  { %v4686_v7 = vld [vmem:[#allocation4 + $0x14] sm:$0xf]  ;;  %v11735_v25 = vrot.slane %v4489_v34, 7  ;;  %v11737_v52 = vrot.slane %v4498_v17, 7  ;;  %v4612_v31 = vshll.u32 %v4576_v0, 16  ;;  %v4616_v59 = vshrl.u32 %v4576_v0, 16 }
 0x328   :  { %v4794_v27 = vld [vmem:[#allocation4 + $0x10] sm:$0xf]  ;;  %v4622_v4 = vshll.u32 %v4577_v51, 16  ;;  %v4626_v10 = vshrl.u32 %v4577_v51, 16  ;;  %v4694_v54 = vsel %vm9505_vm8, 0, %v4685_v42  ;;  %v4695_v19 = vsel %vm9505_vm8, 0, %v4686_v7 }
 0x329   :  { %v4795_v2 = vld [vmem:[#allocation4 + $0x14] sm:$0xf]  ;;  %4802 = vst [vmem:[#allocation5 + $0x58] sm:$0xf] %v4794_v27  ;;  %v11744_v57 = vor.u32 %v4492_v49, %v11735_v25  ;;  %v11748_v53 = vor.u32 %v4501_v8, %v11737_v52  ;;  %v4810_v39 = vld [vmem:[#allocation4 + $0x10] sm:$0xf] }
 0x32a   :  { %v4811_v20 = vld [vmem:[#allocation4 + $0x14] sm:$0xf]  ;;  %4803 = vst [vmem:[#allocation5 + $0x7c] sm:$0xf] %v4795_v2  ;;  %v11752_v22 = vrot.slane %v4612_v31, 5  ;;  %v4618_v55 = vrot.slane %v4616_v59, 4 }
 0x32b   :  { %v11754_v24 = vrot.slane %v4622_v4, 5  ;;  %v4628_v9 = vrot.slane %v4626_v10, 4  ;;  %v4724_v62 = vshrl.u32 %v4694_v54, 16  ;;  %v4727_v38 = vshll.u32 %v4694_v54, 16  ;;  %v4928_v58 = vld [vmem:[#allocation4 + $0x10] sm:$0xf] }
 0x32c   :  { %v4733_v37 = vshrl.u32 %v4695_v19, 16  ;;  %v4736_v21 = vshll.u32 %v4695_v19, 16  ;;  %v4619_v43 = vor.u32 %v4618_v55, %v11752_v22  ;;  %v4819_v26 = vsel %vm1495_vm14, 0, %v4810_v39  ;;  %v4929_v45 = vld [vmem:[#allocation4 + $0x14] sm:$0xf] }
 0x32d   :  { %v4629_v18 = vor.u32 %v4628_v9, %v11754_v24  ;;  %v4820_v63 = vsel %vm1495_vm14, 0, %v4811_v20  ;;  %v5037_v40 = vld [vmem:[#allocation4 + $0x10] sm:$0xf]  ;;  %v5038_v32 = vld [vmem:[#allocation4 + $0x14] sm:$0xf]  ;;  %v11762_v15 = vrot.slane %v4724_v62, 7 }
 0x32e   :  { %v11764_v1 = vrot.slane %v4733_v37, 7  ;;  %v4846_v56 = vshll.u32 %v4819_v26, 16  ;;  %v4850_v12 = vshrl.u32 %v4819_v26, 16  ;;  %v5053_v50 = vld [vmem:[#allocation4 + $0x10] sm:$0xf]  ;;  %v11767_v16 = vrot.slane %v4619_v43, 4 }
 0x32f   :  { %5045 = vst [vmem:[#allocation5 + $0x40] sm:$0xf] %v5037_v40  ;;  %5046 = vst [vmem:[#allocation5 + $0x64] sm:$0xf] %v5038_v32  ;;  %v4856_v6 = vshll.u32 %v4820_v63, 16  ;;  %v4860_v60 = vshrl.u32 %v4820_v63, 16  ;;  %v11772_v17 = vor.u32 %v4727_v38, %v11762_v15 }
 0x330   :  { %13673 = vst [vmem:[#allocation33_spill] sm:$0xff] %v11764_v1  ;;  %v5054_v34 = vld [vmem:[#allocation4 + $0x14] sm:$0xf]  ;;  %v11769_v49 = vrot.slane %v4629_v18, 4  ;;  %v11776_v48 = vor.u32 %v4736_v21, %v11764_v1  ;;  %v11778_v0 = vrot.slane %v4846_v56, 5  ;;  %v4852_v51 = vrot.slane %v4850_v12, 4 }
 0x331   :  { %v11780_v42 = vrot.slane %v4856_v6, 5  ;;  %v4862_v7 = vrot.slane %v4860_v60, 4  ;;  %v4549_v29 = vld [vmem:[#allocation4 + $0x8] sm:$0xf]  ;;  %v4937_v31 = vsel %vm9505_vm8, 0, %v4928_v58  ;;  %v4938_v59 = vsel %vm9505_vm8, 0, %v4929_v45 }
 0x332   :  { %13674 = vst [vmem:[#allocation38_spill] sm:$0xff] %v11778_v0  ;;  %v5062_v27 = vsel %vm1495_vm14, 0, %v5053_v50  ;;  %v5063_v4 = vsel %vm1495_vm14, 0, %v5054_v34  ;;  %v4550_v10 = vld [vmem:[#allocation4 + $0xc] sm:$0xf]  ;;  %v4853_v19 = vor.u32 %v4852_v51, %v11778_v0  ;;  %v4959_v39 = vshrl.u32 %v4937_v31, 16 }
 0x333   :  { %13675 = vst [vmem:[#allocation45_spill] sm:$0xff] %v11780_v42  ;;  %4557 = vst [vmem:[#allocation5 + $0x28] sm:$0xf] %v4549_v29  ;;  %v4863_v2 = vor.u32 %v4862_v7, %v11780_v42  ;;  %v4440_v20 = vld [vmem:[#allocation4 + $0x8] sm:$0xf]  ;;  %v4962_v55 = vshll.u32 %v4937_v31, 16 }
 0x334   :  { %4558 = vst [vmem:[#allocation5 + $0x4c] sm:$0xf] %v4550_v10  ;;  %v4968_v9 = vshrl.u32 %v4938_v59, 16  ;;  %v5080_v62 = vshll.u32 %v5062_v27, 16  ;;  %v5084_v38 = vshrl.u32 %v5062_v27, 16  ;;  %v11793_v21 = vrot.slane %v4853_v19, 4 }
 0x335   :  { %v4441_v37 = vld [vmem:[#allocation4 + $0xc] sm:$0xf]  ;;  %v11795_v43 = vrot.slane %v4959_v39, 7  ;;  %v4971_v18 = vshll.u32 %v4938_v59, 16  ;;  %v5090_v26 = vshll.u32 %v5063_v4, 16  ;;  %v5094_v32 = vshrl.u32 %v5063_v4, 16 }
 0x336   :  { %13676 = vst [vmem:[#allocation42_spill] sm:$0xff] %v11793_v21  ;;  %v4565_v63 = vld [vmem:[#allocation4 + $0x8] sm:$0xf]  ;;  %v11797_v58 = vrot.slane %v4968_v9, 7  ;;  %v11799_v45 = vrot.slane %v5080_v62, 5  ;;  %v5086_v40 = vrot.slane %v5084_v38, 4 }
 0x337   :  { %13677 = vst [vmem:[#allocation18_spill] sm:$0xff] %v11795_v43  ;;  %v4792_v56 = vld [vmem:[#allocation4 + $0x8] sm:$0xf]  ;;  %v11801_v12 = vrot.slane %v4863_v2, 4  ;;  %v11804_v50 = vor.u32 %v4962_v55, %v11795_v43  ;;  %v11806_v6 = vrot.slane %v5090_v26, 5  ;;  %v4449_v60 = vsel %vm9505_vm8, 0, %v4440_v20 }
 0x338   :  { %13678 = vst [vmem:[#allocation37_spill] sm:$0xff] %v11797_v58  ;;  %13679 = vst [vmem:[#allocation73_spill] sm:$0xff] %v11799_v45  ;;  %v4793_v34 = vld [vmem:[#allocation4 + $0xc] sm:$0xf]  ;;  %v9142_v51 = vld [vmem:[%s13171_s3 + $0xd0] sm:$0xff]   ;;  %v11815_v29 = vor.u32 %v4971_v18, %v11797_v58  ;;  %v5087_v31 = vor.u32 %v5086_v40, %v11799_v45  ;;  %v5096_v59 = vrot.slane %v5094_v32, 4 }
 0x339   :  { %13680 = vst [vmem:[#allocation39_spill] sm:$0xff] %v11801_v12  ;;  %13681 = vst [vmem:[#allocation46_spill] sm:$0xff] %v11804_v50  ;;  %v4566_v27 = vld [vmem:[#allocation4 + $0xc] sm:$0xf]  ;;  %v4450_v10 = vsel %vm9505_vm8, 0, %v4441_v37  ;;  %v4471_v19 = vshrl.u32 %v4449_v60, 16  ;;  %8619 = vmatprep.subr.bf16.mxu0 %v9142_v51 }
 0x33a   :  { %13682 = vst [vmem:[#allocation52_spill] sm:$0xff] %v11806_v6  ;;  %4800 = vst [vmem:[#allocation5 + $0x10] sm:$0xf] %v4792_v56  ;;  %v4574_v2 = vsel %vm1495_vm14, 0, %v4565_v63  ;;  %v11823_v39 = vrot.slane %v5087_v31, 4  ;;  %v5097_v20 = vor.u32 %v5096_v59, %v11806_v6  ;;  %v4474_v55 = vshll.u32 %v4449_v60, 16 }
 0x33b   :  { %13683 = vst [vmem:[#allocation57_spill] sm:$0xff] %v11815_v29  ;;  %4801 = vst [vmem:[#allocation5 + $0x34] sm:$0xf] %v4793_v34  ;;  %v4480_v9 = vshrl.u32 %v4450_v10, 16  ;;  %v4683_v62 = vld [vmem:[#allocation4 + $0x8] sm:$0xf] }
 0x33c   :  { %13684 = vst [vmem:[#allocation53_spill] sm:$0xff] %v11823_v39  ;;  %v4684_v38 = vld [vmem:[#allocation4 + $0xc] sm:$0xf]  ;;  %v9143_v18 = vld [vmem:[%s13171_s3 + $0x40] sm:$0xff]   ;;  %v11829_v26 = vrot.slane %v4471_v19, 7  ;;  %v4575_v37 = vsel %vm1495_vm14, 0, %v4566_v27 }
 0x33d   :  { %v4592_v40 = vshll.u32 %v4574_v2, 16  ;;  %v4596_v63 = vshrl.u32 %v4574_v2, 16  ;;  %v5036_v32 = vld [vmem:[#allocation4 + $0xc] sm:$0xf]  ;;  %v11833_v56 = vrot.slane %v4480_v9, 7  ;;  %v4483_v34 = vshll.u32 %v4450_v10, 16  ;;  %8559 = vmatprep.subr.bf16.mxu1 %v9143_v18 }
 0x33e   :  { %v4602_v51 = vshll.u32 %v4575_v37, 16  ;;  %v4606_v60 = vshrl.u32 %v4575_v37, 16  ;;  %v4808_v31 = vld [vmem:[#allocation4 + $0x8] sm:$0xf]  ;;  %5044 = vst [vmem:[#allocation5 + $0x1c] sm:$0xf] %v5036_v32  ;;  %v11838_v4 = vor.u32 %v4474_v55, %v11829_v26 }
 0x33f   :  { %v11835_v59 = vrot.slane %v5097_v20, 4  ;;  %v11840_v19 = vrot.slane %v4592_v40, 5  ;;  %v4598_v7 = vrot.slane %v4596_v63, 4  ;;  %v4809_v27 = vld [vmem:[#allocation4 + $0xc] sm:$0xf]  ;;  %v9144_v2 = vld [vmem:[%s13171_s3 + $0x90] sm:$0xff]   ;;  %v11847_v9 = vor.u32 %v4483_v34, %v11833_v56 }
 0x340   :  { %v11849_v37 = vrot.slane %v4602_v51, 5  ;;  %v4608_v20 = vrot.slane %v4606_v60, 4  ;;  %v4555_v18 = vld [vmem:[#allocation4 + $0x20] sm:$0xf]  ;;  %v4692_v63 = vsel %vm9505_vm8, 0, %v4683_v62  ;;  %v4693_v32 = vsel %vm9505_vm8, 0, %v4684_v38  ;;  %8620 = vmatpush3.bf16.msra.mxu0 %v9144_v2 }
 0x341   :  { %13685 = vst [vmem:[#allocation15_spill] sm:$0xff] %v11840_v19  ;;  %v9145_v55 = vld [vmem:[%s13171_s3] sm:$0xff]   ;;  %v4599_v40 = vor.u32 %v4598_v7, %v11840_v19  ;;  %v4817_v34 = vsel %vm1494_vm13, 0, %v4808_v31  ;;  %4563 = vst [vmem:[#allocation5 + $0x100] sm:$0xf] %v4555_v18  ;;  %v9146_v51 = vld [vmem:[%s13171_s3 + $0xc8] sm:$0xff]  }
 0x342   :  { %v4609_v54 = vor.u32 %v4608_v20, %v11849_v37  ;;  %v4706_v7 = vshrl.u32 %v4692_v63, 16  ;;  %v4715_v28 = vshrl.u32 %v4693_v32, 16  ;;  %v4926_v61 = vld [vmem:[#allocation4 + $0x8] sm:$0x8]  ;;  %8560 = vmatpush3.bf16.msra.mxu1 %v9145_v55  ;;  %v4709_v31 = vshll.u32 %v4692_v63, 16  ;;  %8621 = vmatprep.subr.bf16.mxu0 %v9146_v51  ;;  %v9198_v58 = vld [vmem:[%s13171_s3 + $0x110] sm:$0xff]  }
 0x343   :  { %v9147_v62 = vld [vmem:[%s13171_s3 + $0x88] sm:$0xff]   ;;  %v11869_v38 = vrot.slane %v4599_v40, 4  ;;  %v4818_v2 = vsel %vm1495_vm14, 0, %v4809_v27  ;;  %v4827_v18 = vshrl.u32 %v4817_v34, 16  ;;  %v4718_v10 = vshll.u32 %v4693_v32, 16 }
 0x344   :  { %v4927_v8 = vld [vmem:[#allocation4 + $0xc] sm:$0xf]  ;;  %v11873_v60 = vrot.slane %v4706_v7, 7  ;;  %v11875_v20 = vrot.slane %v4715_v28, 7  ;;  %v4830_v35 = vshll.u32 %v4817_v34, 16  ;;  %v4836_v6 = vshll.u32 %v4818_v2, 16  ;;  %8622 = vmatpush3.bf16.msra.mxu0 %v9147_v62 }
 0x345   :  { %v5052_v55 = vld [vmem:[#allocation4 + $0xc] sm:$0xf]  ;;  %v4829_v39 = vrot.slane %v4827_v18, 4  ;;  %v4840_v45 = vshrl.u32 %v4818_v2, 16  ;;  %v4935_v40 = vsel %vm115_vm5, 0, %v4926_v61  ;;  %v11879_v43 = vrot.slane %v4609_v54, 4 }
 0x346   :  { %v4798_v63 = vld [vmem:[#allocation4 + $0x20] sm:$0xf]  ;;  %v11882_v27 = vor.u32 %v4709_v31, %v11873_v60  ;;  %v11886_v28 = vor.u32 %v4718_v10, %v11875_v20  ;;  %v4799_v34 = vld [vmem:[#allocation4 + $0x24] sm:$0xf]  ;;  %v4832_v7 = vrot.slane %v4830_v35, 5  ;;  %v11888_v2 = vrot.slane %v4836_v6, 5 }
 0x347   :  { %v4446_v32 = vld [vmem:[#allocation4 + $0x20] sm:$0xf]  ;;  %4806 = vst [vmem:[#allocation5 + $0xe8] sm:$0xf] %v4798_v63  ;;  %v4842_v18 = vrot.slane %v4840_v45, 4  ;;  %v4936_v61 = vsel %vm9505_vm8, 0, %v4927_v8 }
 0x348   :  { %13688 = vst [vmem:[#allocation49_spill] sm:$0xff] %v11882_v27  ;;  %13689 = vst [vmem:[#allocation19_spill] sm:$0xff] %v11888_v2  ;;  %v4571_v54 = vld [vmem:[#allocation4 + $0x20] sm:$0xf]  ;;  %v4945_v31 = vshrl.u32 %v4935_v40, 16  ;;  %v4950_v29 = vshrl.u32 %v4936_v61, 16  ;;  %v4833_v12 = vor.u32 %v4832_v7, %v4829_v39 }
 0x349   :  { %4807 = vst [vmem:[#allocation5 + $0x10c] sm:$0xf] %v4799_v34  ;;  %v5061_v10 = vsel %vm1494_vm13, 0, %v5052_v55  ;;  %v4572_v51 = vld [vmem:[#allocation4 + $0x24] sm:$0x1]  ;;  %v4843_v63 = vor.u32 %v4842_v18, %v11888_v2  ;;  %v4953_v8 = vshll.u32 %v4936_v61, 16 }
 0x34a   :  { %v5071_v35 = vshrl.u32 %v5061_v10, 16  ;;  %v5074_v6 = vshll.u32 %v5061_v10, 16  ;;  %v4689_v21 = vld [vmem:[#allocation4 + $0x20] sm:$0xf]  ;;  %v11896_v42 = vrot.slane %v4950_v29, 7  ;;  %v4455_v34 = vsel %vm117_vm10, 0, %v4446_v32 }
 0x34b   :  { %v5041_v45 = vld [vmem:[#allocation4 + $0x20] sm:$0xf]  ;;  %v4580_v40 = vsel %vm1495_vm14, 0, %v4571_v54  ;;  %v5042_v62 = vld [vmem:[#allocation4 + $0x24] sm:$0xf]  ;;  %v11902_v55 = vrot.slane %v4833_v12, 4 }
 0x34c   :  { %13690 = vst [vmem:[#allocation50_spill] sm:$0xff] %v11896_v42  ;;  %5049 = vst [vmem:[#allocation5 + $0xd0] sm:$0xf] %v5041_v45  ;;  %v11904_v39 = vrot.slane %v4945_v31, 11  ;;  %v5073_v7 = vrot.slane %v5071_v35, 4  ;;  %v5076_v18 = vrot.slane %v5074_v6, 5  ;;  %v11909_v29 = vor.u32 %v4953_v8, %v11896_v42 }
 0x34d   :  { %13692 = vst [vmem:[#allocation58_spill] sm:$0xff] %v11902_v55  ;;  %v4690_v10 = vld [vmem:[#allocation4 + $0x24] sm:$0xf]  ;;  %5050 = vst [vmem:[#allocation5 + $0xf4] sm:$0xf] %v5042_v62  ;;  %v11906_v0 = vrot.slane %v4843_v63, 4 }
 0x34e   :  { %13693 = vst [vmem:[#allocation63_spill] sm:$0xff] %v11904_v39  ;;  %13695 = vst [vmem:[#allocation62_spill] sm:$0xff] %v11909_v29  ;;  %v4525_v61 = vshrl.u32 %v4455_v34, 16  ;;  %v4528_v32 = vshll.u32 %v4455_v34, 16  ;;  %v9148_v54 = vld [vmem:[%s13171_s3 + $0xc0] sm:$0xff]   ;;  %v5077_v45 = vor.u32 %v5076_v18, %v5073_v7  ;;  %v4581_v31 = vsel %vm10194_vm15, 0, %v4572_v51 }
 0x34f   :  { %13694 = vst [vmem:[#allocation35_spill] sm:$0xff] %v11906_v0  ;;  %v4652_v39 = vshll.u32 %v4580_v40, 16  ;;  %v4656_v35 = vshrl.u32 %v4580_v40, 16  ;;  %v4814_v6 = vld [vmem:[#allocation4 + $0x20] sm:$0xf]  ;;  %v11919_v8 = vshll.u32 %v4581_v31, 16  ;;  %8623 = vmatprep.subr.bf16.mxu0 %v9148_v54 }
 0x350   :  { %v9152_v62 = vld [vmem:[%s13171_s3 + $0x80] sm:$0xff]   ;;  %v4527_v63 = vrot.slane %v4525_v61, 7  ;;  %v4698_v34 = vsel %vm9505_vm8, 0, %v4689_v21  ;;  %v4699_v29 = vsel %vm117_vm10, 0, %v4690_v10  ;;  %v4553_v55 = vld [vmem:[#allocation4 + $0x18] sm:$0xf] }
 0x351   :  { %13697 = vst [vmem:[#allocation76_spill] sm:$0xff] %v11919_v8  ;;  %v4815_v7 = vld [vmem:[#allocation4 + $0x24] sm:$0xf]  ;;  %v11926_v18 = vrot.slane %v4652_v39, 5  ;;  %v4658_v40 = vrot.slane %v4656_v35, 4  ;;  %v4760_v0 = vshrl.u32 %v4698_v34, 16  ;;  %8624 = vmatpush3.bf16.msra.mxu0 %v9152_v62 }
 0x352   :  { %v11928_v2 = vrot.slane %v5077_v45, 4  ;;  %v11930_v61 = vor.u32 %v4528_v32, %v4527_v63  ;;  %v4769_v21 = vshrl.u32 %v4699_v29, 16  ;;  %v4932_v44 = vld [vmem:[#allocation4 + $0x20] sm:$0xf]  ;;  %v4554_v19 = vld [vmem:[#allocation4 + $0x1c] sm:$0xf] }
 0x353   :  { %13698 = vst [vmem:[#allocation77_spill] sm:$0xff] %v11926_v18  ;;  %4561 = vst [vmem:[#allocation5 + $0xb8] sm:$0xf] %v4553_v55  ;;  %v9153_v10 = vld [vmem:[%s13171_s3 + $0x178] sm:$0xff]   ;;  %v4659_v39 = vor.u32 %v4658_v40, %v11926_v18  ;;  %v11937_v54 = vrot.slane %v4760_v0, 7  ;;  %v4763_v35 = vshll.u32 %v4698_v34, 16 }
 0x354   :  { %13699 = vst [vmem:[#allocation31_spill] sm:$0xff] %v11928_v2  ;;  %13700 = vst [vmem:[#allocation29_spill] sm:$0xff] %v11930_v61  ;;  %v4823_v45 = vsel %vm1495_vm14, 0, %v4814_v6  ;;  %v4933_v32 = vld [vmem:[#allocation4 + $0x24] sm:$0xf]  ;;  %v4771_v62 = vrot.slane %v4769_v21, 7  ;;  %8673 = vmatprep.subr.bf16.mxu1 %v9153_v10 }
 0x355   :  { %13701 = vst [vmem:[#allocation59_spill] sm:$0xff] %v11937_v54  ;;  %4562 = vst [vmem:[#allocation5 + $0xdc] sm:$0xf] %v4554_v19  ;;  %v4824_v63 = vsel %vm1495_vm14, 0, %v4815_v7  ;;  %v4886_v51 = vshll.u32 %v4823_v45, 16  ;;  %v4890_v55 = vshrl.u32 %v4823_v45, 16  ;;  %v11946_v40 = vor.u32 %v4763_v35, %v11937_v54 }
 0x356   :  { %v5057_v31 = vld [vmem:[#allocation4 + $0x20] sm:$0xf]  ;;  %v11943_v2 = vrot.slane %v4659_v39, 4  ;;  %v4772_v0 = vshll.u32 %v4699_v29, 16  ;;  %v4896_v34 = vshll.u32 %v4824_v63, 16  ;;  %v4900_v21 = vshrl.u32 %v4824_v63, 16 }
 0x357   :  { %13703 = vst [vmem:[#allocation82_spill] sm:$0xff] %v11946_v40  ;;  %v11949_v6 = vrot.slane %v4886_v51, 5  ;;  %v4892_v19 = vrot.slane %v4890_v55, 4  ;;  %v5058_v12 = vld [vmem:[#allocation4 + $0x24] sm:$0xf]  ;;  %v4941_v7 = vsel %vm9505_vm8, 0, %v4932_v44 }
 0x358   :  { %13702 = vst [vmem:[#allocation79_spill] sm:$0xff] %v11943_v2  ;;  %v11951_v50 = vrot.slane %v4896_v34, 5  ;;  %v4942_v10 = vsel %vm9505_vm8, 0, %v4933_v32  ;;  %v5066_v39 = vsel %vm1495_vm14, 0, %v5057_v31  ;;  %v4796_v29 = vld [vmem:[#allocation4 + $0x18] sm:$0xf]  ;;  %v11959_v35 = vor.u32 %v4772_v0, %v4771_v62 }
 0x359   :  { %13704 = vst [vmem:[#allocation78_spill] sm:$0xff] %v11949_v6  ;;  %v4893_v51 = vor.u32 %v4892_v19, %v11949_v6  ;;  %v4902_v45 = vrot.slane %v4900_v21, 4  ;;  %v4995_v55 = vshrl.u32 %v4941_v7, 16  ;;  %v4797_v63 = vld [vmem:[#allocation4 + $0x1c] sm:$0xf]  ;;  %v4998_v34 = vshll.u32 %v4941_v7, 16 }
 0x35a   :  { %13705 = vst [vmem:[#allocation25_spill] sm:$0xff] %v11951_v50  ;;  %13706 = vst [vmem:[#allocation28_spill] sm:$0xff] %v11959_v35  ;;  %v5004_v42 = vshrl.u32 %v4942_v10, 16  ;;  %v5067_v44 = vsel %vm1495_vm14, 0, %v5058_v12  ;;  %v5120_v54 = vshll.u32 %v5066_v39, 16  ;;  %v5007_v62 = vshll.u32 %v4942_v10, 16 }
 0x35b   :  { %4804 = vst [vmem:[#allocation5 + $0xa0] sm:$0xf] %v4796_v29  ;;  %v4444_v40 = vld [vmem:[#allocation4 + $0x18] sm:$0xf]  ;;  %4805 = vst [vmem:[#allocation5 + $0xc4] sm:$0xf] %v4797_v63  ;;  %v4903_v32 = vor.u32 %v4902_v45, %v11951_v50 }
 0x35c   :  { %v11965_v31 = vrot.slane %v4995_v55, 7  ;;  %v5124_v0 = vshrl.u32 %v5066_v39, 16  ;;  %v4445_v35 = vld [vmem:[#allocation4 + $0x1c] sm:$0xf]  ;;  %v11967_v19 = vrot.slane %v5004_v42, 7  ;;  %v11969_v21 = vrot.slane %v5120_v54, 5 }
 0x35d   :  { %v5130_v29 = vshll.u32 %v5067_v44, 16  ;;  %v5134_v7 = vshrl.u32 %v5067_v44, 16  ;;  %v4569_v6 = vld [vmem:[#allocation4 + $0x18] sm:$0xf]  ;;  %v11971_v2 = vrot.slane %v4893_v51, 4  ;;  %v11973_v12 = vrot.slane %v4903_v32, 4 }
 0x35e   :  { %13707 = vst [vmem:[#allocation60_spill] sm:$0xff] %v11965_v31  ;;  %13708 = vst [vmem:[#allocation36_spill] sm:$0xff] %v11967_v19  ;;  %v11976_v63 = vor.u32 %v4998_v34, %v11965_v31  ;;  %v5126_v45 = vrot.slane %v5124_v0, 4  ;;  %v4570_v55 = vld [vmem:[#allocation4 + $0x1c] sm:$0xf]  ;;  %v11980_v39 = vor.u32 %v5007_v62, %v11967_v19  ;;  %v4453_v51 = vsel %vm9505_vm8, 0, %v4444_v40  ;;  %v12001_v19 = vpop.f32.mrf.mxu0 }
 0x35f   :  { %13709 = vst [vmem:[#allocation83_spill] sm:$0xff] %v11969_v21  ;;  %13710 = vst [vmem:[#allocation72_spill] sm:$0xff] %v11971_v2  ;;  %v11982_v42 = vrot.slane %v5130_v29, 5  ;;  %v5136_v54 = vrot.slane %v5134_v7, 4  ;;  %v5039_v50 = vld [vmem:[#allocation4 + $0x18] sm:$0xf] }
 0x360   :  { %13711 = vst [vmem:[#allocation89_spill] sm:$0xff] %v11973_v12  ;;  %13712 = vst [vmem:[#allocation22_spill] sm:$0xff] %v11976_v63  ;;  %v5127_v44 = vor.u32 %v5126_v45, %v11969_v21  ;;  %v4454_v34 = vsel %vm9505_vm8, 0, %v4445_v35  ;;  %v4578_v32 = vsel %vm1495_vm14, 0, %v4569_v6  ;;  %v5040_v0 = vld [vmem:[#allocation4 + $0x1c] sm:$0xf] }
 0x361   :  { %13713 = vst [vmem:[#allocation70_spill] sm:$0xff] %v11980_v39  ;;  %13714 = vst [vmem:[#allocation85_spill] sm:$0xff] %v11982_v42  ;;  %v5137_v29 = vor.u32 %v5136_v54, %v11982_v42  ;;  %v4507_v10 = vshrl.u32 %v4453_v51, 16  ;;  %v4516_v7 = vshrl.u32 %v4454_v34, 16  ;;  %v4687_v12 = vld [vmem:[#allocation4 + $0x18] sm:$0xf] }
 0x362   :  { %5047 = vst [vmem:[#allocation5 + $0x88] sm:$0xf] %v5039_v50  ;;  %5048 = vst [vmem:[#allocation5 + $0xac] sm:$0xf] %v5040_v0  ;;  %v11993_v45 = vrot.slane %v5127_v44, 4  ;;  %v4510_v21 = vshll.u32 %v4453_v51, 16 }
 0x363   :  { %v4579_v40 = vsel %vm1495_vm14, 0, %v4570_v55  ;;  %v4632_v35 = vshll.u32 %v4578_v32, 16  ;;  %v11997_v31 = vrot.slane %v4507_v10, 7  ;;  %v11999_v6 = vrot.slane %v4516_v7, 7  ;;  %v4688_v62 = vld [vmem:[#allocation4 + $0x1c] sm:$0xf] }
 0x364   :  { %13715 = vst [vmem:[#allocation91_spill] sm:$0xff] %v11993_v45  ;;  %v4519_v50 = vshll.u32 %v4454_v34, 16  ;;  %v4636_v39 = vshrl.u32 %v4578_v32, 16  ;;  %v4642_v42 = vshll.u32 %v4579_v40, 16  ;;  %v4646_v0 = vshrl.u32 %v4579_v40, 16 }
 0x365   :  { %13716 = vst [vmem:[#allocation88_spill] sm:$0xff] %v11997_v31  ;;  %13717 = vst [vmem:[#allocation65_spill] sm:$0xff] %v11999_v6  ;;  %v12003_v54 = vrot.slane %v4632_v35, 5  ;;  %v4696_v44 = vsel %vm9505_vm8, 0, %v4687_v12  ;;  %v12007_v51 = vrot.slane %v5137_v29, 4  ;;  %v12010_v55 = vor.u32 %v4510_v21, %v11997_v31  ;;  %v12020_v21 = vpop.f32.mrf.mxu0 }
 0x366   :  { %v12014_v34 = vor.u32 %v4519_v50, %v11999_v6  ;;  %v4812_v32 = vld [vmem:[#allocation4 + $0x18] sm:$0xf]  ;;  %v4813_v7 = vld [vmem:[#allocation4 + $0x1c] sm:$0xf]  ;;  %v4638_v45 = vrot.slane %v4636_v39, 4  ;;  %v12016_v35 = vrot.slane %v4642_v42, 5 }
 0x367   :  { %13718 = vst [vmem:[#allocation90_spill] sm:$0xff] %v12007_v51  ;;  %v4648_v2 = vrot.slane %v4646_v0, 4  ;;  %v4697_v40 = vsel %vm9505_vm8, 0, %v4688_v62  ;;  %v4742_v12 = vshrl.u32 %v4696_v44, 16  ;;  %v4745_v29 = vshll.u32 %v4696_v44, 16  ;;  %v4327_v1 = vpop.f32.mrf.mxu0 }
 0x368   :  { %13719 = vst [vmem:[#allocation86_spill] sm:$0xff] %v12014_v34  ;;  %13720 = vst [vmem:[#allocation96_spill] sm:$0xff] %v12016_v35  ;;  %v4751_v51 = vshrl.u32 %v4697_v40, 16  ;;  %v4754_v63 = vshll.u32 %v4697_v40, 16  ;;  %v4639_v10 = vor.u32 %v4638_v45, %v12003_v54  ;;  %v4821_v8 = vsel %vm1495_vm14, 0, %v4812_v32 }
 0x369   :  { %v4649_v50 = vor.u32 %v4648_v2, %v12016_v35  ;;  %v4822_v39 = vsel %vm1495_vm14, 0, %v4813_v7  ;;  %v4930_v42 = vld [vmem:[#allocation4 + $0x18] sm:$0xf]  ;;  %v4931_v0 = vld [vmem:[#allocation4 + $0x1c] sm:$0xf]  ;;  %v12028_v27 = vrot.slane %v4742_v12, 7  ;;  %v8848_v6 = vpop.f32.mrf.mxu0 }
 0x36a   :  { %v12030_v62 = vrot.slane %v4751_v51, 7  ;;  %v4866_v44 = vshll.u32 %v4821_v8, 16  ;;  %v4870_v40 = vshrl.u32 %v4821_v8, 16  ;;  %v5055_v18 = vld [vmem:[#allocation4 + $0x18] sm:$0xf]  ;;  %v12033_v45 = vrot.slane %v4639_v10, 4 }
 0x36b   :  { %13721 = vst [vmem:[#allocation87_spill] sm:$0xff] %v12028_v27  ;;  %v4876_v2 = vshll.u32 %v4822_v39, 16  ;;  %v4880_v31 = vshrl.u32 %v4822_v39, 16  ;;  %v5056_v34 = vld [vmem:[#allocation4 + $0x1c] sm:$0xf]  ;;  %v12035_v32 = vrot.slane %v4649_v50, 4  ;;  %v12038_v7 = vor.u32 %v4745_v29, %v12028_v27 }
 0x36c   :  { %13722 = vst [vmem:[#allocation92_spill] sm:$0xff] %v12030_v62  ;;  %v12042_v51 = vor.u32 %v4754_v63, %v12030_v62  ;;  %v12044_v8 = vrot.slane %v4866_v44, 5  ;;  %v4872_v35 = vrot.slane %v4870_v40, 4  ;;  %v4939_v39 = vsel %vm9505_vm8, 0, %v4930_v42  ;;  %v9185_v44 = vld [vmem:[%s13171_s3 + $0x1f8] sm:$0xff]  }
 0x36d   :  { %13723 = vst [vmem:[#allocation94_spill] sm:$0xff] %v12035_v32  ;;  %v12046_v61 = vrot.slane %v4876_v2, 5  ;;  %v4882_v10 = vrot.slane %v4880_v31, 4  ;;  %v4940_v50 = vsel %vm9505_vm8, 0, %v4931_v0  ;;  %v5064_v29 = vsel %vm1495_vm14, 0, %v5055_v18  ;;  %8737 = vmatprep.subr.bf16.mxu0 %v9185_v44 }
 0x36e   :  { %13724 = vst [vmem:[#allocation93_spill] sm:$0xff] %v12042_v51  ;;  %13725 = vst [vmem:[#allocation26_spill] sm:$0xff] %v12044_v8  ;;  %v5065_v63 = vsel %vm1495_vm14, 0, %v5056_v34  ;;  %v4873_v31 = vor.u32 %v4872_v35, %v12044_v8  ;;  %v4977_v42 = vshrl.u32 %v4939_v39, 16  ;;  %v4980_v12 = vshll.u32 %v4939_v39, 16 }
 0x36f   :  { %13726 = vst [vmem:[#allocation27_spill] sm:$0xff] %v12046_v61  ;;  %v4883_v2 = vor.u32 %v4882_v10, %v12046_v61  ;;  %v4986_v41 = vshrl.u32 %v4940_v50, 16  ;;  %v5100_v0 = vshll.u32 %v5064_v29, 16  ;;  %v5104_v32 = vshrl.u32 %v5064_v29, 16 }
 0x370   :  { %v12062_v18 = vrot.slane %v4873_v31, 4  ;;  %v12064_v34 = vrot.slane %v4977_v42, 7  ;;  %v4989_v14 = vshll.u32 %v4940_v50, 16  ;;  %v5110_v27 = vshll.u32 %v5065_v63, 16  ;;  %v9226_v31 = vld [vmem:[%s13171_s3 + $0x1c8] sm:$0xff]  }
 0x371   :  { %v12066_v51 = vrot.slane %v4986_v41, 7  ;;  %v5102_v40 = vrot.slane %v5100_v0, 5  ;;  %v5106_v62 = vrot.slane %v5104_v32, 4  ;;  %v5114_v35 = vshrl.u32 %v5065_v63, 16  ;;  %v4330_v32 = vpop.f32.mrf.mxu0 }
 0x372   :  { %13727 = vst [vmem:[#allocation40_spill] sm:$0xff] %v12062_v18  ;;  %13728 = vst [vmem:[#allocation43_spill] sm:$0xff] %v12064_v34  ;;  %v12068_v8 = vrot.slane %v4883_v2, 4  ;;  %v12071_v10 = vor.u32 %v4980_v12, %v12064_v34  ;;  %v5112_v29 = vrot.slane %v5110_v27, 5  ;;  %v4352_v42 = vmax.f32 %v11731_v47, 0.0 }
 0x373   :  { %13729 = vst [vmem:[#allocation51_spill] sm:$0xff] %v12066_v51  ;;  %v12075_v44 = vor.u32 %v4989_v14, %v12066_v51  ;;  %v5103_v50 = vsel %vm9487_vm6, %v11835_v59, %v5102_v40  ;;  %v5107_v41 = vor.u32 %v5106_v62, %v5102_v40  ;;  %v5116_v63 = vrot.slane %v5114_v35, 4 }
 0x374   :  { %13730 = vst [vmem:[#allocation44_spill] sm:$0xff] %v12068_v8  ;;  %13731 = vst [vmem:[#allocation66_spill] sm:$0xff] %v12071_v10  ;;  %v4350_v2 = vmax.f32 %v11733_v5, 0.0  ;;  %v4353_v12 = vmax.f32 %v11750_v11, 0.0  ;;  %v4315_v27 = vadd.f32 %v12001_v19, %v11707_v3  ;;  %v4336_v14 = vadd.f32 %v12020_v21, %v11712_v36 }
 0x375   :  { %13732 = vst [vmem:[#allocation54_spill] sm:$0xff] %v12075_v44  ;;  %5164 = vst [vmem:[#allocation5 + $0x68] sm:$0xf] %v5103_v50  ;;  %v5108_v0 = vrot.slane %v5107_v41, 4  ;;  %v4328_v39 = vadd.f32 %v4327_v1, %v11715_v46  ;;  %v4339_v59 = vadd.f32 %v8848_v6, %v11725_v13  ;;  %v5117_v62 = vor.u32 %v5116_v63, %v5112_v29  ;;  %v4564_v50 = vld [vmem:[#allocation4 + $0x4] sm:$0xf] }
 0x376   :  { %v8070_v47 = vpack.c.bf16 %v4353_v12, %v4352_v42  ;;  %v4351_v40 = vmax.f32 %v4315_v27, 0.0  ;;  %v4331_v35 = vadd.f32 %v4330_v32, %v11718_v30  ;;  %v4356_v3 = vmax.f32 %v4336_v14, 0.0  ;;  %v4682_v30 = vld [vmem:[#allocation4 + $0x4] sm:$0x8] }
 0x377   :  { %v5113_v11 = vsel %vm9487_vm6, %v5108_v0, %v5112_v29  ;;  %v4357_v19 = vmax.f32 %v4339_v59, 0.0  ;;  %v4354_v21 = vmax.f32 %v4328_v39, 0.0  ;;  %v13734_v13 = vrot.slane %v13664_v33, 4  ;;  %v9231_v1 = vld [vmem:[%s13171_s3 + $0x1c0] sm:$0xff]  }
 0x378   :  { %5165 = vst [vmem:[#allocation5 + $0x8c] sm:$0xf] %v5113_v11  ;;  %8135 = vst [vmem:[#allocation4 + $0x40] sm:$0xff] %v8070_v47   ;;  %v8065_v36 = vpack.c.bf16 %v4351_v40, %v4350_v2  ;;  %v4355_v46 = vmax.f32 %v4331_v35, 0.0  ;;  %v13736_v42 = vrot.slane %v11829_v26, 4  ;;  %v13737_v32 = vrot.slane %v11833_v56, 4 }
 0x379   :  { %v4477_v6 = vsel %vm9523_vm9, %v13734_v13, %v11838_v4  ;;  %v8080_v41 = vpack.c.bf16 %v4357_v19, %v4356_v3  ;;  %v4573_v33 = vsel %vm1494_vm13, 0, %v4564_v50  ;;  %v4605_v26 = vsel %vm9487_vm6, %v11869_v38, %v11849_v37  ;;  %v13747_v47 = vld [vmem:[#allocation93_spill] sm:$0xff]  ;;  %v13748_v40 = vld [vmem:[#allocation87_spill] sm:$0xff]  ;;  %v13750_v11 = vld [vmem:[#allocation86_spill] sm:$0xff] }
 0x37a   :  { %4541 = vst [vmem:[#allocation5 + $0x24] sm:$0xf] %v4477_v6  ;;  %v4486_v29 = vsel %vm9523_vm9, %v13736_v42, %v11847_v9  ;;  %v4495_v39 = vsel %vm9523_vm9, %v13737_v32, %v11744_v57  ;;  %8134 = vst [vmem:[#allocation4 + $0x38] sm:$0xff] %v8065_v36   ;;  %v8075_v4 = vpack.c.bf16 %v4355_v46, %v4354_v21  ;;  %v4583_v63 = vshrl.u32 %v4573_v33, 16  ;;  %v13753_v36 = vld [vmem:[#allocation29_spill] sm:$0xff]  ;;  %v13757_v6 = vld [vmem:[#allocation94_spill] sm:$0xff] }
 0x37b   :  { %4542 = vst [vmem:[#allocation5 + $0x48] sm:$0xf] %v4486_v29  ;;  %4543 = vst [vmem:[#allocation5 + $0x6c] sm:$0xf] %v4495_v39  ;;  %v4586_v2 = vshll.u32 %v4573_v33, 16  ;;  %v4691_v56 = vsel %vm115_vm5, 0, %v4682_v30  ;;  %v4615_v12 = vsel %vm9487_vm6, %v11879_v43, %v11752_v22  ;;  %v4625_v37 = vsel %vm9487_vm6, %v11767_v16, %v11754_v24 }
 0x37c   :  { %8137 = vst [vmem:[#allocation4 + $0x50] sm:$0xff] %v8080_v41   ;;  %4675 = vst [vmem:[#allocation5 + $0x2c] sm:$0xf] %v4605_v26  ;;  %v13738_v57 = vrot.slane %v11873_v60, 4  ;;  %v12129_v38 = vrot.slane %v5117_v62, 4  ;;  %v12131_v27 = vrot.slane %v4583_v63, 4 }
 0x37d   :  { %8136 = vst [vmem:[#allocation4 + $0x48] sm:$0xff] %v8075_v4   ;;  %v4701_v0 = vshrl.u32 %v4691_v56, 16  ;;  %4676 = vst [vmem:[#allocation5 + $0x50] sm:$0xf] %v4615_v12  ;;  %v13740_v60 = vrot.slane %v11875_v20, 4  ;;  %v13741_v43 = vrot.slane %v11762_v15, 4  ;;  %v4635_v15 = vsel %vm9487_vm6, %v11769_v49, %v12003_v54 }
 0x37e   :  { %v4721_v9 = vsel %vm9523_vm9, %v13738_v57, %v11886_v28  ;;  %13739 = vst [vmem:[#allocation56_spill] sm:$0xff] %v12129_v38  ;;  %4677 = vst [vmem:[#allocation5 + $0x74] sm:$0xf] %v4625_v37  ;;  %v13742_v16 = vrot.slane %v11735_v25, 4  ;;  %v13743_v14 = vrot.slane %v11737_v52, 4  ;;  %v13744_v25 = vld [vmem:[#allocation96_spill] sm:$0xff] }
 0x37f   :  { %4785 = vst [vmem:[#allocation5 + $0x30] sm:$0xf] %v4721_v9  ;;  %v4730_v22 = vsel %vm9523_vm9, %v13740_v60, %v11772_v17  ;;  %v4739_v24 = vsel %vm9523_vm9, %v13741_v43, %v11776_v48  ;;  %v12157_v17 = vrot.slane %v4586_v2, 5  ;;  %v7780_v48 = vrot.slane %v4701_v0, 11  ;;  %4678 = vst [vmem:[#allocation5 + $0x98] sm:$0xf] %v4635_v15 }
 0x380   :  { %4786 = vst [vmem:[#allocation5 + $0x54] sm:$0xf] %v4730_v22  ;;  %v4504_v28 = vsel %vm9523_vm9, %v13742_v16, %v11748_v53  ;;  %v4513_v20 = vsel %vm9523_vm9, %v13743_v14, %v12010_v55  ;;  %4787 = vst [vmem:[#allocation5 + $0x78] sm:$0xf] %v4739_v24  ;;  %v4645_v53 = vsel %vm9487_vm6, %v12033_v45, %v13744_v25  ;;  %v13745_v52 = vld [vmem:[#allocation33_spill] sm:$0xff]  ;;  %v13749_v35 = vrot.slane %v13748_v40, 4 }
 0x381   :  { %4544 = vst [vmem:[#allocation5 + $0x90] sm:$0xf] %v4504_v28  ;;  %4545 = vst [vmem:[#allocation5 + $0xb4] sm:$0xf] %v4513_v20  ;;  %v13746_v55 = vrot.slane %v13745_v52, 4  ;;  %v13751_v45 = vld [vmem:[#allocation88_spill] sm:$0xff] }
 0x382   :  { %v5174_v62 = vld [vmem:[#allocation4 + $0x40] sm:$0xf]  ;;  %v5175_v49 = vld [vmem:[#allocation4 + $0x44] sm:$0xf]  ;;  %4679 = vst [vmem:[#allocation5 + $0xbc] sm:$0xf] %v4645_v53  ;;  %v4757_v50 = vsel %vm9523_vm9, %v13749_v35, %v13747_v47 }
 0x383   :  { %v4748_v59 = vsel %vm9523_vm9, %v13746_v55, %v12038_v7  ;;  %v5283_v54 = vld [vmem:[#allocation4 + $0x40] sm:$0xf]  ;;  %v13752_v3 = vrot.slane %v13751_v45, 4  ;;  %v13754_v21 = vld [vmem:[#allocation65_spill] sm:$0xff]  ;;  %v5183_v42 = vsel %vm9505_vm8, 0, %v5174_v62  ;;  %v5184_v29 = vsel %vm9505_vm8, 0, %v5175_v49 }
 0x384   :  { %4788 = vst [vmem:[#allocation5 + $0x9c] sm:$0xf] %v4748_v59  ;;  %v13755_v7 = vrot.slane %v13754_v21, 4  ;;  %v13756_v13 = vld [vmem:[#allocation77_spill] sm:$0xff]  ;;  %v5284_v32 = vld [vmem:[#allocation4 + $0x44] sm:$0xf] }
 0x385   :  { %v4522_v19 = vsel %vm9523_vm9, %v13752_v3, %v13750_v11  ;;  %v4655_v30 = vsel %vm9487_vm6, %v13757_v6, %v13756_v13  ;;  %v5299_v39 = vld [vmem:[#allocation4 + $0x40] sm:$0xf]  ;;  %5291 = vst [vmem:[#allocation5 + $0x190] sm:$0xf] %v5283_v54  ;;  %v13759_v33 = vld [vmem:[#allocation49_spill] sm:$0xff]  ;;  %v13760_v63 = vld [vmem:[#allocation76_spill] sm:$0xff] }
 0x386   :  { %v4531_v46 = vsel %vm9523_vm9, %v13755_v7, %v13753_v36  ;;  %v4712_v4 = vsel %vm9523_vm9, %v7780_v48, %v13759_v33  ;;  %4789 = vst [vmem:[#allocation5 + $0xc0] sm:$0xf] %v4757_v50  ;;  %4546 = vst [vmem:[#allocation5 + $0xd8] sm:$0xf] %v4522_v19  ;;  %v13761_v2 = vrot.slane %v13760_v63, 5  ;;  %v13762_v26 = vld [vmem:[#allocation79_spill] sm:$0xff] }
 0x387   :  { %4547 = vst [vmem:[#allocation5 + $0xfc] sm:$0xf] %v4531_v46  ;;  %4680 = vst [vmem:[#allocation5 + $0xe0] sm:$0xf] %v4655_v30  ;;  %v5221_v57 = vshrl.u32 %v5183_v42, 16  ;;  %v5224_v9 = vshll.u32 %v5183_v42, 16 }
 0x388   :  { %v4665_v56 = vsel %vm9487_vm6, %v13762_v26, %v13761_v2  ;;  %v5230_v12 = vshrl.u32 %v5184_v29, 16  ;;  %v5233_v37 = vshll.u32 %v5184_v29, 16  ;;  %v5300_v0 = vld [vmem:[#allocation4 + $0x44] sm:$0xf]  ;;  %5292 = vst [vmem:[#allocation5 + $0x1b4] sm:$0xf] %v5284_v32 }
 0x389   :  { %4784 = vst [vmem:[#allocation5 + $0xc] sm:$0xf] %v4712_v4  ;;  %4681 = vst [vmem:[#allocation5 + $0x104] sm:$0xf] %v4665_v56  ;;  %v5308_v22 = vsel %vm1495_vm14, 0, %v5299_v39  ;;  %v5309_v43 = vsel %vm1495_vm14, 0, %v5300_v0 }
 0x38a   :  { %v5417_v24 = vld [vmem:[#allocation4 + $0x40] sm:$0xf]  ;;  %v5418_v16 = vld [vmem:[#allocation4 + $0x44] sm:$0xf]  ;;  %v13765_v14 = vld [vmem:[#allocation92_spill] sm:$0xff]  ;;  %v12213_v55 = vrot.slane %v5221_v57, 7 }
 0x38b   :  { %v13764_v28 = vld [vmem:[#allocation82_spill] sm:$0xff]  ;;  %v13766_v20 = vrot.slane %v13765_v14, 4  ;;  %v13767_v48 = vld [vmem:[#allocation28_spill] sm:$0xff]  ;;  %v13768_v25 = vld [vmem:[#allocation59_spill] sm:$0xff]  ;;  %v12215_v59 = vrot.slane %v5230_v12, 7  ;;  %v5344_v62 = vshll.u32 %v5308_v22, 16 }
 0x38c   :  { %v13769_v53 = vrot.slane %v13768_v25, 4  ;;  %v5348_v49 = vshrl.u32 %v5308_v22, 16  ;;  %v5526_v54 = vld [vmem:[#allocation4 + $0x40] sm:$0xf]  ;;  %v5354_v47 = vshll.u32 %v5309_v43, 16  ;;  %v5358_v40 = vshrl.u32 %v5309_v43, 16 }
 0x38d   :  { %v4766_v15 = vsel %vm9523_vm9, %v13766_v20, %v13764_v28  ;;  %v5426_v35 = vsel %vm9505_vm8, 0, %v5417_v24  ;;  %v5427_v50 = vsel %vm9505_vm8, 0, %v5418_v16  ;;  %v5527_v11 = vld [vmem:[#allocation4 + $0x44] sm:$0xf]  ;;  %5534 = vst [vmem:[#allocation5 + $0x178] sm:$0xf] %v5526_v54  ;;  %v12222_v45 = vor.u32 %v5224_v9, %v12213_v55 }
 0x38e   :  { %v4775_v52 = vsel %vm9523_vm9, %v13769_v53, %v13767_v48  ;;  %4790 = vst [vmem:[#allocation5 + $0xe4] sm:$0xf] %v4766_v15  ;;  %v12226_v19 = vor.u32 %v5233_v37, %v12215_v59  ;;  %v5542_v36 = vld [vmem:[#allocation4 + $0x40] sm:$0xf]  ;;  %v5543_v21 = vld [vmem:[#allocation4 + $0x44] sm:$0xf] }
 0x38f   :  { %4791 = vst [vmem:[#allocation5 + $0x108] sm:$0xf] %v4775_v52  ;;  %5535 = vst [vmem:[#allocation5 + $0x19c] sm:$0xf] %v5527_v11  ;;  %v12230_v46 = vrot.slane %v5344_v62, 5  ;;  %v5350_v13 = vrot.slane %v5348_v49, 4 }
 0x390   :  { %v12232_v6 = vrot.slane %v5354_v47, 5  ;;  %v5360_v30 = vrot.slane %v5358_v40, 4  ;;  %v5456_v42 = vshrl.u32 %v5426_v35, 16  ;;  %v5459_v29 = vshll.u32 %v5426_v35, 16  ;;  %v5660_v26 = vld [vmem:[#allocation4 + $0x40] sm:$0xf] }
 0x391   :  { %v5465_v32 = vshrl.u32 %v5427_v50, 16  ;;  %v5468_v39 = vshll.u32 %v5427_v50, 16  ;;  %v5351_v33 = vor.u32 %v5350_v13, %v12230_v46  ;;  %v5551_v63 = vsel %vm1495_vm14, 0, %v5542_v36  ;;  %v5661_v56 = vld [vmem:[#allocation4 + $0x44] sm:$0xf] }
 0x392   :  { %v5361_v4 = vor.u32 %v5360_v30, %v12232_v6  ;;  %v5552_v2 = vsel %vm1495_vm14, 0, %v5543_v21  ;;  %v5769_v57 = vld [vmem:[#allocation4 + $0x40] sm:$0xf]  ;;  %v5770_v9 = vld [vmem:[#allocation4 + $0x44] sm:$0xf]  ;;  %v12240_v12 = vrot.slane %v5456_v42, 7 }
 0x393   :  { %v12242_v37 = vrot.slane %v5465_v32, 7  ;;  %v5578_v0 = vshll.u32 %v5551_v63, 16  ;;  %v5582_v22 = vshrl.u32 %v5551_v63, 16  ;;  %v5785_v43 = vld [vmem:[#allocation4 + $0x40] sm:$0xf]  ;;  %v12245_v16 = vrot.slane %v5351_v33, 4 }
 0x394   :  { %5777 = vst [vmem:[#allocation5 + $0x160] sm:$0xf] %v5769_v57  ;;  %5778 = vst [vmem:[#allocation5 + $0x184] sm:$0xf] %v5770_v9  ;;  %v5588_v28 = vshll.u32 %v5552_v2, 16  ;;  %v5592_v14 = vshrl.u32 %v5552_v2, 16  ;;  %v12250_v48 = vor.u32 %v5459_v29, %v12240_v12 }
 0x395   :  { %v5786_v20 = vld [vmem:[#allocation4 + $0x44] sm:$0xf]  ;;  %v12247_v15 = vrot.slane %v5361_v4, 4  ;;  %v12254_v53 = vor.u32 %v5468_v39, %v12242_v37  ;;  %v12256_v52 = vrot.slane %v5578_v0, 5  ;;  %v5584_v62 = vrot.slane %v5582_v22, 4 }
 0x396   :  { %v12258_v49 = vrot.slane %v5588_v28, 5  ;;  %v5594_v54 = vrot.slane %v5592_v14, 4  ;;  %v5281_v47 = vld [vmem:[#allocation4 + $0x38] sm:$0xf]  ;;  %v5669_v40 = vsel %vm9505_vm8, 0, %v5660_v26  ;;  %v5670_v35 = vsel %vm9505_vm8, 0, %v5661_v56 }
 0x397   :  { %13770 = vst [vmem:[#allocation55_spill] sm:$0xff] %v12256_v52  ;;  %v5794_v50 = vsel %vm1495_vm14, 0, %v5785_v43  ;;  %v5795_v11 = vsel %vm1495_vm14, 0, %v5786_v20  ;;  %v5282_v36 = vld [vmem:[#allocation4 + $0x3c] sm:$0xf]  ;;  %v5585_v13 = vor.u32 %v5584_v62, %v12256_v52  ;;  %v5691_v42 = vshrl.u32 %v5669_v40, 16 }
 0x398   :  { %13771 = vst [vmem:[#allocation67_spill] sm:$0xff] %v12258_v49  ;;  %5289 = vst [vmem:[#allocation5 + $0x148] sm:$0xf] %v5281_v47  ;;  %v5595_v30 = vor.u32 %v5594_v54, %v12258_v49  ;;  %v5172_v29 = vld [vmem:[#allocation4 + $0x38] sm:$0xf]  ;;  %v5694_v32 = vshll.u32 %v5669_v40, 16 }
 0x399   :  { %5290 = vst [vmem:[#allocation5 + $0x16c] sm:$0xf] %v5282_v36  ;;  %v5700_v39 = vshrl.u32 %v5670_v35, 16  ;;  %v5812_v33 = vshll.u32 %v5794_v50, 16  ;;  %v5816_v4 = vshrl.u32 %v5794_v50, 16  ;;  %v12271_v2 = vrot.slane %v5585_v13, 4 }
 0x39a   :  { %v5173_v63 = vld [vmem:[#allocation4 + $0x3c] sm:$0xf]  ;;  %v12273_v26 = vrot.slane %v5691_v42, 7  ;;  %v5703_v56 = vshll.u32 %v5670_v35, 16  ;;  %v5822_v57 = vshll.u32 %v5795_v11, 16  ;;  %v5826_v28 = vshrl.u32 %v5795_v11, 16 }
 0x39b   :  { %13772 = vst [vmem:[#allocation68_spill] sm:$0xff] %v12271_v2  ;;  %v5297_v9 = vld [vmem:[#allocation4 + $0x38] sm:$0xf]  ;;  %v12275_v0 = vrot.slane %v5700_v39, 7  ;;  %v12277_v22 = vrot.slane %v5812_v33, 5  ;;  %v5818_v43 = vrot.slane %v5816_v4, 4 }
 0x39c   :  { %13773 = vst [vmem:[#allocation95_spill] sm:$0xff] %v12273_v26  ;;  %v5524_v14 = vld [vmem:[#allocation4 + $0x38] sm:$0xf]  ;;  %v12279_v20 = vrot.slane %v5595_v30, 4  ;;  %v12282_v62 = vor.u32 %v5694_v32, %v12273_v26  ;;  %v12284_v54 = vrot.slane %v5822_v57, 5  ;;  %v5181_v47 = vsel %vm9505_vm8, 0, %v5172_v29 }
 0x39d   :  { %13774 = vst [vmem:[#allocation41_spill] sm:$0xff] %v12275_v0  ;;  %13775 = vst [vmem:[#allocation69_spill] sm:$0xff] %v12277_v22  ;;  %v5525_v40 = vld [vmem:[#allocation4 + $0x3c] sm:$0xf]  ;;  %v12290_v50 = vor.u32 %v5703_v56, %v12275_v0  ;;  %v5819_v11 = vor.u32 %v5818_v43, %v12277_v22  ;;  %v5828_v36 = vrot.slane %v5826_v28, 4  ;;  %v5182_v42 = vsel %vm9505_vm8, 0, %v5173_v63 }
 0x39e   :  { %13776 = vst [vmem:[#allocation61_spill] sm:$0xff] %v12279_v20  ;;  %13777 = vst [vmem:[#allocation64_spill] sm:$0xff] %v12282_v62  ;;  %v5298_v13 = vld [vmem:[#allocation4 + $0x3c] sm:$0xf]  ;;  %v5203_v32 = vshrl.u32 %v5181_v47, 16  ;;  %v5306_v29 = vsel %vm1495_vm14, 0, %v5297_v9 }
 0x39f   :  { %13778 = vst [vmem:[#allocation84_spill] sm:$0xff] %v12284_v54  ;;  %5532 = vst [vmem:[#allocation5 + $0x130] sm:$0xf] %v5524_v14  ;;  %v12298_v39 = vrot.slane %v5819_v11, 4  ;;  %v5829_v33 = vor.u32 %v5828_v36, %v12284_v54  ;;  %v5206_v4 = vshll.u32 %v5181_v47, 16  ;;  %v5212_v56 = vshrl.u32 %v5182_v42, 16 }
 0x3a0   :  { %13779 = vst [vmem:[#allocation80_spill] sm:$0xff] %v12290_v50  ;;  %5533 = vst [vmem:[#allocation5 + $0x154] sm:$0xf] %v5525_v40  ;;  %v5415_v57 = vld [vmem:[#allocation4 + $0x38] sm:$0xf]  ;;  %v12301_v28 = vrot.slane %v5203_v32, 7 }
 0x3a1   :  { %13780 = vst [vmem:[#allocation81_spill] sm:$0xff] %v12298_v39  ;;  %v5416_v43 = vld [vmem:[#allocation4 + $0x3c] sm:$0xf]  ;;  %v5307_v14 = vsel %vm1495_vm14, 0, %v5298_v13  ;;  %v5324_v40 = vshll.u32 %v5306_v29, 16  ;;  %v5328_v30 = vshrl.u32 %v5306_v29, 16 }
 0x3a2   :  { %v5768_v63 = vld [vmem:[#allocation4 + $0x3c] sm:$0xf]  ;;  %v12305_v35 = vrot.slane %v5212_v56, 7  ;;  %v5215_v5 = vshll.u32 %v5182_v42, 16  ;;  %v5334_v9 = vshll.u32 %v5307_v14, 16  ;;  %v5338_v11 = vshrl.u32 %v5307_v14, 16 }
 0x3a3   :  { %v5540_v21 = vld [vmem:[#allocation4 + $0x38] sm:$0xf]  ;;  %5776 = vst [vmem:[#allocation5 + $0x13c] sm:$0xf] %v5768_v63  ;;  %v12307_v36 = vrot.slane %v5829_v33, 4  ;;  %v12310_v47 = vor.u32 %v5206_v4, %v12301_v28  ;;  %v12312_v32 = vrot.slane %v5324_v40, 5 }
 0x3a4   :  { %v5330_v24 = vrot.slane %v5328_v30, 4  ;;  %v5541_v3 = vld [vmem:[#allocation4 + $0x3c] sm:$0xf]  ;;  %v12316_v29 = vor.u32 %v5215_v5, %v12305_v35  ;;  %v12318_v56 = vrot.slane %v5334_v9, 5  ;;  %v5340_v42 = vrot.slane %v5338_v11, 4  ;;  %v9178_v60 = vld [vmem:[%s13171_s3 + $0x120] sm:$0xff]  }
 0x3a5   :  { %13781 = vst [vmem:[#allocation17_spill] sm:$0xff] %v12312_v32  ;;  %v5287_v14 = vld [vmem:[#allocation4 + $0x50] sm:$0xf]  ;;  %v5424_v33 = vsel %vm9505_vm8, 0, %v5415_v57  ;;  %v5425_v4 = vsel %vm9505_vm8, 0, %v5416_v43  ;;  %v5549_v30 = vsel %vm1494_vm13, 0, %v5540_v21 }
 0x3a6   :  { %v5331_v63 = vor.u32 %v5330_v24, %v12312_v32  ;;  %5295 = vst [vmem:[#allocation5 + $0x220] sm:$0xf] %v5287_v14  ;;  %v5341_v5 = vor.u32 %v5340_v42, %v12318_v56  ;;  %v5438_v9 = vshrl.u32 %v5424_v33, 16  ;;  %v5447_v25 = vshrl.u32 %v5425_v4, 16  ;;  %v5658_v11 = vld [vmem:[#allocation4 + $0x38] sm:$0x8] }
 0x3a7   :  { %v5441_v24 = vshll.u32 %v5424_v33, 16  ;;  %v5550_v57 = vsel %vm1495_vm14, 0, %v5541_v3  ;;  %v5559_v7 = vshrl.u32 %v5549_v30, 16  ;;  %v5659_v39 = vld [vmem:[#allocation4 + $0x3c] sm:$0xf]  ;;  %v5450_v21 = vshll.u32 %v5425_v4, 16 }
 0x3a8   :  { %v12329_v13 = vrot.slane %v5331_v63, 4  ;;  %v12333_v43 = vrot.slane %v5438_v9, 7  ;;  %v12335_v54 = vrot.slane %v5447_v25, 7  ;;  %v5562_v14 = vshll.u32 %v5549_v30, 16  ;;  %v5784_v40 = vld [vmem:[#allocation4 + $0x3c] sm:$0xf] }
 0x3a9   :  { %v5561_v22 = vrot.slane %v5559_v7, 4  ;;  %v5568_v42 = vshll.u32 %v5550_v57, 16  ;;  %v5572_v38 = vshrl.u32 %v5550_v57, 16  ;;  %v5667_v63 = vsel %vm115_vm5, 0, %v5658_v11  ;;  %v5530_v0 = vld [vmem:[#allocation4 + $0x50] sm:$0xf] }
 0x3aa   :  { %v12339_v33 = vrot.slane %v5341_v5, 4  ;;  %v12342_v3 = vor.u32 %v5441_v24, %v12333_v43  ;;  %v12346_v25 = vor.u32 %v5450_v21, %v12335_v54  ;;  %v5178_v4 = vld [vmem:[#allocation4 + $0x50] sm:$0xf]  ;;  %v5531_v30 = vld [vmem:[#allocation4 + $0x54] sm:$0xf]  ;;  %v5564_v7 = vrot.slane %v5562_v14, 5 }
 0x3ab   :  { %5538 = vst [vmem:[#allocation5 + $0x208] sm:$0xf] %v5530_v0  ;;  %v12348_v26 = vrot.slane %v5568_v42, 5  ;;  %v5574_v57 = vrot.slane %v5572_v38, 4  ;;  %v5668_v11 = vsel %vm9505_vm8, 0, %v5659_v39  ;;  %v5677_v50 = vshrl.u32 %v5667_v63, 16 }
 0x3ac   :  { %v5303_v5 = vld [vmem:[#allocation4 + $0x50] sm:$0xf]  ;;  %5539 = vst [vmem:[#allocation5 + $0x22c] sm:$0xf] %v5531_v30  ;;  %v5682_v20 = vshrl.u32 %v5668_v11, 16  ;;  %v5793_v21 = vsel %vm1494_vm13, 0, %v5784_v40  ;;  %v5565_v2 = vor.u32 %v5564_v7, %v5561_v22 }
 0x3ad   :  { %13782 = vst [vmem:[#allocation34_spill] sm:$0xff] %v12348_v26  ;;  %v5304_v9 = vld [vmem:[#allocation4 + $0x54] sm:$0x1]  ;;  %v5575_v0 = vor.u32 %v5574_v57, %v12348_v26  ;;  %v5803_v14 = vshrl.u32 %v5793_v21, 16  ;;  %v5806_v42 = vshll.u32 %v5793_v21, 16  ;;  %v5685_v39 = vshll.u32 %v5668_v11, 16 }
 0x3ae   :  { %v5421_v49 = vld [vmem:[#allocation4 + $0x50] sm:$0xf]  ;;  %v12356_v62 = vrot.slane %v5682_v20, 7  ;;  %v5187_v30 = vsel %vm117_vm10, 0, %v5178_v4  ;;  %v5312_v63 = vsel %vm1495_vm14, 0, %v5303_v5  ;;  %v12362_v40 = vrot.slane %v5565_v2, 4 }
 0x3af   :  { %v5773_v38 = vld [vmem:[#allocation4 + $0x50] sm:$0xf]  ;;  %v5774_v24 = vld [vmem:[#allocation4 + $0x54] sm:$0xf]  ;;  %v12364_v22 = vrot.slane %v5677_v50, 11  ;;  %v5805_v7 = vrot.slane %v5803_v14, 4 }
 0x3b0   :  { %13783 = vst [vmem:[#allocation47_spill] sm:$0xff] %v12356_v62  ;;  %5781 = vst [vmem:[#allocation5 + $0x1f0] sm:$0xf] %v5773_v38  ;;  %v5808_v57 = vrot.slane %v5806_v42, 5  ;;  %v5422_v21 = vld [vmem:[#allocation4 + $0x54] sm:$0xf]  ;;  %v12369_v20 = vor.u32 %v5685_v39, %v12356_v62 }
 0x3b1   :  { %13785 = vst [vmem:[#allocation48_spill] sm:$0xff] %v12362_v40  ;;  %13786 = vst [vmem:[#allocation71_spill] sm:$0xff] %v12364_v22  ;;  %v12366_v26 = vrot.slane %v5575_v0, 4  ;;  %v5257_v11 = vshrl.u32 %v5187_v30, 16  ;;  %v5260_v4 = vshll.u32 %v5187_v30, 16  ;;  %v5313_v5 = vsel %vm10194_vm15, 0, %v5304_v9 }
 0x3b2   :  { %5782 = vst [vmem:[#allocation5 + $0x214] sm:$0xf] %v5774_v24  ;;  %13788 = vst [vmem:[#allocation23_spill] sm:$0xff] %v12369_v20  ;;  %v5809_v51 = vor.u32 %v5808_v57, %v5805_v7  ;;  %v5384_v38 = vshll.u32 %v5312_v63, 16  ;;  %v5388_v2 = vshrl.u32 %v5312_v63, 16  ;;  %v12373_v22 = vshll.u32 %v5313_v5, 16 }
 0x3b3   :  { %13787 = vst [vmem:[#allocation24_spill] sm:$0xff] %v12366_v26  ;;  %v5546_v40 = vld [vmem:[#allocation4 + $0x50] sm:$0xf]  ;;  %v5259_v50 = vrot.slane %v5257_v11, 7  ;;  %v5430_v24 = vsel %vm9505_vm8, 0, %v5421_v49  ;;  %v5431_v0 = vsel %vm117_vm10, 0, %v5422_v21 }
 0x3b4   :  { %13790 = vst [vmem:[#allocation14_spill] sm:$0xff] %v12373_v22  ;;  %v5547_v14 = vld [vmem:[#allocation4 + $0x54] sm:$0xf]  ;;  %v12380_v39 = vrot.slane %v5384_v38, 5  ;;  %v5390_v30 = vrot.slane %v5388_v2, 4  ;;  %v5492_v7 = vshrl.u32 %v5430_v24, 16 }
 0x3b5   :  { %v5285_v9 = vld [vmem:[#allocation4 + $0x48] sm:$0xf]  ;;  %v12382_v57 = vrot.slane %v5809_v51, 4  ;;  %v12384_v63 = vor.u32 %v5260_v4, %v5259_v50  ;;  %v5501_v5 = vshrl.u32 %v5431_v0, 16  ;;  %v5664_v20 = vld [vmem:[#allocation4 + $0x50] sm:$0xf] }
 0x3b6   :  { %13791 = vst [vmem:[#allocation75_spill] sm:$0xff] %v12380_v39  ;;  %v5286_v49 = vld [vmem:[#allocation4 + $0x4c] sm:$0xf]  ;;  %5293 = vst [vmem:[#allocation5 + $0x1d8] sm:$0xf] %v5285_v9  ;;  %v5391_v21 = vor.u32 %v5390_v30, %v12380_v39  ;;  %v12388_v26 = vrot.slane %v5492_v7, 7 }
 0x3b7   :  { %13792 = vst [vmem:[#allocation32_spill] sm:$0xff] %v12382_v57  ;;  %13793 = vst [vmem:[#allocation21_spill] sm:$0xff] %v12384_v63  ;;  %v5495_v42 = vshll.u32 %v5430_v24, 16  ;;  %v5555_v38 = vsel %vm1495_vm14, 0, %v5546_v40  ;;  %v5665_v2 = vld [vmem:[#allocation4 + $0x54] sm:$0xf] }
 0x3b8   :  { %13794 = vst [vmem:[#allocation30_spill] sm:$0xff] %v12388_v26  ;;  %5294 = vst [vmem:[#allocation5 + $0x1fc] sm:$0xf] %v5286_v49  ;;  %v5503_v51 = vrot.slane %v5501_v5, 7  ;;  %v5556_v4 = vsel %vm1495_vm14, 0, %v5547_v14  ;;  %v5618_v50 = vshll.u32 %v5555_v38, 16 }
 0x3b9   :  { %v5622_v11 = vshrl.u32 %v5555_v38, 16  ;;  %v5789_v57 = vld [vmem:[#allocation4 + $0x50] sm:$0xf]  ;;  %v12394_v62 = vrot.slane %v5391_v21, 4  ;;  %v12397_v9 = vor.u32 %v5495_v42, %v12388_v26  ;;  %v5504_v30 = vshll.u32 %v5431_v0, 16  ;;  %v12537_v63 = vld [vmem:[#allocation5 + $0xb4] sm:$0xff] }
 0x3ba   :  { %v5628_v7 = vshll.u32 %v5556_v4, 16  ;;  %v12400_v44 = vrot.slane %v5618_v50, 5  ;;  %v5632_v49 = vshrl.u32 %v5556_v4, 16  ;;  %v5790_v5 = vld [vmem:[#allocation4 + $0x54] sm:$0xf]  ;;  %v5673_v14 = vsel %vm9505_vm8, 0, %v5664_v20 }
 0x3bb   :  { %13795 = vst [vmem:[#allocation20_spill] sm:$0xff] %v12394_v62  ;;  %13796 = vst [vmem:[#allocation12_spill] sm:$0xff] %v12397_v9  ;;  %v5624_v40 = vrot.slane %v5622_v11, 4  ;;  %v5674_v21 = vsel %vm9505_vm8, 0, %v5665_v2  ;;  %v5798_v42 = vsel %vm1495_vm14, 0, %v5789_v57  ;;  %v12410_v38 = vor.u32 %v5504_v30, %v5503_v51 }
 0x3bc   :  { %13797 = vst [vmem:[#allocation6_spill] sm:$0xff] %v12400_v44  ;;  %v12402_v8 = vrot.slane %v5628_v7, 5  ;;  %v5528_v0 = vld [vmem:[#allocation4 + $0x48] sm:$0xf]  ;;  %v5634_v24 = vrot.slane %v5632_v49, 4  ;;  %v5727_v11 = vshrl.u32 %v5673_v14, 16 }
 0x3bd   :  { %13799 = vst [vmem:[#allocation10_spill] sm:$0xff] %v12410_v38  ;;  %v5625_v50 = vor.u32 %v5624_v40, %v12400_v44  ;;  %v5529_v4 = vld [vmem:[#allocation4 + $0x4c] sm:$0xf]  ;;  %5536 = vst [vmem:[#allocation5 + $0x1c0] sm:$0xf] %v5528_v0  ;;  %v5730_v7 = vshll.u32 %v5673_v14, 16 }
 0x3be   :  { %13798 = vst [vmem:[#allocation7_spill] sm:$0xff] %v12402_v8  ;;  %v5736_v18 = vshrl.u32 %v5674_v21, 16  ;;  %v5799_v20 = vsel %vm1495_vm14, 0, %v5790_v5  ;;  %v5852_v61 = vshll.u32 %v5798_v42, 16  ;;  %v5176_v10 = vld [vmem:[#allocation4 + $0x48] sm:$0xf]  ;;  %v5635_v2 = vor.u32 %v5634_v24, %v12402_v8 }
 0x3bf   :  { %5537 = vst [vmem:[#allocation5 + $0x1e4] sm:$0xf] %v5529_v4  ;;  %v12416_v57 = vrot.slane %v5727_v11, 7  ;;  %v5739_v51 = vshll.u32 %v5674_v21, 16  ;;  %v5856_v30 = vshrl.u32 %v5798_v42, 16  ;;  %v5862_v0 = vshll.u32 %v5799_v20, 16 }
 0x3c0   :  { %v5177_v52 = vld [vmem:[#allocation4 + $0x4c] sm:$0xf]  ;;  %v12418_v40 = vrot.slane %v5736_v18, 7  ;;  %v12420_v49 = vrot.slane %v5852_v61, 5  ;;  %v5866_v14 = vshrl.u32 %v5799_v20, 16  ;;  %v12422_v34 = vrot.slane %v5625_v50, 4 }
 0x3c1   :  { %13800 = vst [vmem:[#allocation96_spill] sm:$0xff] %v12416_v57  ;;  %v5301_v44 = vld [vmem:[#allocation4 + $0x48] sm:$0xf]  ;;  %v12424_v5 = vrot.slane %v5635_v2, 4  ;;  %v12427_v4 = vor.u32 %v5730_v7, %v12416_v57  ;;  %v5858_v24 = vrot.slane %v5856_v30, 4  ;;  %v12433_v18 = vrot.slane %v5862_v0, 5 }
 0x3c2   :  { %13801 = vst [vmem:[#allocation33_spill] sm:$0xff] %v12418_v40  ;;  %13802 = vst [vmem:[#allocation93_spill] sm:$0xff] %v12420_v49  ;;  %v5302_v11 = vld [vmem:[#allocation4 + $0x4c] sm:$0xf]  ;;  %v12431_v42 = vor.u32 %v5739_v51, %v12418_v40  ;;  %v5868_v61 = vrot.slane %v5866_v14, 4  ;;  %v5185_v50 = vsel %vm9505_vm8, 0, %v5176_v10 }
 0x3c3   :  { %13803 = vst [vmem:[#allocation87_spill] sm:$0xff] %v12422_v34  ;;  %13804 = vst [vmem:[#allocation86_spill] sm:$0xff] %v12424_v5  ;;  %v5771_v8 = vld [vmem:[#allocation4 + $0x48] sm:$0xf]  ;;  %v5859_v20 = vor.u32 %v5858_v24, %v12420_v49  ;;  %v5186_v7 = vsel %vm9505_vm8, 0, %v5177_v52  ;;  %v5310_v2 = vsel %vm1495_vm14, 0, %v5301_v44 }
 0x3c4   :  { %13805 = vst [vmem:[#allocation88_spill] sm:$0xff] %v12427_v4  ;;  %13806 = vst [vmem:[#allocation29_spill] sm:$0xff] %v12431_v42  ;;  %v5772_v30 = vld [vmem:[#allocation4 + $0x4c] sm:$0xf]  ;;  %v5869_v51 = vor.u32 %v5868_v61, %v12433_v18  ;;  %v5239_v21 = vshrl.u32 %v5185_v50, 16  ;;  %v5242_v0 = vshll.u32 %v5185_v50, 16 }
 0x3c5   :  { %13807 = vst [vmem:[#allocation65_spill] sm:$0xff] %v12433_v18  ;;  %5779 = vst [vmem:[#allocation5 + $0x1a8] sm:$0xf] %v5771_v8  ;;  %v5248_v40 = vshrl.u32 %v5186_v7, 16  ;;  %v5419_v14 = vld [vmem:[#allocation4 + $0x48] sm:$0xf] }
 0x3c6   :  { %5780 = vst [vmem:[#allocation5 + $0x1cc] sm:$0xf] %v5772_v30  ;;  %v12443_v5 = vrot.slane %v5859_v20, 4  ;;  %v5251_v24 = vshll.u32 %v5186_v7, 16  ;;  %v5311_v10 = vsel %vm1495_vm14, 0, %v5302_v11  ;;  %v5364_v49 = vshll.u32 %v5310_v2, 16 }
 0x3c7   :  { %v5420_v52 = vld [vmem:[#allocation4 + $0x4c] sm:$0xf]  ;;  %v9154_v44 = vld [vmem:[%s13171_s3 + $0x138] sm:$0xff]   ;;  %v12450_v8 = vrot.slane %v5869_v51, 4  ;;  %v12452_v61 = vrot.slane %v5239_v21, 7  ;;  %v12454_v50 = vrot.slane %v5248_v40, 7 }
 0x3c8   :  { %13808 = vst [vmem:[#allocation77_spill] sm:$0xff] %v12443_v5  ;;  %v5368_v18 = vshrl.u32 %v5310_v2, 16  ;;  %v9149_v30 = vld [vmem:[#allocation5] ss:$36 sps:$4 sm:$0xff]   ;;  %v9163_v20 = vld [vmem:[%s13171_s3 + $0x170] sm:$0xff]   ;;  %v12459_v7 = vrot.slane %v5364_v49, 5 }
 0x3c9   :  { %13809 = vst [vmem:[#allocation94_spill] sm:$0xff] %v12450_v8  ;;  %13810 = vst [vmem:[#allocation9_spill] sm:$0xff] %v12452_v61  ;;  %v5374_v11 = vshll.u32 %v5311_v10, 16  ;;  %v5378_v5 = vshrl.u32 %v5311_v10, 16  ;;  %v5428_v57 = vsel %vm9505_vm8, 0, %v5419_v14  ;;  %v12464_v51 = vor.u32 %v5242_v0, %v12452_v61  ;;  %v12539_v61 = vld [vmem:[#allocation5 + $0xd8] sm:$0xff] }
 0x3ca   :  { %13811 = vst [vmem:[#allocation49_spill] sm:$0xff] %v12454_v50  ;;  %v9151_v42 = vld [vmem:[#allocation5 + $0x4] ss:$36 sps:$4 sm:$0xff]   ;;  %v12468_v21 = vor.u32 %v5251_v24, %v12454_v50  ;;  %v5545_v34 = vld [vmem:[#allocation4 + $0x4c] sm:$0xf]  ;;  %v5370_v49 = vrot.slane %v5368_v18, 4 }
 0x3cb   :  { %v5544_v8 = vld [vmem:[#allocation4 + $0x48] sm:$0xf]  ;;  %v12471_v4 = vrot.slane %v5374_v11, 5  ;;  %v5380_v10 = vrot.slane %v5378_v5, 4  ;;  %v5429_v14 = vsel %vm9505_vm8, 0, %v5420_v52  ;;  %6965 = vmatprep.mubr.bf16.mxu1 %v9151_v42  ;;  %v5474_v0 = vshrl.u32 %v5428_v57, 16 }
 0x3cc   :  { %v9155_v26 = vld [vmem:[#allocation5 + $0x4c] ss:$36 sps:$4 sm:$0xff]   ;;  %v5477_v38 = vshll.u32 %v5428_v57, 16  ;;  %v5483_v32 = vshrl.u32 %v5429_v14, 16  ;;  %v5486_v40 = vshll.u32 %v5429_v14, 16  ;;  %6966 = vmatmul.mubr.bf16.vlgmr.msra.gmra.mxu1 %v9149_v30  ;;  %v5371_v5 = vor.u32 %v5370_v49, %v12459_v7 }
 0x3cd   :  { %v9164_v24 = vld [vmem:[%s13171_s3 + $0x130] sm:$0xff]   ;;  %v9170_v18 = vld [vmem:[%s13171_s3 + $0x168] sm:$0xff]   ;;  %v5381_v11 = vor.u32 %v5380_v10, %v12471_v4  ;;  %v5553_v42 = vsel %vm1495_vm14, 0, %v5544_v8  ;;  %v5554_v57 = vsel %vm1495_vm14, 0, %v5545_v34  ;;  %8674 = vmatpush3.bf16.msra.mxu1 %v9154_v44  ;;  %6973 = vmatprep.mubr.bf16.mxu1 %v9155_v26  ;;  %v12487_v14 = vrot.slane %v5474_v0, 7 }
 0x3ce   :  { %v5662_v52 = vld [vmem:[#allocation4 + $0x48] sm:$0xf]  ;;  %v5663_v30 = vld [vmem:[#allocation4 + $0x4c] sm:$0xf]  ;;  %v12489_v2 = vrot.slane %v5483_v32, 7  ;;  %v5598_v9 = vshll.u32 %v5553_v42, 16  ;;  %8675 = vmatprep.subr.bf16.mxu1 %v9163_v20 }
 0x3cf   :  { %v5602_v62 = vshrl.u32 %v5553_v42, 16  ;;  %v5787_v22 = vld [vmem:[#allocation4 + $0x48] sm:$0xf]  ;;  %v12491_v49 = vrot.slane %v5371_v5, 4  ;;  %v12493_v10 = vrot.slane %v5381_v11, 4  ;;  %v5608_v8 = vshll.u32 %v5554_v57, 16 }
 0x3d0   :  { %13812 = vst [vmem:[#allocation76_spill] sm:$0xff] %v12489_v2  ;;  %v5612_v39 = vshrl.u32 %v5554_v57, 16  ;;  %v5788_v50 = vld [vmem:[#allocation4 + $0x4c] sm:$0xf]  ;;  %v12496_v34 = vor.u32 %v5477_v38, %v12487_v14  ;;  %v12500_v44 = vor.u32 %v5486_v40, %v12489_v2  ;;  %v12503_v0 = vrot.slane %v5598_v9, 5 }
 0x3d1   :  { %13813 = vst [vmem:[#allocation79_spill] sm:$0xff] %v12493_v10  ;;  %v5604_v20 = vrot.slane %v5602_v62, 4  ;;  %v12505_v5 = vrot.slane %v5608_v8, 5  ;;  %8676 = vmatpush3.bf16.msra.mxu1 %v9164_v24  ;;  %v9171_v42 = vld [vmem:[%s13171_s3 + $0x128] sm:$0xff]   ;;  %v5671_v38 = vsel %vm9505_vm8, 0, %v5662_v52  ;;  %v5672_v40 = vsel %vm9505_vm8, 0, %v5663_v30 }
 0x3d2   :  { %13814 = vst [vmem:[#allocation13_spill] sm:$0xff] %v12503_v0  ;;  %v5614_v11 = vrot.slane %v5612_v39, 4  ;;  %v5796_v57 = vsel %vm1495_vm14, 0, %v5787_v22  ;;  %v5797_v62 = vsel %vm1495_vm14, 0, %v5788_v50  ;;  %8677 = vmatprep.subr.bf16.mxu1 %v9170_v18  ;;  %v9177_v39 = vld [vmem:[%s13171_s3 + $0x160] sm:$0xff]   ;;  %v5709_v8 = vshrl.u32 %v5671_v38, 16 }
 0x3d3   :  { %13815 = vst [vmem:[#allocation82_spill] sm:$0xff] %v12505_v5  ;;  %v5605_v9 = vor.u32 %v5604_v20, %v12503_v0  ;;  %v5712_v52 = vshll.u32 %v5671_v38, 16  ;;  %v5718_v32 = vshrl.u32 %v5672_v40, 16  ;;  %v5721_v41 = vshll.u32 %v5672_v40, 16  ;;  %v9187_v22 = vld [vmem:[%s13171_s3 + $0x158] sm:$0xff]   ;;  %v5912_v38 = vld [vmem:[#allocation5 + $0x48] sm:$0xff] }
 0x3d4   :  { %v5615_v24 = vor.u32 %v5614_v11, %v12505_v5  ;;  %v5832_v30 = vshll.u32 %v5796_v57, 16  ;;  %v5836_v26 = vshrl.u32 %v5796_v57, 16  ;;  %v12533_v20 = vrot.slane %v5709_v8, 7  ;;  %v5917_v5 = vld [vmem:[#allocation5 + $0x6c] sm:$0xff]  ;;  %v5296_v40 = vld [vmem:[#allocation4 + $0x34] sm:$0xf] }
 0x3d5   :  { %v12529_v50 = vrot.slane %v5605_v9, 4  ;;  %v5842_v11 = vshll.u32 %v5797_v62, 16  ;;  %8678 = vmatpush3.bf16.msra.mxu1 %v9171_v42  ;;  %v12535_v57 = vrot.slane %v5718_v32, 7  ;;  %v5846_v10 = vshrl.u32 %v5797_v62, 16  ;;  %v12548_v32 = vld [vmem:[#allocation5 + $0xfc] sm:$0xff] }
 0x3d6   :  { %v12531_v18 = vrot.slane %v5615_v24, 4  ;;  %v5834_v0 = vrot.slane %v5832_v30, 5  ;;  %v5838_v2 = vrot.slane %v5836_v26, 4  ;;  %8679 = vmatprep.subr.bf16.mxu1 %v9177_v39  ;;  %v12542_v9 = vor.u32 %v5712_v52, %v12533_v20  ;;  %v12557_v30 = vld [vmem:[#allocation5 + $0x90] sm:$0xff]  ;;  %v9188_v62 = vld [vmem:[%s13171_s3 + $0x118] sm:$0xff]  }
 0x3d7   :  { %v5844_v8 = vrot.slane %v5842_v11, 5  ;;  %v13817_v42 = vor.u32 %v12157_v17, %v12131_v27  ;;  %v12551_v26 = vor.u32 %v5721_v41, %v12535_v57  ;;  %v5848_v24 = vrot.slane %v5846_v10, 4  ;;  %v13818_v11 = vld [vmem:[#allocation15_spill] sm:$0xff] }
 0x3d8   :  { %13816 = vst [vmem:[#allocation92_spill] sm:$0xff] %v12531_v18  ;;  %v5835_v39 = vsel %vm9487_vm6, %v12307_v36, %v5834_v0  ;;  %v5839_v52 = vor.u32 %v5838_v2, %v5834_v0  ;;  %v7795_v17 = vcombine.low %v5912_v38, %v5917_v5  ;;  %v7804_v41 = vcombine.low %v12557_v30, %v12537_v63  ;;  %v9165_v2 = vld [vmem:[#allocation5 + $0x94] ss:$36 sps:$4 sm:$0xff]   ;;  %v13847_v63 = vld [vmem:[#allocation19_spill] sm:$0xff]  ;;  %v13848_v30 = vld [vmem:[#allocation58_spill] sm:$0xff] }
 0x3d9   :  { %v4590_v18 = vrot.slane %v13817_v42, 4  ;;  %5896 = vst [vmem:[#allocation5 + $0x188] sm:$0xf] %v5835_v39  ;;  %8680 = vmatpush3.bf16.msra.mxu1 %v9178_v60  ;;  %v5414_v42 = vld [vmem:[#allocation4 + $0x34] sm:$0x8]  ;;  %v7813_v10 = vcombine.low %v12539_v61, %v12548_v32  ;;  %v13819_v0 = vld [vmem:[#allocation97_spill] sm:$0xff]  ;;  %v5849_v38 = vor.u32 %v5848_v24, %v5844_v8 }
 0x3da   :  { %v5840_v36 = vrot.slane %v5839_v52, 4  ;;  %v13820_v39 = vrot.slane %v13819_v0, 4  ;;  %v5305_v60 = vsel %vm1494_vm13, 0, %v5296_v40  ;;  %8681 = vmatprep.subr.bf16.mxu1 %v9187_v22  ;;  %6974 = vmatmul.mubr.bf16.gmra.mxu1 %v7795_v17  ;;  %v5423_v23 = vsel %vm115_vm5, 0, %v5414_v42 }
 0x3db   :  { %v4595_v27 = vsel %vm9487_vm6, %v4590_v18, %v13818_v11  ;;  %v9197_v18 = vld [vmem:[%s13171_s3 + $0x150] sm:$0xff]   ;;  %v5315_v52 = vshrl.u32 %v5305_v60, 16  ;;  %v5318_v11 = vshll.u32 %v5305_v60, 16  ;;  %6981 = vmatprep.mubr.bf16.mxu1 %v9165_v2  ;;  %v13821_v22 = vrot.slane %v12333_v43, 4 }
 0x3dc   :  { %4674 = vst [vmem:[#allocation5 + $0x8] sm:$0xf] %v4595_v27  ;;  %v5209_v5 = vsel %vm9523_vm9, %v13820_v39, %v12310_v47  ;;  %v5337_v27 = vsel %vm9487_vm6, %v12329_v13, %v12318_v56  ;;  %v5845_v47 = vsel %vm9487_vm6, %v5840_v36, %v5844_v8  ;;  %v13822_v24 = vrot.slane %v12301_v28, 4 }
 0x3dd   :  { %5273 = vst [vmem:[#allocation5 + $0x144] sm:$0xf] %v5209_v5  ;;  %5407 = vst [vmem:[#allocation5 + $0x14c] sm:$0xf] %v5337_v27  ;;  %v5453_v40 = vsel %vm9523_vm9, %v13821_v22, %v12346_v25  ;;  %v12597_v56 = vrot.slane %v5849_v38, 4  ;;  %v5317_v8 = vrot.slane %v5315_v52, 4  ;;  %8682 = vmatpush3.bf16.msra.mxu1 %v9188_v62  ;;  %v5357_v25 = vsel %vm9487_vm6, %v12245_v16, %v12232_v6 }
 0x3de   :  { %v5218_v13 = vsel %vm9523_vm9, %v13822_v24, %v12316_v29  ;;  %5897 = vst [vmem:[#allocation5 + $0x1ac] sm:$0xf] %v5845_v47  ;;  %v5320_v17 = vrot.slane %v5318_v11, 5  ;;  %v5433_v36 = vshrl.u32 %v5423_v23, 16  ;;  %5517 = vst [vmem:[#allocation5 + $0x150] sm:$0xf] %v5453_v40  ;;  %v5347_v29 = vsel %vm9487_vm6, %v12339_v33, %v12230_v46  ;;  %8683 = vmatprep.subr.bf16.mxu1 %v9197_v18 }
 0x3df   :  { %5274 = vst [vmem:[#allocation5 + $0x168] sm:$0xf] %v5218_v13  ;;  %v13823_v43 = vrot.slane %v12305_v35, 4  ;;  %v13824_v62 = vrot.slane %v12335_v54, 4  ;;  %5408 = vst [vmem:[#allocation5 + $0x170] sm:$0xf] %v5347_v29 }
 0x3e0   :  { %v5321_v35 = vor.u32 %v5320_v17, %v5317_v8  ;;  %v7783_v2 = vrot.slane %v5433_v36, 11  ;;  %5409 = vst [vmem:[#allocation5 + $0x194] sm:$0xf] %v5357_v25  ;;  %v13825_v46 = vrot.slane %v12240_v12, 4  ;;  %v13826_v16 = vrot.slane %v12213_v55, 4  ;;  %v9186_v33 = vld [vmem:[%s13171_s3 + $0x1b8] sm:$0xff]  }
 0x3e1   :  { %v5227_v28 = vsel %vm9523_vm9, %v13823_v43, %v12222_v45  ;;  %v5462_v42 = vsel %vm9523_vm9, %v13824_v62, %v12250_v48  ;;  %v9208_v45 = vld [vmem:[%s13171_s3 + $0x148] sm:$0xff]   ;;  %v9195_v12 = vld [vmem:[%s13171_s3 + $0x1f0] sm:$0xff]   ;;  %v5367_v55 = vsel %vm9487_vm6, %v12247_v15, %v12459_v7  ;;  %v13828_v39 = vrot.slane %v12242_v37, 4  ;;  %8684 = vmatpush3.bf16.msra.mxu1 %v9198_v58  ;;  %v13832_v52 = vld [vmem:[#allocation21_spill] sm:$0xff] }
 0x3e2   :  { %5275 = vst [vmem:[#allocation5 + $0x18c] sm:$0xf] %v5227_v28  ;;  %v5471_v6 = vsel %vm9523_vm9, %v13825_v46, %v12254_v53  ;;  %5518 = vst [vmem:[#allocation5 + $0x174] sm:$0xf] %v5462_v42  ;;  %v5236_v48 = vsel %vm9523_vm9, %v13826_v16, %v12226_v19  ;;  %v4816_v54 = vld [vmem:[#allocation4 + $0x28] sm:$0x1]  ;;  %v5377_v19 = vsel %vm9487_vm6, %v12491_v49, %v12471_v4  ;;  %8685 = vmatprep.subr.bf16.mxu1 %v9208_v45 }
 0x3e3   :  { %5519 = vst [vmem:[#allocation5 + $0x198] sm:$0xf] %v5471_v6  ;;  %v13827_v53 = vrot.slane %v12215_v59, 4  ;;  %5276 = vst [vmem:[#allocation5 + $0x1b0] sm:$0xf] %v5236_v48  ;;  %v5480_v59 = vsel %vm9523_vm9, %v13828_v39, %v12496_v34  ;;  %v5322_v18 = vrot.slane %v5321_v35, 4  ;;  %v5444_v38 = vsel %vm9523_vm9, %v7783_v2, %v12342_v3  ;;  %6982 = vmatmul.mubr.bf16.gmra.mxu1 %v7804_v41 }
 0x3e4   :  { %v4934_v5 = vld [vmem:[#allocation4 + $0x28] sm:$0xf]  ;;  %5410 = vst [vmem:[#allocation5 + $0x1b8] sm:$0xf] %v5367_v55  ;;  %5411 = vst [vmem:[#allocation5 + $0x1dc] sm:$0xf] %v5377_v19  ;;  %v4839_v41 = vsel %vm9487_vm6, %v13848_v30, %v13847_v63 }
 0x3e5   :  { %v5245_v0 = vsel %vm9523_vm9, %v13827_v53, %v12464_v51  ;;  %v9157_v60 = vld [vmem:[#allocation5 + $0x8] ss:$36 sps:$4 sm:$0xff]   ;;  %v13829_v15 = vrot.slane %v12487_v14, 4  ;;  %5520 = vst [vmem:[#allocation5 + $0x1bc] sm:$0xf] %v5480_v59  ;;  %v13830_v4 = vld [vmem:[#allocation9_spill] sm:$0xff] }
 0x3e6   :  { %v9159_v51 = vld [vmem:[#allocation5 + $0xc] ss:$36 sps:$4 sm:$0xff]   ;;  %5277 = vst [vmem:[#allocation5 + $0x1d4] sm:$0xf] %v5245_v0  ;;  %v13831_v7 = vrot.slane %v13830_v4, 4  ;;  %v13833_v14 = vld [vmem:[#allocation49_spill] sm:$0xff] }
 0x3e7   :  { %v5489_v37 = vsel %vm9523_vm9, %v13829_v15, %v12500_v44  ;;  %v9172_v34 = vld [vmem:[#allocation5 + $0xdc] ss:$36 sps:$4 sm:$0xff]   ;;  %5516 = vst [vmem:[#allocation5 + $0x12c] sm:$0xf] %v5444_v38  ;;  %v9210_v3 = vld [vmem:[%s13171_s3 + $0x108] sm:$0xff]   ;;  %v13834_v11 = vrot.slane %v13833_v14, 4  ;;  %7062 = vmatprep.mubr.bf16.mxu0 %v9159_v51 }
 0x3e8   :  { %v5254_v49 = vsel %vm9523_vm9, %v13831_v7, %v12468_v21  ;;  %5521 = vst [vmem:[#allocation5 + $0x1e0] sm:$0xf] %v5489_v37  ;;  %v13835_v27 = vld [vmem:[#allocation75_spill] sm:$0xff]  ;;  %v13837_v23 = vld [vmem:[#allocation14_spill] sm:$0xff]  ;;  %v13839_v40 = vld [vmem:[#allocation20_spill] sm:$0xff]  ;;  %v4825_v2 = vsel %vm10194_vm15, 0, %v4816_v54  ;;  %7063 = vmatmul.mubr.bf16.vlgmr.msra.gmra.mxu0 %v9157_v60  ;;  %6989 = vmatprep.mubr.bf16.mxu1 %v9172_v34 }
 0x3e9   :  { %v5263_v44 = vsel %vm9523_vm9, %v13834_v11, %v13832_v52  ;;  %5278 = vst [vmem:[#allocation5 + $0x1f8] sm:$0xf] %v5254_v49  ;;  %v13836_v47 = vld [vmem:[#allocation79_spill] sm:$0xff]  ;;  %v13838_v22 = vrot.slane %v13837_v23, 5  ;;  %v13840_v13 = vld [vmem:[#allocation12_spill] sm:$0xff]  ;;  %v13843_v43 = vld [vmem:[#allocation17_spill] sm:$0xff]  ;;  %8738 = vmatpush3.bf16.msra.mxu0 %v9186_v33  ;;  %8686 = vmatpush3.bf16.msra.mxu1 %v9210_v3 }
 0x3ea   :  { %v5387_v21 = vsel %vm9487_vm6, %v13836_v47, %v13835_v27  ;;  %v13841_v8 = vld [vmem:[#allocation76_spill] sm:$0xff]  ;;  %v5327_v28 = vsel %vm9487_vm6, %v5322_v18, %v13843_v43  ;;  %5279 = vst [vmem:[#allocation5 + $0x21c] sm:$0xf] %v5263_v44  ;;  %v13844_v29 = vld [vmem:[#allocation10_spill] sm:$0xff]  ;;  %v13851_v6 = vld [vmem:[#allocation35_spill] sm:$0xff]  ;;  %v4906_v59 = vshll.u32 %v4825_v2, 16  ;;  %8739 = vmatprep.subr.bf16.mxu0 %v9195_v12 }
 0x3eb   :  { %v5397_v24 = vsel %vm9487_vm6, %v13839_v40, %v13838_v22  ;;  %v13842_v17 = vrot.slane %v13841_v8, 4  ;;  %v9162_v58 = vld [vmem:[#allocation5 + $0x54] ss:$36 sps:$4 sm:$0xff]   ;;  %5412 = vst [vmem:[#allocation5 + $0x200] sm:$0xf] %v5387_v21  ;;  %v13845_v25 = vld [vmem:[#allocation30_spill] sm:$0xff]  ;;  %6990 = vmatmul.mubr.bf16.gmra.mxu1 %v7813_v10 }
 0x3ec   :  { %5413 = vst [vmem:[#allocation5 + $0x224] sm:$0xf] %v5397_v24  ;;  %v13846_v62 = vrot.slane %v13845_v25, 4  ;;  %v9220_v45 = vld [vmem:[%s13171_s3 + $0x140] sm:$0xff]   ;;  %5406 = vst [vmem:[#allocation5 + $0x128] sm:$0xf] %v5327_v28  ;;  %7070 = vmatprep.mubr.bf16.mxu0 %v9162_v58 }
 0x3ed   :  { %v5498_v36 = vsel %vm9523_vm9, %v13842_v17, %v13840_v13  ;;  %v13850_v46 = vld [vmem:[#allocation38_spill] sm:$0xff]  ;;  %4918 = vst [vmem:[#allocation5 + $0x14] sm:$0xf] %v4839_v41  ;;  %v13853_v53 = vld [vmem:[#allocation63_spill] sm:$0xff]  ;;  %v9196_v60 = vld [vmem:[%s13171_s3 + $0x1b0] sm:$0xff]   ;;  %v12743_v14 = vsel %vm117_vm10, 0, %v4934_v5  ;;  %8687 = vmatprep.subr.bf16.mxu1 %v9220_v45 }
 0x3ee   :  { %v5507_v42 = vsel %vm9523_vm9, %v13846_v62, %v13844_v29  ;;  %5522 = vst [vmem:[#allocation5 + $0x204] sm:$0xf] %v5498_v36  ;;  %v4849_v16 = vsel %vm9487_vm6, %v13851_v6, %v13850_v46  ;;  %v13852_v48 = vld [vmem:[#allocation62_spill] sm:$0xff]  ;;  %v13857_v51 = vld [vmem:[#allocation45_spill] sm:$0xff]  ;;  %v13860_v37 = vld [vmem:[#allocation39_spill] sm:$0xff]  ;;  %v4908_v13 = vrot.slane %v4906_v59, 5  ;;  %8740 = vmatpush3.bf16.msra.mxu0 %v9196_v60 }
 0x3ef   :  { %5523 = vst [vmem:[#allocation5 + $0x228] sm:$0xf] %v5507_v42  ;;  %v4956_v0 = vsel %vm9523_vm9, %v13853_v53, %v13852_v48  ;;  %v13854_v55 = vld [vmem:[#allocation46_spill] sm:$0xff]  ;;  %4919 = vst [vmem:[#allocation5 + $0x38] sm:$0xf] %v4849_v16  ;;  %v13861_v7 = vld [vmem:[#allocation57_spill] sm:$0xff] }
 0x3f0   :  { %v13855_v19 = vld [vmem:[#allocation50_spill] sm:$0xff]  ;;  %5028 = vst [vmem:[#allocation5 + $0x18] sm:$0xf] %v4956_v0  ;;  %v9202_v11 = vld [vmem:[%s13171_s3 + $0x1e8] sm:$0xff]   ;;  %v13866_v47 = vld [vmem:[#allocation37_spill] sm:$0xff]  ;;  %v5013_v48 = vshrl.u32 %v12743_v14, 16 }
 0x3f1   :  { %v13856_v39 = vrot.slane %v13855_v19, 4  ;;  %v13858_v18 = vld [vmem:[#allocation42_spill] sm:$0xff]  ;;  %v13867_v21 = vrot.slane %v13866_v47, 4  ;;  %v13868_v5 = vld [vmem:[#allocation27_spill] sm:$0xff]  ;;  %v13869_v12 = vld [vmem:[#allocation40_spill] sm:$0xff]  ;;  %v5016_v53 = vshll.u32 %v12743_v14, 16  ;;  %8741 = vmatprep.subr.bf16.mxu0 %v9202_v11 }
 0x3f2   :  { %v4859_v38 = vsel %vm9487_vm6, %v13858_v18, %v13857_v51  ;;  %v13859_v15 = vld [vmem:[#allocation26_spill] sm:$0xff]  ;;  %v4879_v22 = vsel %vm9487_vm6, %v13869_v12, %v13868_v5  ;;  %v13871_v3 = vld [vmem:[#allocation44_spill] sm:$0xff]  ;;  %v12767_v8 = vld [vmem:[%s13171_s3 + $0x238] sm:$0xff]   ;;  %v5015_v5 = vrot.slane %v5013_v48, 7 }
 0x3f3   :  { %v4965_v54 = vsel %vm9523_vm9, %v13856_v39, %v13854_v55  ;;  %v4869_v4 = vsel %vm9487_vm6, %v13860_v37, %v13859_v15  ;;  %v13862_v49 = vld [vmem:[#allocation18_spill] sm:$0xff]  ;;  %4920 = vst [vmem:[#allocation5 + $0x5c] sm:$0xf] %v4859_v38  ;;  %4922 = vst [vmem:[#allocation5 + $0xa4] sm:$0xf] %v4879_v22  ;;  %v13873_v36 = vld [vmem:[#allocation43_spill] sm:$0xff] }
 0x3f4   :  { %5029 = vst [vmem:[#allocation5 + $0x3c] sm:$0xf] %v4965_v54  ;;  %v13863_v33 = vrot.slane %v13862_v49, 4  ;;  %v9222_v44 = vld [vmem:[%s13171_s3 + $0x100] sm:$0xff]   ;;  %4921 = vst [vmem:[#allocation5 + $0x80] sm:$0xf] %v4869_v4  ;;  %v5018_v10 = vor.u32 %v5016_v53, %v5015_v5 }
 0x3f5   :  { %v13865_v27 = vld [vmem:[#allocation66_spill] sm:$0xff]  ;;  %v13874_v58 = vrot.slane %v13873_v36, 4  ;;  %v13876_v29 = vld [vmem:[#allocation51_spill] sm:$0xff]  ;;  %v13878_v42 = vld [vmem:[#allocation25_spill] sm:$0xff]  ;;  %8688 = vmatpush3.bf16.msra.mxu1 %v9222_v44 }
 0x3f6   :  { %v4974_v34 = vsel %vm9523_vm9, %v13863_v33, %v13861_v7  ;;  %v4983_v23 = vsel %vm9523_vm9, %v13867_v21, %v13865_v27  ;;  %v13870_v40 = vld [vmem:[#allocation78_spill] sm:$0xff]  ;;  %v13877_v25 = vrot.slane %v13876_v29, 4  ;;  %v13879_v45 = vld [vmem:[#allocation72_spill] sm:$0xff]  ;;  %v13883_v6 = vld [vmem:[#allocation89_spill] sm:$0xff]  ;;  %8849 = vmatprep.subr.bf16.mxu1 %v12767_v8 }
 0x3f7   :  { %5030 = vst [vmem:[#allocation5 + $0x60] sm:$0xf] %v4974_v34  ;;  %v4889_v24 = vsel %vm9487_vm6, %v13871_v3, %v13870_v40  ;;  %5031 = vst [vmem:[#allocation5 + $0x84] sm:$0xf] %v4983_v23  ;;  %v13872_v17 = vld [vmem:[#allocation54_spill] sm:$0xff]  ;;  %v4899_v63 = vsel %vm9487_vm6, %v13879_v45, %v13878_v42  ;;  %v13881_v41 = vld [vmem:[#allocation60_spill] sm:$0xff]  ;;  %v4909_v16 = vsel %vm9487_vm6, %v13883_v6, %v4908_v13 }
 0x3f8   :  { %4923 = vst [vmem:[#allocation5 + $0xc8] sm:$0xf] %v4889_v24  ;;  %v4992_v43 = vsel %vm9523_vm9, %v13874_v58, %v13872_v17  ;;  %v13875_v28 = vld [vmem:[#allocation22_spill] sm:$0xff]  ;;  %v13882_v2 = vrot.slane %v13881_v41, 4  ;;  %4924 = vst [vmem:[#allocation5 + $0xec] sm:$0xf] %v4899_v63 }
 0x3f9   :  { %v5001_v62 = vsel %vm9523_vm9, %v13877_v25, %v13875_v28  ;;  %v13880_v30 = vld [vmem:[#allocation70_spill] sm:$0xff]  ;;  %5032 = vst [vmem:[#allocation5 + $0xa8] sm:$0xf] %v4992_v43  ;;  %v13885_v55 = vld [vmem:[#allocation48_spill] sm:$0xff]  ;;  %v5548_v39 = vld [vmem:[#allocation4 + $0x58] sm:$0x1] }
 0x3fa   :  { %v5010_v46 = vsel %vm9523_vm9, %v13882_v2, %v13880_v30  ;;  %5033 = vst [vmem:[#allocation5 + $0xcc] sm:$0xf] %v5001_v62  ;;  %v13884_v0 = vld [vmem:[#allocation34_spill] sm:$0xff]  ;;  %v5666_v54 = vld [vmem:[#allocation4 + $0x58] sm:$0xf]  ;;  %v9206_v59 = vld [vmem:[%s13171_s3 + $0x1a8] sm:$0xff]  }
 0x3fb   :  { %5034 = vst [vmem:[#allocation5 + $0xf0] sm:$0xf] %v5010_v46  ;;  %v5571_v19 = vsel %vm9487_vm6, %v13885_v55, %v13884_v0  ;;  %v9207_v51 = vld [vmem:[%s13171_s3 + $0x1e0] sm:$0xff]   ;;  %4925 = vst [vmem:[#allocation5 + $0x110] sm:$0xf] %v4909_v16  ;;  %v13886_v18 = vld [vmem:[#allocation55_spill] sm:$0xff]  ;;  %8742 = vmatpush3.bf16.msra.mxu0 %v9206_v59 }
 0x3fc   :  { %v13887_v38 = vld [vmem:[#allocation24_spill] sm:$0xff]  ;;  %5650 = vst [vmem:[#allocation5 + $0x134] sm:$0xf] %v5571_v19  ;;  %v13888_v37 = vld [vmem:[#allocation23_spill] sm:$0xff]  ;;  %v13895_v12 = vld [vmem:[#allocation13_spill] sm:$0xff]  ;;  %v13905_v62 = vrot.slane %v12533_v20, 4  ;;  %8743 = vmatprep.subr.bf16.mxu0 %v9207_v51 }
 0x3fd   :  { %v5581_v15 = vsel %vm9487_vm6, %v13887_v38, %v13886_v18  ;;  %v13889_v4 = vld [vmem:[#allocation71_spill] sm:$0xff]  ;;  %v13890_v7 = vld [vmem:[#allocation64_spill] sm:$0xff]  ;;  %v13896_v22 = vld [vmem:[#allocation61_spill] sm:$0xff]  ;;  %v5557_v32 = vsel %vm10194_vm15, 0, %v5548_v39  ;;  %v13907_v42 = vrot.slane %v12535_v57, 4  ;;  %v5675_v57 = vsel %vm117_vm10, 0, %v5666_v54 }
 0x3fe   :  { %v5688_v60 = vsel %vm9523_vm9, %v13889_v4, %v13888_v37  ;;  %v13891_v49 = vld [vmem:[#allocation47_spill] sm:$0xff]  ;;  %v13894_v27 = vld [vmem:[#allocation68_spill] sm:$0xff]  ;;  %5651 = vst [vmem:[#allocation5 + $0x158] sm:$0xf] %v5581_v15  ;;  %v5601_v40 = vsel %vm9487_vm6, %v13896_v22, %v13895_v12  ;;  %v13900_v36 = vld [vmem:[#allocation41_spill] sm:$0xff]  ;;  %v5724_v61 = vsel %vm9523_vm9, %v13905_v62, %v12551_v26  ;;  %v5638_v30 = vshll.u32 %v5557_v32, 16 }
 0x3ff   :  { %v13892_v33 = vrot.slane %v13891_v49, 4  ;;  %v13893_v14 = vld [vmem:[#allocation67_spill] sm:$0xff]  ;;  %v9160_v21 = vld [vmem:[#allocation5 + $0x50] ss:$36 sps:$4 sm:$0xff]   ;;  %5760 = vst [vmem:[#allocation5 + $0x138] sm:$0xf] %v5688_v60 }
 0x400   :  { %v5591_v47 = vsel %vm9487_vm6, %v13894_v27, %v13893_v14  ;;  %v9181_v23 = vld [vmem:[#allocation5 + $0x124] ss:$36 sps:$4 sm:$0xff]   ;;  %v13897_v3 = vld [vmem:[#allocation80_spill] sm:$0xff]  ;;  %v13901_v11 = vrot.slane %v13900_v36, 4  ;;  %v9169_v58 = vld [vmem:[#allocation5 + $0x9c] ss:$36 sps:$4 sm:$0xff]   ;;  %7071 = vmatmul.mubr.bf16.gmra.mxu0 %v9160_v21 }
 0x401   :  { %v5697_v34 = vsel %vm9523_vm9, %v13892_v33, %v13890_v7  ;;  %5652 = vst [vmem:[#allocation5 + $0x17c] sm:$0xf] %v5591_v47  ;;  %v13898_v24 = vld [vmem:[#allocation95_spill] sm:$0xff]  ;;  %5653 = vst [vmem:[#allocation5 + $0x1a0] sm:$0xf] %v5601_v40  ;;  %v13902_v43 = vld [vmem:[#allocation82_spill] sm:$0xff]  ;;  %6997 = vmatprep.mubr.bf16.mxu1 %v9181_v23  ;;  %7078 = vmatprep.mubr.bf16.mxu0 %v9169_v58 }
 0x402   :  { %5761 = vst [vmem:[#allocation5 + $0x15c] sm:$0xf] %v5697_v34  ;;  %v13899_v13 = vrot.slane %v13898_v24, 4  ;;  %v5715_v44 = vsel %vm9523_vm9, %v13901_v11, %v12542_v9  ;;  %v5611_v28 = vsel %vm9487_vm6, %v12529_v50, %v13902_v43  ;;  %v13903_v29 = vld [vmem:[#allocation6_spill] sm:$0xff]  ;;  %v13904_v25 = vld [vmem:[#allocation92_spill] sm:$0xff]  ;;  %v13908_v63 = vld [vmem:[#allocation7_spill] sm:$0xff] }
 0x403   :  { %5763 = vst [vmem:[#allocation5 + $0x1a4] sm:$0xf] %v5715_v44  ;;  %v5621_v9 = vsel %vm9487_vm6, %v13904_v25, %v13903_v29  ;;  %5654 = vst [vmem:[#allocation5 + $0x1c4] sm:$0xf] %v5611_v28  ;;  %v13906_v50 = vld [vmem:[#allocation88_spill] sm:$0xff]  ;;  %v13909_v20 = vld [vmem:[#allocation87_spill] sm:$0xff] }
 0x404   :  { %v5706_v17 = vsel %vm9523_vm9, %v13899_v13, %v13897_v3  ;;  %5655 = vst [vmem:[#allocation5 + $0x1e8] sm:$0xf] %v5621_v9  ;;  %v5733_v45 = vsel %vm9523_vm9, %v13907_v42, %v13906_v50  ;;  %5764 = vst [vmem:[#allocation5 + $0x1c8] sm:$0xf] %v5724_v61  ;;  %v5631_v26 = vsel %vm9487_vm6, %v13909_v20, %v13908_v63  ;;  %v9209_v35 = vld [vmem:[%s13171_s3 + $0x1a0] sm:$0xff]   ;;  %v13910_v41 = vld [vmem:[#allocation29_spill] sm:$0xff] }
 0x405   :  { %5762 = vst [vmem:[#allocation5 + $0x180] sm:$0xf] %v5706_v17  ;;  %5765 = vst [vmem:[#allocation5 + $0x1ec] sm:$0xf] %v5733_v45  ;;  %v13911_v2 = vld [vmem:[#allocation96_spill] sm:$0xff]  ;;  %v13913_v16 = vld [vmem:[#allocation73_spill] sm:$0xff]  ;;  %8744 = vmatpush3.bf16.msra.mxu0 %v9209_v35 }
 0x406   :  { %5656 = vst [vmem:[#allocation5 + $0x20c] sm:$0xf] %v5631_v26  ;;  %v13912_v46 = vrot.slane %v13911_v2, 4  ;;  %v13914_v48 = vld [vmem:[#allocation31_spill] sm:$0xff]  ;;  %v13915_v0 = vld [vmem:[#allocation52_spill] sm:$0xff]  ;;  %v13916_v55 = vld [vmem:[#allocation53_spill] sm:$0xff] }
 0x407   :  { %v5083_v53 = vsel %vm9487_vm6, %v13914_v48, %v13913_v16  ;;  %v5093_v19 = vsel %vm9487_vm6, %v13916_v55, %v13915_v0  ;;  %v9214_v52 = vld [vmem:[%s13171_s3 + $0x1d8] sm:$0xff]   ;;  %v13917_v39 = vld [vmem:[#allocation36_spill] sm:$0xff]  ;;  %v5640_v18 = vrot.slane %v5638_v30, 5  ;;  %v13919_v38 = vld [vmem:[#allocation83_spill] sm:$0xff]  ;;  %v5745_v49 = vshrl.u32 %v5675_v57, 16 }
 0x408   :  { %v5742_v6 = vsel %vm9523_vm9, %v13912_v46, %v13910_v41  ;;  %v13918_v54 = vrot.slane %v13917_v39, 4  ;;  %5162 = vst [vmem:[#allocation5 + $0x20] sm:$0xf] %v5083_v53  ;;  %5163 = vst [vmem:[#allocation5 + $0x44] sm:$0xf] %v5093_v19  ;;  %v13920_v15 = vld [vmem:[#allocation56_spill] sm:$0xff]  ;;  %8745 = vmatprep.subr.bf16.mxu0 %v9214_v52 }
 0x409   :  { %5766 = vst [vmem:[#allocation5 + $0x210] sm:$0xf] %v5742_v6  ;;  %v5123_v37 = vsel %vm9487_vm6, %v13920_v15, %v13919_v38  ;;  %v13921_v4 = vld [vmem:[#allocation85_spill] sm:$0xff]  ;;  %v13922_v51 = vld [vmem:[#allocation91_spill] sm:$0xff]  ;;  %v13923_v33 = vld [vmem:[#allocation74_spill] sm:$0xff]  ;;  %v5748_v24 = vshll.u32 %v5675_v57, 16 }
 0x40a   :  { %v5019_v59 = vsel %vm9523_vm9, %v13918_v54, %v5018_v10  ;;  %v5133_v60 = vsel %vm9487_vm6, %v13922_v51, %v13921_v4  ;;  %v9218_v7 = vld [vmem:[%s13171_s3 + $0x198] sm:$0xff]   ;;  %5166 = vst [vmem:[#allocation5 + $0xb0] sm:$0xf] %v5123_v37  ;;  %v13924_v34 = vld [vmem:[#allocation90_spill] sm:$0xff]  ;;  %v13926_v47 = vld [vmem:[#allocation32_spill] sm:$0xff]  ;;  %v5747_v29 = vrot.slane %v5745_v49, 7 }
 0x40b   :  { %5035 = vst [vmem:[#allocation5 + $0x114] sm:$0xf] %v5019_v59  ;;  %5167 = vst [vmem:[#allocation5 + $0xd4] sm:$0xf] %v5133_v60  ;;  %v5143_v14 = vsel %vm9487_vm6, %v13924_v34, %v13923_v33  ;;  %v13925_v27 = vld [vmem:[#allocation69_spill] sm:$0xff]  ;;  %v13927_v23 = vld [vmem:[#allocation84_spill] sm:$0xff]  ;;  %8746 = vmatpush3.bf16.msra.mxu0 %v9218_v7 }
 0x40c   :  { %v5815_v21 = vsel %vm9487_vm6, %v13926_v47, %v13925_v27  ;;  %v13928_v5 = vld [vmem:[#allocation81_spill] sm:$0xff]  ;;  %v9219_v22 = vld [vmem:[%s13171_s3 + $0x1d0] sm:$0xff]   ;;  %v13929_v40 = vld [vmem:[#allocation86_spill] sm:$0xff]  ;;  %5168 = vst [vmem:[#allocation5 + $0xf8] sm:$0xf] %v5143_v14  ;;  %v5750_v10 = vor.u32 %v5748_v24, %v5747_v29 }
 0x40d   :  { %v5825_v12 = vsel %vm9487_vm6, %v13928_v5, %v13927_v23  ;;  %v5641_v3 = vsel %vm9487_vm6, %v13929_v40, %v5640_v18  ;;  %5894 = vst [vmem:[#allocation5 + $0x140] sm:$0xf] %v5815_v21  ;;  %v13930_v13 = vld [vmem:[#allocation93_spill] sm:$0xff]  ;;  %v9179_v28 = vld [vmem:[#allocation5 + $0x120] ss:$36 sps:$4 sm:$0xff]   ;;  %v13934_v25 = vld [vmem:[#allocation16_spill] sm:$0xff]  ;;  %8747 = vmatprep.subr.bf16.mxu0 %v9219_v22 }
 0x40e   :  { %5895 = vst [vmem:[#allocation5 + $0x164] sm:$0xf] %v5825_v12  ;;  %v5855_v17 = vsel %vm9487_vm6, %v12597_v56, %v13930_v13  ;;  %v13931_v36 = vld [vmem:[#allocation65_spill] sm:$0xff]  ;;  %5657 = vst [vmem:[#allocation5 + $0x230] sm:$0xf] %v5641_v3  ;;  %v13935_v9 = vld [vmem:[#allocation94_spill] sm:$0xff]  ;;  %6998 = vmatmul.mubr.bf16.gmra.mxu1 %v9179_v28 }
 0x40f   :  { %v13932_v11 = vld [vmem:[#allocation77_spill] sm:$0xff]  ;;  %5898 = vst [vmem:[#allocation5 + $0x1d0] sm:$0xf] %v5855_v17  ;;  %v5875_v62 = vsel %vm9487_vm6, %v13935_v9, %v13934_v25  ;;  %v9191_v56 = vld [vmem:[#allocation5 + $0x16c] ss:$36 sps:$4 sm:$0xff]   ;;  %v9232_v35 = vld [vmem:[%s13171_s3 + $0x180] sm:$0xff]  }
 0x410   :  { %v5865_v44 = vsel %vm9487_vm6, %v13932_v11, %v13931_v36  ;;  %v13933_v58 = vld [vmem:[#allocation33_spill] sm:$0xff]  ;;  %5900 = vst [vmem:[#allocation5 + $0x218] sm:$0xf] %v5875_v62  ;;  %v9176_v32 = vld [vmem:[#allocation5 + $0xe4] ss:$36 sps:$4 sm:$0xff]   ;;  %7005 = vmatprep.mubr.bf16.mxu1 %v9191_v56  ;;  %v9221_v50 = vld [vmem:[%s13171_s3 + $0x190] sm:$0xff]  }
 0x411   :  { %v5743_v43 = vrot.slane %v13933_v58, 4  ;;  %5899 = vst [vmem:[#allocation5 + $0x1f4] sm:$0xf] %v5865_v44  ;;  %v9167_v61 = vld [vmem:[#allocation5 + $0x98] ss:$36 sps:$4 sm:$0xff]   ;;  %v9227_v63 = vld [vmem:[%s13171_s3 + $0x188] sm:$0xff]   ;;  %8748 = vmatpush3.bf16.msra.mxu0 %v9221_v50 }
 0x412   :  { %7079 = vmatmul.mubr.bf16.gmra.mxu0 %v9167_v61  ;;  %v9174_v45 = vld [vmem:[#allocation5 + $0xe0] ss:$36 sps:$4 sm:$0xff]   ;;  %v9189_v20 = vld [vmem:[#allocation5 + $0x168] ss:$36 sps:$4 sm:$0xff]   ;;  %v9201_v26 = vld [vmem:[#allocation5 + $0x1b4] ss:$36 sps:$4 sm:$0xff]   ;;  %8749 = vmatprep.subr.bf16.mxu0 %v9226_v31 }
 0x413   :  { %7086 = vmatprep.mubr.bf16.mxu0 %v9176_v32  ;;  %v5751_v42 = vsel %vm9523_vm9, %v5743_v43, %v5750_v10  ;;  %v9184_v30 = vld [vmem:[#allocation5 + $0x12c] ss:$36 sps:$4 sm:$0xff]   ;;  %v9213_v2 = vld [vmem:[#allocation5 + $0x1fc] ss:$36 sps:$4 sm:$0xff]   ;;  %v9194_v46 = vld [vmem:[#allocation5 + $0x174] ss:$36 sps:$4 sm:$0xff]  }
 0x414   :  { %5767 = vst [vmem:[#allocation5 + $0x234] sm:$0xf] %v5751_v42  ;;  %v9199_v57 = vld [vmem:[#allocation5 + $0x1b0] ss:$36 sps:$4 sm:$0xff]   ;;  %v9182_v41 = vld [vmem:[#allocation5 + $0x128] ss:$36 sps:$4 sm:$0xff]  }
 0x415   :  { %8750 = vmatpush3.bf16.msra.mxu0 %v9227_v63  ;;  %v9211_v6 = vld [vmem:[#allocation5 + $0x1f8] ss:$36 sps:$4 sm:$0xff]   ;;  %v9192_v16 = vld [vmem:[#allocation5 + $0x170] ss:$36 sps:$4 sm:$0xff]   ;;  %v9217_v52 = vld [vmem:[#allocation5 + $0x204] ss:$36 sps:$4 sm:$0xff]  }
 0x416   :  { %7006 = vmatmul.mubr.bf16.gmra.mxu1 %v9189_v20  ;;  %8751 = vmatprep.subr.bf16.mxu0 %v9231_v1  ;;  %v9225_v48 = vld [vmem:[#allocation5 + $0x14] ss:$36 sps:$4 sm:$0xff]   ;;  %v9205_v53 = vld [vmem:[#allocation5 + $0x1bc] ss:$36 sps:$4 sm:$0xff]   ;;  %v9247_v54 = vld [vmem:[%s13171_s3 + $0x228] sm:$0xff]  }
 0x417   :  { %7013 = vmatprep.mubr.bf16.mxu1 %v9201_v26  ;;  %v9223_v0 = vld [vmem:[#allocation5 + $0x10] ss:$36 sps:$4 sm:$0xff]   ;;  %v9203_v55 = vld [vmem:[#allocation5 + $0x1b8] ss:$36 sps:$4 sm:$0xff]   ;;  %v9215_v18 = vld [vmem:[#allocation5 + $0x200] ss:$36 sps:$4 sm:$0xff]  }
 0x418   :  { %v9240_v19 = vld [vmem:[%s13171_s3 + $0x230] sm:$0xff]   ;;  %v9236_v39 = vld [vmem:[#allocation5 + $0x5c] ss:$36 sps:$4 sm:$0xff]   ;;  %v9243_v38 = vld [vmem:[#allocation5 + $0xa4] ss:$36 sps:$4 sm:$0xff]  }
 0x419   :  { %8752 = vmatpush3.bf16.msra.mxu0 %v9232_v35  ;;  %v9234_v59 = vld [vmem:[#allocation5 + $0x58] ss:$36 sps:$4 sm:$0xff]   ;;  %v9254_v15 = vld [vmem:[%s13171_s3 + $0x220] sm:$0xff]   ;;  %v9250_v60 = vld [vmem:[#allocation5 + $0xec] ss:$36 sps:$4 sm:$0xff]  }
 0x41a   :  { %7087 = vmatmul.mubr.bf16.gmra.mxu0 %v9174_v45  ;;  %v9230_v37 = vld [vmem:[#allocation5 + $0x1c] ss:$36 sps:$4 sm:$0xff]   ;;  %v9268_v7 = vld [vmem:[%s13171_s3 + $0x210] sm:$0xff]   ;;  %v9239_v49 = vld [vmem:[#allocation5 + $0x64] ss:$36 sps:$4 sm:$0xff]  }
 0x41b   :  { %7094 = vmatprep.mubr.bf16.mxu0 %v9184_v30  ;;  %v9241_v4 = vld [vmem:[#allocation5 + $0xa0] ss:$36 sps:$4 sm:$0xff]   ;;  %v9228_v51 = vld [vmem:[#allocation5 + $0x18] ss:$36 sps:$4 sm:$0xff]   ;;  %v9275_v33 = vld [vmem:[%s13171_s3 + $0x208] sm:$0xff]  }
 0x41c   :  { %v9248_v34 = vld [vmem:[#allocation5 + $0xe8] ss:$36 sps:$4 sm:$0xff]   ;;  %v9237_v14 = vld [vmem:[#allocation5 + $0x60] ss:$36 sps:$4 sm:$0xff]   ;;  %v9257_v27 = vld [vmem:[#allocation5 + $0x134] ss:$36 sps:$4 sm:$0xff]  }
 0x41d   :  { %v9282_v47 = vld [vmem:[%s13171_s3 + $0x200] sm:$0xff]   ;;  %v9246_v21 = vld [vmem:[#allocation5 + $0xac] ss:$36 sps:$4 sm:$0xff]   ;;  %v9253_v22 = vld [vmem:[#allocation5 + $0xf4] ss:$36 sps:$4 sm:$0xff]  }
 0x41e   :  { %7014 = vmatmul.mubr.bf16.gmra.mxu1 %v9199_v57  ;;  %v9255_v23 = vld [vmem:[#allocation5 + $0x130] ss:$36 sps:$4 sm:$0xff]   ;;  %v9244_v5 = vld [vmem:[#allocation5 + $0xa8] ss:$36 sps:$4 sm:$0xff]   ;;  %v9264_v12 = vld [vmem:[#allocation5 + $0x17c] ss:$36 sps:$4 sm:$0xff]  }
 0x41f   :  { %7021 = vmatprep.mubr.bf16.mxu1 %v9213_v2  ;;  %v9262_v40 = vld [vmem:[#allocation5 + $0x178] ss:$36 sps:$4 sm:$0xff]   ;;  %v9251_v3 = vld [vmem:[#allocation5 + $0xf0] ss:$36 sps:$4 sm:$0xff]   ;;  %v9271_v24 = vld [vmem:[#allocation5 + $0x1c4] ss:$36 sps:$4 sm:$0xff]  }
 0x420   :  { %v9260_v13 = vld [vmem:[#allocation5 + $0x13c] ss:$36 sps:$4 sm:$0xff]   ;;  %v9278_v11 = vld [vmem:[#allocation5 + $0x20c] ss:$36 sps:$4 sm:$0xff]   ;;  %v9267_v44 = vld [vmem:[#allocation5 + $0x184] ss:$36 sps:$4 sm:$0xff]  }
 0x421   :  { %v9269_v17 = vld [vmem:[#allocation5 + $0x1c0] ss:$36 sps:$4 sm:$0xff]   ;;  %v9258_v36 = vld [vmem:[#allocation5 + $0x138] ss:$36 sps:$4 sm:$0xff]   ;;  %v9276_v58 = vld [vmem:[#allocation5 + $0x208] ss:$36 sps:$4 sm:$0xff]  }
 0x422   :  { %7095 = vmatmul.mubr.bf16.gmra.mxu0 %v9182_v41  ;;  %v9265_v43 = vld [vmem:[#allocation5 + $0x180] ss:$36 sps:$4 sm:$0xff]   ;;  %v9274_v29 = vld [vmem:[#allocation5 + $0x1cc] ss:$36 sps:$4 sm:$0xff]   ;;  %v9281_v61 = vld [vmem:[#allocation5 + $0x214] ss:$36 sps:$4 sm:$0xff]  }
 0x423   :  { %7102 = vmatprep.mubr.bf16.mxu0 %v9194_v46  ;;  %v9283_v28 = vld [vmem:[#allocation5 + $0x20] ss:$36 sps:$4 sm:$0xff]   ;;  %v9284_v25 = vld [vmem:[#allocation5 + $0x68] ss:$36 sps:$4 sm:$0xff]   ;;  %v9285_v62 = vld [vmem:[#allocation5 + $0xb0] ss:$36 sps:$4 sm:$0xff]  }
 0x424   :  { %v9272_v9 = vld [vmem:[#allocation5 + $0x1c8] ss:$36 sps:$4 sm:$0xff]   ;;  %v9286_v56 = vld [vmem:[#allocation5 + $0xf8] ss:$36 sps:$4 sm:$0xff]   ;;  %v9279_v32 = vld [vmem:[#allocation5 + $0x210] ss:$36 sps:$4 sm:$0xff]  }
 0x425   :  { %v9287_v10 = vld [vmem:[#allocation5 + $0x140] ss:$36 sps:$4 sm:$0xff]   ;;  %v9288_v50 = vld [vmem:[#allocation5 + $0x188] ss:$36 sps:$4 sm:$0xff]   ;;  %v9289_v42 = vld [vmem:[#allocation5 + $0x1d0] ss:$36 sps:$4 sm:$0xff]  }
 0x426   :  { %7022 = vmatmul.mubr.bf16.gmra.mxu1 %v9211_v6  ;;  %v9290_v31 = vld [vmem:[#allocation5 + $0x218] ss:$36 sps:$4 sm:$0xff]   ;;  %v12971_v6 = vld [vmem:[%s13172_s6] ss:$0 sm:$0xff] }
 0x427   :  { %7159 = vmatprep.mubr.bf16.mxu1 %v9225_v48 }
 0x42a   :  { %7103 = vmatmul.mubr.bf16.gmra.mxu0 %v9192_v16 }
 0x42b   :  { %7110 = vmatprep.mubr.bf16.mxu0 %v9205_v53 }
 0x42e   :  { %7160 = vmatmul.mubr.bf16.vlgmr.msra.gmra.mxu1 %v9223_v0 }
 0x42f   :  { %8850 = vmatpush3.bf16.msra.mxu1 %v12767_v8  ;;  %7167 = vmatprep.mubr.bf16.mxu1 %v9236_v39  ;;  %v9261_v8 = vld [vmem:[%s13171_s3 + $0x218] sm:$0xff]  }
 0x430   :  { %8851 = vmatprep.subr.bf16.mxu1 %v9240_v19 }
 0x432   :  { %7111 = vmatmul.mubr.bf16.gmra.mxu0 %v9203_v55 }
 0x433   :  { %7118 = vmatprep.mubr.bf16.mxu0 %v9217_v52  ;;  %8852 = vmatpush3.bf16.msra.mxu1 %v9240_v19 }
 0x434   :  { %8853 = vmatprep.subr.bf16.mxu1 %v9247_v54 }
 0x436   :  { %7168 = vmatmul.mubr.bf16.gmra.mxu1 %v9234_v59 }
 0x437   :  { %7175 = vmatprep.mubr.bf16.mxu1 %v9243_v38  ;;  %8854 = vmatpush3.bf16.msra.mxu1 %v9247_v54 }
 0x438   :  { %8855 = vmatprep.subr.bf16.mxu1 %v9254_v15 }
 0x43a   :  { %7119 = vmatmul.mubr.bf16.gmra.mxu0 %v9215_v18 }
 0x43b   :  { %7256 = vmatprep.mubr.bf16.mxu0 %v9230_v37  ;;  %8856 = vmatpush3.bf16.msra.mxu1 %v9254_v15 }
 0x43c   :  { %8857 = vmatprep.subr.bf16.mxu1 %v9261_v8 }
 0x43e   :  { %7176 = vmatmul.mubr.bf16.gmra.mxu1 %v9241_v4 }
 0x43f   :  { %7183 = vmatprep.mubr.bf16.mxu1 %v9250_v60  ;;  %8858 = vmatpush3.bf16.msra.mxu1 %v9261_v8 }
 0x440   :  { %8859 = vmatprep.subr.bf16.mxu1 %v9268_v7 }
 0x442   :  { %7257 = vmatmul.mubr.bf16.vlgmr.msra.gmra.mxu0 %v9228_v51 }
 0x443   :  { %7264 = vmatprep.mubr.bf16.mxu0 %v9239_v49  ;;  %8860 = vmatpush3.bf16.msra.mxu1 %v9268_v7 }
 0x444   :  { %8861 = vmatprep.subr.bf16.mxu1 %v9275_v33 }
 0x446   :  { %7184 = vmatmul.mubr.bf16.gmra.mxu1 %v9248_v34 }
 0x447   :  { %7191 = vmatprep.mubr.bf16.mxu1 %v9257_v27  ;;  %8862 = vmatpush3.bf16.msra.mxu1 %v9275_v33 }
 0x448   :  { %8863 = vmatprep.subr.bf16.mxu1 %v9282_v47 }
 0x44a   :  { %7265 = vmatmul.mubr.bf16.gmra.mxu0 %v9237_v14 }
 0x44b   :  { %7272 = vmatprep.mubr.bf16.mxu0 %v9246_v21  ;;  %8864 = vmatpush3.bf16.msra.mxu1 %v9282_v47 }
 0x44e   :  { %7192 = vmatmul.mubr.bf16.gmra.mxu1 %v9255_v23 }
 0x44f   :  { %7199 = vmatprep.mubr.bf16.mxu1 %v9264_v12 }
 0x452   :  { %7273 = vmatmul.mubr.bf16.gmra.mxu0 %v9244_v5 }
 0x453   :  { %7280 = vmatprep.mubr.bf16.mxu0 %v9253_v22 }
 0x456   :  { %7200 = vmatmul.mubr.bf16.gmra.mxu1 %v9262_v40 }
 0x457   :  { %7207 = vmatprep.mubr.bf16.mxu1 %v9271_v24 }
 0x45a   :  { %7281 = vmatmul.mubr.bf16.gmra.mxu0 %v9251_v3 }
 0x45b   :  { %7288 = vmatprep.mubr.bf16.mxu0 %v9260_v13 }
 0x45e   :  { %7208 = vmatmul.mubr.bf16.gmra.mxu1 %v9269_v17 }
 0x45f   :  { %7215 = vmatprep.mubr.bf16.mxu1 %v9278_v11 }
 0x462   :  { %7289 = vmatmul.mubr.bf16.gmra.mxu0 %v9258_v36 }
 0x463   :  { %7296 = vmatprep.mubr.bf16.mxu0 %v9267_v44 }
 0x466   :  { %7216 = vmatmul.mubr.bf16.gmra.mxu1 %v9276_v58 }
 0x467   :  { %8865 = vmatprep.mubr.bf16.mxu1 %v9283_v28 }
 0x46a   :  { %7297 = vmatmul.mubr.bf16.gmra.mxu0 %v9265_v43 }
 0x46b   :  { %7304 = vmatprep.mubr.bf16.mxu0 %v9274_v29 }
 0x46e   :  { %8866 = vmatmul.mubr.bf16.vlgmr.msra.gmra.mxu1 %v9284_v25 }
 0x46f   :  { %8869 = vmatprep.mubr.bf16.mxu1 %v9285_v62 }
 0x472   :  { %7305 = vmatmul.mubr.bf16.gmra.mxu0 %v9272_v9 }
 0x473   :  { %7312 = vmatprep.mubr.bf16.mxu0 %v9281_v61 }
 0x476   :  { %8870 = vmatmul.mubr.bf16.gmra.mxu1 %v9286_v56 }
 0x477   :  { %8873 = vmatprep.mubr.bf16.mxu1 %v9287_v10 }
 0x47a   :  { %7313 = vmatmul.mubr.bf16.gmra.mxu0 %v9279_v32 }
 0x47e   :  { %8874 = vmatmul.mubr.bf16.gmra.mxu1 %v9288_v50 }
 0x47f   :  { %8877 = vmatprep.mubr.bf16.mxu1 %v9289_v42 }
 0x486   :  { %8878 = vmatmul.mubr.bf16.gmra.mxu1 %v9290_v31 }
 0x48c   :  { %v8561_v45 = vpop.f32.mrf.mxu1 }
 0x48e   :  { %v8562_v63 = vpop.f32.mrf.mxu1 }
 0x48f   :  { %v8563_v20 = vadd.f32 %v8562_v63, %v8561_v45 }
 0x490   :  { %v8564_v26 = vpop.f32.mrf.mxu1 }
 0x491   :  { %v6968_v0 = vadd.f32 %v8563_v20, %v12971_v6 }
 0x492   :  { %v8565_v1 = vpop.f32.mrf.mxu1 }
 0x493   :  { %v8566_v30 = vadd.f32 %v8565_v1, %v8564_v26 }
 0x495   :  { %v6971_v38 = vadd.f32 %v8566_v30, %v12971_v6 }
 0x49a   :  { %v8567_v35 = vpop.f32.mrf.mxu1 }
 0x49c   :  { %v8568_v57 = vpop.f32.mrf.mxu1 }
 0x49d   :  { %v8569_v41 = vadd.f32 %v8568_v57, %v8567_v35 }
 0x49e   :  { %v8570_v2 = vpop.f32.mrf.mxu1 }
 0x49f   :  { %v6976_v49 = vadd.f32 %v8569_v41, %v12971_v6 }
 0x4a0   :  { %v8571_v46 = vpop.f32.mrf.mxu1 }
 0x4a1   :  { %v8572_v16 = vadd.f32 %v8571_v46, %v8570_v2 }
 0x4a3   :  { %v8573_v48 = vpop.f32.mrf.mxu1  ;;  %v6979_v5 = vadd.f32 %v8572_v16, %v12971_v6 }
 0x4a5   :  { %v8574_v55 = vpop.f32.mrf.mxu1 }
 0x4a6   :  { %v8575_v52 = vadd.f32 %v8574_v55, %v8573_v48 }
 0x4a7   :  { %v8576_v54 = vpop.f32.mrf.mxu1 }
 0x4a8   :  { %v8625_v53 = vpop.f32.mrf.mxu0  ;;  %v6984_v36 = vadd.f32 %v8575_v52, %v12971_v6 }
 0x4a9   :  { %v8577_v15 = vpop.f32.mrf.mxu1 }
 0x4aa   :  { %v8626_v19 = vpop.f32.mrf.mxu0  ;;  %v8578_v8 = vadd.f32 %v8577_v15, %v8576_v54 }
 0x4ab   :  { %v8627_v39 = vadd.f32 %v8626_v19, %v8625_v53  ;;  %v8579_v51 = vpop.f32.mrf.mxu1 }
 0x4ac   :  { %v8628_v59 = vpop.f32.mrf.mxu0  ;;  %v6987_v9 = vadd.f32 %v8578_v8, %v12971_v6 }
 0x4ad   :  { %v12974_v18 = vadd.f32 %v8627_v39, %v6968_v0  ;;  %v8580_v33 = vpop.f32.mrf.mxu1 }
 0x4ae   :  { %v8629_v37 = vpop.f32.mrf.mxu0  ;;  %v8581_v14 = vadd.f32 %v8580_v33, %v8579_v51 }
 0x4af   :  { %v8630_v4 = vadd.f32 %v8629_v37, %v8628_v59  ;;  %v8582_v47 = vpop.f32.mrf.mxu1 }
 0x4b0   :  { %v6992_v31 = vadd.f32 %v8581_v14, %v12971_v6 }
 0x4b1   :  { %v12977_v7 = vadd.f32 %v8630_v4, %v6971_v38  ;;  %v8583_v12 = vpop.f32.mrf.mxu1 }
 0x4b2   :  { %v8584_v40 = vadd.f32 %v8583_v12, %v8582_v47 }
 0x4b4   :  { %v6995_v57 = vadd.f32 %v8584_v40, %v12971_v6 }
 0x4c0   :  { %v8631_v60 = vpop.f32.mrf.mxu0 }
 0x4c2   :  { %v8632_v34 = vpop.f32.mrf.mxu0 }
 0x4c3   :  { %v8633_v27 = vadd.f32 %v8632_v34, %v8631_v60 }
 0x4c4   :  { %v8634_v21 = vpop.f32.mrf.mxu0 }
 0x4c5   :  { %v12980_v23 = vadd.f32 %v8633_v27, %v6976_v49 }
 0x4c6   :  { %v8635_v22 = vpop.f32.mrf.mxu0 }
 0x4c7   :  { %v8636_v3 = vadd.f32 %v8635_v22, %v8634_v21 }
 0x4c9   :  { %v12983_v17 = vadd.f32 %v8636_v3, %v6979_v5 }
 0x4ce   :  { %v8585_v24 = vpop.f32.mrf.mxu1 }
 0x4d0   :  { %v8586_v11 = vpop.f32.mrf.mxu1 }
 0x4d1   :  { %v8587_v58 = vadd.f32 %v8586_v11, %v8585_v24 }
 0x4d2   :  { %v8637_v13 = vpop.f32.mrf.mxu0  ;;  %v8588_v28 = vpop.f32.mrf.mxu1 }
 0x4d3   :  { %v7000_v55 = vadd.f32 %v8587_v58, %v12971_v6 }
 0x4d4   :  { %v8638_v44 = vpop.f32.mrf.mxu0  ;;  %v8589_v62 = vpop.f32.mrf.mxu1 }
 0x4d5   :  { %v8639_v43 = vadd.f32 %v8638_v44, %v8637_v13  ;;  %v8590_v56 = vadd.f32 %v8589_v62, %v8588_v28 }
 0x4d6   :  { %v8640_v29 = vpop.f32.mrf.mxu0  ;;  %v8591_v10 = vpop.f32.mrf.mxu1 }
 0x4d7   :  { %v12986_v25 = vadd.f32 %v8639_v43, %v6984_v36  ;;  %v7003_v37 = vadd.f32 %v8590_v56, %v12971_v6 }
 0x4d8   :  { %v8641_v61 = vpop.f32.mrf.mxu0  ;;  %v8592_v45 = vpop.f32.mrf.mxu1 }
 0x4d9   :  { %v8642_v32 = vadd.f32 %v8641_v61, %v8640_v29  ;;  %v8593_v20 = vadd.f32 %v8592_v45, %v8591_v10 }
 0x4da   :  { %v8643_v50 = vpop.f32.mrf.mxu0  ;;  %v8594_v1 = vpop.f32.mrf.mxu1 }
 0x4db   :  { %v12989_v42 = vadd.f32 %v8642_v32, %v6987_v9  ;;  %v7008_v14 = vadd.f32 %v8593_v20, %v12971_v6 }
 0x4dc   :  { %v8644_v63 = vpop.f32.mrf.mxu0  ;;  %v8595_v41 = vpop.f32.mrf.mxu1 }
 0x4dd   :  { %v8645_v26 = vadd.f32 %v8644_v63, %v8643_v50  ;;  %v8596_v46 = vadd.f32 %v8595_v41, %v8594_v1 }
 0x4de   :  { %v8646_v30 = vpop.f32.mrf.mxu0  ;;  %v8597_v48 = vpop.f32.mrf.mxu1 }
 0x4df   :  { %v12992_v35 = vadd.f32 %v8645_v26, %v6992_v31  ;;  %v7011_v3 = vadd.f32 %v8596_v46, %v12971_v6 }
 0x4e0   :  { %v8647_v2 = vpop.f32.mrf.mxu0  ;;  %v8598_v19 = vpop.f32.mrf.mxu1 }
 0x4e1   :  { %v8648_v16 = vadd.f32 %v8647_v2, %v8646_v30  ;;  %v8599_v39 = vadd.f32 %v8598_v19, %v8597_v48 }
 0x4e2   :  { %v8649_v53 = vpop.f32.mrf.mxu0  ;;  %v8600_v59 = vpop.f32.mrf.mxu1 }
 0x4e3   :  { %v12995_v0 = vadd.f32 %v8648_v16, %v6995_v57  ;;  %v7016_v28 = vadd.f32 %v8599_v39, %v12971_v6 }
 0x4e4   :  { %v8650_v52 = vpop.f32.mrf.mxu0  ;;  %v8601_v8 = vpop.f32.mrf.mxu1 }
 0x4e5   :  { %v8651_v54 = vadd.f32 %v8650_v52, %v8649_v53  ;;  %v8602_v51 = vadd.f32 %v8601_v8, %v8600_v59 }
 0x4e6   :  { %v8652_v38 = vpop.f32.mrf.mxu0  ;;  %v8603_v49 = vpop.f32.mrf.mxu1 }
 0x4e7   :  { %v12998_v15 = vadd.f32 %v8651_v54, %v7000_v55  ;;  %v7019_v31 = vadd.f32 %v8602_v51, %v12971_v6 }
 0x4e8   :  { %v8653_v4 = vpop.f32.mrf.mxu0  ;;  %v8604_v27 = vpop.f32.mrf.mxu1 }
 0x4e9   :  { %v8654_v60 = vadd.f32 %v8653_v4, %v8652_v38  ;;  %v8605_v21 = vadd.f32 %v8604_v27, %v8603_v49 }
 0x4ea   :  { %v8655_v33 = vpop.f32.mrf.mxu0  ;;  %v8606_v12 = vpop.f32.mrf.mxu1 }
 0x4eb   :  { %v13001_v34 = vadd.f32 %v8654_v60, %v7003_v37  ;;  %v7024_v57 = vadd.f32 %v8605_v21, %v12971_v6 }
 0x4ec   :  { %v8656_v47 = vpop.f32.mrf.mxu0  ;;  %v8607_v24 = vpop.f32.mrf.mxu1 }
 0x4ed   :  { %13936 = vst [vmem:[#allocation28_spill] sm:$0xff] %v13001_v34  ;;  %v8657_v5 = vadd.f32 %v8656_v47, %v8655_v33  ;;  %v13007_v36 = vadd.f32 %v8607_v24, %v8606_v12 }
 0x4ee   :  { %v8658_v22 = vpop.f32.mrf.mxu0  ;;  %v8689_v44 = vpop.f32.mrf.mxu1 }
 0x4ef   :  { %v13004_v40 = vadd.f32 %v8657_v5, %v7008_v14 }
 0x4f0   :  { %v8659_v13 = vpop.f32.mrf.mxu0  ;;  %v8690_v29 = vpop.f32.mrf.mxu1 }
 0x4f1   :  { %v8660_v11 = vadd.f32 %v8659_v13, %v8658_v22  ;;  %v8691_v62 = vadd.f32 %v8690_v29, %v8689_v44 }
 0x4f2   :  { %v8661_v58 = vpop.f32.mrf.mxu0  ;;  %v13012_v56 = vpop.f32.mrf.mxu1 }
 0x4f3   :  { %v13009_v43 = vadd.f32 %v8660_v11, %v7011_v3  ;;  %v13015_v10 = vadd.f32 %v8691_v62, %v12974_v18 }
 0x4f4   :  { %v8662_v9 = vpop.f32.mrf.mxu0  ;;  %v8693_v45 = vpop.f32.mrf.mxu1 }
 0x4f5   :  { %13937 = vst [vmem:[#allocation59_spill] sm:$0xff] %v13009_v43  ;;  %v8663_v61 = vadd.f32 %v8662_v9, %v8661_v58 }
 0x4f6   :  { %v8664_v32 = vpop.f32.mrf.mxu0  ;;  %v8695_v26 = vpop.f32.mrf.mxu1 }
 0x4f7   :  { %v13017_v50 = vadd.f32 %v8663_v61, %v7016_v28 }
 0x4f8   :  { %v8665_v63 = vpop.f32.mrf.mxu0  ;;  %v8696_v41 = vpop.f32.mrf.mxu1 }
 0x4f9   :  { %13938 = vst [vmem:[#allocation15_spill] sm:$0xff] %v13017_v50  ;;  %v8666_v20 = vadd.f32 %v8665_v63, %v8664_v32 }
 0x4fa   :  { %v8667_v1 = vpop.f32.mrf.mxu0  ;;  %v8698_v16 = vpop.f32.mrf.mxu1 }
 0x4fb   :  { %v13020_v30 = vadd.f32 %v8666_v20, %v7019_v31 }
 0x4fc   :  { %v8668_v2 = vpop.f32.mrf.mxu0  ;;  %v8699_v53 = vpop.f32.mrf.mxu1 }
 0x4fd   :  { %13939 = vst [vmem:[#allocation97_spill] sm:$0xff] %v13020_v30  ;;  %v8669_v46 = vadd.f32 %v8668_v2, %v8667_v1 }
 0x4fe   :  { %v13023_v48 = vpop.f32.mrf.mxu0  ;;  %v8701_v19 = vpop.f32.mrf.mxu1 }
 0x4ff   :  { %13940 = vst [vmem:[#allocation9_spill] sm:$0xff] %v13023_v48  ;;  %v13025_v18 = vadd.f32 %v8669_v46, %v7024_v57 }
 0x500   :  { %v13027_v55 = vpop.f32.mrf.mxu0  ;;  %v8702_v39 = vpop.f32.mrf.mxu1 }
 0x501   :  { %13941 = vst [vmem:[#allocation21_spill] sm:$0xff] %v13025_v18  ;;  %13942 = vst [vmem:[#allocation49_spill] sm:$0xff] %v13027_v55  ;;  %v8697_v18 = vadd.f32 %v8696_v41, %v8695_v26  ;;  %v8700_v55 = vadd.f32 %v8699_v53, %v8698_v16 }
 0x502   :  { %v8753_v52 = vpop.f32.mrf.mxu0  ;;  %v13029_v59 = vpop.f32.mrf.mxu1 }
 0x503   :  { %v7173_v26 = vadd.f32 %v8700_v55, %v12983_v17 }
 0x504   :  { %v8754_v54 = vpop.f32.mrf.mxu0  ;;  %v13031_v37 = vpop.f32.mrf.mxu1 }
 0x505   :  { %v8706_v55 = vadd.f32 %v13031_v37, %v13029_v59 }
 0x506   :  { %v8756_v38 = vpop.f32.mrf.mxu0  ;;  %v8707_v4 = vpop.f32.mrf.mxu1 }
 0x508   :  { %v8757_v8 = vpop.f32.mrf.mxu0  ;;  %v8708_v60 = vpop.f32.mrf.mxu1 }
 0x509   :  { %v8758_v53 = vadd.f32 %v8757_v8, %v8756_v38 }
 0x50a   :  { %v8759_v51 = vpop.f32.mrf.mxu0  ;;  %v8710_v33 = vpop.f32.mrf.mxu1 }
 0x50c   :  { %v8760_v49 = vpop.f32.mrf.mxu0  ;;  %v8711_v27 = vpop.f32.mrf.mxu1 }
 0x50e   :  { %v8762_v14 = vpop.f32.mrf.mxu0  ;;  %v13033_v21 = vpop.f32.mrf.mxu1 }
 0x510   :  { %v8763_v47 = vpop.f32.mrf.mxu0  ;;  %v13035_v12 = vpop.f32.mrf.mxu1 }
 0x511   :  { %v8764_v41 = vadd.f32 %v8763_v47, %v8762_v14  ;;  %v7181_v47 = vadd.f32 %v8706_v55, %v12989_v42 }
 0x512   :  { %v8765_v5 = vpop.f32.mrf.mxu0  ;;  %v13037_v3 = vpop.f32.mrf.mxu1 }
 0x513   :  { %v7270_v17 = vadd.f32 %v8764_v41, %v7173_v26  ;;  %v7027_v26 = vadd.f32 %v13007_v36, %v12971_v6 }
 0x514   :  { %v8766_v22 = vpop.f32.mrf.mxu0  ;;  %v13041_v13 = vpop.f32.mrf.mxu1 }
 0x516   :  { %v13039_v24 = vpop.f32.mrf.mxu0  ;;  %v13045_v44 = vpop.f32.mrf.mxu1 }
 0x518   :  { %v13043_v11 = vpop.f32.mrf.mxu0  ;;  %v8720_v28 = vpop.f32.mrf.mxu1 }
 0x51a   :  { %v8771_v58 = vpop.f32.mrf.mxu0  ;;  %v13047_v9 = vpop.f32.mrf.mxu1 }
 0x51c   :  { %v8772_v29 = vpop.f32.mrf.mxu0  ;;  %v13049_v61 = vpop.f32.mrf.mxu1 }
 0x51d   :  { %v8773_v8 = vadd.f32 %v8772_v29, %v8771_v58  ;;  %v8721_v58 = vadd.f32 %v8720_v28, %v13045_v44  ;;  %v8718_v28 = vadd.f32 %v13041_v13, %v13037_v3 }
 0x51e   :  { %v8774_v62 = vpop.f32.mrf.mxu0  ;;  %v13051_v31 = vpop.f32.mrf.mxu1 }
 0x51f   :  { %13943 = vst [vmem:[#allocation75_spill] sm:$0xff] %v13051_v31 }
 0x520   :  { %v8775_v32 = vpop.f32.mrf.mxu0  ;;  %v13055_v20 = vpop.f32.mrf.mxu1 }
 0x521   :  { %13944 = vst [vmem:[#allocation79_spill] sm:$0xff] %v13055_v20  ;;  %v8694_v20 = vadd.f32 %v8693_v45, %v13012_v56  ;;  %v8709_v56 = vadd.f32 %v8708_v60, %v8707_v4 }
 0x522   :  { %v13053_v63 = vpop.f32.mrf.mxu0  ;;  %v13059_v57 = vpop.f32.mrf.mxu1 }
 0x523   :  { %13946 = vst [vmem:[#allocation20_spill] sm:$0xff] %v13059_v57  ;;  %v7170_v57 = vadd.f32 %v8697_v18, %v12980_v23  ;;  %v7165_v16 = vadd.f32 %v8694_v20, %v12977_v7  ;;  %v8703_v23 = vadd.f32 %v8702_v39, %v8701_v19  ;;  %v8712_v18 = vadd.f32 %v8711_v27, %v8710_v33 }
 0x524   :  { %v13057_v1 = vpop.f32.mrf.mxu0  ;;  %v13063_v46 = vpop.f32.mrf.mxu1  ;;  %v7186_v38 = vadd.f32 %v8709_v56, %v12992_v35  ;;  %v8767_v33 = vadd.f32 %v8766_v22, %v8765_v5  ;;  %v8770_v35 = vadd.f32 %v13043_v11, %v13039_v24 }
 0x525   :  { %13945 = vst [vmem:[#allocation14_spill] sm:$0xff] %v13057_v1  ;;  %13948 = vst [vmem:[#allocation76_spill] sm:$0xff] %v13063_v46  ;;  %v7262_v7 = vadd.f32 %v8758_v53, %v7165_v16  ;;  %v7178_v39 = vadd.f32 %v8703_v23, %v12986_v25  ;;  %v13955_v16 = vld [vmem:[#allocation59_spill] sm:$0xff] }
 0x526   :  { %v13061_v2 = vpop.f32.mrf.mxu0  ;;  %v13067_v50 = vpop.f32.mrf.mxu1 }
 0x527   :  { %13947 = vst [vmem:[#allocation12_spill] sm:$0xff] %v13061_v2  ;;  %13950 = vst [vmem:[#allocation10_spill] sm:$0xff] %v13067_v50  ;;  %v8761_v2 = vadd.f32 %v8760_v49, %v8759_v51  ;;  %v8755_v50 = vadd.f32 %v8754_v54, %v8753_v52  ;;  %v7275_v11 = vadd.f32 %v8767_v33, %v7178_v39 }
 0x528   :  { %v13065_v30 = vpop.f32.mrf.mxu0  ;;  %v13071_v31 = vpop.f32.mrf.mxu1  ;;  %v13964_v33 = vld [vmem:[#allocation79_spill] sm:$0xff] }
 0x529   :  { %13949 = vst [vmem:[#allocation17_spill] sm:$0xff] %v13065_v30  ;;  %13951 = vst [vmem:[#allocation30_spill] sm:$0xff] %v13071_v31  ;;  %v7259_v52 = vadd.f32 %v8755_v50, %v13015_v10  ;;  %v8776_v10 = vadd.f32 %v8775_v32, %v8774_v62  ;;  %v8715_v62 = vadd.f32 %v13035_v12, %v13033_v21 }
 0x52a   :  { %v13069_v34 = vpop.f32.mrf.mxu0  ;;  %v13076_v43 = vpop.f32.mrf.mxu1  ;;  %v7202_v21 = vadd.f32 %v8721_v58, %v13004_v40 }
 0x52b   :  { %13952 = vst [vmem:[#allocation19_spill] sm:$0xff] %v13076_v43  ;;  %v7267_v43 = vadd.f32 %v8761_v2, %v7170_v57  ;;  %v7278_v2 = vadd.f32 %v8770_v35, %v7181_v47  ;;  %v7194_v41 = vadd.f32 %v8715_v62, %v12998_v15 }
 0x52c   :  { %v13073_v48 = vpop.f32.mrf.mxu0  ;;  %v13081_v30 = vpop.f32.mrf.mxu1  ;;  %v13954_v3 = vld [vmem:[#allocation14_spill] sm:$0xff] }
 0x52d   :  { %13953 = vst [vmem:[#allocation58_spill] sm:$0xff] %v13081_v30  ;;  %v8785_v12 = vadd.f32 %v13073_v48, %v13069_v34  ;;  %v8779_v13 = vadd.f32 %v13954_v3, %v13053_v63  ;;  %v13971_v3 = vld [vmem:[#allocation97_spill] sm:$0xff] }
 0x52e   :  { %v13079_v46 = vpop.f32.mrf.mxu0  ;;  %v8867_v31 = vpop.f32.mrf.mxu1  ;;  %v13959_v6 = vld [vmem:[#allocation12_spill] sm:$0xff] }
 0x52f   :  { %v7364_v30 = vadd.f32 %v8867_v31, %v7267_v43  ;;  %v7189_v43 = vadd.f32 %v8712_v18, %v12995_v0  ;;  %v7283_v0 = vadd.f32 %v8773_v8, %v7186_v38  ;;  %v13956_v18 = vld [vmem:[#allocation9_spill] sm:$0xff]  ;;  %v7291_v35 = vadd.f32 %v8779_v13, %v7194_v41 }
 0x530   :  { %v13084_v1 = vpop.f32.mrf.mxu0  ;;  %v7355_v51 = vpop.f32.mrf.mxu1  ;;  %v13960_v36 = vld [vmem:[#allocation17_spill] sm:$0xff] }
 0x531   :  { %v7356_v60 = vadd.f32 %v7355_v51, %v7259_v52  ;;  %v7420_v27 = vmax.f32 %v7364_v30, 0.0  ;;  %v8724_v30 = vadd.f32 %v13049_v61, %v13047_v9  ;;  %v7286_v44 = vadd.f32 %v8776_v10, %v7189_v43  ;;  %v13957_v51 = vld [vmem:[#allocation49_spill] sm:$0xff] }
 0x532   :  { %v13087_v45 = vpop.f32.mrf.mxu0  ;;  %v8868_v54 = vpop.f32.mrf.mxu1  ;;  %v8788_v34 = vadd.f32 %v13084_v1, %v13079_v46  ;;  %v8672_v52 = vadd.f32 %v13957_v51, %v13956_v18  ;;  %v8782_v15 = vadd.f32 %v13960_v36, %v13959_v6  ;;  %v7299_v1 = vadd.f32 %v8785_v12, %v7202_v21  ;;  %v13963_v46 = vld [vmem:[#allocation75_spill] sm:$0xff] }
 0x533   :  { %v7367_v19 = vadd.f32 %v8868_v54, %v7270_v17  ;;  %v7418_v25 = vmax.f32 %v7356_v60, 0.0  ;;  %v7205_v53 = vadd.f32 %v8724_v30, %v13955_v16  ;;  %v13958_v17 = vld [vmem:[#allocation28_spill] sm:$0xff]  ;;  %v13961_v54 = vld [vmem:[#allocation10_spill] sm:$0xff]  ;;  %v8727_v43 = vadd.f32 %v13964_v33, %v13963_v46 }
 0x534   :  { %v13089_v49 = vpop.f32.mrf.mxu0  ;;  %v7358_v14 = vpop.f32.mrf.mxu1  ;;  %v7197_v55 = vadd.f32 %v8718_v28, %v13958_v17  ;;  %v13966_v10 = vld [vmem:[#allocation58_spill] sm:$0xff]  ;;  %v13970_v28 = vld [vmem:[#allocation15_spill] sm:$0xff] }
 0x535   :  { %v7421_v59 = vmax.f32 %v7367_v19, 0.0  ;;  %v7359_v37 = vadd.f32 %v7358_v14, %v7262_v7  ;;  %v13962_v7 = vld [vmem:[#allocation30_spill] sm:$0xff]  ;;  %v13965_v14 = vld [vmem:[#allocation19_spill] sm:$0xff]  ;;  %v7302_v58 = vadd.f32 %v8788_v34, %v7205_v53 }
 0x536   :  { %v13095_v4 = vpop.f32.mrf.mxu0  ;;  %v8871_v29 = vpop.f32.mrf.mxu1  ;;  %v8733_v63 = vadd.f32 %v13962_v7, %v13961_v54  ;;  %v7294_v30 = vadd.f32 %v8782_v15, %v7197_v55 }
 0x537   :  { %v8090_v5 = vpack.c.bf16 %v7421_v59, %v7420_v27  ;;  %v7419_v22 = vmax.f32 %v7359_v37, 0.0  ;;  %v7380_v24 = vadd.f32 %v8871_v29, %v7283_v0  ;;  %v8736_v27 = vadd.f32 %v13966_v10, %v13965_v14 }
 0x538   :  { %v13099_v50 = vpop.f32.mrf.mxu0  ;;  %v7371_v32 = vpop.f32.mrf.mxu1  ;;  %v7124_v29 = vadd.f32 %v8672_v52, %v7027_v26 }
 0x539   :  { %8138 = vst [vmem:[%s13173_s7 + $0x8] sm:$0xff] %v8090_v5   ;;  %v8085_v42 = vpack.c.bf16 %v7419_v22, %v7418_v25  ;;  %v7372_v9 = vadd.f32 %v7371_v32, %v7275_v11  ;;  %v7424_v48 = vmax.f32 %v7380_v24, 0.0  ;;  %v13967_v25 = vld [vmem:[#allocation20_spill] sm:$0xff]  ;;  %v13969_v32 = vld [vmem:[#allocation21_spill] sm:$0xff] }
 0x53a   :  { %v8795_v31 = vpop.f32.mrf.mxu0  ;;  %v8872_v57 = vpop.f32.mrf.mxu1  ;;  %v13968_v5 = vld [vmem:[#allocation76_spill] sm:$0xff]  ;;  %v7221_v21 = vadd.f32 %v8736_v27, %v7124_v29 }
 0x53b   :  { %8086 = vst [vmem:[%s13173_s7] sm:$0xff] %v8085_v42   ;;  %v7383_v61 = vadd.f32 %v8872_v57, %v7286_v44  ;;  %v7422_v60 = vmax.f32 %v7372_v9, 0.0  ;;  %v8730_v22 = vadd.f32 %v13968_v5, %v13967_v25  ;;  %v7218_v42 = vadd.f32 %v8733_v63, %v13969_v32 }
 0x53c   :  { %v8796_v20 = vpop.f32.mrf.mxu0  ;;  %v7374_v40 = vpop.f32.mrf.mxu1  ;;  %v7210_v57 = vadd.f32 %v8727_v43, %v13970_v28 }
 0x53d   :  { %v7425_v56 = vmax.f32 %v7383_v61, 0.0  ;;  %v7375_v23 = vadd.f32 %v7374_v40, %v7278_v2  ;;  %v8797_v24 = vadd.f32 %v8796_v20, %v8795_v31  ;;  %v8791_v2 = vadd.f32 %v13089_v49, %v13087_v45 }
 0x53e   :  { %v8798_v38 = vpop.f32.mrf.mxu0  ;;  %v8875_v8 = vpop.f32.mrf.mxu1  ;;  %v7213_v13 = vadd.f32 %v8730_v22, %v13971_v3  ;;  %v8794_v31 = vadd.f32 %v13099_v50, %v13095_v4 }
 0x53f   :  { %v8100_v19 = vpack.c.bf16 %v7425_v56, %v7424_v48  ;;  %v7423_v39 = vmax.f32 %v7375_v23, 0.0  ;;  %v7396_v47 = vadd.f32 %v8875_v8, %v7299_v1  ;;  %v7315_v34 = vadd.f32 %v8797_v24, %v7218_v42 }
 0x540   :  { %v7387_v59 = vpop.f32.mrf.mxu1  ;;  %v8799_v0 = vpop.f32.mrf.mxu0  ;;  %v7307_v56 = vadd.f32 %v8791_v2, %v7210_v57  ;;  %v7310_v51 = vadd.f32 %v8794_v31, %v7213_v13 }
 0x541   :  { %8140 = vst [vmem:[%s13173_s7 + $0x18] sm:$0xff] %v8100_v19   ;;  %v8095_v37 = vpack.c.bf16 %v7423_v39, %v7422_v60  ;;  %v7388_v11 = vadd.f32 %v7387_v59, %v7291_v35  ;;  %v8800_v9 = vadd.f32 %v8799_v0, %v8798_v38  ;;  %v7428_v61 = vmax.f32 %v7396_v47, 0.0 }
 0x542   :  { %v8876_v62 = vpop.f32.mrf.mxu1 }
 0x543   :  { %8139 = vst [vmem:[%s13173_s7 + $0x10] sm:$0xff] %v8095_v37   ;;  %v7399_v44 = vadd.f32 %v8876_v62, %v7302_v58  ;;  %v7426_v16 = vmax.f32 %v7388_v11, 0.0  ;;  %v7318_v23 = vadd.f32 %v8800_v9, %v7221_v21 }
 0x544   :  { %v7390_v12 = vpop.f32.mrf.mxu1 }
 0x545   :  { %v7429_v26 = vmax.f32 %v7399_v44, 0.0  ;;  %v7391_v41 = vadd.f32 %v7390_v12, %v7294_v30 }
 0x546   :  { %v8879_v20 = vpop.f32.mrf.mxu1 }
 0x547   :  { %v8110_v53 = vpack.c.bf16 %v7429_v26, %v7428_v61  ;;  %v7427_v40 = vmax.f32 %v7391_v41, 0.0  ;;  %v7412_v49 = vadd.f32 %v8879_v20, %v7315_v34 }
 0x548   :  { %v7403_v48 = vpop.f32.mrf.mxu1 }
 0x549   :  { %8142 = vst [vmem:[%s13173_s7 + $0x28] sm:$0xff] %v8110_v53   ;;  %v8105_v45 = vpack.c.bf16 %v7427_v40, %v7426_v16  ;;  %v7404_v4 = vadd.f32 %v7403_v48, %v7307_v56  ;;  %v7432_v17 = vmax.f32 %v7412_v49, 0.0 }
 0x54a   :  { %v8880_v18 = vpop.f32.mrf.mxu1 }
 0x54b   :  { %8141 = vst [vmem:[%s13173_s7 + $0x20] sm:$0xff] %v8105_v45   ;;  %v7415_v50 = vadd.f32 %v8880_v18, %v7318_v23  ;;  %v7430_v36 = vmax.f32 %v7404_v4, 0.0 }
 0x54c   :  { %v7406_v52 = vpop.f32.mrf.mxu1 }
 0x54d   :  { %v7433_v55 = vmax.f32 %v7415_v50, 0.0  ;;  %v7407_v6 = vadd.f32 %v7406_v52, %v7310_v51 }
 0x54f   :  { %v8120_v15 = vpack.c.bf16 %v7433_v55, %v7432_v17  ;;  %v7431_v54 = vmax.f32 %v7407_v6, 0.0 }
 0x551   :  { %8144 = vst [vmem:[%s13173_s7 + $0x38] sm:$0xff] %v8120_v15   ;;  %v8115_v7 = vpack.c.bf16 %v7431_v54, %v7430_v36 }
 0x553   :  { %8143 = vst [vmem:[%s13173_s7 + $0x30] sm:$0xff] %v8115_v7  }

</bundles_post_ra>
